<compile_context>
chip_gen: v5e
topology: v5e:2x2
jax: 0.10.0
libtpu: 0.0.40
codegen_flags: <defaults>
</compile_context>

<pallas_src>
import math

import jax
import jax.numpy as jnp
from jax.experimental import pallas as pl
from jax.experimental.pallas import tpu as pltpu


def _round_up(x, m):
    return ((x + m - 1) // m) * m


def _encoder_kernel(loc_ref, time_ref, invpos_ref, phase_ref,
                    wemb_ref, bemb_ref,
                    wt_ref, bt_ref,
                    w1a_ref, w1b_ref, b1_ref,
                    w2_ref, b2_ref,
                    out_ref, temb_ref, eemb_ref):
    TR = loc_ref.shape[0]
    LOC = wemb_ref.shape[0]
    Dp = wemb_ref.shape[1]
    mm_dtype = wt_ref.dtype                      # matmul operand dtype (f32 or bf16)

    loc = loc_ref[...]                           # (TR, 1) int32
    t = time_ref[...]                            # (TR, 1) f32

    # ---- event embedding: one_hot(event_loc) @ W_emb + b_emb -----------------
    if LOC <= 16:
        # Small vocabulary: VPU select-based row lookup, no MXU pass.
        wemb = wemb_ref[...].astype(jnp.float32)             # (LOC, Dp)
        acc = jnp.zeros((TR, Dp), jnp.float32)
        for l in range(LOC):                                  # static unroll
            acc = acc + jnp.where(loc == l, wemb[l:l + 1, :], 0.0)
        event_emb = acc + bemb_ref[...]
    else:
        lane_loc = jax.lax.broadcasted_iota(jnp.int32, (TR, LOC), 1)
        one_hot = (lane_loc == loc).astype(mm_dtype)          # (TR, LOC)
        event_emb = jnp.dot(one_hot, wemb_ref[...],
                            preferred_element_type=jnp.float32) + bemb_ref[...]

    # ---- temporal encoding: sin(t * 1/posvec + phase), phase in {0, pi/2} ----
    pe = jnp.sin(t * invpos_ref[...] + phase_ref[...])        # (TR, Dp), one EUP op/elem
    time_emb = jnp.dot(pe.astype(mm_dtype), wt_ref[...],
                       preferred_element_type=jnp.float32) + bt_ref[...]

    # ---- combined_proj(cat([event_emb, time_emb])) as split matmuls ----------
    h = (jnp.dot(event_emb.astype(mm_dtype), w1a_ref[...],
                 preferred_element_type=jnp.float32)
         + jnp.dot(time_emb.astype(mm_dtype), w1b_ref[...],
                   preferred_element_type=jnp.float32)
         + b1_ref[...])
    h = jnp.maximum(h, 0.0)                                    # ReLU
    enc = jnp.dot(h.astype(mm_dtype), w2_ref[...],
                  preferred_element_type=jnp.float32) + b2_ref[...]

    out_ref[...] = enc
    temb_ref[...] = time_emb
    eemb_ref[...] = event_emb


def simple_encoder_st(event_loc, event_time, params, *,
                      tile_rows=256, matmul_dtype=jnp.float32):
    """event_loc: (B, S, 1) int, event_time: (B, S) f32.

    tile_rows: multiple of 128 (sweep 256-1024).
    matmul_dtype: jnp.bfloat16 for v6e/v7x MXU speedup (loosen tolerances).
    """
    B, S, _ = event_loc.shape
    N = B * S
    LOC, D = params["w_emb"].shape
    Dp = _round_up(D, 128)                       # lane-dense feature padding
    grid = (pl.cdiv(N, tile_rows),)
    Np = grid[0] * tile_rows                     # row padding to tile boundary

    # ---- flatten + pad inputs ------------------------------------------------
    loc_flat = event_loc.reshape(N, 1).astype(jnp.int32)
    time_flat = event_time.reshape(N, 1).astype(jnp.float32)
    if Np != N:
        loc_flat = jnp.pad(loc_flat, ((0, Np - N), (0, 0)))
        time_flat = jnp.pad(time_flat, ((0, Np - N), (0, 0)))

    # ---- pad parameters to Dp (weights as (in, out): kernel does x @ W + b) --
    p = params
    pad_c = lambda a: jnp.pad(a, ((0, 0), (0, Dp - D)))
    pad_rc = lambda a: jnp.pad(a, ((0, Dp - D), (0, Dp - D)))
    wemb_dtype = jnp.float32 if LOC <= 16 else matmul_dtype
    w_emb = pad_c(p["w_emb"]).astype(wemb_dtype)               # (LOC, Dp)
    b_emb = pad_c(p["b_emb"])
    w_temp = pad_rc(p["w_temp"]).astype(matmul_dtype)          # (Dp, Dp)
    b_temp = pad_c(p["b_temp"])
    w1a = pad_rc(p["w1a"]).astype(matmul_dtype)
    w1b = pad_rc(p["w1b"]).astype(matmul_dtype)
    b1 = pad_c(p["b1"])
    w2 = pad_rc(p["w2"]).astype(matmul_dtype)
    b2 = pad_c(p["b2"])

    # reciprocal position vector + sin/cos phase, precomputed once
    inv_pos = pad_c((1.0 / p["position_vec"]).astype(jnp.float32))      # (1, Dp)
    idx = jnp.arange(D)
    phase = pad_c(jnp.where((idx % 2) == 0, 0.0,
                            jnp.float32(math.pi / 2)).reshape(1, D)
                  .astype(jnp.float32))                                  # (1, Dp)

    row_in = pl.BlockSpec((tile_rows, 1), lambda i: (i, 0))
    row_out = pl.BlockSpec((tile_rows, Dp), lambda i: (i, 0))

    def full(shape):
        return pl.BlockSpec(shape, lambda i: tuple(0 for _ in shape))

    out_shapes = tuple(jax.ShapeDtypeStruct((Np, Dp), jnp.float32) for _ in range(3))

    enc, temb, eemb = pl.pallas_call(
        _encoder_kernel,
        out_shape=out_shapes,
        grid_spec=pltpu.PrefetchScalarGridSpec(
            num_scalar_prefetch=0,
            grid=grid,
            in_specs=[
                row_in,                                # event_loc rows
                row_in,                                # event_time rows
                full((1, Dp)), full((1, Dp)),          # inv_posvec, phase
                full((LOC, Dp)), full((1, Dp)),        # event_emb linear
                full((Dp, Dp)), full((1, Dp)),         # temporal_proj linear
                full((Dp, Dp)), full((Dp, Dp)), full((1, Dp)),  # combined layer 1 (split)
                full((Dp, Dp)), full((1, Dp)),         # combined layer 2
            ],
            out_specs=[row_out, row_out, row_out],
        ),
        compiler_params=pltpu.CompilerParams(
            dimension_semantics=("parallel",),         # shards row tiles across TCs
            vmem_limit_bytes=64 * 1024 * 1024,
        ),
    )(loc_flat, time_flat, inv_pos, phase,
      w_emb, b_emb, w_temp, b_temp, w1a, w1b, b1, w2, b2)

    enc = enc[:N, :D].reshape(B, S, D)
    temb = temb[:N, :D].reshape(B, S, D)
    eemb = eemb[:N, :D].reshape(B, S, D)
    return enc, temb, eemb


def make_params(key, d_model, loc_dim):
    ks = jax.random.split(key, 6)
    scale = 0.1
    position_vec = jnp.array(
        [math.pow(10000.0, 2.0 * (i // 2) / d_model) for i in range(d_model)],
        dtype=jnp.float32).reshape(1, d_model)
    return {
        "position_vec": position_vec,
        # stored as (in, out) so kernel does x @ W + b  (== PyTorch x @ W.T + b)
        "w_emb": scale * jax.random.normal(ks[0], (loc_dim, d_model), jnp.float32),
        "b_emb": scale * jax.random.normal(ks[1], (1, d_model), jnp.float32),
        "w_temp": scale * jax.random.normal(ks[2], (d_model, d_model), jnp.float32),
        "b_temp": scale * jax.random.normal(ks[3], (1, d_model), jnp.float32),
        # combined_proj layer 1: (2*d_model, d_model) split into two (d_model, d_model)
        "w1a": scale * jax.random.normal(ks[4], (d_model, d_model), jnp.float32),
        "w1b": scale * jax.random.normal(ks[5], (d_model, d_model), jnp.float32),
        "b1": jnp.zeros((1, d_model), jnp.float32),
        "w2": scale * jax.random.normal(jax.random.fold_in(key, 7),
                                        (d_model, d_model), jnp.float32),
        "b2": jnp.zeros((1, d_model), jnp.float32),
    }


def reference(event_loc, event_time, p):
    """Pure-JAX reference mirroring the PyTorch forward."""
    d_model = p["w_emb"].shape[1]
    loc_dim = p["w_emb"].shape[0]
    one_hot = jax.nn.one_hot(event_loc[..., 0].astype(jnp.int32), loc_dim,
                             dtype=jnp.float32)
    event_emb = one_hot @ p["w_emb"] + p["b_emb"][0]
    pos = event_time[..., None] / p["position_vec"][0]
    idx = jnp.arange(d_model)
    pe = jnp.where((idx % 2) == 0, jnp.sin(pos), jnp.cos(pos))
    time_emb = pe @ p["w_temp"] + p["b_temp"][0]
    h = jnp.maximum(event_emb @ p["w1a"] + time_emb @ p["w1b"] + p["b1"][0], 0.0)
    enc = h @ p["w2"] + p["b2"][0]
    return enc, time_emb, event_emb


if __name__ == "__main__":
    B, S = 2, 8
    d_model, loc_dim = 32, 4

    key = jax.random.PRNGKey(0)
    k_loc, k_time, k_par = jax.random.split(key, 3)

    event_loc = jax.random.randint(k_loc, (B, S, 1), 0, loc_dim, dtype=jnp.int32)
    event_time = jax.random.uniform(k_time, (B, S), jnp.float32) * 10.0
    params = make_params(k_par, d_model, loc_dim)

    # f32 matmul operands here for a tight correctness check; pass
    # matmul_dtype=jnp.bfloat16 on v6e/v7x for MXU throughput (atol ~1e-2).
    enc, temb, eemb = simple_encoder_st(event_loc, event_time, params,
                                        tile_rows=256,
                                        matmul_dtype=jnp.float32)
    jax.block_until_ready((enc, temb, eemb))

    enc_r, temb_r, eemb_r = reference(event_loc, event_time, params)
    assert jnp.allclose(enc, enc_r, atol=1e-4), "enc_output mismatch"
    assert jnp.allclose(temb, temb_r, atol=1e-4), "time_emb mismatch"
    assert jnp.allclose(eemb, eemb_r, atol=1e-4), "event_emb mismatch"

    print("KERNEL_OK")
</pallas_src>

<mosaic_0001>
module attributes {stable_mosaic.version = 11 : i64} {
  func.func @_encoder_kernel(%arg0: i32, %arg1: memref<256x1xi32, #tpu.memory_space<vmem>>, %arg2: memref<256x1xf32, #tpu.memory_space<vmem>>, %arg3: memref<1x128xf32, #tpu.memory_space<vmem>>, %arg4: memref<1x128xf32, #tpu.memory_space<vmem>>, %arg5: memref<4x128xf32, #tpu.memory_space<vmem>>, %arg6: memref<1x128xf32, #tpu.memory_space<vmem>>, %arg7: memref<128x128xf32, #tpu.memory_space<vmem>>, %arg8: memref<1x128xf32, #tpu.memory_space<vmem>>, %arg9: memref<128x128xf32, #tpu.memory_space<vmem>>, %arg10: memref<128x128xf32, #tpu.memory_space<vmem>>, %arg11: memref<1x128xf32, #tpu.memory_space<vmem>>, %arg12: memref<128x128xf32, #tpu.memory_space<vmem>>, %arg13: memref<1x128xf32, #tpu.memory_space<vmem>>, %arg14: memref<256x128xf32, #tpu.memory_space<vmem>>, %arg15: memref<256x128xf32, #tpu.memory_space<vmem>>, %arg16: memref<256x128xf32, #tpu.memory_space<vmem>>) attributes {dimension_semantics = [#tpu.dimension_semantics<parallel>], iteration_bounds = array<i64: 1>, scalar_prefetch = 0 : i64, scratch_operands = 0 : i64, tpu.core_type = #tpu.core_type<tc>, window_params = [{transform_indices = @transform_0, window_bounds = array<i64: 256, 1>}, {transform_indices = @transform_1, window_bounds = array<i64: 256, 1>}, {pipeline_mode = #tpu.pipeline_mode<synchronous>, transform_indices = @transform_2, window_bounds = array<i64: 1, 128>}, {pipeline_mode = #tpu.pipeline_mode<synchronous>, transform_indices = @transform_3, window_bounds = array<i64: 1, 128>}, {pipeline_mode = #tpu.pipeline_mode<synchronous>, transform_indices = @transform_4, window_bounds = array<i64: 4, 128>}, {pipeline_mode = #tpu.pipeline_mode<synchronous>, transform_indices = @transform_5, window_bounds = array<i64: 1, 128>}, {pipeline_mode = #tpu.pipeline_mode<synchronous>, transform_indices = @transform_6, window_bounds = array<i64: 128, 128>}, {pipeline_mode = #tpu.pipeline_mode<synchronous>, transform_indices = @transform_7, window_bounds = array<i64: 1, 128>}, {pipeline_mode = #tpu.pipeline_mode<synchronous>, transform_indices = @transform_8, window_bounds = array<i64: 128, 128>}, {pipeline_mode = #tpu.pipeline_mode<synchronous>, transform_indices = @transform_9, window_bounds = array<i64: 128, 128>}, {pipeline_mode = #tpu.pipeline_mode<synchronous>, transform_indices = @transform_10, window_bounds = array<i64: 1, 128>}, {pipeline_mode = #tpu.pipeline_mode<synchronous>, transform_indices = @transform_11, window_bounds = array<i64: 128, 128>}, {pipeline_mode = #tpu.pipeline_mode<synchronous>, transform_indices = @transform_12, window_bounds = array<i64: 1, 128>}, {transform_indices = @transform_13, window_bounds = array<i64: 256, 128>}, {transform_indices = @transform_14, window_bounds = array<i64: 256, 128>}, {transform_indices = @transform_15, window_bounds = array<i64: 256, 128>}]} {
    %c0 = arith.constant 0 : index
    %c0_0 = arith.constant 0 : index
    %0 = vector.load %arg1[%c0, %c0_0] : memref<256x1xi32, #tpu.memory_space<vmem>>, vector<256x1xi32>
    %c0_1 = arith.constant 0 : index
    %c0_2 = arith.constant 0 : index
    %1 = vector.load %arg2[%c0_1, %c0_2] : memref<256x1xf32, #tpu.memory_space<vmem>>, vector<256x1xf32>
    %c0_3 = arith.constant 0 : index
    %c0_4 = arith.constant 0 : index
    %2 = vector.load %arg5[%c0_3, %c0_4] : memref<4x128xf32, #tpu.memory_space<vmem>>, vector<4x128xf32>
    %cst = arith.constant 0.000000e+00 : f32
    %3 = vector.broadcast %cst : f32 to vector<256x128xf32>
    %c0_i32 = arith.constant 0 : i32
    %4 = vector.broadcast %c0_i32 : i32 to vector<256x1xi32>
    %5 = arith.cmpi eq, %0, %4 : vector<256x1xi32>
    %6 = vector.extract_strided_slice %2 {offsets = [0, 0], sizes = [1, 128], strides = [1, 1]} : vector<4x128xf32> to vector<1x128xf32>
    %cst_5 = arith.constant 0.000000e+00 : f32
    %7 = vector.shape_cast %5 : vector<256x1xi1> to vector<256x1xi1>
    %8 = vector.broadcast %7 : vector<256x1xi1> to vector<256x128xi1>
    %9 = vector.shape_cast %6 : vector<1x128xf32> to vector<1x128xf32>
    %10 = vector.broadcast %9 : vector<1x128xf32> to vector<256x128xf32>
    %11 = vector.broadcast %cst_5 : f32 to vector<256x128xf32>
    %12 = arith.select %8, %10, %11 : vector<256x128xi1>, vector<256x128xf32>
    %13 = arith.addf %3, %12 : vector<256x128xf32>
    %c1_i32 = arith.constant 1 : i32
    %14 = vector.broadcast %c1_i32 : i32 to vector<256x1xi32>
    %15 = arith.cmpi eq, %0, %14 : vector<256x1xi32>
    %16 = vector.extract_strided_slice %2 {offsets = [1, 0], sizes = [1, 128], strides = [1, 1]} : vector<4x128xf32> to vector<1x128xf32>
    %cst_6 = arith.constant 0.000000e+00 : f32
    %17 = vector.shape_cast %15 : vector<256x1xi1> to vector<256x1xi1>
    %18 = vector.broadcast %17 : vector<256x1xi1> to vector<256x128xi1>
    %19 = vector.shape_cast %16 : vector<1x128xf32> to vector<1x128xf32>
    %20 = vector.broadcast %19 : vector<1x128xf32> to vector<256x128xf32>
    %21 = vector.broadcast %cst_6 : f32 to vector<256x128xf32>
    %22 = arith.select %18, %20, %21 : vector<256x128xi1>, vector<256x128xf32>
    %23 = arith.addf %13, %22 : vector<256x128xf32>
    %c2_i32 = arith.constant 2 : i32
    %24 = vector.broadcast %c2_i32 : i32 to vector<256x1xi32>
    %25 = arith.cmpi eq, %0, %24 : vector<256x1xi32>
    %26 = vector.extract_strided_slice %2 {offsets = [2, 0], sizes = [1, 128], strides = [1, 1]} : vector<4x128xf32> to vector<1x128xf32>
    %cst_7 = arith.constant 0.000000e+00 : f32
    %27 = vector.shape_cast %25 : vector<256x1xi1> to vector<256x1xi1>
    %28 = vector.broadcast %27 : vector<256x1xi1> to vector<256x128xi1>
    %29 = vector.shape_cast %26 : vector<1x128xf32> to vector<1x128xf32>
    %30 = vector.broadcast %29 : vector<1x128xf32> to vector<256x128xf32>
    %31 = vector.broadcast %cst_7 : f32 to vector<256x128xf32>
    %32 = arith.select %28, %30, %31 : vector<256x128xi1>, vector<256x128xf32>
    %33 = arith.addf %23, %32 : vector<256x128xf32>
    %c3_i32 = arith.constant 3 : i32
    %34 = vector.broadcast %c3_i32 : i32 to vector<256x1xi32>
    %35 = arith.cmpi eq, %0, %34 : vector<256x1xi32>
    %36 = vector.extract_strided_slice %2 {offsets = [3, 0], sizes = [1, 128], strides = [1, 1]} : vector<4x128xf32> to vector<1x128xf32>
    %cst_8 = arith.constant 0.000000e+00 : f32
    %37 = vector.shape_cast %35 : vector<256x1xi1> to vector<256x1xi1>
    %38 = vector.broadcast %37 : vector<256x1xi1> to vector<256x128xi1>
    %39 = vector.shape_cast %36 : vector<1x128xf32> to vector<1x128xf32>
    %40 = vector.broadcast %39 : vector<1x128xf32> to vector<256x128xf32>
    %41 = vector.broadcast %cst_8 : f32 to vector<256x128xf32>
    %42 = arith.select %38, %40, %41 : vector<256x128xi1>, vector<256x128xf32>
    %43 = arith.addf %33, %42 : vector<256x128xf32>
    %c0_9 = arith.constant 0 : index
    %c0_10 = arith.constant 0 : index
    %44 = vector.load %arg6[%c0_9, %c0_10] : memref<1x128xf32, #tpu.memory_space<vmem>>, vector<1x128xf32>
    %45 = vector.broadcast %44 : vector<1x128xf32> to vector<256x128xf32>
    %46 = arith.addf %43, %45 : vector<256x128xf32>
    %c0_11 = arith.constant 0 : index
    %c0_12 = arith.constant 0 : index
    %47 = vector.load %arg3[%c0_11, %c0_12] : memref<1x128xf32, #tpu.memory_space<vmem>>, vector<1x128xf32>
    %48 = vector.broadcast %1 : vector<256x1xf32> to vector<256x128xf32>
    %49 = vector.broadcast %47 : vector<1x128xf32> to vector<256x128xf32>
    %50 = arith.mulf %48, %49 : vector<256x128xf32>
    %c0_13 = arith.constant 0 : index
    %c0_14 = arith.constant 0 : index
    %51 = vector.load %arg4[%c0_13, %c0_14] : memref<1x128xf32, #tpu.memory_space<vmem>>, vector<1x128xf32>
    %52 = vector.broadcast %51 : vector<1x128xf32> to vector<256x128xf32>
    %53 = arith.addf %50, %52 : vector<256x128xf32>
    %54 = math.sin %53 : vector<256x128xf32>
    %c0_15 = arith.constant 0 : index
    %c0_16 = arith.constant 0 : index
    %55 = vector.load %arg7[%c0_15, %c0_16] : memref<128x128xf32, #tpu.memory_space<vmem>>, vector<128x128xf32>
    %cst_17 = arith.constant dense<0.000000e+00> : vector<256x128xf32>
    %56 = tpu.matmul %54, %55, %cst_17 {dimension_numbers = #tpu.dot_dimension_numbers<[1], [0], [0], [1], [0, 0, 1, 1], [], []>} : vector<256x128xf32>, vector<128x128xf32>, vector<256x128xf32> -> vector<256x128xf32>
    %c0_18 = arith.constant 0 : index
    %c0_19 = arith.constant 0 : index
    %57 = vector.load %arg8[%c0_18, %c0_19] : memref<1x128xf32, #tpu.memory_space<vmem>>, vector<1x128xf32>
    %58 = vector.broadcast %57 : vector<1x128xf32> to vector<256x128xf32>
    %59 = arith.addf %56, %58 : vector<256x128xf32>
    %c0_20 = arith.constant 0 : index
    %c0_21 = arith.constant 0 : index
    %60 = vector.load %arg9[%c0_20, %c0_21] : memref<128x128xf32, #tpu.memory_space<vmem>>, vector<128x128xf32>
    %cst_22 = arith.constant dense<0.000000e+00> : vector<256x128xf32>
    %61 = tpu.matmul %46, %60, %cst_22 {dimension_numbers = #tpu.dot_dimension_numbers<[1], [0], [0], [1], [0, 0, 1, 1], [], []>} : vector<256x128xf32>, vector<128x128xf32>, vector<256x128xf32> -> vector<256x128xf32>
    %c0_23 = arith.constant 0 : index
    %c0_24 = arith.constant 0 : index
    %62 = vector.load %arg10[%c0_23, %c0_24] : memref<128x128xf32, #tpu.memory_space<vmem>>, vector<128x128xf32>
    %cst_25 = arith.constant dense<0.000000e+00> : vector<256x128xf32>
    %63 = tpu.matmul %59, %62, %cst_25 {dimension_numbers = #tpu.dot_dimension_numbers<[1], [0], [0], [1], [0, 0, 1, 1], [], []>} : vector<256x128xf32>, vector<128x128xf32>, vector<256x128xf32> -> vector<256x128xf32>
    %64 = arith.addf %61, %63 : vector<256x128xf32>
    %c0_26 = arith.constant 0 : index
    %c0_27 = arith.constant 0 : index
    %65 = vector.load %arg11[%c0_26, %c0_27] : memref<1x128xf32, #tpu.memory_space<vmem>>, vector<1x128xf32>
    %66 = vector.broadcast %65 : vector<1x128xf32> to vector<256x128xf32>
    %67 = arith.addf %64, %66 : vector<256x128xf32>
    %cst_28 = arith.constant 0.000000e+00 : f32
    %68 = vector.broadcast %cst_28 : f32 to vector<256x128xf32>
    %69 = arith.maximumf %67, %68 : vector<256x128xf32>
    %c0_29 = arith.constant 0 : index
    %c0_30 = arith.constant 0 : index
    %70 = vector.load %arg12[%c0_29, %c0_30] : memref<128x128xf32, #tpu.memory_space<vmem>>, vector<128x128xf32>
    %cst_31 = arith.constant dense<0.000000e+00> : vector<256x128xf32>
    %71 = tpu.matmul %69, %70, %cst_31 {dimension_numbers = #tpu.dot_dimension_numbers<[1], [0], [0], [1], [0, 0, 1, 1], [], []>} : vector<256x128xf32>, vector<128x128xf32>, vector<256x128xf32> -> vector<256x128xf32>
    %c0_32 = arith.constant 0 : index
    %c0_33 = arith.constant 0 : index
    %72 = vector.load %arg13[%c0_32, %c0_33] : memref<1x128xf32, #tpu.memory_space<vmem>>, vector<1x128xf32>
    %73 = vector.broadcast %72 : vector<1x128xf32> to vector<256x128xf32>
    %74 = arith.addf %71, %73 : vector<256x128xf32>
    %c0_34 = arith.constant 0 : index
    %c0_35 = arith.constant 0 : index
    %75 = vector.load %arg14[%c0_34, %c0_35] : memref<256x128xf32, #tpu.memory_space<vmem>>, vector<256x128xf32>
    tpu.vector_store %arg14[%c0_34, %c0_35], %74 {strides = array<i32>} : memref<256x128xf32, #tpu.memory_space<vmem>>, vector<256x128xf32>,
    %c0_36 = arith.constant 0 : index
    %c0_37 = arith.constant 0 : index
    %76 = vector.load %arg15[%c0_36, %c0_37] : memref<256x128xf32, #tpu.memory_space<vmem>>, vector<256x128xf32>
    tpu.vector_store %arg15[%c0_36, %c0_37], %59 {strides = array<i32>} : memref<256x128xf32, #tpu.memory_space<vmem>>, vector<256x128xf32>,
    %c0_38 = arith.constant 0 : index
    %c0_39 = arith.constant 0 : index
    %77 = vector.load %arg16[%c0_38, %c0_39] : memref<256x128xf32, #tpu.memory_space<vmem>>, vector<256x128xf32>
    tpu.vector_store %arg16[%c0_38, %c0_39], %46 {strides = array<i32>} : memref<256x128xf32, #tpu.memory_space<vmem>>, vector<256x128xf32>,
    return
  }
  func.func @transform_0(%arg0: i32) -> (i32, i32) {
    %c0_i32 = arith.constant 0 : i32
    %c0_i32_0 = arith.constant 0 : i32
    return %arg0, %c0_i32 : i32, i32
  }
  func.func @transform_1(%arg0: i32) -> (i32, i32) {
    %c0_i32 = arith.constant 0 : i32
    %c0_i32_0 = arith.constant 0 : i32
    return %arg0, %c0_i32 : i32, i32
  }
  func.func @transform_2(%arg0: i32) -> (i32, i32) {
    %c0_i32 = arith.constant 0 : i32
    %c0_i32_0 = arith.constant 0 : i32
    %c0_i32_1 = arith.constant 0 : i32
    return %c0_i32, %c0_i32_0 : i32, i32
  }
  func.func @transform_3(%arg0: i32) -> (i32, i32) {
    %c0_i32 = arith.constant 0 : i32
    %c0_i32_0 = arith.constant 0 : i32
    %c0_i32_1 = arith.constant 0 : i32
    return %c0_i32, %c0_i32_0 : i32, i32
  }
  func.func @transform_4(%arg0: i32) -> (i32, i32) {
    %c0_i32 = arith.constant 0 : i32
    %c0_i32_0 = arith.constant 0 : i32
    %c0_i32_1 = arith.constant 0 : i32
    return %c0_i32, %c0_i32_0 : i32, i32
  }
  func.func @transform_5(%arg0: i32) -> (i32, i32) {
    %c0_i32 = arith.constant 0 : i32
    %c0_i32_0 = arith.constant 0 : i32
    %c0_i32_1 = arith.constant 0 : i32
    return %c0_i32, %c0_i32_0 : i32, i32
  }
  func.func @transform_6(%arg0: i32) -> (i32, i32) {
    %c0_i32 = arith.constant 0 : i32
    %c0_i32_0 = arith.constant 0 : i32
    %c0_i32_1 = arith.constant 0 : i32
    return %c0_i32, %c0_i32_0 : i32, i32
  }
  func.func @transform_7(%arg0: i32) -> (i32, i32) {
    %c0_i32 = arith.constant 0 : i32
    %c0_i32_0 = arith.constant 0 : i32
    %c0_i32_1 = arith.constant 0 : i32
    return %c0_i32, %c0_i32_0 : i32, i32
  }
  func.func @transform_8(%arg0: i32) -> (i32, i32) {
    %c0_i32 = arith.constant 0 : i32
    %c0_i32_0 = arith.constant 0 : i32
    %c0_i32_1 = arith.constant 0 : i32
    return %c0_i32, %c0_i32_0 : i32, i32
  }
  func.func @transform_9(%arg0: i32) -> (i32, i32) {
    %c0_i32 = arith.constant 0 : i32
    %c0_i32_0 = arith.constant 0 : i32
    %c0_i32_1 = arith.constant 0 : i32
    return %c0_i32, %c0_i32_0 : i32, i32
  }
  func.func @transform_10(%arg0: i32) -> (i32, i32) {
    %c0_i32 = arith.constant 0 : i32
    %c0_i32_0 = arith.constant 0 : i32
    %c0_i32_1 = arith.constant 0 : i32
    return %c0_i32, %c0_i32_0 : i32, i32
  }
  func.func @transform_11(%arg0: i32) -> (i32, i32) {
    %c0_i32 = arith.constant 0 : i32
    %c0_i32_0 = arith.constant 0 : i32
    %c0_i32_1 = arith.constant 0 : i32
    return %c0_i32, %c0_i32_0 : i32, i32
  }
  func.func @transform_12(%arg0: i32) -> (i32, i32) {
    %c0_i32 = arith.constant 0 : i32
    %c0_i32_0 = arith.constant 0 : i32
    %c0_i32_1 = arith.constant 0 : i32
    return %c0_i32, %c0_i32_0 : i32, i32
  }
  func.func @transform_13(%arg0: i32) -> (i32, i32) {
    %c0_i32 = arith.constant 0 : i32
    %c0_i32_0 = arith.constant 0 : i32
    return %arg0, %c0_i32 : i32, i32
  }
  func.func @transform_14(%arg0: i32) -> (i32, i32) {
    %c0_i32 = arith.constant 0 : i32
    %c0_i32_0 = arith.constant 0 : i32
    return %arg0, %c0_i32 : i32, i32
  }
  func.func @transform_15(%arg0: i32) -> (i32, i32) {
    %c0_i32 = arith.constant 0 : i32
    %c0_i32_0 = arith.constant 0 : i32
    return %arg0, %c0_i32 : i32, i32
  }
}

</mosaic_0001>

<bundles_post_ra>
// kernel: tpu_custom_call.1
= control target key start
LH: loop header
LB: loop body
LE: loop exit
PB: predicated region body
PF: predicated region fallthrough
CT: control target
= control target key end

     0   :  { %21 = vsyncpa [#allocation3], 0  ;;  %s14370_s0 = inlined_call_operand.vmem [shape: s32[256,1], index: 0, kind: input, shape index: {}]   ;;  %s14371_s1 = inlined_call_operand.vmem [shape: f32[256,1], index: 1, kind: input, shape index: {}]   ;;  %s14372_s2 = inlined_call_operand.vmem [shape: f32[1,128], index: 2, kind: input, shape index: {}]   ;;  %s14373_s3 = inlined_call_operand.vmem [shape: f32[1,128], index: 3, kind: input, shape index: {}]   ;;  %s14374_s4 = inlined_call_operand.hbm [shape: f32[4,128], index: 4, kind: input, shape index: {}]   ;;  %s14375_s5 = inlined_call_operand.hbm [shape: f32[1,128], index: 5, kind: input, shape index: {}]   ;;  %s14376_s6 = inlined_call_operand.vmem [shape: f32[128,128], index: 6, kind: input, shape index: {}]   ;;  %s14377_s7 = inlined_call_operand.vmem [shape: f32[1,128], index: 7, kind: input, shape index: {}]   ;;  %s14378_s8 = inlined_call_operand.vmem [shape: f32[128,128], index: 8, kind: input, shape index: {}]   ;;  %s14379_s9 = inlined_call_operand.vmem [shape: f32[128,128], index: 9, kind: input, shape index: {}]   ;;  %s14380_s10 = inlined_call_operand.vmem [shape: f32[1,128], index: 10, kind: input, shape index: {}]   ;;  %s14381_s11 = inlined_call_operand.vmem [shape: f32[128,128], index: 11, kind: input, shape index: {}]   ;;  %s14382_s12 = inlined_call_operand.vmem [shape: f32[1,128], index: 12, kind: input, shape index: {}]   ;;  %s14383_s13 = inlined_call_operand.hbm [shape: f32[256,128], index: 13, kind: output, shape index: {0}]   ;;  %s14384_s14 = inlined_call_operand.hbm [shape: f32[256,128], index: 14, kind: output, shape index: {1}]   ;;  %s14385_s15 = inlined_call_operand.hbm [shape: f32[256,128], index: 15, kind: output, shape index: {2}]  }
   0x1   :  { %22 = vsyncpa [#allocation6], 0 }
   0x2   :  { %23 = vsyncpa [#allocation4], 0 }
   0x3   :  { %24 = vsyncpa [#allocation9], 0  ;;  %s38_s20 = sshll.u32 %s14374_s4, 4  ;;  %s7429_s21 = smov [#allocation2]   ;;  %s39_s20 = int_to_ptr.hbm [resolvable:$true] %s38_s20 }
   0x4   :  { %s40_s22 = sshll.u32 %s7429_s21, 4  ;;  %s49_s25 = sshll.u32 %s14375_s5, 4  ;;  %s41_s22 = int_to_ptr.vmem [resolvable:$true] %s40_s22  ;;  %s50_s25 = int_to_ptr.hbm [resolvable:$true] %s49_s25 }
   0x5   :  { %43 = dma.hbm_to_vmem [thread:$0]  %s39_s20, 64, %s41_s22, [#allocation3]  }
   0x6   :  { %s7430_s26 = smov [#allocation5]  }
   0x7   :  { %s51_s27 = sshll.u32 %s7430_s26, 4  ;;  %s52_s27 = int_to_ptr.vmem [resolvable:$true] %s51_s27 }
   0x8   :  { %54 = dma.hbm_to_vmem [thread:$0]  %s50_s25, 16, %s52_s27, [#allocation6]  }
   0x9   :  { %7421 = dma.done.wait [#allocation3], 64  }
   0xa   :  { %7422 = vsyncadd [#allocation3], 4294967232 }
   0xb   :  { %7423 = dma.done.wait [#allocation6], 16  }
   0xc   :  { %7424 = vsyncadd [#allocation6], 4294967280  ;;  %v14386_v0 = vmov 0   ;;  %v7535_v1 = vld [vmem:[%s14370_s0 + $0x20] sm:$0xff]  ;;  %v7540_v2 = vld [vmem:[%s14370_s0 + $0x10] sm:$0xff]  ;;  %s7438_s18 = smov [#allocation8]  }
   0xd   :  { %7253 = vset.pattern.permute.xlu2 %v14386_v0  ;;  %7252 = vset.pattern.permute.xlu1 %v14386_v0  ;;  %v7545_v3 = vld [vmem:[%s14370_s0] sm:$0xff]  ;;  %vm146_vm0 = vcmp.eq.s32.totalorder %v7535_v1, 0  ;;  %vm144_vm1 = vcmp.eq.s32.totalorder %v7540_v2, 0  ;;  %v7556_v7 = vld [vmem:[%s14370_s0 + $0x28] sm:$0xff]  ;;  %v7561_v8 = vld [vmem:[%s14370_s0 + $0x18] sm:$0xff]  ;;  %s7103_s19 = sshll.u32 %s7438_s18, 4  ;;  %s7104_s19 = int_to_ptr.vmem [resolvable:$true] %s7103_s19 }
   0xe   :  { %7251 = vset.pattern.permute.xlu0 %v14386_v0  ;;  %vm142_vm2 = vcmp.eq.s32.totalorder %v7545_v3, 0  ;;  %v178_v4 = vsel %vm146_vm0, 1, %v14386_v0  ;;  %v176_v5 = vsel %vm144_vm1, 1, %v14386_v0  ;;  %v7566_v9 = vld [vmem:[%s14370_s0 + $0x8] sm:$0xff]  ;;  %vm147_vm3 = vcmp.eq.s32.totalorder %v7556_v7, 0  ;;  %v7577_v13 = vld [vmem:[%s14370_s0 + $0x40] sm:$0xff] }
   0xf   :  { %v174_v6 = vsel %vm142_vm2, 1, %v14386_v0  ;;  %219 = vperm.xlu2 %7253, %v178_v4   ;;  %213 = vperm.xlu1 %7252, %v176_v5   ;;  %vm145_vm4 = vcmp.eq.s32.totalorder %v7561_v8, 0  ;;  %vm143_vm5 = vcmp.eq.s32.totalorder %v7566_v9, 0  ;;  %v179_v10 = vsel %vm147_vm3, 1, %v14386_v0  ;;  %v7582_v14 = vld [vmem:[%s14370_s0 + $0x38] sm:$0xff]  ;;  %v7587_v15 = vld [vmem:[%s14370_s0 + $0x30] sm:$0xff] }
  0x10   :  { %207 = vperm.xlu0 %7251, %v174_v6   ;;  %v177_v11 = vsel %vm145_vm4, 1, %v14386_v0  ;;  %v175_v12 = vsel %vm143_vm5, 1, %v14386_v0  ;;  %vm150_vm6 = vcmp.eq.s32.totalorder %v7577_v13, 0  ;;  %vm149_vm7 = vcmp.eq.s32.totalorder %v7582_v14, 0  ;;  %v7598_v19 = vld [vmem:[%s14370_s0 + $0x58] sm:$0xff]  ;;  %v7603_v20 = vld [vmem:[%s14370_s0 + $0x50] sm:$0xff] }
  0x11   :  { %vm148_vm8 = vcmp.eq.s32.totalorder %v7587_v15, 0  ;;  %v182_v16 = vsel %vm150_vm6, 1, %v14386_v0  ;;  %v181_v17 = vsel %vm149_vm7, 1, %v14386_v0  ;;  %v7608_v21 = vld [vmem:[%s14370_s0 + $0x48] sm:$0xff]  ;;  %vm153_vm9 = vcmp.eq.s32.totalorder %v7598_v19, 0  ;;  %v91_v25 = vld [vmem:[%s14370_s0 + $0x70] sm:$0xff] }
  0x12   :  { %v180_v18 = vsel %vm148_vm8, 1, %v14386_v0  ;;  %vm152_vm10 = vcmp.eq.s32.totalorder %v7603_v20, 0  ;;  %vm151_vm11 = vcmp.eq.s32.totalorder %v7608_v21, 0  ;;  %v185_v22 = vsel %vm153_vm9, 1, %v14386_v0  ;;  %v90_v26 = vld [vmem:[%s14370_s0 + $0x68] sm:$0xff]  ;;  %v7625_v27 = vld [vmem:[%s14370_s0 + $0x60] sm:$0xff] }
  0x13   :  { %v184_v23 = vsel %vm152_vm10, 1, %v14386_v0  ;;  %v183_v24 = vsel %vm151_vm11, 1, %v14386_v0  ;;  %vm156_vm12 = vcmp.eq.s32.totalorder %v91_v25, 0  ;;  %vm155_vm13 = vcmp.eq.s32.totalorder %v90_v26, 0  ;;  %v94_v31 = vld [vmem:[%s14370_s0 + $0x88] sm:$0xff]  ;;  %v93_v32 = vld [vmem:[%s14370_s0 + $0x80] sm:$0xff] }
  0x14   :  { %vm154_vm14 = vcmp.eq.s32.totalorder %v7625_v27, 0  ;;  %v188_v28 = vsel %vm156_vm12, 1, %v14386_v0  ;;  %v187_v29 = vsel %vm155_vm13, 1, %v14386_v0  ;;  %v92_v33 = vld [vmem:[%s14370_s0 + $0x78] sm:$0xff]  ;;  %vm159_vm15 = vcmp.eq.s32.totalorder %v94_v31, 0  ;;  %v97_v37 = vld [vmem:[%s14370_s0 + $0xa0] sm:$0xff] }
  0x15   :  { %v186_v30 = vsel %vm154_vm14, 1, %v14386_v0  ;;  %vm158_vm0 = vcmp.eq.s32.totalorder %v93_v32, 0  ;;  %vm157_vm1 = vcmp.eq.s32.totalorder %v92_v33, 0  ;;  %v191_v34 = vsel %vm159_vm15, 1, %v14386_v0  ;;  %v96_v38 = vld [vmem:[%s14370_s0 + $0x98] sm:$0xff]  ;;  %v95_v39 = vld [vmem:[%s14370_s0 + $0x90] sm:$0xff] }
  0x16   :  { %v190_v35 = vsel %vm158_vm0, 1, %v14386_v0  ;;  %v189_v36 = vsel %vm157_vm1, 1, %v14386_v0  ;;  %vm162_vm2 = vcmp.eq.s32.totalorder %v97_v37, 0  ;;  %vm161_vm3 = vcmp.eq.s32.totalorder %v96_v38, 0  ;;  %v100_v43 = vld [vmem:[%s14370_s0 + $0xb8] sm:$0xff]  ;;  %v99_v44 = vld [vmem:[%s14370_s0 + $0xb0] sm:$0xff] }
  0x17   :  { %222 = vperm.xlu2 %7253, %v179_v10   ;;  %216 = vperm.xlu1 %7252, %v177_v11   ;;  %vm160_vm4 = vcmp.eq.s32.totalorder %v95_v39, 0  ;;  %v194_v40 = vsel %vm162_vm2, 1, %v14386_v0  ;;  %v193_v41 = vsel %vm161_vm3, 1, %v14386_v0  ;;  %v98_v45 = vld [vmem:[%s14370_s0 + $0xa8] sm:$0xff]  ;;  %vm165_vm5 = vcmp.eq.s32.totalorder %v100_v43, 0  ;;  %v103_v49 = vld [vmem:[%s14370_s0 + $0xd0] sm:$0xff] }
  0x18   :  { %210 = vperm.xlu0 %7251, %v175_v12   ;;  %v192_v42 = vsel %vm160_vm4, 1, %v14386_v0  ;;  %vm164_vm6 = vcmp.eq.s32.totalorder %v99_v44, 0  ;;  %vm163_vm7 = vcmp.eq.s32.totalorder %v98_v45, 0  ;;  %v197_v46 = vsel %vm165_vm5, 1, %v14386_v0  ;;  %v102_v50 = vld [vmem:[%s14370_s0 + $0xc8] sm:$0xff]  ;;  %v101_v51 = vld [vmem:[%s14370_s0 + $0xc0] sm:$0xff] }
  0x19   :  { %v196_v47 = vsel %vm164_vm6, 1, %v14386_v0  ;;  %v195_v48 = vsel %vm163_vm7, 1, %v14386_v0  ;;  %vm168_vm8 = vcmp.eq.s32.totalorder %v103_v49, 0  ;;  %vm167_vm9 = vcmp.eq.s32.totalorder %v102_v50, 0  ;;  %v106_v55 = vld [vmem:[%s14370_s0 + $0xe8] sm:$0xff]  ;;  %v105_v56 = vld [vmem:[%s14370_s0 + $0xe0] sm:$0xff] }
  0x1a   :  { %vm166_vm10 = vcmp.eq.s32.totalorder %v101_v51, 0  ;;  %v200_v52 = vsel %vm168_vm8, 1, %v14386_v0  ;;  %v199_v53 = vsel %vm167_vm9, 1, %v14386_v0  ;;  %v104_v57 = vld [vmem:[%s14370_s0 + $0xd8] sm:$0xff]  ;;  %vm171_vm11 = vcmp.eq.s32.totalorder %v106_v55, 0  ;;  %v107_v61 = vld [vmem:[%s14370_s0 + $0xf0] sm:$0xff] }
  0x1b   :  { %v198_v54 = vsel %vm166_vm10, 1, %v14386_v0  ;;  %vm170_vm12 = vcmp.eq.s32.totalorder %v105_v56, 0  ;;  %vm169_vm13 = vcmp.eq.s32.totalorder %v104_v57, 0  ;;  %v203_v58 = vsel %vm171_vm11, 1, %v14386_v0  ;;  %v110_v63 = vld [vmem:[%s14371_s1 + $0x8] sm:$0xff]  ;;  %v109_v4 = vld [vmem:[%s14371_s1] sm:$0xff] }
  0x1c   :  { %v202_v59 = vsel %vm170_vm12, 1, %v14386_v0  ;;  %v201_v60 = vsel %vm169_vm13, 1, %v14386_v0  ;;  %vm172_vm14 = vcmp.eq.s32.totalorder %v107_v61, 0  ;;  %v113_v5 = vld [vmem:[%s14371_s1 + $0x20] sm:$0xff]  ;;  %v112_v6 = vld [vmem:[%s14371_s1 + $0x18] sm:$0xff]  ;;  %v111_v10 = vld [vmem:[%s14371_s1 + $0x10] sm:$0xff] }
  0x1d   :  { %v204_v62 = vsel %vm172_vm14, 1, %v14386_v0  ;;  %v108_v11 = vld [vmem:[%s14370_s0 + $0xf8] sm:$0xff]  ;;  %vm399_vm0 = vcmp.eq.s32.totalorder %v7545_v3, 1  ;;  %vm400_vm1 = vcmp.eq.s32.totalorder %v7566_v9, 1  ;;  %vm401_vm2 = vcmp.eq.s32.totalorder %v7540_v2, 1  ;;  %s7439_s20 = smov 128  }
  0x1e   :  { %vm173_vm15 = vcmp.eq.s32.totalorder %v108_v11, 0  ;;  %v116_v25 = vld [vmem:[%s14371_s1 + $0x38] sm:$0xff]  ;;  %vm402_vm3 = vcmp.eq.s32.totalorder %v7561_v8, 1  ;;  %vm403_vm4 = vcmp.eq.s32.totalorder %v7535_v1, 1  ;;  %vm404_vm5 = vcmp.eq.s32.totalorder %v7556_v7, 1  ;;  %s7440_s21 = smov 8  }
  0x1f   :  { %231 = vperm.xlu2 %7253, %v182_v16   ;;  %228 = vperm.xlu1 %7252, %v181_v17   ;;  %v115_v16 = vld [vmem:[%s14371_s1 + $0x30] sm:$0xff]  ;;  %v114_v17 = vld [vmem:[%s14371_s1 + $0x28] sm:$0xff]  ;;  %vm405_vm6 = vcmp.eq.s32.totalorder %v7587_v15, 1  ;;  %vm913_vm7 = vcmp.eq.s32.totalorder %v7545_v3, 3  ;;  %vm656_vm8 = vcmp.eq.s32.totalorder %v7545_v3, 2  ;;  %vm914_vm9 = vcmp.eq.s32.totalorder %v7566_v9, 3 }
  0x20   :  { %225 = vperm.xlu0 %7251, %v180_v18   ;;  %v205_v18 = vsel %vm173_vm15, 1, %v14386_v0  ;;  %vm657_vm10 = vcmp.eq.s32.totalorder %v7566_v9, 2  ;;  %v137_v3 = vld [vmem:[%s14371_s1 + $0xe0] sm:$0xff]  ;;  %vm915_vm11 = vcmp.eq.s32.totalorder %v7540_v2, 3  ;;  %vm658_vm12 = vcmp.eq.s32.totalorder %v7540_v2, 2  ;;  %v138_v9 = vld [vmem:[%s14371_s1 + $0xe8] sm:$0xff] }
  0x21   :  { %vm916_vm13 = vcmp.eq.s32.totalorder %v7561_v8, 3  ;;  %vm659_vm14 = vcmp.eq.s32.totalorder %v7561_v8, 2  ;;  %vm917_vm15 = vcmp.eq.s32.totalorder %v7535_v1, 3  ;;  %s7118_s22 = sshll.u32 %s14385_s15, 4  ;;  %s7092_s26 = sshll.u32 %s14383_s13, 4  ;;  %s7119_s22 = int_to_ptr.hbm [resolvable:$true] %s7118_s22  ;;  %s7093_s26 = int_to_ptr.hbm [resolvable:$true] %s7092_s26 }
  0x27   :  { %240 = vperm.xlu2 %7253, %v185_v22   ;;  %237 = vperm.xlu1 %7252, %v184_v23   ;;  %v117_v23 = vld [vmem:[%s14371_s1 + $0x40] sm:$0xff] }
  0x28   :  { %234 = vperm.xlu0 %7251, %v183_v24   ;;  %v431_v24 = vsel %vm399_vm0, 1, %v14386_v0  ;;  %vm660_vm0 = vcmp.eq.s32.totalorder %v7535_v1, 2  ;;  %v7904_v1 = vld [vmem:[#allocation2] sm:$0xf] }
  0x2f   :  { %249 = vperm.xlu2 %7253, %v188_v28   ;;  %246 = vperm.xlu1 %7252, %v187_v29   ;;  %v432_v28 = vsel %vm400_vm1, 1, %v14386_v0  ;;  %v119_v29 = vld [vmem:[%s14371_s1 + $0x50] sm:$0xff]  ;;  %vm662_vm1 = vcmp.eq.s32.totalorder %v7587_v15, 2 }
  0x30   :  { %243 = vperm.xlu0 %7251, %v186_v30   ;;  %v118_v30 = vld [vmem:[%s14371_s1 + $0x48] sm:$0xff] }
  0x37   :  { %258 = vperm.xlu2 %7253, %v191_v34   ;;  %255 = vperm.xlu1 %7252, %v190_v35   ;;  %v122_v34 = vld [vmem:[%s14371_s1 + $0x68] sm:$0xff]  ;;  %v121_v35 = vld [vmem:[%s14371_s1 + $0x60] sm:$0xff] }
  0x38   :  { %252 = vperm.xlu0 %7251, %v189_v36   ;;  %v120_v36 = vld [vmem:[%s14371_s1 + $0x58] sm:$0xff] }
  0x3f   :  { %267 = vperm.xlu2 %7253, %v194_v40   ;;  %264 = vperm.xlu1 %7252, %v193_v41   ;;  %v124_v40 = vld [vmem:[%s14371_s1 + $0x78] sm:$0xff]  ;;  %v123_v41 = vld [vmem:[%s14371_s1 + $0x70] sm:$0xff] }
  0x40   :  { %261 = vperm.xlu0 %7251, %v192_v42   ;;  %v433_v42 = vsel %vm401_vm2, 1, %v14386_v0  ;;  %vm918_vm2 = vcmp.eq.s32.totalorder %v7556_v7, 3 }
  0x47   :  { %276 = vperm.xlu2 %7253, %v197_v46   ;;  %273 = vperm.xlu1 %7252, %v196_v47   ;;  %v126_v46 = vld [vmem:[%s14371_s1 + $0x88] sm:$0xff]  ;;  %v434_v47 = vsel %vm402_vm3, 1, %v14386_v0  ;;  %vm661_vm3 = vcmp.eq.s32.totalorder %v7556_v7, 2  ;;  %v950_v7 = vsel %vm918_vm2, 1, %v14386_v0 }
  0x48   :  { %270 = vperm.xlu0 %7251, %v195_v48   ;;  %v125_v48 = vld [vmem:[%s14371_s1 + $0x80] sm:$0xff] }
  0x4f   :  { %285 = vperm.xlu2 %7253, %v200_v52   ;;  %282 = vperm.xlu1 %7252, %v199_v53   ;;  %v435_v52 = vsel %vm403_vm4, 1, %v14386_v0  ;;  %v128_v53 = vld [vmem:[%s14371_s1 + $0x98] sm:$0xff] }
  0x50   :  { %279 = vperm.xlu0 %7251, %v198_v54   ;;  %v127_v54 = vld [vmem:[%s14371_s1 + $0x90] sm:$0xff] }
  0x57   :  { %294 = vperm.xlu2 %7253, %v203_v58   ;;  %291 = vperm.xlu1 %7252, %v202_v59   ;;  %v131_v58 = vld [vmem:[%s14371_s1 + $0xb0] sm:$0xff]  ;;  %v130_v59 = vld [vmem:[%s14371_s1 + $0xa8] sm:$0xff] }
  0x58   :  { %288 = vperm.xlu0 %7251, %v201_v60   ;;  %v129_v60 = vld [vmem:[%s14371_s1 + $0xa0] sm:$0xff] }
  0x5f   :  { %297 = vperm.xlu2 %7253, %v204_v62   ;;  %1214 = vperm.xlu1 %7252, %v110_v63  }
  0x60   :  { %1209 = vperm.xlu0 %7251, %v109_v4   ;;  %v133_v4 = vld [vmem:[%s14371_s1 + $0xc0] sm:$0xff] }
  0x67   :  { %1229 = vperm.xlu2 %7253, %v113_v5   ;;  %1224 = vperm.xlu1 %7252, %v112_v6   ;;  %v132_v5 = vld [vmem:[%s14371_s1 + $0xb8] sm:$0xff]  ;;  %v436_v6 = vsel %vm404_vm5, 1, %v14386_v0 }
  0x68   :  { %1219 = vperm.xlu0 %7251, %v111_v10  }
  0x69   :  { %v7713_v12 = vpop.permute.xlu2 %219 }
  0x6a   :  { %vm306_vm4 = vcmp.eq.s32.totalorder %v7713_v12, 1  ;;  %v693_v12 = vsel %vm661_vm3, 1, %v14386_v0 }
  0x6f   :  { %1239 = vperm.xlu2 %7253, %v115_v16   ;;  %1234 = vperm.xlu1 %7252, %v114_v17   ;;  %v135_v17 = vld [vmem:[%s14371_s1 + $0xd0] sm:$0xff] }
  0x70   :  { %300 = vperm.xlu0 %7251, %v205_v18   ;;  %v437_v18 = vsel %vm405_vm6, 1, %v14386_v0 }
  0x71   :  { %v7722_v22 = vpop.permute.xlu2 %222 }
  0x72   :  { %vm307_vm5 = vcmp.eq.s32.totalorder %v7722_v22, 1 }
  0x77   :  { %1249 = vperm.xlu2 %7253, %v117_v23   ;;  %464 = vperm.xlu1 %7252, %v431_v24   ;;  %v134_v23 = vld [vmem:[%s14371_s1 + $0xc8] sm:$0xff] }
  0x78   :  { %1244 = vperm.xlu0 %7251, %v116_v25   ;;  %v136_v25 = vld [vmem:[%s14371_s1 + $0xd8] sm:$0xff] }
  0x79   :  { %v7732_v26 = vpop.permute.xlu2 %231 }
  0x7a   :  { %vm310_vm6 = vcmp.eq.s32.totalorder %v7732_v26, 1 }
  0x7f   :  { %467 = vperm.xlu2 %7253, %v432_v28   ;;  %1259 = vperm.xlu1 %7252, %v119_v29   ;;  %v945_v28 = vsel %vm913_vm7, 1, %v14386_v0  ;;  %v688_v29 = vsel %vm656_vm8, 1, %v14386_v0 }
  0x80   :  { %1254 = vperm.xlu0 %7251, %v118_v30  }
  0x81   :  { %v7742_v31 = vpop.permute.xlu2 %240  ;;  %v7744_v32 = vpop.permute.xlu1 %213 }
  0x82   :  { %v7746_v33 = vpop.permute.xlu0 %207  ;;  %vm313_vm7 = vcmp.eq.s32.totalorder %v7742_v31, 1  ;;  %vm304_vm8 = vcmp.eq.s32.totalorder %v7744_v32, 1 }
  0x87   :  { %1274 = vperm.xlu2 %7253, %v122_v34   ;;  %1269 = vperm.xlu1 %7252, %v121_v35  }
  0x88   :  { %1264 = vperm.xlu0 %7251, %v120_v36   ;;  %v946_v36 = vsel %vm914_vm9, 1, %v14386_v0  ;;  %vm302_vm9 = vcmp.eq.s32.totalorder %v7746_v33, 1 }
  0x89   :  { %v7757_v37 = vpop.permute.xlu2 %249  ;;  %v7759_v38 = vpop.permute.xlu1 %216 }
  0x8a   :  { %v7761_v39 = vpop.permute.xlu0 %210 }
  0x8f   :  { %1284 = vperm.xlu2 %7253, %v124_v40   ;;  %1279 = vperm.xlu1 %7252, %v123_v41   ;;  %v689_v40 = vsel %vm657_vm10, 1, %v14386_v0  ;;  %vm316_vm10 = vcmp.eq.s32.totalorder %v7757_v37, 1 }
  0x90   :  { %470 = vperm.xlu0 %7251, %v433_v42  }
  0x91   :  { %v7771_v43 = vpop.permute.xlu2 %258  ;;  %v7773_v44 = vpop.permute.xlu1 %228 }
  0x92   :  { %v7776_v45 = vpop.permute.xlu0 %225 }
  0x93   :  { %vm308_vm2 = vcmp.eq.s32.totalorder %v7776_v45, 1 }
  0x97   :  { %1294 = vperm.xlu2 %7253, %v126_v46   ;;  %473 = vperm.xlu1 %7252, %v434_v47   ;;  %v947_v47 = vsel %vm915_vm11, 1, %v14386_v0  ;;  %vm305_vm11 = vcmp.eq.s32.totalorder %v7759_v38, 1 }
  0x98   :  { %1289 = vperm.xlu0 %7251, %v125_v48   ;;  %v690_v48 = vsel %vm658_vm12, 1, %v14386_v0  ;;  %vm303_vm12 = vcmp.eq.s32.totalorder %v7761_v39, 1 }
  0x99   :  { %v7785_v49 = vpop.permute.xlu2 %267  ;;  %v7787_v50 = vpop.permute.xlu1 %237 }
  0x9a   :  { %v7790_v51 = vpop.permute.xlu0 %234  ;;  %vm322_vm3 = vcmp.eq.s32.totalorder %v7785_v49, 1 }
  0x9f   :  { %476 = vperm.xlu2 %7253, %v435_v52   ;;  %1304 = vperm.xlu1 %7252, %v128_v53  }
  0xa0   :  { %1299 = vperm.xlu0 %7251, %v127_v54   ;;  %v139_v54 = vld [vmem:[%s14371_s1 + $0xf0] sm:$0xff] }
  0xa1   :  { %v7799_v55 = vpop.permute.xlu2 %276  ;;  %v7801_v56 = vpop.permute.xlu1 %246 }
  0xa2   :  { %v7803_v57 = vpop.permute.xlu0 %243 }
  0xa7   :  { %1319 = vperm.xlu2 %7253, %v131_v58   ;;  %1314 = vperm.xlu1 %7252, %v130_v59   ;;  %v948_v58 = vsel %vm916_vm13, 1, %v14386_v0  ;;  %v691_v59 = vsel %vm659_vm14, 1, %v14386_v0  ;;  %vm663_vm13 = vcmp.eq.s32.totalorder %v7582_v14, 2  ;;  %vm406_vm14 = vcmp.eq.s32.totalorder %v7582_v14, 1 }
  0xa8   :  { %1309 = vperm.xlu0 %7251, %v129_v60  }
  0xa9   :  { %v7814_v61 = vpop.permute.xlu2 %285  ;;  %v7816_v62 = vpop.permute.xlu1 %255 }
  0xaa   :  { %v7818_v63 = vpop.permute.xlu0 %252 }
  0xaf   :  { %1329 = vperm.xlu2 %7253, %v133_v4   ;;  %1324 = vperm.xlu1 %7252, %v132_v5   ;;  %v140_v4 = vld [vmem:[%s14371_s1 + $0xf8] sm:$0xff]  ;;  %v949_v5 = vsel %vm917_vm15, 1, %v14386_v0  ;;  %vm319_vm15 = vcmp.eq.s32.totalorder %v7771_v43, 1  ;;  %v695_v43 = vsel %vm663_vm13, 1, %v14386_v0  ;;  %vm317_vm13 = vcmp.eq.s32.totalorder %v7818_v63, 1 }
  0xb0   :  { %479 = vperm.xlu0 %7251, %v436_v6   ;;  %v692_v6 = vsel %vm660_vm0, 1, %v14386_v0  ;;  %vm309_vm0 = vcmp.eq.s32.totalorder %v7773_v44, 1  ;;  %v438_v44 = vsel %vm406_vm14, 1, %v14386_v0  ;;  %vm920_vm14 = vcmp.eq.s32.totalorder %v7582_v14, 3 }
  0xb1   :  { %v7828_v10 = vpop.permute.xlu2 %294  ;;  %v7831_v11 = vpop.permute.xlu1 %264 }
  0xb2   :  { %v7833_v16 = vpop.permute.xlu0 %261 }
  0xb7   :  { %1339 = vperm.xlu2 %7253, %v135_v17   ;;  %482 = vperm.xlu1 %7252, %v437_v18   ;;  %v7902_v18 = vld [vmem:[%s14372_s2] ss:$0 sm:$0xff] }
  0xb8   :  { %1334 = vperm.xlu0 %7251, %v134_v23   ;;  %v7910_v23 = vperm.slane %v7904_v1, 0 }
  0xb9   :  { %v7842_v24 = vpop.permute.xlu2 %297  ;;  %v7851_v30 = vpop.permute.xlu1 %273 }
  0xba   :  { %v7853_v34 = vpop.permute.xlu0 %270  ;;  %v7957_v39 = vsel %vm304_vm8, %v7910_v23, 0.0  ;;  %v7969_v26 = vsel %vm316_vm10, %v7910_v23, 0.0  ;;  %v7974_v31 = vsel %vm305_vm11, %v7910_v23, 0.0  ;;  %v7979_v32 = vsel %vm303_vm12, %v7910_v23, 0.0 }
  0xbb   :  { %14624 = vst [vmem:[#allocation19_spill] sm:$0xff] %v7969_v26  ;;  %v8002_v49 = vsel %vm309_vm0, %v7910_v23, 0.0  ;;  %vm314_vm8 = vcmp.eq.s32.totalorder %v7803_v57, 1  ;;  %vm407_vm10 = vcmp.eq.s32.totalorder %v7577_v13, 1  ;;  %vm328_vm11 = vcmp.eq.s32.totalorder %v7814_v61, 1 }
  0xbc   :  { %14627 = vst [vmem:[#allocation22_spill] sm:$0xff] %v8002_v49  ;;  %vm318_vm12 = vcmp.eq.s32.totalorder %v7816_v62, 1  ;;  %vm321_vm0 = vcmp.eq.s32.totalorder %v7831_v11, 1 }
  0xbd   :  { %v8072_v11 = vsel %vm318_vm12, %v7910_v23, 0.0  ;;  %v8086_v62 = vsel %vm321_vm0, %v7910_v23, 0.0  ;;  %vm666_vm12 = vcmp.eq.s32.totalorder %v7603_v20, 2 }
  0xbe   :  { %14637 = vst [vmem:[#allocation32_spill] sm:$0xff] %v8072_v11 }
  0xbf   :  { %1344 = vperm.xlu2 %7253, %v136_v25   ;;  %978 = vperm.xlu1 %7252, %v945_v28   ;;  %v7916_v25 = vld [vmem:[%s14373_s3] ss:$0 sm:$0xff]  ;;  %14640 = vst [vmem:[#allocation35_spill] sm:$0xff] %v8086_v62 }
  0xc0   :  { %721 = vperm.xlu0 %7251, %v688_v29   ;;  %v694_v29 = vsel %vm662_vm1, 1, %v14386_v0  ;;  %vm919_vm1 = vcmp.eq.s32.totalorder %v7587_v15, 3  ;;  %v7996_v15 = vsel %vm319_vm15, %v7910_v23, 0.0  ;;  %vm331_vm15 = vcmp.eq.s32.totalorder %v7828_v10, 1 }
  0xc1   :  { %v1230_v35 = vpop.permute.xlu2 %1229  ;;  %v7862_v41 = vpop.permute.xlu1 %282  ;;  %14626 = vst [vmem:[#allocation21_spill] sm:$0xff] %v7996_v15  ;;  %v951_v45 = vsel %vm919_vm1, 1, %v14386_v0  ;;  %vm320_vm1 = vcmp.eq.s32.totalorder %v7833_v16, 1  ;;  %v8077_v16 = vsel %vm317_vm13, %v7910_v23, 0.0  ;;  %v8082_v57 = vsel %vm331_vm15, %v7910_v23, 0.0 }
  0xc2   :  { %v7864_v42 = vpop.permute.xlu0 %279  ;;  %v1374_v28 = vmul.f32 %v7902_v18, %v1230_v35  ;;  %14638 = vst [vmem:[#allocation33_spill] sm:$0xff] %v8077_v16  ;;  %vm409_vm13 = vcmp.eq.s32.totalorder %v7603_v20, 1 }
  0xc3   :  { %14639 = vst [vmem:[#allocation34_spill] sm:$0xff] %v8082_v57 }
  0xc7   :  { %1349 = vperm.xlu2 %7253, %v137_v3   ;;  %981 = vperm.xlu1 %7252, %v946_v36   ;;  %v7928_v3 = vsel %vm306_vm4, %v7910_v23, 0.0  ;;  %v7937_v36 = vsel %vm307_vm5, %v7910_v23, 0.0  ;;  %vm312_vm4 = vcmp.eq.s32.totalorder %v7787_v50, 1  ;;  %vm311_vm5 = vcmp.eq.s32.totalorder %v7790_v51, 1 }
  0xc8   :  { %724 = vperm.xlu0 %7251, %v689_v40   ;;  %14620 = vst [vmem:[#allocation15_spill] sm:$0xff] %v7937_v36  ;;  %v7941_v40 = vadd.f32 %v7916_v25, %v1374_v28  ;;  %v8005_v50 = vsel %vm308_vm2, %v7910_v23, 0.0  ;;  %vm665_vm2 = vcmp.eq.s32.totalorder %v7608_v21, 2 }
  0xc9   :  { %v1240_v46 = vpop.permute.xlu2 %1239  ;;  %v7874_v52 = vpop.permute.xlu1 %291  ;;  %14628 = vst [vmem:[#allocation23_spill] sm:$0xff] %v8005_v50 }
  0xca   :  { %v7876_v53 = vpop.permute.xlu0 %288  ;;  %14621 = vst [vmem:[#allocation16_spill] sm:$0xff] %v7941_v40  ;;  %v2061_v33 = vand.u32 2139095040, %v7941_v40  ;;  %vm330_vm15 = vcmp.eq.s32.totalorder %v7874_v52, 1 }
  0xcb   :  { %vm329_vm0 = vcmp.eq.s32.totalorder %v7876_v53, 1  ;;  %v6544_v53 = vld [vmem:[%s14378_s8 + $0x68] sm:$0xff] }
  0xcf   :  { %1354 = vperm.xlu2 %7253, %v138_v9   ;;  %984 = vperm.xlu1 %7252, %v947_v47   ;;  %v1376_v9 = vmul.f32 %v7902_v18, %v1240_v46  ;;  %v7947_v47 = vsel %vm310_vm6, %v7910_v23, 0.0  ;;  %v7962_v46 = vsel %vm302_vm9, %v7910_v23, 0.0  ;;  %vm325_vm6 = vcmp.eq.s32.totalorder %v7799_v55, 1 }
  0xd0   :  { %727 = vperm.xlu0 %7251, %v690_v48   ;;  %14622 = vst [vmem:[#allocation17_spill] sm:$0xff] %v7947_v47  ;;  %v7952_v48 = vsel %vm313_vm7, %v7910_v23, 0.0  ;;  %vm315_vm7 = vcmp.eq.s32.totalorder %v7801_v56, 1  ;;  %vm664_vm9 = vcmp.eq.s32.totalorder %v7577_v13, 2 }
  0xd1   :  { %v7879_v2 = vpop.permute.xlu2 %1249  ;;  %v7888_v60 = vpop.permute.xlu1 %1214  ;;  %14623 = vst [vmem:[#allocation18_spill] sm:$0xff] %v7952_v48  ;;  %v7988_v37 = vadd.f32 %v7916_v25, %v1376_v9 }
  0xd2   :  { %v7890_v8 = vpop.permute.xlu0 %1209  ;;  %v1378_v38 = vmul.f32 %v7902_v18, %v7879_v2  ;;  %v8008_v2 = vsel %vm322_vm3, %v7910_v23, 0.0  ;;  %v1371_v55 = vmul.f32 %v7902_v18, %v7888_v60  ;;  %v8033_v60 = vsel %vm315_vm7, %v7910_v23, 0.0 }
  0xd3   :  { %14625 = vst [vmem:[#allocation20_spill] sm:$0xff] %v7988_v37  ;;  %v2371_v51 = vand.u32 2139095040, %v7988_v37  ;;  %v1370_v56 = vmul.f32 %v7902_v18, %v7890_v8  ;;  %vm408_vm3 = vcmp.eq.s32.totalorder %v7608_v21, 1  ;;  %vm323_vm7 = vcmp.eq.s32.totalorder %v7853_v34, 1 }
  0xd4   :  { %14629 = vst [vmem:[#allocation24_spill] sm:$0xff] %v8008_v2  ;;  %v8046_v9 = vadd.f32 %v7916_v25, %v1371_v55 }
  0xd5   :  { %14634 = vst [vmem:[#allocation29_spill] sm:$0xff] %v8033_v60 }
  0xd6   :  { %v1596_v61 = vand.u32 2139095040, %v8046_v9 }
  0xd7   :  { %1359 = vperm.xlu2 %7253, %v139_v54   ;;  %987 = vperm.xlu1 %7252, %v948_v58   ;;  %v8012_v58 = vsel %vm312_vm4, %v7910_v23, 0.0  ;;  %vm332_vm4 = vcmp.eq.s32.totalorder %v7842_v24, 1 }
  0xd8   :  { %730 = vperm.xlu0 %7251, %v691_v59   ;;  %14630 = vst [vmem:[#allocation25_spill] sm:$0xff] %v8012_v58  ;;  %v2062_v59 = vshrl.u32 %v2061_v33, 23 }
  0xd9   :  { %v7897_v17 = vpop.permute.xlu2 %467  ;;  %v7932_v22 = vpop.permute.xlu1 %1224 }
  0xda   :  { %v7934_v35 = vpop.permute.xlu0 %1219  ;;  %v1373_v14 = vmul.f32 %v7902_v18, %v7932_v22 }
  0xdc   :  { %v8093_v10 = vadd.f32 %v7916_v25, %v1373_v14 }
  0xde   :  { %14642 = vst [vmem:[#allocation37_spill] sm:$0xff] %v8093_v10 }
  0xdf   :  { %1364 = vperm.xlu2 %7253, %v140_v4   ;;  %990 = vperm.xlu1 %7252, %v949_v5   ;;  %v8018_v4 = vsel %vm311_vm5, %v7910_v23, 0.0  ;;  %v8021_v5 = vsel %vm325_vm6, %v7910_v23, 0.0  ;;  %vm324_vm5 = vcmp.eq.s32.totalorder %v7851_v30, 1  ;;  %vm921_vm6 = vcmp.eq.s32.totalorder %v7577_v13, 3 }
  0xe0   :  { %733 = vperm.xlu0 %7251, %v692_v6   ;;  %14631 = vst [vmem:[#allocation26_spill] sm:$0xff] %v8018_v4  ;;  %v8024_v6 = vadd.f32 %v7916_v25, %v1378_v38  ;;  %v8050_v38 = vadd.f32 %v7916_v25, %v1370_v56  ;;  %v8089_v56 = vsel %vm320_vm1, %v7910_v23, 0.0  ;;  %v1906_v13 = vand.u32 2139095040, %v8093_v10 }
  0xe1   :  { %v7964_v54 = vpop.permute.xlu2 %1274  ;;  %14632 = vst [vmem:[#allocation27_spill] sm:$0xff] %v8021_v5  ;;  %v8028_v28 = vpop.permute.xlu1 %1234 }
  0xe2   :  { %14633 = vst [vmem:[#allocation28_spill] sm:$0xff] %v8024_v6  ;;  %v2681_v33 = vand.u32 2139095040, %v8024_v6 }
  0xe3   :  { %14641 = vst [vmem:[#allocation36_spill] sm:$0xff] %v8089_v56 }
  0xe4   :  { %v2682_v63 = vshrl.u32 %v2681_v33, 23 }
  0xe6   :  { %v7165_v14 = vadd.s32 4294967169, %v2682_v63  ;;  %v8130_v63 = vsel %vm324_vm5, %v7910_v23, 0.0  ;;  %vm667_vm5 = vcmp.eq.s32.totalorder %v7598_v19, 2 }
  0xe7   :  { %739 = vperm.xlu2 %7253, %v694_v29   ;;  %993 = vperm.xlu1 %7252, %v950_v7   ;;  %v8030_v29 = vpop.permute.xlu0 %300  ;;  %v7153_v7 = vadd.s32 4294967169, %v2062_v59  ;;  %v8062_v59 = vsel %vm314_vm8, %v7910_v23, 0.0  ;;  %14645 = vst [vmem:[#allocation39_spill] sm:$0xff] %v8130_v63  ;;  %v1375_v63 = vmul.f32 %v7902_v18, %v8028_v28 }
  0xe8   :  { %736 = vperm.xlu0 %7251, %v693_v12   ;;  %v2372_v12 = vshrl.u32 %v2371_v51, 23  ;;  %14635 = vst [vmem:[#allocation30_spill] sm:$0xff] %v8062_v59  ;;  %v8067_v51 = vsel %vm328_vm11, %v7910_v23, 0.0  ;;  %v2688_v24 = vadd.s32 1, %v7165_v14 }
  0xe9   :  { %v8041_v8 = vpop.permute.xlu2 %1284  ;;  %14636 = vst [vmem:[#allocation31_spill] sm:$0xff] %v8067_v51  ;;  %v2068_v22 = vadd.s32 1, %v7153_v7  ;;  %v1372_v7 = vmul.f32 %v7902_v18, %v7934_v35  ;;  %v6413_v35 = vld [vmem:[%s14376_s6 + $0x78] sm:$0xff]  ;;  %v14643_v51 = vmov 0  }
  0xea   :  { %v7159_v55 = vadd.s32 4294967169, %v2372_v12  ;;  %v8101_v12 = vpop.permute.xlu1 %464  ;;  %v697_v5 = vsel %vm665_vm2, 1, %v14643_v51  ;;  %v440_v2 = vsel %vm408_vm3, 1, %v14643_v51  ;;  %6418 = vmatpush.msra.mxu0 %v6413_v35  ;;  %v8133_v35 = vperm.slane %v7904_v1, 1 }
  0xeb   :  { %vm2069_vm8 = vcmp.gt.s32.totalorder %v2068_v22, 0  ;;  %v8116_v62 = vadd.f32 %v7916_v25, %v1372_v7  ;;  %v8138_v7 = vsel %vm323_vm7, %v7910_v23, 0.0  ;;  %v1907_v1 = vshrl.u32 %v1906_v13, 23 }
  0xec   :  { %14646 = vst [vmem:[#allocation40_spill] sm:$0xff] %v8138_v7  ;;  %v2070_v56 = vsel %vm2069_vm8, %v2068_v22, 0  ;;  %v441_v13 = vsel %vm409_vm13, 1, %v14643_v51  ;;  %vm2689_vm1 = vcmp.gt.s32.totalorder %v2688_v24, 0  ;;  %v1383_v7 = vmul.f32 %v7902_v18, %v7964_v54 }
  0xed   :  { %v8199_v54 = vsel %vm329_vm0, %v7910_v23, 0.0  ;;  %v2690_v28 = vsel %vm2689_vm1, %v2688_v24, 0  ;;  %v8212_v24 = vadd.f32 %v7916_v25, %v1375_v63  ;;  %vm923_vm7 = vcmp.eq.s32.totalorder %v7603_v20, 3  ;;  %v6542_v20 = vld [vmem:[%s14378_s8 + $0x58] sm:$0xff] }
  0xee   :  { %14654 = vst [vmem:[#allocation48_spill] sm:$0xff] %v8199_v54  ;;  %vm924_vm13 = vcmp.eq.s32.totalorder %v7598_v19, 3 }
  0xef   :  { %742 = vperm.xlu2 %7253, %v695_v43   ;;  %485 = vperm.xlu1 %7252, %v438_v44   ;;  %v696_v43 = vsel %vm664_vm9, 1, %v14386_v0  ;;  %v439_v44 = vsel %vm407_vm10, 1, %v14386_v0  ;;  %v8103_v33 = vpop.permute.xlu0 %1244  ;;  %vm327_vm9 = vcmp.eq.s32.totalorder %v7862_v41, 1  ;;  %vm326_vm10 = vcmp.eq.s32.totalorder %v7864_v42, 1  ;;  %14655 = vst [vmem:[#allocation49_spill] sm:$0xff] %v8212_v24 }
  0xf0   :  { %996 = vperm.xlu0 %7251, %v951_v45   ;;  %v952_v45 = vsel %vm920_vm14, 1, %v14386_v0  ;;  %v1441_v0 = vand.u32 2139095040, %v8050_v38  ;;  %v8147_v34 = vsel %vm327_vm9, %v7910_v23, 0.0  ;;  %v8150_v41 = vsel %vm326_vm10, %v7910_v23, 0.0 }
  0xf1   :  { %v8110_v57 = vpop.permute.xlu2 %1294  ;;  %14647 = vst [vmem:[#allocation41_spill] sm:$0xff] %v8147_v34  ;;  %vm922_vm14 = vcmp.eq.s32.totalorder %v7608_v21, 3  ;;  %v8153_v42 = vand.u32 31, %v2070_v56  ;;  %v7150_v34 = vadd.s32 4294967169, %v1907_v1  ;;  %v6410_v21 = vld [vmem:[%s14376_s6 + $0x60] sm:$0xff]  ;;  %v6545_v1 = vld [vmem:[%s14378_s8 + $0x70] sm:$0xff] }
  0xf2   :  { %14648 = vst [vmem:[#allocation42_spill] sm:$0xff] %v8150_v41  ;;  %v8175_v41 = vsel %vm330_vm15, %v7910_v23, 0.0  ;;  %vm333_vm9 = vcmp.eq.s32.totalorder %v8030_v29, 1  ;;  %v956_v58 = vsel %vm924_vm13, 1, %v14643_v51 }
  0xf3   :  { %14649 = vst [vmem:[#allocation43_spill] sm:$0xff] %v8153_v42  ;;  %v8192_v52 = vsub.s32 32, %v8153_v42  ;;  %v8338_v47 = vsel %vm333_vm9, %v7910_v23, 0.0 }
  0xf4   :  { %14650 = vst [vmem:[#allocation44_spill] sm:$0xff] %v8175_v41 }
  0xf5   :  { %14652 = vst [vmem:[#allocation46_spill] sm:$0xff] %v8192_v52 }
  0xf6   :  { %14665 = vst [vmem:[#allocation59_spill] sm:$0xff] %v8338_v47  ;;  %v7261_v47 = vld [vmem:[%s14370_s0 + $0x60] sm:$0xff] }
  0xf7   :  { %745 = vperm.xlu2 %7253, %v696_v43   ;;  %488 = vperm.xlu1 %7252, %v439_v44   ;;  %v2378_v43 = vadd.s32 1, %v7159_v55  ;;  %v1597_v44 = vshrl.u32 %v1596_v61, 23  ;;  %v953_v55 = vsel %vm921_vm6, 1, %v14643_v51  ;;  %v6412_v61 = vld [vmem:[%s14376_s6 + $0x70] sm:$0xff]  ;;  %v8159_v14 = vpop.permute.xlu0 %1254  ;;  %vm410_vm6 = vcmp.eq.s32.totalorder %v7598_v19, 1 }
  0xf8   :  { %999 = vperm.xlu0 %7251, %v952_v45   ;;  %v1442_v45 = vshrl.u32 %v1441_v0, 23  ;;  %v8125_v0 = vsel %vm332_vm4, %v7910_v23, 0.0  ;;  %6419 = vmatpush.msra.mxu0 %v6412_v61  ;;  %v1751_v61 = vand.u32 2139095040, %v8116_v62  ;;  %vm560_vm4 = vcmp.eq.s32.totalorder %v7897_v17, 1  ;;  %v6538_v23 = vld [vmem:[%s14378_s8 + $0x38] sm:$0xff] }
  0xf9   :  { %14644 = vst [vmem:[#allocation38_spill] sm:$0xff] %v8125_v0  ;;  %vm2379_vm11 = vcmp.gt.s32.totalorder %v2378_v43, 0  ;;  %v7144_v30 = vadd.s32 4294967169, %v1597_v44  ;;  %v8157_v44 = vpop.permute.xlu1 %1259  ;;  %v8181_v15 = vpop.permute.xlu2 %476  ;;  %v593_v63 = vsel %vm560_vm4, %v8133_v35, 0.0  ;;  %vm925_vm1 = vcmp.eq.s32.totalorder %v7261_v47, 3 }
  0xfa   :  { %v7141_v0 = vadd.s32 4294967169, %v1442_v45  ;;  %v698_v45 = vsel %vm666_vm12, 1, %v14643_v51  ;;  %v8270_v26 = vadd.f32 %v593_v63, %v7979_v32  ;;  %v6406_v32 = vld [vmem:[%s14376_s6 + $0x40] sm:$0xff]  ;;  %v6541_v63 = vld [vmem:[%s14378_s8 + $0x50] sm:$0xff]  ;;  %vm411_vm12 = vcmp.eq.s32.totalorder %v7625_v27, 1 }
  0xfc   :  { %v1448_v22 = vadd.s32 1, %v7141_v0  ;;  %v954_v0 = vsel %vm922_vm14, 1, %v14643_v51  ;;  %vm559_vm14 = vcmp.eq.s32.totalorder %v8101_v12, 1  ;;  %v6535_v12 = vld [vmem:[%s14378_s8 + $0x20] sm:$0xff] }
  0xfe   :  { %vm1449_vm3 = vcmp.gt.s32.totalorder %v1448_v22, 0 }
  0xff   :  { %748 = vperm.xlu2 %7253, %v697_v5   ;;  %491 = vperm.xlu1 %7252, %v440_v2   ;;  %v2380_v2 = vsel %vm2379_vm11, %v2378_v43, 0  ;;  %v1603_v5 = vadd.s32 1, %v7144_v30  ;;  %v6546_v43 = vld [vmem:[%s14378_s8 + $0x78] sm:$0xff]  ;;  %v1752_v30 = vshrl.u32 %v1751_v61, 23  ;;  %v8189_v61 = vshrl.u32 %v2070_v56, 5  ;;  %v8257_v16 = vpop.permute.xlu0 %1264 }
 0x100   :  { %1002 = vperm.xlu0 %7251, %v953_v55   ;;  %v6411_v55 = vld [vmem:[%s14376_s6 + $0x68] sm:$0xff]  ;;  %6676 = vmatpush.msra.mxu2 %v6546_v43  ;;  %v6409_v56 = vld [vmem:[%s14376_s6 + $0x58] sm:$0xff]  ;;  %v1913_v43 = vadd.s32 1, %v7150_v34  ;;  %v6408_v34 = vld [vmem:[%s14376_s6 + $0x50] sm:$0xff]  ;;  %vm668_vm11 = vcmp.eq.s32.totalorder %v7625_v27, 2 }
 0x101   :  { %6420 = vmatpush.msra.mxu0 %v6411_v55  ;;  %14651 = vst [vmem:[#allocation45_spill] sm:$0xff] %v8189_v61  ;;  %v8194_v55 = vand.u32 31, %v2380_v2  ;;  %vm1604_vm2 = vcmp.gt.s32.totalorder %v1603_v5, 0  ;;  %v7147_v41 = vadd.s32 4294967169, %v1752_v30  ;;  %v6543_v30 = vld [vmem:[%s14378_s8 + $0x60] sm:$0xff]  ;;  %v700_v48 = vsel %vm668_vm11, 1, %v14643_v51 }
 0x102   :  { %6677 = vmatpush.msra.mxu2 %v6545_v1  ;;  %v1605_v1 = vsel %vm1604_vm2, %v1603_v5, 0  ;;  %vm1914_vm8 = vcmp.gt.s32.totalorder %v1913_v43, 0  ;;  %v2216_v5 = vand.u32 2139095040, %v8212_v24  ;;  %v6539_v27 = vld [vmem:[%s14378_s8 + $0x40] sm:$0xff] }
 0x103   :  { %14653 = vst [vmem:[#allocation47_spill] sm:$0xff] %v8194_v55  ;;  %6421 = vmatpush.msra.mxu0 %v6410_v21  ;;  %v8234_v21 = vand.u32 31, %v2690_v28  ;;  %v8244_v17 = vsub.s32 32, %v8194_v55  ;;  %v8278_v59 = vand.u32 31, %v1605_v1 }
 0x104   :  { %6678 = vmatpush.msra.mxu2 %v6544_v53  ;;  %v1758_v53 = vadd.s32 1, %v7147_v41  ;;  %v6407_v41 = vld [vmem:[%s14376_s6 + $0x48] sm:$0xff] }
 0x105   :  { %6422 = vmatpush.msra.mxu0 %v6409_v56  ;;  %14658 = vst [vmem:[#allocation52_spill] sm:$0xff] %v8234_v21  ;;  %v699_v56 = vsel %vm667_vm5, 1, %v14643_v51  ;;  %v8276_v60 = vsub.s32 32, %v8234_v21 }
 0x106   :  { %14659 = vst [vmem:[#allocation53_spill] sm:$0xff] %v8244_v17  ;;  %6679 = vmatpush.msra.mxu2 %v6543_v30  ;;  %v8267_v30 = vshrl.u32 %v1605_v1, 5  ;;  %vm1759_vm10 = vcmp.gt.s32.totalorder %v1758_v53, 0  ;;  %v2217_v1 = vshrl.u32 %v2216_v5, 23  ;;  %v1379_v5 = vmul.f32 %v7902_v18, %v8159_v14 }
 0x107   :  { %751 = vperm.xlu2 %7253, %v698_v45   ;;  %494 = vperm.xlu1 %7252, %v441_v13   ;;  %v8215_v45 = vadd.f32 %v7916_v25, %v1383_v7  ;;  %v1385_v13 = vmul.f32 %v7902_v18, %v8041_v8  ;;  %v1377_v8 = vmul.f32 %v7902_v18, %v8103_v33  ;;  %v1450_v33 = vsel %vm1449_vm3, %v1448_v22, 0 }
 0x108   :  { %1005 = vperm.xlu0 %7251, %v954_v0   ;;  %v8226_v0 = vshrl.u32 %v2380_v2, 5  ;;  %v442_v2 = vsel %vm410_vm6, 1, %v14643_v51  ;;  %6423 = vmatpush.msra.mxu0 %v6408_v34  ;;  %v955_v7 = vsel %vm923_vm7, 1, %v14643_v51  ;;  %v8255_v34 = vpop.permute.xlu1 %1269  ;;  %v8265_v22 = vshrl.u32 %v2690_v28, 5  ;;  %14663 = vst [vmem:[#allocation57_spill] sm:$0xff] %v8276_v60  ;;  %v8283_v28 = vpop.permute.xlu2 %1319  ;;  %v6401_v60 = vld [vmem:[%s14376_s6 + $0x18] sm:$0xff] }
 0x109   :  { %14656 = vst [vmem:[#allocation50_spill] sm:$0xff] %v8215_v45  ;;  %v3456_v54 = vand.u32 2139095040, %v8215_v45  ;;  %v8253_v11 = vadd.f32 %v7916_v25, %v1385_v13  ;;  %v8273_v13 = vadd.f32 %v7916_v25, %v1377_v8  ;;  %v8280_v45 = vand.u32 31, %v1450_v33  ;;  %6680 = vmatpush.msra.mxu2 %v6542_v20 }
 0x10a   :  { %14657 = vst [vmem:[#allocation51_spill] sm:$0xff] %v8226_v0  ;;  %6424 = vmatpush.msra.mxu0 %v6407_v41  ;;  %v1915_v8 = vsel %vm1914_vm8, %v1913_v43, 0  ;;  %v6540_v43 = vld [vmem:[%s14378_s8 + $0x48] sm:$0xff]  ;;  %v1387_v20 = vmul.f32 %v7902_v18, %v8110_v57  ;;  %v443_v57 = vsel %vm411_vm12, 1, %v14643_v51  ;;  %v1392_v50 = vmul.f32 %v7902_v18, %v8283_v28 }
 0x10b   :  { %14660 = vst [vmem:[#allocation54_spill] sm:$0xff] %v8253_v11  ;;  %v2526_v41 = vand.u32 2139095040, %v8273_v13  ;;  %6681 = vmatpush.msra.mxu2 %v6541_v63  ;;  %v8324_v14 = vsub.s32 32, %v8280_v45  ;;  %v8326_v63 = vand.u32 31, %v1915_v8  ;;  %v8355_v29 = vshrl.u32 %v1915_v8, 5 }
 0x10c   :  { %14661 = vst [vmem:[#allocation55_spill] sm:$0xff] %v8265_v22  ;;  %6425 = vmatpush.msra.mxu0 %v6406_v32  ;;  %v8310_v32 = vsub.s32 32, %v8278_v59 }
 0x10d   :  { %14662 = vst [vmem:[#allocation56_spill] sm:$0xff] %v8273_v13  ;;  %6682 = vmatpush.msra.mxu2 %v6540_v43  ;;  %v2527_v19 = vshrl.u32 %v2526_v41, 23  ;;  %v8344_v43 = vadd.f32 %v7916_v25, %v1387_v20  ;;  %v8361_v20 = vpop.permute.xlu0 %470  ;;  %v8371_v8 = vsub.s32 32, %v8326_v63 }
 0x10e   :  { %14664 = vst [vmem:[#allocation58_spill] sm:$0xff] %v8326_v63 }
 0x10f   :  { %754 = vperm.xlu2 %7253, %v699_v56   ;;  %497 = vperm.xlu1 %7252, %v442_v2   ;;  %v3457_v56 = vshrl.u32 %v3456_v54, 23  ;;  %v6405_v2 = vld [vmem:[%s14376_s6 + $0x38] sm:$0xff]  ;;  %v1380_v54 = vmul.f32 %v7902_v18, %v8157_v44  ;;  %v6404_v44 = vld [vmem:[%s14376_s6 + $0x30] sm:$0xff]  ;;  %14666 = vst [vmem:[#allocation60_spill] sm:$0xff] %v8344_v43  ;;  %v7162_v21 = vadd.s32 4294967169, %v2527_v19 }
 0x110   :  { %1008 = vperm.xlu0 %7251, %v955_v7   ;;  %v3766_v7 = vand.u32 2139095040, %v8253_v11  ;;  %v8312_v11 = vshrl.u32 %v1450_v33, 5  ;;  %6426 = vmatpush.msra.mxu0 %v6405_v2  ;;  %v1760_v33 = vsel %vm1759_vm10, %v1758_v53, 0  ;;  %v7156_v2 = vadd.s32 4294967169, %v2217_v1  ;;  %v6403_v53 = vld [vmem:[%s14376_s6 + $0x28] sm:$0xff]  ;;  %14669 = vst [vmem:[#allocation63_spill] sm:$0xff] %v8355_v29  ;;  %v1280_v41 = vpop.permute.xlu1 %1279 }
 0x111   :  { %v7180_v4 = vadd.s32 4294967169, %v3457_v56  ;;  %v8347_v22 = vadd.f32 %v7916_v25, %v1380_v54  ;;  %v8350_v1 = vadd.f32 %v7916_v25, %v1379_v5  ;;  %v8357_v56 = vshrl.u32 %v1760_v33, 5  ;;  %6683 = vmatpush.msra.mxu2 %v6539_v27  ;;  %14671 = vst [vmem:[#allocation64_spill] sm:$0xff] %v8371_v8 }
 0x112   :  { %v3767_v49 = vshrl.u32 %v3766_v7, 23  ;;  %6427 = vmatpush.msra.mxu0 %v6404_v44  ;;  %v8359_v7 = vand.u32 31, %v1760_v33  ;;  %v14670_v54 = vand.u32 2147483647, %v8050_v38  ;;  %v2223_v44 = vadd.s32 1, %v7156_v2 }
 0x113   :  { %14667 = vst [vmem:[#allocation61_spill] sm:$0xff] %v8347_v22  ;;  %v3463_v33 = vadd.s32 1, %v7180_v4  ;;  %6684 = vmatpush.msra.mxu2 %v6538_v23  ;;  %v2991_v6 = vand.u32 2139095040, %v8347_v22  ;;  %v2836_v2 = vand.u32 2139095040, %v8350_v1  ;;  %v1382_v4 = vmul.f32 %v7902_v18, %v8255_v34 }
 0x114   :  { %14668 = vst [vmem:[#allocation62_spill] sm:$0xff] %v8350_v1  ;;  %v8368_v5 = vand.u32 8388607, %v14670_v54  ;;  %6428 = vmatpush.msra.mxu0 %v6403_v53  ;;  %v7186_v27 = vadd.s32 4294967169, %v3767_v49  ;;  %v1330_v54 = vpop.permute.xlu2 %1329  ;;  %v4076_v53 = vand.u32 2139095040, %v8344_v43  ;;  %v6536_v49 = vld [vmem:[%s14378_s8 + $0x28] sm:$0xff]  ;;  %v1381_v23 = vmul.f32 %v7902_v18, %v8257_v16 }
 0x115   :  { %v592_v22 = vsel %vm559_vm14, %v8133_v35, 0.0  ;;  %v1394_v34 = vmul.f32 %v7902_v18, %v1330_v54  ;;  %v957_v16 = vsel %vm925_vm1, 1, %v14643_v51  ;;  %v6400_v1 = vld [vmem:[%s14376_s6 + $0x10] sm:$0xff]  ;;  %vm2224_vm2 = vcmp.gt.s32.totalorder %v2223_v44, 0 }
 0x116   :  { %vm3464_vm3 = vcmp.gt.s32.totalorder %v3463_v33, 0  ;;  %v2533_v54 = vadd.s32 1, %v7162_v21  ;;  %v4077_v13 = vshrl.u32 %v4076_v53, 23  ;;  %v2992_v47 = vshrl.u32 %v2991_v6, 23  ;;  %v6399_v21 = vld [vmem:[%s14376_s6 + $0x8] sm:$0xff]  ;;  %v6534_v6 = vld [vmem:[%s14378_s8 + $0x18] sm:$0xff] }
 0x117   :  { %757 = vperm.xlu2 %7253, %v700_v48   ;;  %500 = vperm.xlu1 %7252, %v443_v57   ;;  %v6402_v48 = vld [vmem:[%s14376_s6 + $0x20] sm:$0xff]  ;;  %v8377_v57 = vld [vmem:[%s14370_s0 + $0x68] sm:$0xff]  ;;  %v2837_v0 = vshrl.u32 %v2836_v2, 23  ;;  %v8427_v55 = vadd.f32 %v7916_v25, %v1382_v4  ;;  %v3465_v53 = vsel %vm3464_vm3, %v3463_v33, 0  ;;  %vm563_vm10 = vcmp.eq.s32.totalorder %v8181_v15, 1 }
 0x118   :  { %1011 = vperm.xlu0 %7251, %v956_v58   ;;  %vm669_vm15 = vcmp.eq.s32.totalorder %v8377_v57, 2  ;;  %vm412_vm0 = vcmp.eq.s32.totalorder %v8377_v57, 1  ;;  %v6537_v58 = vld [vmem:[%s14378_s8 + $0x30] sm:$0xff]  ;;  %6429 = vmatpush.msra.mxu0 %v6402_v48  ;;  %v8407_v48 = vsub.s32 32, %v8359_v7  ;;  %v8455_v2 = vpop.permute.xlu1 %473  ;;  %v6398_v4 = vld [vmem:[%s14376_s6] sm:$0xff]  ;;  %vm2534_vm7 = vcmp.gt.s32.totalorder %v2533_v54, 0 }
 0x119   :  { %v701_v19 = vsel %vm669_vm15, 1, %v14643_v51  ;;  %v444_v43 = vsel %vm412_vm0, 1, %v14643_v51  ;;  %6685 = vmatpush.msra.mxu2 %v6537_v58  ;;  %v3773_v58 = vadd.s32 1, %v7186_v27  ;;  %14672 = vst [vmem:[#allocation65_spill] sm:$0xff] %v8427_v55  ;;  %v8430_v27 = vadd.f32 %v7916_v25, %v1381_v23  ;;  %v6533_v23 = vld [vmem:[%s14378_s8 + $0x10] sm:$0xff] }
 0x11a   :  { %6430 = vmatpush.msra.mxu0 %v6401_v60  ;;  %v8424_v60 = vadd.f32 %v592_v22, %v7962_v46  ;;  %v1384_v46 = vmul.f32 %v7902_v18, %v1280_v41  ;;  %v8441_v22 = vadd.f32 %v7916_v25, %v1394_v34  ;;  %v8453_v41 = vadd.f32 %v7916_v25, %v1392_v50 }
 0x11b   :  { %6686 = vmatpush.msra.mxu2 %v6536_v49  ;;  %14673 = vst [vmem:[#allocation66_spill] sm:$0xff] %v8430_v27  ;;  %vm3774_vm6 = vcmp.gt.s32.totalorder %v3773_v58, 0  ;;  %v1290_v49 = vpop.permute.xlu0 %1289  ;;  %v7168_v33 = vadd.s32 4294967169, %v2837_v0  ;;  %v3301_v50 = vand.u32 2139095040, %v8427_v55  ;;  %v3146_v34 = vand.u32 2139095040, %v8430_v27 }
 0x11c   :  { %6431 = vmatpush.msra.mxu0 %v6400_v1  ;;  %14674 = vst [vmem:[#allocation67_spill] sm:$0xff] %v8441_v22  ;;  %v2225_v1 = vsel %vm2224_vm2, %v2223_v44, 0  ;;  %v7192_v44 = vadd.s32 4294967169, %v4077_v13  ;;  %v5161_v13 = vand.u32 2139095040, %v8441_v22  ;;  %v1386_v0 = vmul.f32 %v7902_v18, %v1290_v49 }
 0x11d   :  { %6687 = vmatpush.msra.mxu2 %v6535_v12  ;;  %14675 = vst [vmem:[#allocation68_spill] sm:$0xff] %v8453_v41  ;;  %v8480_v28 = vand.u32 31, %v2225_v1  ;;  %v8482_v55 = vand.u32 31, %v3465_v53  ;;  %v4851_v27 = vand.u32 2139095040, %v8453_v41  ;;  %v3775_v49 = vsel %vm3774_vm6, %v3773_v58, 0 }
 0x11e   :  { %6432 = vmatpush.msra.mxu0 %v6399_v21  ;;  %v8472_v21 = vadd.f32 %v7916_v25, %v1384_v46  ;;  %v4083_v22 = vadd.s32 1, %v7192_v44  ;;  %v2843_v37 = vadd.s32 1, %v7168_v33  ;;  %v3302_v24 = vshrl.u32 %v3301_v50, 23  ;;  %v1340_v50 = vpop.permute.xlu2 %1339 }
 0x11f   :  { %760 = vperm.xlu2 %7253, %v701_v19   ;;  %503 = vperm.xlu1 %7252, %v444_v43   ;;  %v8446_v43 = vld [vmem:[%s14370_s0 + $0x70] sm:$0xff]  ;;  %v7171_v19 = vadd.s32 4294967169, %v2992_v47  ;;  %v14426_v47 = vmov 683565275   ;;  %14677 = vst [vmem:[#allocation70_spill] sm:$0xff] %v8480_v28  ;;  %v3147_v61 = vshrl.u32 %v3146_v34, 23  ;;  %v8495_v52 = vadd.f32 %v7916_v25, %v1386_v0 }
 0x120   :  { %1014 = vperm.xlu0 %7251, %v957_v16   ;;  %vm670_vm4 = vcmp.eq.s32.totalorder %v8446_v43, 2  ;;  %vm413_vm5 = vcmp.eq.s32.totalorder %v8446_v43, 1  ;;  %6688 = vmatpush.msra.mxu2 %v6534_v6  ;;  %14676 = vst [vmem:[#allocation69_spill] sm:$0xff] %v8472_v21  ;;  %v8478_v6 = vshrl.u32 %v14426_v47, %v8324_v14  ;;  %v8487_v46 = vshll.u32 %v14426_v47, %v8280_v45  ;;  %v1305_v34 = vpop.permute.xlu1 %1304 }
 0x121   :  { %v702_v16 = vsel %vm670_vm4, 1, %v14643_v51  ;;  %v445_v12 = vsel %vm413_vm5, 1, %v14643_v51  ;;  %6433 = vmatpush.msra.mxu0 %v6398_v4  ;;  %14678 = vst [vmem:[#allocation71_spill] sm:$0xff] %v8482_v55  ;;  %v8489_v4 = vshrl.u32 %v2225_v1, 5  ;;  %v2998_v17 = vadd.s32 1, %v7171_v19 }
 0x122   :  { %6689 = vmatpush.msra.mxu2 %v6533_v23  ;;  %v2535_v23 = vsel %vm2534_vm7, %v2533_v54, 0  ;;  %v3611_v42 = vand.u32 2139095040, %v8472_v21  ;;  %v5162_v41 = vshrl.u32 %v5161_v13, 23  ;;  %14680 = vst [vmem:[#allocation73_spill] sm:$0xff] %v8495_v52  ;;  %vm926_vm8 = vcmp.eq.s32.totalorder %v8377_v57, 3 }
 0x123   :  { %14679 = vst [vmem:[#allocation72_spill] sm:$0xff] %v8489_v4  ;;  %v8499_v1 = vsub.s32 32, %v8480_v28  ;;  %v8501_v58 = vshrl.u32 %v3465_v53, 5  ;;  %v8504_v54 = vsub.s32 32, %v8482_v55  ;;  %v4852_v44 = vshrl.u32 %v4851_v27, 23 }
 0x124   :  { %v8506_v19 = vand.u32 31, %v3775_v49  ;;  %v8508_v33 = vand.u32 31, %v2535_v23  ;;  %vm4084_vm9 = vcmp.gt.s32.totalorder %v4083_v22, 0  ;;  %vm2999_vm11 = vcmp.gt.s32.totalorder %v2998_v17, 0 }
 0x125   :  { %14681 = vst [vmem:[#allocation74_spill] sm:$0xff] %v8499_v1  ;;  %vm2844_vm12 = vcmp.gt.s32.totalorder %v2843_v37, 0  ;;  %v7177_v57 = vadd.s32 4294967169, %v3302_v24  ;;  %v7174_v53 = vadd.s32 4294967169, %v3147_v61  ;;  %v7213_v13 = vadd.s32 4294967169, %v5162_v41  ;;  %v1300_v41 = vpop.permute.xlu0 %1299 }
 0x126   :  { %14682 = vst [vmem:[#allocation75_spill] sm:$0xff] %v8501_v58  ;;  %v3921_v0 = vand.u32 2139095040, %v8495_v52  ;;  %v8513_v27 = vshrl.u32 %v3775_v49, 5  ;;  %v8515_v47 = vshrl.u32 %v2535_v23, 5  ;;  %v7207_v21 = vadd.s32 4294967169, %v4852_v44 }
 0x127   :  { %763 = vperm.xlu2 %7253, %v702_v16   ;;  %506 = vperm.xlu1 %7252, %v445_v12   ;;  %14683 = vst [vmem:[#allocation76_spill] sm:$0xff] %v8504_v54  ;;  %v958_v16 = vsel %vm926_vm8, 1, %v14643_v51  ;;  %v3612_v12 = vshrl.u32 %v3611_v42, 23  ;;  %v1396_v58 = vmul.f32 %v7902_v18, %v1340_v50  ;;  %v8519_v55 = vsub.s32 32, %v8506_v19 }
 0x128   :  { %14684 = vst [vmem:[#allocation77_spill] sm:$0xff] %v8506_v19  ;;  %1017 = vperm.xlu0 %7251, %v958_v16   ;;  %v8522_v24 = vsub.s32 32, %v8508_v33  ;;  %v596_v42 = vsel %vm563_vm10, %v8133_v35, 0.0  ;;  %v1389_v61 = vmul.f32 %v7902_v18, %v1305_v34  ;;  %v4085_v49 = vsel %vm4084_vm9, %v4083_v22, 0 }
 0x129   :  { %14685 = vst [vmem:[#allocation78_spill] sm:$0xff] %v8508_v33  ;;  %v3000_v23 = vsel %vm2999_vm11, %v2998_v17, 0  ;;  %v2845_v44 = vsel %vm2844_vm12, %v2843_v37, 0  ;;  %v3308_v50 = vadd.s32 1, %v7177_v57  ;;  %v3153_v16 = vadd.s32 1, %v7174_v53 }
 0x12a   :  { %14686 = vst [vmem:[#allocation79_spill] sm:$0xff] %v8513_v27  ;;  %v7183_v52 = vadd.s32 4294967169, %v3612_v12  ;;  %v5168_v27 = vadd.s32 1, %v7213_v13  ;;  %v8532_v19 = vadd.f32 %v596_v42, %v7928_v3  ;;  %v4858_v54 = vadd.s32 1, %v7207_v21 }
 0x12b   :  { %14687 = vst [vmem:[#allocation80_spill] sm:$0xff] %v8515_v47  ;;  %v8535_v15 = vadd.f32 %v7916_v25, %v1396_v58  ;;  %v1388_v34 = vmul.f32 %v7902_v18, %v1300_v41  ;;  %v8538_v47 = vshrl.u32 %v4085_v49, 5  ;;  %v8540_v22 = vand.u32 31, %v4085_v49 }
 0x12c   :  { %14688 = vst [vmem:[#allocation81_spill] sm:$0xff] %v8519_v55  ;;  %v3922_v55 = vshrl.u32 %v3921_v0, 23  ;;  %v8542_v17 = vshrl.u32 %v3000_v23, 5  ;;  %v8545_v37 = vadd.f32 %v7916_v25, %v1389_v61  ;;  %v8547_v57 = vand.u32 31, %v3000_v23 }
 0x12d   :  { %14689 = vst [vmem:[#allocation82_spill] sm:$0xff] %v8522_v24  ;;  %v8549_v53 = vshrl.u32 %v2845_v44, 5  ;;  %vm3309_vm13 = vcmp.gt.s32.totalorder %v3308_v50, 0  ;;  %vm561_vm14 = vcmp.eq.s32.totalorder %v8361_v20, 1  ;;  %vm3154_vm15 = vcmp.gt.s32.totalorder %v3153_v16, 0 }
 0x12e   :  { %14690 = vst [vmem:[#allocation83_spill] sm:$0xff] %v8532_v19  ;;  %v3618_v3 = vadd.s32 1, %v7183_v52  ;;  %vm5169_vm0 = vcmp.gt.s32.totalorder %v5168_v27, 0  ;;  %v7189_v21 = vadd.s32 4294967169, %v3922_v55  ;;  %v8552_v58 = vand.u32 31, %v2845_v44  ;;  %v8566_v52 = vld [vmem:[%s14370_s0 + $0x78] sm:$0xff] }
 0x12f   :  { %14691 = vst [vmem:[#allocation84_spill] sm:$0xff] %v8535_v15  ;;  %vm4859_vm1 = vcmp.gt.s32.totalorder %v4858_v54, 0  ;;  %v5471_v12 = vand.u32 2139095040, %v8535_v15  ;;  %v8556_v13 = vadd.f32 %v7916_v25, %v1388_v34  ;;  %v8559_v0 = vsub.s32 32, %v8540_v22 }
 0x130   :  { %14692 = vst [vmem:[#allocation85_spill] sm:$0xff] %v8538_v47  ;;  %v594_v42 = vsel %vm561_vm14, %v8133_v35, 0.0  ;;  %v4386_v61 = vand.u32 2139095040, %v8545_v37  ;;  %vm671_vm2 = vcmp.eq.s32.totalorder %v8566_v52, 2  ;;  %v3310_v55 = vsel %vm3309_vm13, %v3308_v50, 0 }
 0x131   :  { %14693 = vst [vmem:[#allocation86_spill] sm:$0xff] %v8540_v22  ;;  %v3155_v20 = vsel %vm3154_vm15, %v3153_v16, 0  ;;  %v5170_v41 = vsel %vm5169_vm0, %v5168_v27, 0  ;;  %vm562_vm3 = vcmp.eq.s32.totalorder %v8455_v2, 1  ;;  %v4860_v49 = vsel %vm4859_vm1, %v4858_v54, 0 }
 0x132   :  { %14694 = vst [vmem:[#allocation87_spill] sm:$0xff] %v8542_v17  ;;  %vm3619_vm4 = vcmp.gt.s32.totalorder %v3618_v3, 0  ;;  %v3928_v23 = vadd.s32 1, %v7189_v21  ;;  %v703_v44 = vsel %vm671_vm2, 1, %v14643_v51  ;;  %v5472_v34 = vshrl.u32 %v5471_v12, 23 }
 0x133   :  { %14695 = vst [vmem:[#allocation88_spill] sm:$0xff] %v8545_v37  ;;  %v4231_v15 = vand.u32 2139095040, %v8556_v13  ;;  %766 = vperm.xlu2 %7253, %v703_v44   ;;  %vm414_vm5 = vcmp.eq.s32.totalorder %v8566_v52, 1  ;;  %vm927_vm6 = vcmp.eq.s32.totalorder %v8446_v43, 3  ;;  %v8574_v37 = vand.u32 31, %v5170_v41 }
 0x134   :  { %14696 = vst [vmem:[#allocation89_spill] sm:$0xff] %v8547_v57  ;;  %v4387_v50 = vshrl.u32 %v4386_v61, 23  ;;  %v446_v27 = vsel %vm414_vm5, 1, %v14643_v51  ;;  %v959_v16 = vsel %vm927_vm6, 1, %v14643_v51  ;;  %v8579_v54 = vsub.s32 32, %v8547_v57 }
 0x135   :  { %14697 = vst [vmem:[#allocation90_spill] sm:$0xff] %v8549_v53  ;;  %v8581_v21 = vand.u32 31, %v3310_v55  ;;  %v8583_v12 = vand.u32 31, %v3155_v20  ;;  %509 = vperm.xlu1 %7252, %v446_v27   ;;  %1020 = vperm.xlu0 %7251, %v959_v16   ;;  %v8586_v44 = vsub.s32 32, %v8552_v58  ;;  %v8588_v43 = vshrl.u32 %v3310_v55, 5 }
 0x136   :  { %14698 = vst [vmem:[#allocation91_spill] sm:$0xff] %v8552_v58  ;;  %v8591_v61 = vadd.f32 %v594_v42, %v7957_v39  ;;  %v595_v47 = vsel %vm562_vm3, %v8133_v35, 0.0  ;;  %v8596_v22 = vand.u32 31, %v4860_v49  ;;  %vm3929_vm7 = vcmp.gt.s32.totalorder %v3928_v23, 0 }
 0x137   :  { %14699 = vst [vmem:[#allocation92_spill] sm:$0xff] %v8556_v13  ;;  %v3620_v13 = vsel %vm3619_vm4, %v3618_v3, 0  ;;  %v4232_v17 = vshrl.u32 %v4231_v15, 23  ;;  %v1345_v3 = vpop.permute.xlu2 %1344  ;;  %v8601_v16 = vsub.s32 32, %v8574_v37  ;;  %v7198_v55 = vadd.s32 4294967169, %v4387_v50 }
 0x138   :  { %14700 = vst [vmem:[#allocation93_spill] sm:$0xff] %v8559_v0  ;;  %v7219_v0 = vadd.s32 4294967169, %v5472_v34  ;;  %v8598_v27 = vand.u32 31, %v3620_v13  ;;  %v8606_v42 = vsub.s32 32, %v8581_v21  ;;  %v8608_v2 = vshrl.u32 %v3155_v20, 5 }
 0x139   :  { %14701 = vst [vmem:[#allocation94_spill] sm:$0xff] %v8574_v37  ;;  %v8611_v57 = vsub.s32 32, %v8583_v12  ;;  %v8614_v15 = vadd.f32 %v595_v47, %v7974_v31  ;;  %v8616_v34 = vshrl.u32 %v4860_v49, 5  ;;  %v3930_v50 = vsel %vm3929_vm7, %v3928_v23, 0 }
 0x13a   :  { %14702 = vst [vmem:[#allocation95_spill] sm:$0xff] %v8579_v54  ;;  %v8618_v54 = vshrl.u32 %v5170_v41, 5  ;;  %v1397_v53 = vmul.f32 %v7902_v18, %v1345_v3  ;;  %v5478_v20 = vadd.s32 1, %v7219_v0  ;;  %v4393_v47 = vadd.s32 1, %v7198_v55  ;;  %v1315_v41 = vpop.permute.xlu1 %1314 }
 0x13b   :  { %14703 = vst [vmem:[#allocation96_spill] sm:$0xff] %v8581_v21  ;;  %v8624_v21 = vshrl.u32 %v3620_v13, 5  ;;  %v14465_v18 = vmov 2102212464   ;;  %v14467_v13 = vmov 1326507024  }
 0x13c   :  { %14704 = vst [vmem:[#allocation97_spill] sm:$0xff] %v8583_v12  ;;  %v5184_v23 = vshll.u32 %v14465_v18, %v8574_v37  ;;  %v8638_v0 = vshrl.u32 %v3930_v50, 5  ;;  %v8640_v3 = vand.u32 31, %v3930_v50  ;;  %vm5193_vm8 = vcmp.lt.s32.totalorder %v8618_v54, 4  ;;  %v8651_v18 = vld [vmem:[%s14372_s2] ss:$0 sm:$0xff] }
 0x13d   :  { %14705 = vst [vmem:[#allocation98_spill] sm:$0xff] %v8586_v44  ;;  %vm5479_vm9 = vcmp.gt.s32.totalorder %v5478_v20, 0  ;;  %v14480_v50 = vmov 2131351028   ;;  %vm4394_vm10 = vcmp.gt.s32.totalorder %v4393_v47, 0  ;;  %vm1470_vm12 = vcmp.lt.s32.totalorder %v8312_v11, 1 }
 0x13e   :  { %14706 = vst [vmem:[#allocation99_spill] sm:$0xff] %v8588_v43  ;;  %v14457_v43 = vmov 2475754826   ;;  %vm1473_vm13 = vcmp.lt.s32.totalorder %v8312_v11, 4  ;;  %vm1472_vm14 = vcmp.lt.s32.totalorder %v8312_v11, 3  ;;  %vm1471_vm15 = vcmp.lt.s32.totalorder %v8312_v11, 2 }
 0x13f   :  { %14707 = vst [vmem:[#allocation100_spill] sm:$0xff] %v8591_v61  ;;  %v1456_v39 = vshrl.u32 %v14457_v43, %v8324_v14  ;;  %v8622_v43 = vsub.s32 32, %v8596_v22  ;;  %vm1625_vm5 = vcmp.lt.s32.totalorder %v8267_v30, 1  ;;  %vm1628_vm6 = vcmp.lt.s32.totalorder %v8267_v30, 4 }
 0x140   :  { %14708 = vst [vmem:[#allocation101_spill] sm:$0xff] %v8596_v22  ;;  %vm1627_vm7 = vcmp.lt.s32.totalorder %v8267_v30, 3 }
 0x141   :  { %14709 = vst [vmem:[#allocation102_spill] sm:$0xff] %v8598_v27  ;;  %v8632_v49 = vor.u32 %v1456_v39, %v8487_v46  ;;  %v8646_v46 = vadd.f32 %v7916_v25, %v1397_v53  ;;  %v14724_v25 = vmov 2102212464  }
 0x142   :  { %14710 = vst [vmem:[#allocation103_spill] sm:$0xff] %v8601_v16  ;;  %v1462_v53 = vshrl.u32 %v14724_v25, %v8324_v14 }
 0x143   :  { %14711 = vst [vmem:[#allocation104_spill] sm:$0xff] %v8606_v42  ;;  %v7195_v42 = vadd.s32 4294967169, %v4232_v17  ;;  %v5188_v17 = vshrl.u32 %v14467_v13, %v8601_v16  ;;  %v1391_v13 = vmul.f32 %v8651_v18, %v1315_v41  ;;  %v14726_v41 = vmov 920167782  }
 0x144   :  { %14712 = vst [vmem:[#allocation105_spill] sm:$0xff] %v8608_v2  ;;  %v8627_v2 = vsub.s32 32, %v8598_v27 }
 0x145   :  { %14713 = vst [vmem:[#allocation106_spill] sm:$0xff] %v8611_v57  ;;  %v14473_v57 = vmov 920167782   ;;  %v4238_v39 = vadd.s32 1, %v7195_v42 }
 0x146   :  { %14714 = vst [vmem:[#allocation107_spill] sm:$0xff] %v8614_v15  ;;  %v5185_v31 = vshrl.u32 %v14473_v57, %v8601_v16  ;;  %v5187_v55 = vshll.u32 %v14473_v57, %v8574_v37  ;;  %v1459_v16 = vshrl.u32 %v14480_v50, %v8324_v14  ;;  %v14725_v37 = vmov 2475754826  }
 0x147   :  { %14715 = vst [vmem:[#allocation108_spill] sm:$0xff] %v8616_v34  ;;  %v1310_v34 = vpop.permute.xlu0 %1309  ;;  %v8668_v50 = vsub.s32 32, %v8640_v3  ;;  %vm4239_vm11 = vcmp.gt.s32.totalorder %v4238_v39, 0 }
 0x148   :  { %14716 = vst [vmem:[#allocation109_spill] sm:$0xff] %v8618_v54  ;;  %v8656_v22 = vor.u32 %v5185_v31, %v5184_v23  ;;  %v1390_v57 = vmul.f32 %v8651_v18, %v1310_v34  ;;  %v5189_v42 = vor.u32 %v5188_v17, %v5187_v55  ;;  %v5480_v31 = vsel %vm5479_vm9, %v5478_v20, 0  ;;  %v8676_v17 = vld [vmem:[%s14373_s3] ss:$0 sm:$0xff] }
 0x149   :  { %14717 = vst [vmem:[#allocation110_spill] sm:$0xff] %v8622_v43  ;;  %v1458_v43 = vshll.u32 %v14725_v37, %v8280_v45  ;;  %v5626_v23 = vand.u32 2139095040, %v8646_v46  ;;  %v14728_v34 = vmov 2131351028   ;;  %v8679_v55 = vadd.f32 %v8676_v17, %v1391_v13 }
 0x14a   :  { %14718 = vst [vmem:[#allocation111_spill] sm:$0xff] %v8624_v21  ;;  %v1465_v21 = vshrl.u32 %v14726_v41, %v8324_v14  ;;  %v1461_v27 = vshll.u32 %v14728_v34, %v8280_v45  ;;  %v8693_v44 = vsel %vm5193_vm8, %v5189_v42, 1326507024  ;;  %v8695_v13 = vshrl.u32 %v5480_v31, 5 }
 0x14b   :  { %14719 = vst [vmem:[#allocation112_spill] sm:$0xff] %v8627_v2  ;;  %v4395_v2 = vsel %vm4394_vm10, %v4393_v47, 0  ;;  %v1460_v12 = vor.u32 %v1459_v16, %v1458_v43  ;;  %v8689_v47 = vsel %vm5193_vm8, %v8656_v22, 920167782  ;;  %v8715_v42 = vshrl.u32 %v5626_v23, 23 }
 0x14c   :  { %14720 = vst [vmem:[#allocation113_spill] sm:$0xff] %v8638_v0  ;;  %v1464_v0 = vshll.u32 %v14724_v25, %v8280_v45  ;;  %v1463_v20 = vor.u32 %v1462_v53, %v1461_v27  ;;  %v8701_v43 = vshrl.u32 %v4395_v2, 5  ;;  %vm1626_vm9 = vcmp.lt.s32.totalorder %v8267_v30, 2  ;;  %v8938_v30 = vld [vmem:[%s14370_s0 + $0x80] sm:$0xff] }
 0x14d   :  { %14721 = vst [vmem:[#allocation114_spill] sm:$0xff] %v8640_v3  ;;  %v1478_v27 = vsel %vm1470_vm12, %v8632_v49, %v1460_v12 }
 0x14e   :  { %14722 = vst [vmem:[#allocation115_spill] sm:$0xff] %v8646_v46  ;;  %v1466_v58 = vor.u32 %v1465_v21, %v1464_v0  ;;  %v14731_v46 = vmov 1326507024   ;;  %v1467_v21 = vshll.u32 %v14726_v41, %v8280_v45  ;;  %v8709_v0 = vand.u32 31, %v4395_v2 }
 0x14f   :  { %14723 = vst [vmem:[#allocation116_spill] sm:$0xff] %v8656_v22  ;;  %v1468_v3 = vshrl.u32 %v14731_v46, %v8324_v14  ;;  %v4240_v45 = vsel %vm4239_vm11, %v4238_v39, 0  ;;  %v1475_v2 = vsel %vm1473_vm13, %v1463_v20, 2102212464 }
 0x150   :  { %14727 = vst [vmem:[#allocation117_spill] sm:$0xff] %v8668_v50  ;;  %v8682_v50 = vadd.f32 %v8676_v17, %v1390_v57  ;;  %v8699_v57 = vand.u32 31, %v5480_v31  ;;  %v1479_v16 = vsel %vm1473_vm13, %v1466_v58, 920167782  ;;  %v1482_v31 = vsel %vm1470_vm12, %v1460_v12, %v1463_v20 }
 0x151   :  { %14729 = vst [vmem:[#allocation118_spill] sm:$0xff] %v8679_v55  ;;  %v1469_v14 = vor.u32 %v1468_v3, %v1467_v21  ;;  %v1480_v53 = vsel %vm1472_vm14, %v1463_v20, %v1479_v16  ;;  %v8755_v33 = vand.u32 31, %v4240_v45 }
 0x152   :  { %14730 = vst [vmem:[#allocation119_spill] sm:$0xff] %v8682_v50  ;;  %v1481_v3 = vsel %vm1471_vm15, %v1478_v27, %v1480_v53  ;;  %v8732_v54 = vsub.s32 32, %v8699_v57  ;;  %v8736_v20 = vshll.u32 %v14724_v25, %v8699_v57 }
 0x153   :  { %14732 = vst [vmem:[#allocation120_spill] sm:$0xff] %v8689_v47  ;;  %v1483_v21 = vsel %vm1473_vm13, %v1469_v14, 1326507024  ;;  %v1511_v27 = vand.u32 65535, %v1481_v3  ;;  %v1512_v53 = vshrl.u32 %v1481_v3, 16  ;;  %v1476_v14 = vsel %vm1472_vm14, %v1460_v12, %v1475_v2 }
 0x154   :  { %14733 = vst [vmem:[#allocation121_spill] sm:$0xff] %v8693_v44  ;;  %v1484_v39 = vsel %vm1472_vm14, %v1466_v58, %v1483_v21  ;;  %v14738_v44 = vor.u32 8388608, %v8368_v5  ;;  %v8748_v21 = vshll.u32 %v14726_v41, %v8699_v57 }
 0x155   :  { %14734 = vst [vmem:[#allocation122_spill] sm:$0xff] %v8695_v13  ;;  %v1485_v16 = vsel %vm1471_vm15, %v1482_v31, %v1484_v39  ;;  %v8751_v39 = vsub.s32 32, %v8709_v0 }
 0x156   :  { %14735 = vst [vmem:[#allocation123_spill] sm:$0xff] %v8699_v57  ;;  %v8726_v47 = vshll.u32 %v14738_v44, 8  ;;  %v1474_v44 = vsel %vm1470_vm12, %v8478_v6, %v8632_v49  ;;  %v1489_v3 = vand.u32 65535, %v1485_v16  ;;  %v1490_v31 = vshrl.u32 %v1485_v16, 16 }
 0x157   :  { %14736 = vst [vmem:[#allocation124_spill] sm:$0xff] %v8701_v43  ;;  %v8753_v43 = vshrl.u32 %v4240_v45, 5  ;;  %v8759_v12 = vsel %vm1471_vm15, %v1474_v44, %v1476_v14 }
 0x158   :  { %14737 = vst [vmem:[#allocation125_spill] sm:$0xff] %v8709_v0  ;;  %v1487_v58 = vand.u32 65535, %v8726_v47  ;;  %v1488_v5 = vshrl.u32 %v8726_v47, 16 }
 0x159   :  { %14739 = vst [vmem:[#allocation126_spill] sm:$0xff] %v8732_v54 }
 0x15a   :  { %14740 = vst [vmem:[#allocation127_spill] sm:$0xff] %v8751_v39  ;;  %v1514_v23 = vmul.u32 %v1512_v53, %v1487_v58  ;;  %v1515_v22 = vmul.u32 %v1511_v27, %v1488_v5  ;;  %v1492_v24 = vmul.u32 %v1490_v31, %v1487_v58  ;;  %v1493_v6 = vmul.u32 %v1489_v3, %v1488_v5 }
 0x15b   :  { %14741 = vst [vmem:[#allocation128_spill] sm:$0xff] %v8753_v43  ;;  %v1513_v49 = vmul.u32 %v1511_v27, %v1487_v58  ;;  %v1491_v57 = vmul.u32 %v1489_v3, %v1487_v58  ;;  %v1494_v4 = vmul.u32 %v1490_v31, %v1488_v5  ;;  %v1516_v39 = vmul.u32 %v1512_v53, %v1488_v5  ;;  %v8765_v53 = vpop.permute.xlu0 %479 }
 0x15c   :  { %14742 = vst [vmem:[#allocation129_spill] sm:$0xff] %v8755_v33  ;;  %v1517_v2 = vshll.u32 %v1514_v23, 16  ;;  %v1495_v0 = vshll.u32 %v1492_v24, 16  ;;  %v1518_v28 = vshrl.u32 %v1514_v23, 16  ;;  %v1519_v1 = vshll.u32 %v1515_v22, 16 }
 0x15d   :  { %v1497_v45 = vshll.u32 %v1493_v6, 16  ;;  %v1520_v44 = vshrl.u32 %v1515_v22, 16  ;;  %v1496_v14 = vshrl.u32 %v1492_v24, 16  ;;  %v1498_v23 = vshrl.u32 %v1493_v6, 16 }
 0x15e   :  { %vm1521_vm0 = vc.u32 %v1513_v49, %v1517_v2  ;;  %v1523_v43 = vadd.s32 %v1517_v2, %v1513_v49  ;;  %vm1499_vm1 = vc.u32 %v1491_v57, %v1495_v0  ;;  %v1501_v19 = vadd.s32 %v1495_v0, %v1491_v57 }
 0x15f   :  { %v1522_v15 = vsel %vm1521_vm0, 1, %v14643_v51  ;;  %v1500_v11 = vsel %vm1499_vm1, 1, %v14643_v51  ;;  %v14743_v57 = vand.u32 2147483647, %v8046_v9  ;;  %v14744_v49 = vmov 683565275  }
 0x160   :  { %v1524_v27 = vadd.s32 %v1522_v15, %v1516_v39  ;;  %vm1525_vm2 = vc.u32 %v1523_v43, %v1519_v1  ;;  %v1502_v16 = vadd.s32 %v1500_v11, %v1494_v4  ;;  %vm1503_vm3 = vc.u32 %v1501_v19, %v1497_v45  ;;  %v1325_v19 = vpop.permute.xlu1 %1324 }
 0x161   :  { %v1526_v58 = vsel %vm1525_vm2, 1, %v14643_v51  ;;  %v1504_v5 = vsel %vm1503_vm3, 1, %v14643_v51  ;;  %v1600_v0 = vand.u32 8388607, %v14743_v57  ;;  %v1610_v22 = vshll.u32 %v14744_v49, %v8278_v59 }
 0x162   :  { %v1528_v3 = vadd.s32 %v1526_v58, %v1524_v27  ;;  %v1506_v31 = vadd.s32 %v1504_v5, %v1502_v16  ;;  %v1611_v24 = vshrl.u32 %v14725_v37, %v8310_v32  ;;  %v1614_v4 = vshrl.u32 %v14728_v34, %v8310_v32 }
 0x163   :  { %v1613_v39 = vshll.u32 %v14725_v37, %v8278_v59  ;;  %v1616_v6 = vshll.u32 %v14728_v34, %v8278_v59  ;;  %v1617_v2 = vshrl.u32 %v14724_v25, %v8310_v32  ;;  %v1619_v11 = vshll.u32 %v14724_v25, %v8278_v59 }
 0x164   :  { %v1529_v15 = vadd.s32 %v1528_v3, %v1518_v28  ;;  %v1507_v16 = vadd.s32 %v1506_v31, %v1496_v14  ;;  %v8782_v45 = vor.u32 %v1611_v24, %v1610_v22  ;;  %v1620_v27 = vshrl.u32 %v14726_v41, %v8310_v32 }
 0x165   :  { %v8788_v28 = vor.u32 %v1614_v4, %v1613_v39  ;;  %v1622_v5 = vshll.u32 %v14726_v41, %v8278_v59  ;;  %v1623_v3 = vshrl.u32 %v14731_v46, %v8310_v32  ;;  %v8796_v14 = vadd.s32 %v1523_v43, %v1519_v1 }
 0x166   :  { %v1530_v58 = vadd.s32 %v1529_v15, %v1520_v44  ;;  %v8794_v57 = vadd.s32 %v1507_v16, %v1498_v23  ;;  %v8798_v31 = vor.u32 %v1617_v2, %v1616_v6  ;;  %v1621_v22 = vor.u32 %v1620_v27, %v1619_v11  ;;  %v8824_v23 = vpop.permute.xlu0 %1334 }
 0x167   :  { %v7222_v24 = vadd.s32 4294967169, %v8715_v42  ;;  %v1601_v61 = vor.u32 8388608, %v1600_v0  ;;  %v1624_v44 = vor.u32 %v1623_v3, %v1622_v5  ;;  %v1531_v4 = vmul.u32 %v8726_v47, %v8759_v12  ;;  %14745 = vst [vmem:[#allocation130_spill] sm:$0xff] %v8824_v23 }
 0x168   :  { %v1534_v40 = vadd.s32 1, %v1530_v58  ;;  %vm1533_vm4 = vc.u32 %v8794_v57, %v8796_v14  ;;  %v1633_v1 = vsel %vm1625_vm5, %v8782_v45, %v8788_v28  ;;  %v1634_v43 = vsel %vm1628_vm6, %v1621_v22, 920167782 }
 0x169   :  { %v1635_v47 = vsel %vm1627_vm7, %v8798_v31, %v1634_v43  ;;  %v5495_v12 = vshrl.u32 %v14726_v41, %v8732_v54  ;;  %v1638_v15 = vsel %vm1628_vm6, %v1624_v44, 1326507024  ;;  %v8830_v39 = vshll.u32 %v1601_v61, 8 }
 0x16a   :  { %v1535_v59 = vsel %vm1533_vm4, %v1534_v40, %v1530_v58  ;;  %v1637_v40 = vsel %vm1625_vm5, %v8788_v28, %v8798_v31  ;;  %v1636_v0 = vsel %vm1626_vm9, %v1633_v1, %v1635_v47  ;;  %v8834_v6 = vshrl.u32 %v14731_v46, %v8732_v54 }
 0x16b   :  { %v1536_v42 = vadd.s32 %v1535_v59, %v1531_v4  ;;  %v1639_v16 = vsel %vm1627_vm7, %v1621_v22, %v1638_v15  ;;  %v1667_v11 = vshrl.u32 %v1636_v0, 16  ;;  %v14746_v27 = vand.u32 2139095040, %v8679_v55  ;;  %v1350_v4 = vpop.permute.xlu2 %1349  ;;  %v8842_v59 = vpop.permute.xlu1 %482 }
 0x16c   :  { %v14747_v5 = vand.u32 2139095040, %v8682_v50  ;;  %14748 = vst [vmem:[#allocation131_spill] sm:$0xff] %v8842_v59  ;;  %v1640_v61 = vsel %vm1626_vm9, %v1637_v40, %v1639_v16  ;;  %v1642_v44 = vand.u32 65535, %v8830_v39  ;;  %v1666_v22 = vand.u32 65535, %v1636_v0 }
 0x16d   :  { %v1537_v2 = vadd.s32 536870912, %v1536_v42  ;;  %v4697_v58 = vshrl.u32 %v14746_v27, 23  ;;  %v1644_v43 = vand.u32 65535, %v1640_v61  ;;  %v1645_v47 = vshrl.u32 %v1640_v61, 16 }
 0x16e   :  { %v4542_v3 = vshrl.u32 %v14747_v5, 23  ;;  %v8850_v15 = vsub.s32 32, %v8755_v33  ;;  %v8852_v27 = vadd.s32 1, %v7222_v24  ;;  %v1643_v5 = vshrl.u32 %v8830_v39, 16  ;;  %v722_v29 = vpop.permute.xlu0 %721 }
 0x16f   :  { %v8847_v1 = vshrl.u32 %v1537_v2, 30  ;;  %v8855_v54 = vmul.u32 %v1667_v11, %v1642_v44  ;;  %v1398_v55 = vmul.f32 %v8651_v18, %v1350_v4  ;;  %v8859_v40 = vmul.f32 %v8651_v18, %v1325_v19  ;;  %v7266_v19 = vld [vmem:[#allocation2] sm:$0xf] }
 0x170   :  { %14749 = vst [vmem:[#allocation132_spill] sm:$0xff] %v8850_v15  ;;  %v1647_v16 = vmul.u32 %v1645_v47, %v1642_v44  ;;  %v8863_v61 = vor.u32 %v5495_v12, %v8736_v20  ;;  %v8867_v24 = vmul.u32 %v1644_v43, %v1643_v5  ;;  %v1646_v15 = vmul.u32 %v1644_v43, %v1642_v44 }
 0x171   :  { %v1539_v2 = vshll.u32 %v8847_v1, 30  ;;  %v1672_v50 = vshll.u32 %v8855_v54, 16  ;;  %v8872_v59 = vmul.u32 %v1666_v22, %v1643_v5  ;;  %v8874_v18 = vadd.s32 4294967169, %v4697_v58 }
 0x172   :  { %14750 = vst [vmem:[#allocation133_spill] sm:$0xff] %v8863_v61  ;;  %v1650_v4 = vshll.u32 %v1647_v16, 16  ;;  %v8876_v23 = vperm.slane %v7266_v19, 2  ;;  %v1668_v20 = vmul.u32 %v1666_v22, %v1642_v44  ;;  %v1671_v12 = vmul.u32 %v1667_v11, %v1643_v5 }
 0x173   :  { %v8870_v33 = vsub.s32 %v1536_v42, %v1539_v2  ;;  %v1649_v36 = vmul.u32 %v1645_v47, %v1643_v5  ;;  %v1652_v42 = vshll.u32 %v8867_v24, 16  ;;  %v1674_v8 = vshll.u32 %v8872_v59, 16  ;;  %v979_v44 = vpop.permute.xlu1 %978 }
 0x174   :  { %vm1654_vm11 = vc.u32 %v1646_v15, %v1650_v4  ;;  %v1656_v2 = vadd.s32 %v1650_v4, %v1646_v15  ;;  %vm1676_vm12 = vc.u32 %v1668_v20, %v1672_v50  ;;  %v1678_v10 = vadd.s32 %v1672_v50, %v1668_v20 }
 0x175   :  { %vm1541_vm10 = vcmp.lt.s32.totalorder %v8870_v33, 0  ;;  %v1542_v0 = vsub.s32 0, %v8870_v33  ;;  %v1655_v43 = vsel %vm1654_vm11, 1, %v14643_v51  ;;  %v1677_v11 = vsel %vm1676_vm12, 1, %v14643_v51 }
 0x176   :  { %v1657_v63 = vadd.s32 %v1655_v43, %v1649_v36  ;;  %vm1658_vm13 = vc.u32 %v1656_v2, %v1652_v42  ;;  %v1679_v47 = vadd.s32 %v1677_v11, %v1671_v12  ;;  %vm5634_vm14 = vcmp.gt.s32.totalorder %v8852_v27, 0 }
 0x177   :  { %v1543_v58 = vsel %vm1541_vm10, %v1542_v0, %v8870_v33  ;;  %v8886_v5 = vadd.s32 4294967169, %v4542_v3  ;;  %vm816_vm15 = vcmp.eq.s32.totalorder %v722_v29, 1  ;;  %v1659_v15 = vsel %vm1658_vm13, 1, %v14643_v51 }
 0x178   :  { %v1544_v22 = vclz %v1543_v58  ;;  %v8889_v4 = vperm.slane %v7266_v19, 3  ;;  %v1661_v36 = vadd.s32 %v1659_v15, %v1657_v63  ;;  %vm1680_vm0 = vc.u32 %v1678_v10, %v1674_v8 }
 0x179   :  { %vm1073_vm1 = vcmp.eq.s32.totalorder %v979_v44, 1  ;;  %v1609_v43 = vshrl.u32 %v14744_v49, %v8310_v32  ;;  %v1630_v50 = vsel %vm1628_vm6, %v8798_v31, 2102212464  ;;  %v1681_v20 = vsel %vm1680_vm0, 1, %v14643_v51  ;;  %v6531_v44 = vld [vmem:[%s14378_s8] sm:$0xff] }
 0x17a   :  { %v7142_v0 = vadd.s32 4294967294, %v1544_v22  ;;  %vm5503_vm2 = vcmp.lt.s32.totalorder %v8695_v13, 4  ;;  %v849_v29 = vsel %vm816_vm15, %v8876_v23, 0.0  ;;  %v1651_v3 = vshrl.u32 %v1647_v16, 16 }
 0x17b   :  { %v1683_v19 = vadd.s32 %v1681_v20, %v1679_v47  ;;  %v1532_v63 = vadd.s32 %v8796_v14, %v8794_v57  ;;  %v1629_v32 = vsel %vm1625_vm5, %v1609_v43, %v8782_v45  ;;  %v1673_v42 = vshrl.u32 %v8855_v54, 16 }
 0x17c   :  { %vm7143_vm3 = vcmp.lt.s32.totalorder %v7142_v0, 0  ;;  %v1631_v58 = vsel %vm1627_vm7, %v8788_v28, %v1630_v50  ;;  %v1662_v11 = vadd.s32 %v1661_v36, %v1651_v3  ;;  %v8909_v16 = vadd.f32 %v8676_v17, %v1398_v55 }
 0x17d   :  { %v1547_v12 = vsel %vm7143_vm3, 0, %v7142_v0  ;;  %v881_v22 = vadd.f32 %v849_v29, %v8424_v60  ;;  %vm1440_vm4 = vcmp.lt.s32.totalorder %v8050_v38, 0  ;;  %v1653_v57 = vshrl.u32 %v8867_v24, 16 }
 0x17e   :  { %v1548_v31 = vsub.s32 32, %v1547_v12  ;;  %v1552_v2 = vsub.s32 4294967266, %v1547_v12  ;;  %14751 = vst [vmem:[#allocation134_spill] sm:$0xff] %v8909_v16  ;;  %v1684_v14 = vadd.s32 %v1683_v19, %v1673_v42  ;;  %v1549_v45 = vshll.u32 %v8870_v33, %v1547_v12 }
 0x17f   :  { %v1675_v15 = vshrl.u32 %v8872_v59, 16  ;;  %v5635_v28 = vsel %vm5634_vm14, %v8852_v27, 0  ;;  %v1106_v55 = vsel %vm1073_vm1, %v8889_v4, 0.0  ;;  %v1562_v60 = vsub.s32 4, %v8847_v1  ;;  %v6532_v27 = vld [vmem:[%s14378_s8 + $0x8] sm:$0xff] }
 0x180   :  { %v1550_v54 = vshrl.u32 %v1532_v63, %v1548_v31  ;;  %v1553_v47 = vadd.s32 127, %v1552_v2  ;;  %v1632_v0 = vsel %vm1626_vm9, %v1629_v32, %v1631_v58  ;;  %v8924_v43 = vadd.s32 %v1662_v11, %v1653_v57  ;;  %6690 = vmatpush.msra.mxu2 %v6532_v27  ;;  %v8948_v63 = vld [vmem:[#allocation5] ss:$0 sm:$0xff] }
 0x181   :  { %v1685_v33 = vadd.s32 %v1684_v14, %v1675_v15  ;;  %v14752_v50 = vand.u32 2147483647, %v8050_v38  ;;  %vm672_vm6 = vcmp.eq.s32.totalorder %v8938_v30, 2  ;;  %vm415_vm7 = vcmp.eq.s32.totalorder %v8938_v30, 1 }
 0x182   :  { %v1551_v24 = vor.u32 %v1550_v54, %v1549_v45  ;;  %v1554_v36 = vshll.u32 %v1553_v47, 23  ;;  %vm928_vm9 = vcmp.eq.s32.totalorder %v8566_v52, 3  ;;  %v1138_v20 = vadd.f32 %v1106_v55, %v881_v22  ;;  %6691 = vmatpush.msra.mxu2 %v6531_v44 }
 0x183   :  { %vm8928_vm5 = vcmp.le.f32.partialorder %v14752_v50, 0.7853982  ;;  %v704_v3 = vsel %vm672_vm6, 1, %v14643_v51  ;;  %v447_v19 = vsel %vm415_vm7, 1, %v14643_v51  ;;  %v8950_v12 = vadd.s32 %v1678_v10, %v1674_v8 }
 0x184   :  { %v1555_v29 = vor.u32 4788187, %v1554_v36  ;;  %v8955_v32 = vsel %vm5503_vm2, %v8863_v61, 920167782  ;;  %v14756_v52 = vor.u32 %v8834_v6, %v8748_v21  ;;  %v8966_v31 = vadd.f32 %v8676_v17, %v8859_v40  ;;  %769 = vperm.xlu2 %7253, %v704_v3   ;;  %512 = vperm.xlu1 %7252, %v447_v19  }
 0x185   :  { %14755 = vst [vmem:[#allocation135_spill] sm:$0xff] %v8955_v32  ;;  %v960_v10 = vsel %vm928_vm9, 1, %v14643_v51  ;;  %v1558_v2 = vcvt.s32.f32 %v1551_v24  ;;  %v1174_v58 = vadd.f32 %v8948_v63, %v1138_v20  ;;  %vm1688_vm10 = vc.u32 %v8924_v43, %v8950_v12 }
 0x186   :  { %v8962_v42 = vsel %vm5503_vm2, %v14756_v52, 1326507024  ;;  %14758 = vst [vmem:[#allocation137_spill] sm:$0xff] %v8966_v31  ;;  %v1556_v8 = vand.u32 2147483647, %v1555_v29  ;;  %1023 = vperm.xlu0 %7251, %v960_v10   ;;  %v8972_v21 = vshrl.u32 %v5635_v28, 5  ;;  %v1686_v17 = vmul.u32 %v8830_v39, %v1632_v0 }
 0x187   :  { %14757 = vst [vmem:[#allocation136_spill] sm:$0xff] %v8962_v42  ;;  %v8975_v6 = vadd.s32 1, %v8874_v18  ;;  %v1689_v40 = vadd.s32 1, %v1685_v33  ;;  %vm564_vm11 = vcmp.eq.s32.totalorder %v8765_v53, 1  ;;  %v1563_v22 = vsel %vm1440_vm4, %v1562_v60, %v8847_v1  ;;  %6692 = vmatmul.f32.vlgmr.msra.gmra.mxu2 %v1174_v58 }
 0x188   :  { %14759 = vst [vmem:[#allocation138_spill] sm:$0xff] %v8972_v21  ;;  %v1559_v11 = vmul.f32 %v1558_v2, %v1556_v8  ;;  %v14530_v57 = vand.u32 2147483647, %v8116_v62  ;;  %v1769_v14 = vshrl.u32 %v14728_v34, %v8407_v48  ;;  %v1772_v18 = vshrl.u32 %v14724_v25, %v8407_v48 }
 0x189   :  { %7054 = vst [vmem:[#allocation10] sm:$0xff] %v1174_v58  ;;  %v1690_v45 = vsel %vm1688_vm10, %v1689_v40, %v1685_v33  ;;  %v1777_v39 = vshll.u32 %v14726_v41, %v8359_v7  ;;  %v1778_v54 = vshrl.u32 %v14731_v46, %v8407_v48  ;;  %v8991_v47 = vand.u32 31, %v5635_v28 }
 0x18a   :  { %v1560_v1 = vxor.u32 2147483648, %v1559_v11  ;;  %v1691_v15 = vadd.s32 %v1690_v45, %v1686_v17  ;;  %v1775_v55 = vshrl.u32 %v14726_v41, %v8407_v48  ;;  %v8996_v60 = vadd.s32 1, %v8886_v5 }
 0x18b   :  { %14760 = vst [vmem:[#allocation139_spill] sm:$0xff] %v8991_v47  ;;  %v1768_v0 = vshll.u32 %v14725_v37, %v8359_v7  ;;  %v1771_v24 = vshll.u32 %v14728_v34, %v8359_v7  ;;  %v1779_v36 = vor.u32 %v1778_v54, %v1777_v39  ;;  %v1565_v28 = vsel %vm8928_vm5, 0, %v1563_v22 }
 0x18c   :  { %v1561_v33 = vsel %vm1440_vm4, %v1560_v1, %v1559_v11  ;;  %v1692_v50 = vadd.s32 536870912, %v1691_v15  ;;  %v1774_v27 = vshll.u32 %v14724_v25, %v8359_v7  ;;  %v1755_v44 = vand.u32 8388607, %v14530_v57 }
 0x18d   :  { %v9011_v5 = vsel %vm8928_vm5, %v8050_v38, %v1561_v33  ;;  %v9015_v20 = vor.u32 %v1769_v14, %v1768_v0  ;;  %v9017_v29 = vor.u32 %v1772_v18, %v1771_v24  ;;  %vm1783_vm12 = vcmp.lt.s32.totalorder %v8357_v56, 4  ;;  %v725_v33 = vpop.permute.xlu0 %724 }
 0x18e   :  { %v1566_v3 = vmul.f32 %v9011_v5, %v9011_v5  ;;  %v9021_v19 = vshrl.u32 %v1692_v50, 30  ;;  %v1776_v52 = vor.u32 %v1775_v55, %v1774_v27  ;;  %v1582_v8 = vadd.s32 3, %v1565_v28 }
 0x18f   :  { %v1793_v2 = vsel %vm1783_vm12, %v1779_v36, 1326507024  ;;  %vm1780_vm13 = vcmp.lt.s32.totalorder %v8357_v56, 1  ;;  %v1756_v11 = vor.u32 8388608, %v1755_v44  ;;  %v1766_v22 = vshrl.u32 %v14725_v37, %v8407_v48 }
 0x190   :  { %v1567_v58 = vmul.f32 -0.001358992, %v1566_v3  ;;  %v1574_v17 = vmul.f32 -0.00019511016, %v1566_v3  ;;  %v1694_v40 = vshll.u32 %v9021_v19, 30  ;;  %vm1782_vm14 = vcmp.lt.s32.totalorder %v8357_v56, 3 }
 0x191   :  { %v1792_v14 = vsel %vm1780_vm13, %v9015_v20, %v9017_v29  ;;  %v1794_v54 = vsel %vm1782_vm14, %v1776_v52, %v1793_v2  ;;  %v9044_v1 = vsel %vm564_vm11, %v8133_v35, 0.0  ;;  %v9046_v55 = vand.u32 3, %v1582_v8 }
 0x192   :  { %v1568_v45 = vadd.f32 0.041655596, %v1567_v58  ;;  %v1575_v18 = vadd.f32 0.008332121, %v1574_v17  ;;  %v9037_v39 = vsub.s32 %v1691_v15, %v1694_v40  ;;  %v1765_v0 = vshll.u32 %v14744_v49, %v8359_v7 }
 0x193   :  { %vm1781_vm15 = vcmp.lt.s32.totalorder %v8357_v56, 2  ;;  %v9054_v28 = vsub.s32 32, %v8991_v47  ;;  %v9058_v53 = vshll.u32 %v14724_v25, %v8991_v47  ;;  %v9064_v7 = vshll.u32 %v1756_v11, 8 }
 0x194   :  { %v1569_v24 = vmul.f32 %v1568_v45, %v1566_v3  ;;  %v1576_v36 = vmul.f32 %v1575_v18, %v1566_v3  ;;  %vm1696_vm0 = vcmp.lt.s32.totalorder %v9037_v39, 0  ;;  %v1697_v15 = vsub.s32 0, %v9037_v39 }
 0x195   :  { %14761 = vst [vmem:[#allocation140_spill] sm:$0xff] %v9054_v28  ;;  %v9062_v50 = vsel %vm1781_vm15, %v1792_v14, %v1794_v54  ;;  %v9067_v2 = vor.u32 %v1766_v22, %v1765_v0  ;;  %vm1585_vm1 = vcmp.eq.s32.totalorder %v9046_v55, 0  ;;  %vm1588_vm3 = vcmp.eq.s32.totalorder %v9046_v55, 2 }
 0x196   :  { %v1570_v27 = vadd.f32 -0.4999988, %v1569_v24  ;;  %v1577_v44 = vadd.f32 -0.16666654, %v1576_v36  ;;  %v1698_v8 = vsel %vm1696_vm0, %v1697_v15, %v9037_v39  ;;  %vm817_vm4 = vcmp.eq.s32.totalorder %v725_v33, 1  ;;  %v982_v24 = vpop.permute.xlu1 %981 }
 0x197   :  { %vm1595_vm5 = vcmp.lt.s32.totalorder %v8046_v9, 0  ;;  %v1699_v58 = vclz %v1698_v8  ;;  %vm1584_vm6 = vcmp.lt.s32.totalorder %v9046_v55, 2  ;;  %v1789_v11 = vsel %vm1783_vm12, %v1776_v52, 920167782 }
 0x198   :  { %v1571_v17 = vmul.f32 %v1570_v27, %v1566_v3  ;;  %v1578_v40 = vmul.f32 %v1577_v44, %v1566_v3  ;;  %v1800_v14 = vshrl.u32 %v9062_v50, 16  ;;  %vm1581_vm7 = vweird.f32 %v8050_v38 }
 0x199   :  { %v1687_v22 = vadd.s32 %v8950_v12, %v8924_v43  ;;  %v7145_v45 = vadd.s32 4294967294, %v1699_v58  ;;  %v1764_v18 = vshrl.u32 %v14744_v49, %v8407_v48  ;;  %v9082_v54 = vand.u32 65535, %v9064_v7 }
 0x19a   :  { %v1572_v3 = vadd.f32 1.0, %v1571_v17  ;;  %v1579_v0 = vadd.f32 1.0, %v1578_v40  ;;  %v850_v52 = vsel %vm817_vm4, %v8876_v23, 0.0  ;;  %v1788_v36 = vsel %vm1780_vm13, %v9067_v2, %v9015_v20 }
 0x19b   :  { %vm7146_vm9 = vcmp.lt.s32.totalorder %v7145_v45, 0  ;;  %v1717_v43 = vsub.s32 4, %v9021_v19  ;;  %v1790_v48 = vsel %vm1782_vm14, %v9017_v29, %v1789_v11  ;;  %v9095_v12 = vmul.u32 %v1800_v14, %v9082_v54 }
 0x19c   :  { %v1580_v15 = vmul.f32 %v1579_v0, %v9011_v5  ;;  %v1589_v27 = vxor.u32 2147483648, %v1572_v3  ;;  %v14762_v33 = vand.u32 2147483647, %v8046_v9  ;;  %v1702_v8 = vsel %vm7146_vm9, 0, %v7145_v45 }
 0x19d   :  { %v1799_v58 = vand.u32 65535, %v9062_v50  ;;  %vm4704_vm11 = vcmp.gt.s32.totalorder %v8975_v6, 0  ;;  %vm1074_vm0 = vcmp.eq.s32.totalorder %v982_v24, 1  ;;  %v882_v17 = vadd.f32 %v850_v52, %v8270_v26 }
 0x19e   :  { %vm9100_vm10 = vcmp.le.f32.partialorder %v14762_v33, 0.7853982  ;;  %v1703_v40 = vsub.s32 32, %v1702_v8  ;;  %v1707_v11 = vsub.s32 4294967266, %v1702_v8  ;;  %v1586_v57 = vxor.u32 2147483648, %v1580_v15 }
 0x19f   :  { %v1785_v5 = vsel %vm1783_vm12, %v9017_v29, 2102212464  ;;  %v9112_v0 = vsel %vm1781_vm15, %v1788_v36, %v1790_v48  ;;  %v9115_v45 = vshrl.u32 %v9064_v7, 16  ;;  %v1704_v50 = vshll.u32 %v9037_v39, %v1702_v8 }
 0x1a0   :  { %v1705_v33 = vshrl.u32 %v1687_v22, %v1703_v40  ;;  %v1708_v59 = vadd.s32 127, %v1707_v11  ;;  %v1805_v26 = vshll.u32 %v9095_v12, 16  ;;  %v1587_v52 = vsel %vm1585_vm1, %v1572_v3, %v1586_v57  ;;  %v9137_v3 = vld [vmem:[%s14370_s0 + $0x88] sm:$0xff] }
 0x1a1   :  { %v1590_v10 = vsel %vm1588_vm3, %v1589_v27, %v1580_v15  ;;  %v1718_v29 = vsel %vm1595_vm5, %v1717_v43, %v9021_v19  ;;  %v1801_v36 = vmul.u32 %v1799_v58, %v9082_v54  ;;  %v9130_v8 = vmul.u32 %v1799_v58, %v9115_v45 }
 0x1a2   :  { %v1591_v48 = vsel %vm1584_vm6, %v1587_v52, %v1590_v10  ;;  %v1706_v39 = vor.u32 %v1705_v33, %v1704_v50  ;;  %v1709_v22 = vshll.u32 %v1708_v59, 23  ;;  %vm673_vm12 = vcmp.eq.s32.totalorder %v9137_v3, 2 }
 0x1a3   :  { %v1592_v57 = vsel %vm1581_vm7, nan, %v1591_v48  ;;  %vm416_vm1 = vcmp.eq.s32.totalorder %v9137_v3, 1  ;;  %vm929_vm3 = vcmp.eq.s32.totalorder %v8938_v30, 3  ;;  %v705_v10 = vsel %vm673_vm12, 1, %v14643_v51 }
 0x1a4   :  { %6434 = vmatmul.f32.vlgmr.msra.gmra.mxu0 %v1592_v57  ;;  %v1710_v19 = vor.u32 4788187, %v1709_v22  ;;  %v448_v59 = vsel %vm416_vm1, 1, %v14643_v51  ;;  %vm1809_vm4 = vc.u32 %v1801_v36, %v1805_v26  ;;  %v1107_v38 = vsel %vm1074_vm0, %v8889_v4, 0.0  ;;  %772 = vperm.xlu2 %7253, %v705_v10  }
 0x1a5   :  { %515 = vperm.xlu1 %7252, %v448_v59   ;;  %v961_v55 = vsel %vm929_vm3, 1, %v14643_v51  ;;  %v1784_v43 = vsel %vm1780_vm13, %v1764_v18, %v9067_v2  ;;  %v1786_v30 = vsel %vm1782_vm14, %v9015_v20, %v1785_v5  ;;  %v1713_v27 = vcvt.s32.f32 %v1706_v39 }
 0x1a6   :  { %v1711_v15 = vand.u32 2147483647, %v1710_v19  ;;  %v1720_v58 = vsel %vm9100_vm10, 0, %v1718_v29  ;;  %1026 = vperm.xlu0 %7251, %v961_v55   ;;  %v1804_v24 = vmul.u32 %v1800_v14, %v9115_v45  ;;  %v1139_v40 = vadd.f32 %v1107_v38, %v882_v17 }
 0x1a7   :  { %v1807_v11 = vshll.u32 %v9130_v8, 16  ;;  %v1810_v50 = vsel %vm1809_vm4, 1, %v14643_v51  ;;  %v1821_v33 = vand.u32 65535, %v9112_v0  ;;  %v1811_v18 = vadd.s32 %v1805_v26, %v1801_v36 }
 0x1a8   :  { %v1714_v2 = vmul.f32 %v1713_v27, %v1711_v15  ;;  %v1812_v52 = vadd.s32 %v1810_v50, %v1804_v24  ;;  %v1822_v20 = vshrl.u32 %v9112_v0, 16  ;;  %v9162_v5 = vshll.u32 %v14726_v41, %v8991_v47 }
 0x1a9   :  { %v9167_v14 = vsel %vm4704_vm11, %v8975_v6, 0  ;;  %v1737_v17 = vadd.s32 3, %v1720_v58  ;;  %v1175_v29 = vadd.f32 %v8948_v63, %v1139_v40  ;;  %v14765_v48 = vand.u32 2139095040, %v8909_v16 }
 0x1aa   :  { %v1715_v26 = vxor.u32 2147483648, %v1714_v2  ;;  %vm1813_vm13 = vc.u32 %v1811_v18, %v1807_v11  ;;  %v1824_v0 = vmul.u32 %v1822_v20, %v9082_v54  ;;  %v14766_v36 = vand.u32 2139095040, %v8966_v31 }
 0x1ab   :  { %v9172_v39 = vshrl.u32 %v14765_v48, 23  ;;  %6695 = vmatmul.f32.gmra.mxu2 %v1175_v29  ;;  %7055 = vst [vmem:[#allocation10 + $0x8] sm:$0xff] %v1175_v29  ;;  %v9181_v6 = vsel %vm1781_vm15, %v1784_v43, %v1786_v30  ;;  %v1814_v57 = vsel %vm1813_vm13, 1, %v14643_v51  ;;  %v1825_v19 = vmul.u32 %v1821_v33, %v9115_v45  ;;  %v14767_v43 = vld [vmem:[#allocation37_spill] sm:$0xff]  ;;  %v14768_v29 = vld [vmem:[#allocation64_spill] sm:$0xff] }
 0x1ac   :  { %v9177_v22 = vshrl.u32 %v14766_v36, 23  ;;  %v1716_v10 = vsel %vm1595_vm5, %v1715_v26, %v1714_v2  ;;  %v1816_v59 = vadd.s32 %v1814_v57, %v1812_v52  ;;  %v1823_v38 = vmul.u32 %v1821_v33, %v9082_v54  ;;  %v14769_v26 = vld [vmem:[#allocation58_spill] sm:$0xff] }
 0x1ad   :  { %v1827_v55 = vshll.u32 %v1824_v0, 16  ;;  %v9191_v15 = vsel %vm9100_vm10, %v8046_v9, %v1716_v10  ;;  %v9193_v27 = vand.u32 3, %v1737_v17  ;;  %v1806_v56 = vshrl.u32 %v9095_v12, 16 }
 0x1ae   :  { %v14531_v30 = vand.u32 2147483647, %v14767_v43  ;;  %v1721_v58 = vmul.f32 %v9191_v15, %v9191_v15  ;;  %v1826_v24 = vmul.u32 %v1822_v20, %v9115_v45  ;;  %v1808_v54 = vshrl.u32 %v9130_v8, 16 }
 0x1af   :  { %vm1831_vm14 = vc.u32 %v1823_v38, %v1827_v55  ;;  %v1833_v40 = vadd.s32 %v1827_v55, %v1823_v38  ;;  %v1817_v11 = vadd.s32 %v1816_v59, %v1806_v56  ;;  %v1829_v50 = vshll.u32 %v1825_v19, 16 }
 0x1b0   :  { %v1832_v44 = vsel %vm1831_vm14, 1, %v14643_v51  ;;  %v1722_v33 = vmul.f32 -0.001358992, %v1721_v58  ;;  %v1729_v2 = vmul.f32 -0.00019511016, %v1721_v58  ;;  %v1830_v18 = vshrl.u32 %v1825_v19, 16 }
 0x1b1   :  { %v1834_v52 = vadd.s32 %v1832_v44, %v1826_v24  ;;  %v1828_v12 = vshrl.u32 %v1824_v0, 16  ;;  %vm1835_vm15 = vc.u32 %v1833_v40, %v1829_v50  ;;  %v1910_v17 = vand.u32 8388607, %v14531_v30  ;;  %v985_v30 = vpop.permute.xlu1 %984 }
 0x1b2   :  { %v1921_v45 = vshrl.u32 %v14725_v37, %v14768_v29  ;;  %v1723_v20 = vadd.f32 0.041655596, %v1722_v33  ;;  %v1730_v48 = vadd.f32 0.008332121, %v1729_v2  ;;  %v1836_v8 = vsel %vm1835_vm15, 1, %v14643_v51 }
 0x1b3   :  { %v1920_v36 = vshll.u32 %v14744_v49, %v14769_v26  ;;  %v9209_v57 = vadd.s32 %v1817_v11, %v1808_v54  ;;  %v9211_v10 = vadd.s32 %v1833_v40, %v1829_v50  ;;  %v1838_v19 = vadd.s32 %v1836_v8, %v1834_v52 }
 0x1b4   :  { %v1923_v0 = vshll.u32 %v14725_v37, %v14769_v26  ;;  %v1724_v59 = vmul.f32 %v1723_v20, %v1721_v58  ;;  %v1731_v38 = vmul.f32 %v1730_v48, %v1721_v58  ;;  %v1924_v56 = vshrl.u32 %v14728_v34, %v14768_v29 }
 0x1b5   :  { %v9215_v55 = vor.u32 %v1921_v45, %v1920_v36  ;;  %v1839_v24 = vadd.s32 %v1838_v19, %v1828_v12  ;;  %v1927_v44 = vshrl.u32 %v14724_v25, %v14768_v29  ;;  %v1929_v54 = vshll.u32 %v14724_v25, %v14769_v26 }
 0x1b6   :  { %v1930_v40 = vshrl.u32 %v14726_v41, %v14768_v29  ;;  %v1725_v11 = vadd.f32 -0.4999988, %v1724_v59  ;;  %v1732_v50 = vadd.f32 -0.16666654, %v1731_v38  ;;  %v9225_v33 = vor.u32 %v1924_v56, %v1923_v0 }
 0x1b7   :  { %v1926_v2 = vshll.u32 %v14728_v34, %v14769_v26  ;;  %v1840_v52 = vadd.s32 %v1839_v24, %v1830_v18  ;;  %v1932_v12 = vshll.u32 %v14726_v41, %v14769_v26  ;;  %v1933_v20 = vshrl.u32 %v14731_v46, %v14768_v29 }
 0x1b8   :  { %v1931_v45 = vor.u32 %v1930_v40, %v1929_v54  ;;  %v1726_v48 = vmul.f32 %v1725_v11, %v1721_v58  ;;  %v1733_v8 = vmul.f32 %v1732_v50, %v1721_v58  ;;  %vm1739_vm5 = vcmp.lt.s32.totalorder %v9193_v27, 2  ;;  %v14770_v58 = vld [vmem:[#allocation63_spill] sm:$0xff] }
 0x1b9   :  { %v1841_v36 = vmul.u32 %v9064_v7, %v9181_v6  ;;  %vm1843_vm6 = vc.u32 %v9209_v57, %v9211_v10  ;;  %vm4549_vm7 = vcmp.gt.s32.totalorder %v8996_v60, 0  ;;  %vm1736_vm9 = vweird.f32 %v8046_v9 }
 0x1ba   :  { %v1844_v18 = vadd.s32 1, %v1840_v52  ;;  %v1911_v19 = vor.u32 8388608, %v1910_v17  ;;  %v9240_v26 = vor.u32 %v1927_v44, %v1926_v2  ;;  %v1934_v0 = vor.u32 %v1933_v20, %v1932_v12 }
 0x1bb   :  { %v1727_v59 = vadd.f32 1.0, %v1726_v48  ;;  %v1734_v38 = vadd.f32 1.0, %v1733_v8  ;;  %vm1935_vm10 = vcmp.lt.s32.totalorder %v14770_v58, 1  ;;  %vm1938_vm11 = vcmp.lt.s32.totalorder %v14770_v58, 4 }
 0x1bc   :  { %v1845_v56 = vsel %vm1843_vm6, %v1844_v18, %v1840_v52  ;;  %vm1936_vm0 = vcmp.lt.s32.totalorder %v14770_v58, 2  ;;  %v1943_v7 = vsel %vm1935_vm10, %v9215_v55, %v9225_v33  ;;  %v1944_v6 = vsel %vm1938_vm11, %v1931_v45, 920167782 }
 0x1bd   :  { %v1735_v17 = vmul.f32 %v1734_v38, %v9191_v15  ;;  %v1744_v24 = vxor.u32 2147483648, %v1727_v59  ;;  %v1846_v44 = vadd.s32 %v1845_v56, %v1841_v36  ;;  %vm1937_vm12 = vcmp.lt.s32.totalorder %v14770_v58, 3 }
 0x1be   :  { %v1945_v54 = vsel %vm1937_vm12, %v9240_v26, %v1944_v6  ;;  %v1947_v40 = vsel %vm1935_vm10, %v9225_v33, %v9240_v26  ;;  %v1948_v11 = vsel %vm1938_vm11, %v1934_v0, 1326507024  ;;  %v9262_v50 = vshll.u32 %v1911_v19, 8 }
 0x1bf   :  { %v1741_v2 = vxor.u32 2147483648, %v1735_v17  ;;  %vm1743_vm1 = vcmp.eq.s32.totalorder %v9193_v27, 2  ;;  %v1847_v15 = vadd.s32 536870912, %v1846_v44  ;;  %v1946_v52 = vsel %vm1936_vm0, %v1943_v7, %v1945_v54 }
 0x1c0   :  { %vm1740_vm3 = vcmp.eq.s32.totalorder %v9193_v27, 0  ;;  %v1745_v12 = vsel %vm1743_vm1, %v1744_v24, %v1735_v17  ;;  %v1949_v20 = vsel %vm1937_vm12, %v1931_v45, %v1948_v11  ;;  %v1952_v48 = vand.u32 65535, %v9262_v50 }
 0x1c1   :  { %v1742_v8 = vsel %vm1740_vm3, %v1727_v59, %v1741_v2  ;;  %v9271_v36 = vshrl.u32 %v1847_v15, 30  ;;  %v1950_v18 = vsel %vm1936_vm0, %v1947_v40, %v1949_v20  ;;  %v1977_v19 = vshrl.u32 %v1946_v52, 16  ;;  %v728_v59 = vpop.permute.xlu0 %727 }
 0x1c2   :  { %v1746_v0 = vsel %vm1739_vm5, %v1742_v8, %v1745_v12  ;;  %v1953_v38 = vshrl.u32 %v9262_v50, 16  ;;  %v1954_v56 = vand.u32 65535, %v1950_v18  ;;  %v1955_v7 = vshrl.u32 %v1950_v18, 16 }
 0x1c3   :  { %v9280_v6 = vshrl.u32 %v14726_v41, %v9054_v28  ;;  %v1747_v45 = vsel %vm1736_vm9, nan, %v1746_v0  ;;  %v1849_v17 = vshll.u32 %v9271_v36, 30  ;;  %v1976_v24 = vand.u32 65535, %v1946_v52 }
 0x1c4   :  { %v9287_v54 = vshrl.u32 %v14731_v46, %v9054_v28  ;;  %6437 = vmatmul.f32.gmra.mxu0 %v1747_v45  ;;  %v1957_v27 = vmul.u32 %v1955_v7, %v1952_v48  ;;  %v9289_v40 = vmul.u32 %v1954_v56, %v1953_v38  ;;  %v9291_v11 = vmul.u32 %v1977_v19, %v1952_v48 }
 0x1c5   :  { %v9294_v2 = vshrl.u32 %v9167_v14, 5  ;;  %v9297_v9 = vand.u32 31, %v9167_v14  ;;  %v9302_v15 = vsel %vm4549_vm7, %v8996_v60, 0  ;;  %v1850_v52 = vsub.s32 %v1846_v44, %v1849_v17 }
 0x1c6   :  { %v9305_v12 = vadd.s32 4294967169, %v9172_v39  ;;  %vm818_vm4 = vcmp.eq.s32.totalorder %v728_v59, 1  ;;  %v1956_v20 = vmul.u32 %v1954_v56, %v1952_v48  ;;  %v1960_v8 = vshll.u32 %v1957_v27, 16  ;;  %v14773_v39 = vld [vmem:[#allocation15_spill] sm:$0xff] }
 0x1c7   :  { %14771 = vst [vmem:[#allocation37_spill] sm:$0xff] %v9294_v2  ;;  %vm1851_vm13 = vcmp.lt.s32.totalorder %v1850_v52, 0  ;;  %v1852_v18 = vsub.s32 0, %v1850_v52  ;;  %v1959_v0 = vmul.u32 %v1955_v7, %v1953_v38  ;;  %v9307_v45 = vmul.u32 %v1976_v24, %v1953_v38 }
 0x1c8   :  { %14772 = vst [vmem:[#allocation64_spill] sm:$0xff] %v9297_v9  ;;  %v1962_v14 = vshll.u32 %v9289_v40, 16  ;;  %vm1964_vm14 = vc.u32 %v1956_v20, %v1960_v8  ;;  %v1966_v16 = vadd.s32 %v1960_v8, %v1956_v20  ;;  %v1982_v60 = vshll.u32 %v9291_v11, 16 }
 0x1c9   :  { %v9312_v44 = vadd.s32 4294967169, %v9177_v22  ;;  %v9316_v17 = vadd.f32 %v9044_v1, %v14773_v39  ;;  %v1853_v56 = vsel %vm1851_vm13, %v1852_v18, %v1850_v52  ;;  %v1965_v47 = vsel %vm1964_vm14, 1, %v14643_v51  ;;  %v14777_v39 = vld [vmem:[#allocation100_spill] sm:$0xff] }
 0x1ca   :  { %v1854_v7 = vclz %v1853_v56  ;;  %v1967_v28 = vadd.s32 %v1965_v47, %v1959_v0  ;;  %vm1968_vm15 = vc.u32 %v1966_v16, %v1962_v14  ;;  %v1978_v32 = vmul.u32 %v1976_v24, %v1952_v48 }
 0x1cb   :  { %vm1075_vm5 = vcmp.eq.s32.totalorder %v985_v30, 1  ;;  %v851_v20 = vsel %vm818_vm4, %v8876_v23, 0.0  ;;  %v1969_v8 = vsel %vm1968_vm15, 1, %v14643_v51  ;;  %v1981_v61 = vmul.u32 %v1977_v19, %v1953_v38 }
 0x1cc   :  { %v7148_v22 = vadd.s32 4294967294, %v1854_v7  ;;  %v1984_v42 = vshll.u32 %v9307_v45, 16  ;;  %vm1986_vm6 = vc.u32 %v1978_v32, %v1982_v60  ;;  %v1988_v1 = vadd.s32 %v1982_v60, %v1978_v32 }
 0x1cd   :  { %v1842_v18 = vadd.s32 %v9211_v10, %v9209_v57  ;;  %v1919_v47 = vshrl.u32 %v14744_v49, %v14768_v29  ;;  %v1940_v16 = vsel %vm1938_vm11, %v9240_v26, 2102212464  ;;  %v1987_v48 = vsel %vm1986_vm6, 1, %v14643_v51 }
 0x1ce   :  { %v14774_v59 = vand.u32 2147483647, %v8116_v62  ;;  %vm7149_vm9 = vcmp.lt.s32.totalorder %v7148_v22, 0  ;;  %v1971_v32 = vadd.s32 %v1969_v8, %v1967_v28  ;;  %v1989_v38 = vadd.s32 %v1987_v48, %v1981_v61 }
 0x1cf   :  { %vm1990_vm1 = vc.u32 %v1988_v1, %v1984_v42  ;;  %v1857_v57 = vsel %vm7149_vm9, 0, %v7148_v22  ;;  %v1872_v10 = vsub.s32 4, %v9271_v36  ;;  %v1939_v29 = vsel %vm1935_vm10, %v1919_v47, %v9215_v55 }
 0x1d0   :  { %vm9333_vm7 = vcmp.le.f32.partialorder %v14774_v59, 0.7853982  ;;  %v1991_v26 = vsel %vm1990_vm1, 1, %v14643_v51  ;;  %v1858_v24 = vsub.s32 32, %v1857_v57  ;;  %v1862_v0 = vsub.s32 4294967266, %v1857_v57  ;;  %v14778_v59 = vld [vmem:[#allocation16_spill] sm:$0xff] }
 0x1d1   :  { %v1941_v14 = vsel %vm1937_vm12, %v9225_v33, %v1940_v16  ;;  %v1961_v60 = vshrl.u32 %v1957_v27, 16  ;;  %v883_v28 = vadd.f32 %v851_v20, %v14777_v39  ;;  %vm1750_vm11 = vcmp.lt.s32.totalorder %v8116_v62, 0 }
 0x1d2   :  { %v1983_v61 = vshrl.u32 %v9291_v11, 16  ;;  %v1993_v56 = vadd.s32 %v1991_v26, %v1989_v38  ;;  %v1859_v7 = vshll.u32 %v1850_v52, %v1857_v57  ;;  %v1860_v8 = vshrl.u32 %v1842_v18, %v1858_v24  ;;  %v9360_v18 = vld [vmem:[%s14370_s0 + $0x90] sm:$0xff] }
 0x1d3   :  { %v1863_v22 = vadd.s32 127, %v1862_v0  ;;  %v1972_v55 = vadd.s32 %v1971_v32, %v1961_v60  ;;  %v1108_v47 = vsel %vm1075_vm5, %v8889_v4, 0.0  ;;  %v1873_v48 = vsel %vm1750_vm11, %v1872_v10, %v9271_v36  ;;  %v14780_v60 = vld [vmem:[#allocation46_spill] sm:$0xff] }
 0x1d4   :  { %v1942_v33 = vsel %vm1936_vm0, %v1939_v29, %v1941_v14  ;;  %v1963_v27 = vshrl.u32 %v9289_v40, 16  ;;  %v1861_v20 = vor.u32 %v1860_v8, %v1859_v7  ;;  %v1994_v11 = vadd.s32 %v1993_v56, %v1983_v61 }
 0x1d5   :  { %v1864_v16 = vshll.u32 %v1863_v22, 23  ;;  %v14539_v52 = vand.u32 2147483647, %v14778_v59  ;;  %vm674_vm10 = vcmp.eq.s32.totalorder %v9360_v18, 2  ;;  %vm417_vm12 = vcmp.eq.s32.totalorder %v9360_v18, 1 }
 0x1d6   :  { %vm930_vm3 = vcmp.eq.s32.totalorder %v9137_v3, 3  ;;  %v1140_v30 = vadd.f32 %v1108_v47, %v883_v28  ;;  %v706_v36 = vsel %vm674_vm10, 1, %v14643_v51  ;;  %v449_v40 = vsel %vm417_vm12, 1, %v14643_v51 }
 0x1d7   :  { %v1865_v58 = vor.u32 4788187, %v1864_v16  ;;  %v9367_v32 = vadd.s32 %v1972_v55, %v1963_v27  ;;  %v9371_v38 = vor.u32 %v9280_v6, %v9058_v53  ;;  %v1875_v57 = vsel %vm9333_vm7, 0, %v1873_v48  ;;  %775 = vperm.xlu2 %7253, %v706_v36   ;;  %518 = vperm.xlu1 %7252, %v449_v40   ;;  %v14786_v36 = vld [vmem:[#allocation107_spill] sm:$0xff] }
 0x1d8   :  { %v962_v10 = vsel %vm930_vm3, 1, %v14643_v51  ;;  %v1985_v3 = vshrl.u32 %v9307_v45, 16  ;;  %v1868_v26 = vcvt.s32.f32 %v1861_v20  ;;  %v9377_v24 = vadd.s32 %v1988_v1, %v1984_v42  ;;  %v14781_v1 = vld [vmem:[#allocation43_spill] sm:$0xff] }
 0x1d9   :  { %14779 = vst [vmem:[#allocation58_spill] sm:$0xff] %v9371_v38  ;;  %v1866_v29 = vand.u32 2147483647, %v1865_v58  ;;  %1029 = vperm.xlu0 %7251, %v962_v10   ;;  %v1996_v0 = vmul.u32 %v9262_v50, %v1942_v33  ;;  %v1176_v14 = vadd.f32 %v8948_v63, %v1140_v30  ;;  %v2065_v6 = vand.u32 8388607, %v14539_v52 }
 0x1da   :  { %v1995_v53 = vadd.s32 %v1994_v11, %v1985_v3  ;;  %v2079_v39 = vshrl.u32 %v14728_v34, %v14780_v60  ;;  %vm1998_vm0 = vc.u32 %v9367_v32, %v9377_v24  ;;  %v2076_v45 = vshrl.u32 %v14725_v37, %v14780_v60 }
 0x1db   :  { %v1869_v28 = vmul.f32 %v1868_v26, %v1866_v29  ;;  %v2082_v42 = vshrl.u32 %v14724_v25, %v14780_v60  ;;  %6698 = vmatmul.f32.gmra.mxu2 %v1176_v14  ;;  %7056 = vst [vmem:[#allocation10 + $0x10] sm:$0xff] %v1176_v14  ;;  %v2078_v61 = vshll.u32 %v14725_v37, %v14781_v1  ;;  %v2066_v10 = vor.u32 8388608, %v2065_v6 }
 0x1dc   :  { %v1999_v50 = vadd.s32 1, %v1995_v53  ;;  %v2084_v56 = vshll.u32 %v14724_v25, %v14781_v1  ;;  %v2085_v7 = vshrl.u32 %v14726_v41, %v14780_v60  ;;  %v2081_v22 = vshll.u32 %v14728_v34, %v14781_v1 }
 0x1dd   :  { %v1870_v8 = vxor.u32 2147483648, %v1869_v28  ;;  %v2087_v55 = vshll.u32 %v14726_v41, %v14781_v1  ;;  %v2088_v47 = vshrl.u32 %v14731_v46, %v14780_v60  ;;  %v2075_v33 = vshll.u32 %v14744_v49, %v14781_v1 }
 0x1de   :  { %v2000_v48 = vsel %vm1998_vm0, %v1999_v50, %v1995_v53  ;;  %v9405_v27 = vor.u32 %v2079_v39, %v2078_v61  ;;  %v2086_v20 = vor.u32 %v2085_v7, %v2084_v56  ;;  %v9409_v30 = vor.u32 %v2082_v42, %v2081_v22 }
 0x1df   :  { %v1871_v16 = vsel %vm1750_vm11, %v1870_v8, %v1869_v28  ;;  %v2001_v11 = vadd.s32 %v2000_v48, %v1996_v0  ;;  %v2089_v58 = vor.u32 %v2088_v47, %v2087_v55  ;;  %v9418_v3 = vor.u32 %v2076_v45, %v2075_v33  ;;  %v14782_v0 = vld [vmem:[#allocation45_spill] sm:$0xff]  ;;  %v731_v45 = vpop.permute.xlu0 %730 }
 0x1e0   :  { %v9416_v40 = vsel %vm9333_vm7, %v8116_v62, %v1871_v16  ;;  %v1892_v26 = vadd.s32 3, %v1875_v57  ;;  %vm2093_vm4 = vcmp.lt.s32.totalorder %v14782_v0, 4  ;;  %vm2090_vm13 = vcmp.lt.s32.totalorder %v14782_v0, 1 }
 0x1e1   :  { %v1876_v29 = vmul.f32 %v9416_v40, %v9416_v40  ;;  %v2002_v14 = vadd.s32 536870912, %v2001_v11  ;;  %vm2092_vm14 = vcmp.lt.s32.totalorder %v14782_v0, 3  ;;  %v2099_v53 = vsel %vm2093_vm4, %v2086_v20, 920167782 }
 0x1e2   :  { %v2103_v19 = vsel %vm2093_vm4, %v2089_v58, 1326507024  ;;  %v2102_v57 = vsel %vm2090_vm13, %v9405_v27, %v9409_v30  ;;  %vm2091_vm15 = vcmp.lt.s32.totalorder %v14782_v0, 2  ;;  %v2098_v42 = vsel %vm2090_vm13, %v9418_v3, %v9405_v27 }
 0x1e3   :  { %v1877_v6 = vmul.f32 -0.001358992, %v1876_v29  ;;  %v1884_v39 = vmul.f32 -0.00019511016, %v1876_v29  ;;  %v9429_v28 = vshrl.u32 %v2002_v14, 30  ;;  %v2104_v50 = vsel %vm2092_vm14, %v2086_v20, %v2103_v19 }
 0x1e4   :  { %v9442_v1 = vshll.u32 %v2066_v10, 8  ;;  %v2100_v8 = vsel %vm2092_vm14, %v9409_v30, %v2099_v53  ;;  %v9449_v22 = vsub.s32 32, %v9297_v9  ;;  %v9452_v55 = vshrl.u32 %v9302_v15, 5 }
 0x1e5   :  { %v1878_v61 = vadd.f32 0.041655596, %v1877_v6  ;;  %v1885_v56 = vadd.f32 0.008332121, %v1884_v39  ;;  %v2004_v7 = vshll.u32 %v9429_v28, 30  ;;  %v1893_v47 = vand.u32 3, %v1892_v26 }
 0x1e6   :  { %14783 = vst [vmem:[#allocation63_spill] sm:$0xff] %v9449_v22  ;;  %v2105_v48 = vsel %vm2091_vm15, %v2102_v57, %v2104_v50  ;;  %vm819_vm5 = vcmp.eq.s32.totalorder %v731_v45, 1  ;;  %v9460_v58 = vsel %vm2091_vm15, %v2098_v42, %v2100_v8  ;;  %v2107_v10 = vand.u32 65535, %v9442_v1 }
 0x1e7   :  { %14784 = vst [vmem:[#allocation15_spill] sm:$0xff] %v9452_v55  ;;  %v1879_v33 = vmul.f32 %v1878_v61, %v1876_v29  ;;  %v1886_v20 = vmul.f32 %v1885_v56, %v1876_v29  ;;  %v9456_v16 = vsub.s32 %v2001_v11, %v2004_v7  ;;  %v2109_v14 = vand.u32 65535, %v2105_v48 }
 0x1e8   :  { %v2110_v53 = vshrl.u32 %v2105_v48, 16  ;;  %v9466_v39 = vand.u32 31, %v9302_v15  ;;  %v9469_v11 = vadd.s32 1, %v9305_v12  ;;  %v9472_v57 = vadd.s32 1, %v9312_v44 }
 0x1e9   :  { %v1880_v19 = vadd.f32 -0.4999988, %v1879_v33  ;;  %v1887_v6 = vadd.f32 -0.16666654, %v1886_v20  ;;  %vm2006_vm6 = vcmp.lt.s32.totalorder %v9456_v16, 0  ;;  %v2007_v26 = vsub.s32 0, %v9456_v16  ;;  %v988_v20 = vpop.permute.xlu1 %987 }
 0x1ea   :  { %14785 = vst [vmem:[#allocation100_spill] sm:$0xff] %v9466_v39  ;;  %v9474_v42 = vmul.u32 %v2110_v53, %v2107_v10  ;;  %vm1894_vm7 = vcmp.lt.s32.totalorder %v1893_v47, 2  ;;  %v9478_v7 = vshrl.u32 %v9442_v1, 16  ;;  %vm1891_vm9 = vweird.f32 %v8116_v62 }
 0x1eb   :  { %v1881_v50 = vmul.f32 %v1880_v19, %v1876_v29  ;;  %v1888_v61 = vmul.f32 %v1887_v6, %v1876_v29  ;;  %v2008_v56 = vsel %vm2006_vm6, %v2007_v26, %v9456_v16  ;;  %v852_v15 = vsel %vm819_vm5, %v8876_v23, 0.0 }
 0x1ec   :  { %v2009_v12 = vclz %v2008_v56  ;;  %v2115_v8 = vshll.u32 %v9474_v42, 16  ;;  %v14544_v44 = vshrl.u32 %v9460_v58, 16  ;;  %v2111_v29 = vmul.u32 %v2109_v14, %v2107_v10 }
 0x1ed   :  { %v1882_v48 = vadd.f32 1.0, %v1881_v50  ;;  %v1889_v33 = vadd.f32 1.0, %v1888_v61  ;;  %v9486_v19 = vmul.u32 %v2109_v14, %v9478_v7  ;;  %vm1895_vm1 = vcmp.eq.s32.totalorder %v1893_v47, 0 }
 0x1ee   :  { %vm1898_vm11 = vcmp.eq.s32.totalorder %v1893_v47, 2  ;;  %v1997_v6 = vadd.s32 %v9377_v24, %v9367_v32  ;;  %v7151_v26 = vadd.s32 4294967294, %v2009_v12  ;;  %vm2119_vm10 = vc.u32 %v2111_v29, %v2115_v8 }
 0x1ef   :  { %v1890_v45 = vmul.f32 %v1889_v33, %v9416_v40  ;;  %v1899_v56 = vxor.u32 2147483648, %v1882_v48  ;;  %v2121_v52 = vadd.s32 %v2115_v8, %v2111_v29  ;;  %vm1076_vm12 = vcmp.eq.s32.totalorder %v988_v20, 1 }
 0x1f0   :  { %v884_v50 = vadd.f32 %v852_v15, %v14786_v36  ;;  %vm7152_vm3 = vcmp.lt.s32.totalorder %v7151_v26, 0  ;;  %v9494_v61 = vmul.u32 %v14544_v44, %v2107_v10  ;;  %v2117_v31 = vshll.u32 %v9486_v19, 16 }
 0x1f1   :  { %v1896_v14 = vxor.u32 2147483648, %v1890_v45  ;;  %v2012_v13 = vsel %vm7152_vm3, 0, %v7151_v26  ;;  %v2131_v32 = vand.u32 65535, %v9460_v58  ;;  %v2114_v40 = vmul.u32 %v2110_v53, %v9478_v7 }
 0x1f2   :  { %v2013_v24 = vsub.s32 32, %v2012_v13  ;;  %v2017_v12 = vsub.s32 4294967266, %v2012_v13  ;;  %v2120_v8 = vsel %vm2119_vm10, 1, %v14643_v51  ;;  %v1900_v36 = vsel %vm1898_vm11, %v1899_v56, %v1890_v45  ;;  %v1355_v45 = vpop.permute.xlu2 %1354  ;;  %v7271_v56 = vld [vmem:[%s14372_s2] ss:$0 sm:$0xff] }
 0x1f3   :  { %v1897_v33 = vsel %vm1895_vm1, %v1882_v48, %v1896_v14  ;;  %v2014_v15 = vshll.u32 %v9456_v16, %v2012_v13  ;;  %vm2123_vm0 = vc.u32 %v2121_v52, %v2117_v31  ;;  %v2137_v2 = vshll.u32 %v9494_v61, 16  ;;  %v9517_v16 = vld [vmem:[%s14370_s0 + $0x98] sm:$0xff] }
 0x1f4   :  { %v1901_v29 = vsel %vm1894_vm7, %v1897_v33, %v1900_v36  ;;  %v2015_v26 = vshrl.u32 %v1997_v6, %v2013_v24  ;;  %v2018_v44 = vadd.s32 127, %v2017_v12  ;;  %vm14574_vm5 = vcmp.lt.s32.totalorder %v8972_v21, 4 }
 0x1f5   :  { %v1902_v53 = vsel %vm1891_vm9, nan, %v1901_v29  ;;  %v1109_v22 = vsel %vm1076_vm12, %v8889_v4, 0.0  ;;  %v2122_v48 = vadd.s32 %v2120_v8, %v2114_v40  ;;  %v2133_v14 = vmul.u32 %v2131_v32, %v2107_v10 }
 0x1f6   :  { %6440 = vmatmul.f32.gmra.mxu0 %v1902_v53  ;;  %v2016_v13 = vor.u32 %v2015_v26, %v2014_v15  ;;  %v2019_v31 = vshll.u32 %v2018_v44, 23  ;;  %v2124_v52 = vsel %vm2123_vm0, 1, %v14643_v51  ;;  %v9512_v47 = vmul.u32 %v2131_v32, %v9478_v7 }
 0x1f7   :  { %vm675_vm6 = vcmp.eq.s32.totalorder %v9517_v16, 2  ;;  %vm418_vm7 = vcmp.eq.s32.totalorder %v9517_v16, 1  ;;  %vm931_vm9 = vcmp.eq.s32.totalorder %v9360_v18, 3  ;;  %v1141_v62 = vadd.f32 %v1109_v22, %v884_v50 }
 0x1f8   :  { %v2020_v10 = vor.u32 4788187, %v2019_v31  ;;  %v707_v44 = vsel %vm675_vm6, 1, %v14643_v51  ;;  %v450_v20 = vsel %vm418_vm7, 1, %v14643_v51  ;;  %vm9524_vm1 = vc.u32 %v2133_v14, %v2137_v2  ;;  %v734_v31 = vpop.permute.xlu0 %733 }
 0x1f9   :  { %v9531_v32 = vmul.f32 %v7271_v56, %v1355_v45  ;;  %v2027_v24 = vsub.s32 4, %v9429_v28  ;;  %778 = vperm.xlu2 %7253, %v707_v44   ;;  %521 = vperm.xlu1 %7252, %v450_v20   ;;  %v963_v18 = vsel %vm931_vm9, 1, %v14643_v51  ;;  %v2126_v22 = vadd.s32 %v2124_v52, %v2122_v48 }
 0x1fa   :  { %vm1905_vm11 = vcmp.lt.s32.totalorder %v14767_v43, 0  ;;  %v2021_v50 = vand.u32 2147483647, %v2020_v10  ;;  %v2023_v12 = vcvt.s32.f32 %v2016_v13  ;;  %1032 = vperm.xlu0 %7251, %v963_v18   ;;  %v14789_v40 = vshrl.u32 %v9460_v58, 16  ;;  %v991_v18 = vpop.permute.xlu1 %990 }
 0x1fb   :  { %v1177_v33 = vadd.f32 %v8948_v63, %v1141_v62  ;;  %v2095_v36 = vsel %vm2093_vm4, %v9409_v30, 2102212464  ;;  %v2116_v15 = vshrl.u32 %v9474_v42, 16  ;;  %v2142_v29 = vsel %vm9524_vm1, 1, %v14643_v51  ;;  %v14790_v42 = vld [vmem:[#allocation49_spill] sm:$0xff] }
 0x1fc   :  { %v2136_v8 = vmul.u32 %v14789_v40, %v9478_v7  ;;  %v2024_v26 = vmul.f32 %v2023_v12, %v2021_v50  ;;  %v2139_v53 = vshll.u32 %v9512_v47, 16  ;;  %v2143_v48 = vadd.s32 %v2137_v2, %v2133_v14 }
 0x1fd   :  { %v2028_v58 = vsel %vm1905_vm11, %v2027_v24, %v9429_v28  ;;  %6701 = vmatmul.f32.gmra.mxu2 %v1177_v33  ;;  %7057 = vst [vmem:[#allocation10 + $0x18] sm:$0xff] %v1177_v33  ;;  %v2074_v63 = vshrl.u32 %v14744_v49, %v14780_v60  ;;  %v2127_v30 = vadd.s32 %v2126_v22, %v2116_v15  ;;  %v14548_v7 = vand.u32 2147483647, %v14790_v42  ;;  %v14795_v22 = vld [vmem:[#allocation20_spill] sm:$0xff] }
 0x1fe   :  { %v2144_v45 = vadd.s32 %v2142_v29, %v2136_v8  ;;  %v9557_v13 = vsel %vm14574_vm5, %v9371_v38, 920167782  ;;  %v14792_v2 = vand.u32 2147483647, %v14767_v43  ;;  %v2025_v28 = vxor.u32 2147483648, %v2024_v26 }
 0x1ff   :  { %14791 = vst [vmem:[#allocation16_spill] sm:$0xff] %v9557_v13  ;;  %vm2145_vm10 = vc.u32 %v2143_v48, %v2139_v53  ;;  %v2094_v60 = vsel %vm2090_vm13, %v2074_v63, %v9418_v3  ;;  %v2096_v52 = vsel %vm2092_vm14, %v9405_v27, %v2095_v36  ;;  %v2118_v62 = vshrl.u32 %v9486_v19, 16 }
 0x200   :  { %vm9561_vm4 = vcmp.le.f32.partialorder %v14792_v2, 0.7853982  ;;  %v2146_v10 = vsel %vm2145_vm10, 1, %v14643_v51  ;;  %v2026_v44 = vsel %vm1905_vm11, %v2025_v28, %v2024_v26  ;;  %v2138_v6 = vshrl.u32 %v9494_v61, 16 }
 0x201   :  { %v2030_v20 = vsel %vm9561_vm4, 0, %v2028_v58  ;;  %v2148_v24 = vadd.s32 %v2146_v10, %v2144_v45  ;;  %v9581_v3 = vsel %vm9561_vm4, %v14767_v43, %v2026_v44  ;;  %v2128_v27 = vadd.s32 %v2127_v30, %v2118_v62  ;;  %v14800_v10 = vld [vmem:[#allocation83_spill] sm:$0xff] }
 0x202   :  { %v2220_v19 = vand.u32 8388607, %v14548_v7  ;;  %v14547_v50 = vand.u32 2147483647, %v14795_v22  ;;  %v2031_v12 = vmul.f32 %v9581_v3, %v9581_v3  ;;  %vm820_vm13 = vcmp.eq.s32.totalorder %v734_v31, 1  ;;  %v14799_v31 = vld [vmem:[#allocation53_spill] sm:$0xff] }
 0x203   :  { %v2140_v40 = vshrl.u32 %v9512_v47, 16  ;;  %v2149_v61 = vadd.s32 %v2148_v24, %v2138_v6  ;;  %v14796_v8 = vor.u32 %v9287_v54, %v9162_v5  ;;  %v2047_v36 = vadd.s32 3, %v2030_v20  ;;  %v14798_v54 = vld [vmem:[#allocation130_spill] sm:$0xff] }
 0x204   :  { %v2097_v15 = vsel %vm2091_vm15, %v2094_v60, %v2096_v52  ;;  %v2147_v29 = vadd.s32 %v2143_v48, %v2139_v53  ;;  %v2032_v26 = vmul.f32 -0.001358992, %v2031_v12  ;;  %v2039_v45 = vmul.f32 -0.00019511016, %v2031_v12 }
 0x205   :  { %v9594_v33 = vsel %vm14574_vm5, %v14796_v8, 1326507024  ;;  %vm1077_vm14 = vcmp.eq.s32.totalorder %v991_v18, 1  ;;  %v2150_v58 = vadd.s32 %v2149_v61, %v2140_v40  ;;  %v853_v63 = vsel %vm820_vm13, %v8876_v23, 0.0  ;;  %v14801_v18 = vld [vmem:[#allocation47_spill] sm:$0xff] }
 0x206   :  { %14797 = vst [vmem:[#allocation46_spill] sm:$0xff] %v9594_v33  ;;  %vm2153_vm12 = vc.u32 %v2128_v27, %v2147_v29  ;;  %v2221_v47 = vor.u32 8388608, %v2220_v19  ;;  %v9601_v5 = vand.u32 8388607, %v14547_v50  ;;  %v9604_v30 = vmul.f32 %v7271_v56, %v14798_v54 }
 0x207   :  { %v2033_v2 = vadd.f32 0.041655596, %v2032_v26  ;;  %v2040_v14 = vadd.f32 0.008332121, %v2039_v45  ;;  %v2154_v0 = vadd.s32 1, %v2150_v58  ;;  %v9606_v28 = vand.u32 3, %v2047_v36 }
 0x208   :  { %v9609_v53 = vsel %vm1077_vm14, %v8889_v4, 0.0  ;;  %v2151_v48 = vmul.u32 %v9442_v1, %v2097_v15  ;;  %v2386_v60 = vshrl.u32 %v14725_v37, %v14799_v31  ;;  %v9615_v44 = vadd.f32 %v853_v63, %v14800_v10  ;;  %v14804_v1 = vld [vmem:[#allocation72_spill] sm:$0xff] }
 0x209   :  { %v2034_v52 = vmul.f32 %v2033_v2, %v2031_v12  ;;  %v2041_v62 = vmul.f32 %v2040_v14, %v2031_v12  ;;  %v2155_v56 = vsel %vm2153_vm12, %v2154_v0, %v2150_v58  ;;  %v9617_v20 = vadd.s32 %v2147_v29, %v2128_v27  ;;  %v14802_v27 = vld [vmem:[#allocation74_spill] sm:$0xff] }
 0x20a   :  { %v2156_v6 = vadd.s32 %v2155_v56, %v2151_v48  ;;  %v9619_v24 = vshll.u32 %v2221_v47, 8  ;;  %v2385_v19 = vshll.u32 %v14744_v49, %v14801_v18  ;;  %v2388_v8 = vshll.u32 %v14725_v37, %v14801_v18  ;;  %v14803_v2 = vld [vmem:[#allocation70_spill] sm:$0xff] }
 0x20b   :  { %v2035_v40 = vadd.f32 -0.4999988, %v2034_v52  ;;  %v2042_v61 = vadd.f32 -0.16666654, %v2041_v62  ;;  %vm2050_vm15 = vcmp.eq.s32.totalorder %v9606_v28, 0  ;;  %vm2053_vm3 = vcmp.eq.s32.totalorder %v9606_v28, 2 }
 0x20c   :  { %v2157_v36 = vadd.s32 536870912, %v2156_v6  ;;  %v2231_v15 = vshrl.u32 %v14725_v37, %v14802_v27  ;;  %v9630_v29 = vor.u32 %v2386_v60, %v2385_v19  ;;  %v2389_v26 = vshrl.u32 %v14728_v34, %v14799_v31 }
 0x20d   :  { %v2036_v45 = vmul.f32 %v2035_v40, %v2031_v12  ;;  %v2043_v58 = vmul.f32 %v2042_v61, %v2031_v12  ;;  %vm2049_vm0 = vcmp.lt.s32.totalorder %v9606_v28, 2  ;;  %v2234_v63 = vshrl.u32 %v14728_v34, %v14802_v27 }
 0x20e   :  { %v2240_v47 = vshrl.u32 %v14726_v41, %v14802_v27  ;;  %vm2046_vm6 = vweird.f32 %v14767_v43  ;;  %v2158_v54 = vshrl.u32 %v2157_v36, 30  ;;  %v2230_v14 = vshll.u32 %v14744_v49, %v14803_v2 }
 0x20f   :  { %v2233_v0 = vshll.u32 %v14725_v37, %v14803_v2  ;;  %v2237_v12 = vshrl.u32 %v14724_v25, %v14802_v27  ;;  %v2037_v48 = vadd.f32 1.0, %v2036_v45  ;;  %v2044_v60 = vadd.f32 1.0, %v2043_v58 }
 0x210   :  { %v2239_v52 = vshll.u32 %v14724_v25, %v14803_v2  ;;  %v2243_v62 = vshrl.u32 %v14731_v46, %v14802_v27  ;;  %v2159_v10 = vshll.u32 %v2158_v54, 30  ;;  %v2232_v56 = vor.u32 %v2231_v15, %v2230_v14 }
 0x211   :  { %v2236_v19 = vshll.u32 %v14728_v34, %v14803_v2  ;;  %v2242_v40 = vshll.u32 %v14726_v41, %v14803_v2  ;;  %v2045_v61 = vmul.f32 %v2044_v60, %v9581_v3  ;;  %v2054_v36 = vxor.u32 2147483648, %v2037_v48 }
 0x212   :  { %vm2060_vm7 = vcmp.lt.s32.totalorder %v14778_v59, 0  ;;  %v2235_v45 = vor.u32 %v2234_v63, %v2233_v0  ;;  %v2241_v58 = vor.u32 %v2240_v47, %v2239_v52  ;;  %v9656_v50 = vsub.s32 %v2156_v6, %v2159_v10 }
 0x213   :  { %v2238_v7 = vor.u32 %v2237_v12, %v2236_v19  ;;  %vm2245_vm9 = vcmp.lt.s32.totalorder %v14804_v1, 1  ;;  %v9660_v15 = vand.u32 65535, %v9619_v24  ;;  %v2051_v14 = vxor.u32 2147483648, %v2045_v61 }
 0x214   :  { %v2182_v13 = vsub.s32 4, %v2158_v54  ;;  %v2244_v38 = vor.u32 %v2243_v62, %v2242_v40  ;;  %vm2246_vm1 = vcmp.lt.s32.totalorder %v14804_v1, 2  ;;  %v14805_v3 = vand.u32 2147483647, %v14778_v59 }
 0x215   :  { %vm2161_vm4 = vcmp.lt.s32.totalorder %v9656_v50, 0  ;;  %v2162_v6 = vsub.s32 0, %v9656_v50  ;;  %vm2247_vm10 = vcmp.lt.s32.totalorder %v14804_v1, 3  ;;  %vm2248_vm13 = vcmp.lt.s32.totalorder %v14804_v1, 4 }
 0x216   :  { %vm9665_vm11 = vcmp.le.f32.partialorder %v14805_v3, 0.7853982  ;;  %v2052_v63 = vsel %vm2050_vm15, %v2037_v48, %v2051_v14  ;;  %v2055_v47 = vsel %vm2053_vm3, %v2054_v36, %v2045_v61  ;;  %v2253_v0 = vsel %vm2245_vm9, %v2232_v56, %v2235_v45 }
 0x217   :  { %v2254_v12 = vsel %vm2248_vm13, %v2241_v58, 920167782  ;;  %v2056_v60 = vsel %vm2049_vm0, %v2052_v63, %v2055_v47  ;;  %v2163_v52 = vsel %vm2161_vm4, %v2162_v6, %v9656_v50  ;;  %v2257_v48 = vsel %vm2245_vm9, %v2235_v45, %v2238_v7 }
 0x218   :  { %v2255_v62 = vsel %vm2247_vm10, %v2238_v7, %v2254_v12  ;;  %v2057_v10 = vsel %vm2046_vm6, nan, %v2056_v60  ;;  %v2164_v19 = vclz %v2163_v52  ;;  %v2258_v28 = vsel %vm2248_vm13, %v2244_v38, 1326507024 }
 0x219   :  { %v9692_v40 = vsel %vm2246_vm1, %v2253_v0, %v2255_v62  ;;  %6443 = vmatmul.f32.gmra.mxu0 %v2057_v10  ;;  %v2259_v61 = vsel %vm2247_vm10, %v2241_v58, %v2258_v28  ;;  %v2263_v36 = vshrl.u32 %v9619_v24, 16  ;;  %v9699_v14 = vor.u32 %v2389_v26, %v2388_v8 }
 0x21a   :  { %v9703_v43 = vshll.u32 %v14728_v34, %v14801_v18  ;;  %v7154_v3 = vadd.s32 4294967294, %v2164_v19  ;;  %v2260_v6 = vsel %vm2246_vm1, %v2257_v48, %v2259_v61  ;;  %v2287_v63 = vshrl.u32 %v9692_v40, 16 }
 0x21b   :  { %v9710_v38 = vshrl.u32 %v14724_v25, %v14799_v31  ;;  %v2183_v58 = vsel %vm2060_vm7, %v2182_v13, %v2158_v54  ;;  %v2264_v47 = vand.u32 65535, %v2260_v6  ;;  %v2265_v8 = vshrl.u32 %v2260_v6, 16 }
 0x21c   :  { %v9716_v26 = vshll.u32 %v14724_v25, %v14801_v18  ;;  %vm7155_vm14 = vcmp.lt.s32.totalorder %v7154_v3, 0  ;;  %v2229_v0 = vshrl.u32 %v14744_v49, %v14802_v27  ;;  %v9722_v12 = vshrl.u32 %v14726_v41, %v14799_v31 }
 0x21d   :  { %v9726_v60 = vshll.u32 %v14726_v41, %v14801_v18  ;;  %v2167_v52 = vsel %vm7155_vm14, 0, %v7154_v3  ;;  %v2250_v13 = vsel %vm2248_vm13, %v2238_v7, 2102212464  ;;  %v2267_v54 = vmul.u32 %v2265_v8, %v9660_v15 }
 0x21e   :  { %v2286_v62 = vand.u32 65535, %v9692_v40  ;;  %v2168_v48 = vsub.s32 32, %v2167_v52  ;;  %v2172_v10 = vsub.s32 4294967266, %v2167_v52  ;;  %v2185_v27 = vsel %vm9665_vm11, 0, %v2183_v58 }
 0x21f   :  { %v9735_v19 = vmul.u32 %v2287_v63, %v9660_v15  ;;  %v2249_v18 = vsel %vm2245_vm9, %v2229_v0, %v2232_v56  ;;  %v2266_v28 = vmul.u32 %v2264_v47, %v9660_v15  ;;  %v2270_v61 = vshll.u32 %v2267_v54, 16 }
 0x220   :  { %v9742_v7 = vshrl.u32 %v14731_v46, %v14799_v31  ;;  %v2169_v40 = vshll.u32 %v9656_v50, %v2167_v52  ;;  %v2170_v3 = vshrl.u32 %v9617_v20, %v2168_v48  ;;  %v2173_v6 = vadd.s32 127, %v2172_v10  ;;  %v9756_v50 = vld [vmem:[%s14370_s0 + $0xa0] sm:$0xff] }
 0x221   :  { %v2251_v58 = vsel %vm2247_vm10, %v2235_v45, %v2250_v13  ;;  %v9748_v33 = vadd.s32 3, %v2185_v27  ;;  %v2268_v21 = vmul.u32 %v2264_v47, %v2263_v36  ;;  %vm2274_vm12 = vc.u32 %v2266_v28, %v2270_v61 }
 0x222   :  { %v9750_v56 = vmul.u32 %v2286_v62, %v2263_v36  ;;  %v2171_v0 = vor.u32 %v2170_v3, %v2169_v40  ;;  %v2174_v9 = vshll.u32 %v2173_v6, 23  ;;  %v2276_v55 = vadd.s32 %v2270_v61, %v2266_v28 }
 0x223   :  { %v2292_v22 = vshll.u32 %v9735_v19, 16  ;;  %vm676_vm15 = vcmp.eq.s32.totalorder %v9756_v50, 2  ;;  %vm419_vm3 = vcmp.eq.s32.totalorder %v9756_v50, 1  ;;  %vm932_vm0 = vcmp.eq.s32.totalorder %v9517_v16, 3 }
 0x224   :  { %v1142_v20 = vadd.f32 %v9609_v53, %v9615_v44  ;;  %v2175_v45 = vor.u32 4788187, %v2174_v9  ;;  %v708_v47 = vsel %vm676_vm15, 1, %v14643_v51  ;;  %v451_v52 = vsel %vm419_vm3, 1, %v14643_v51  ;;  %v9772_v44 = vld [vmem:[#allocation5] ss:$0 sm:$0xff] }
 0x225   :  { %v2275_v13 = vsel %vm2274_vm12, 1, %v14643_v51  ;;  %781 = vperm.xlu2 %7253, %v708_v47   ;;  %524 = vperm.xlu1 %7252, %v451_v52   ;;  %v964_v48 = vsel %vm932_vm0, 1, %v14643_v51  ;;  %v9769_v10 = vsel %vm2246_vm1, %v2249_v18, %v2251_v58  ;;  %v2269_v27 = vmul.u32 %v2265_v8, %v2263_v36 }
 0x226   :  { %v2272_v16 = vshll.u32 %v2268_v21, 16  ;;  %v2176_v28 = vand.u32 2147483647, %v2175_v45  ;;  %v2178_v61 = vcvt.s32.f32 %v2171_v0  ;;  %1035 = vperm.xlu0 %7251, %v964_v48   ;;  %v2288_v9 = vmul.u32 %v2286_v62, %v9660_v15  ;;  %v14808_v48 = vld [vmem:[#allocation51_spill] sm:$0xff] }
 0x227   :  { %v2291_v53 = vmul.u32 %v2287_v63, %v2263_v36  ;;  %v1178_v40 = vadd.f32 %v9772_v44, %v1142_v20  ;;  %v2277_v3 = vadd.s32 %v2275_v13, %v2269_v27  ;;  %v2294_v6 = vshll.u32 %v9750_v56, 16 }
 0x228   :  { %vm2278_vm6 = vc.u32 %v2276_v55, %v2272_v16  ;;  %v2179_v47 = vmul.f32 %v2178_v61, %v2176_v28  ;;  %vm2296_vm9 = vc.u32 %v2288_v9, %v2292_v22  ;;  %v2298_v8 = vadd.s32 %v2292_v22, %v2288_v9 }
 0x229   :  { %v2279_v1 = vsel %vm2278_vm6, 1, %v14643_v51  ;;  %6704 = vmatmul.f32.gmra.mxu2 %v1178_v40  ;;  %7058 = vst [vmem:[#allocation10 + $0x20] sm:$0xff] %v1178_v40  ;;  %v2271_v18 = vshrl.u32 %v2267_v54, 16  ;;  %v2297_v15 = vsel %vm2296_vm9, 1, %v14643_v51  ;;  %v9780_v36 = vor.u32 %v9710_v38, %v9703_v43 }
 0x22a   :  { %v2281_v58 = vadd.s32 %v2279_v1, %v2277_v3  ;;  %v2180_v63 = vxor.u32 2147483648, %v2179_v47  ;;  %v2273_v62 = vshrl.u32 %v2268_v21, 16  ;;  %v2299_v55 = vadd.s32 %v2297_v15, %v2291_v53  ;;  %v9831_v3 = vpop.permute.xlu2 %1359 }
 0x22b   :  { %vm2300_vm1 = vc.u32 %v2298_v8, %v2294_v6  ;;  %v2293_v20 = vshrl.u32 %v9735_v19, 16  ;;  %v2396_v22 = vor.u32 %v9722_v12, %v9716_v26  ;;  %v2295_v52 = vshrl.u32 %v9750_v56, 16 }
 0x22c   :  { %v2282_v0 = vadd.s32 %v2281_v58, %v2271_v18  ;;  %v2301_v45 = vsel %vm2300_vm1, 1, %v14643_v51  ;;  %v2181_v54 = vsel %vm2060_vm7, %v2180_v63, %v2179_v47  ;;  %v2399_v43 = vor.u32 %v9742_v7, %v9726_v60 }
 0x22d   :  { %v2303_v13 = vadd.s32 %v2301_v45, %v2299_v55  ;;  %v9794_v21 = vsel %vm9665_vm11, %v14778_v59, %v2181_v54  ;;  %v9798_v19 = vadd.s32 %v2298_v8, %v2294_v6  ;;  %vm2400_vm4 = vcmp.lt.s32.totalorder %v14808_v48, 1 }
 0x22e   :  { %v9796_v38 = vadd.s32 %v2282_v0, %v2273_v62  ;;  %v2186_v26 = vmul.f32 %v9794_v21, %v9794_v21  ;;  %vm2403_vm7 = vcmp.lt.s32.totalorder %v14808_v48, 4  ;;  %v2408_v60 = vsel %vm2400_vm4, %v9630_v29, %v9699_v14 }
 0x22f   :  { %v2304_v12 = vadd.s32 %v2303_v13, %v2293_v20  ;;  %vm2401_vm10 = vcmp.lt.s32.totalorder %v14808_v48, 2  ;;  %vm2402_vm13 = vcmp.lt.s32.totalorder %v14808_v48, 3  ;;  %v2409_v2 = vsel %vm2403_vm7, %v2396_v22, 920167782  ;;  %v9853_v13 = vld [vmem:[%s14373_s3] ss:$0 sm:$0xff] }
 0x230   :  { %vm2308_vm11 = vc.u32 %v9796_v38, %v9798_v19  ;;  %v2187_v7 = vmul.f32 -0.001358992, %v2186_v26  ;;  %v2194_v56 = vmul.f32 -0.00019511016, %v2186_v26  ;;  %v2410_v16 = vsel %vm2402_vm13, %v9780_v36, %v2409_v2 }
 0x231   :  { %v2305_v27 = vadd.s32 %v2304_v12, %v2295_v52  ;;  %v9819_v28 = vsel %vm2401_vm10, %v2408_v60, %v2410_v16  ;;  %v2412_v61 = vsel %vm2400_vm4, %v9699_v14, %v9780_v36  ;;  %v2413_v9 = vsel %vm2403_vm7, %v2399_v43, 1326507024 }
 0x232   :  { %v14809_v53 = vor.u32 8388608, %v9601_v5  ;;  %v2188_v6 = vadd.f32 0.041655596, %v2187_v7  ;;  %v2195_v47 = vadd.f32 0.008332121, %v2194_v56  ;;  %v2414_v8 = vsel %vm2402_vm13, %v2396_v22, %v2413_v9 }
 0x233   :  { %v2309_v1 = vadd.s32 1, %v2305_v27  ;;  %vm5789_vm14 = vcmp.gt.s32.totalorder %v9469_v11, 0  ;;  %v2306_v18 = vmul.u32 %v9619_v24, %v9769_v10  ;;  %v2415_v58 = vsel %vm2401_vm10, %v2412_v61, %v2414_v8  ;;  %v9877_v8 = vpop.permute.xlu2 %1364 }
 0x234   :  { %v9829_v40 = vshll.u32 %v14809_v53, 8  ;;  %v2189_v15 = vmul.f32 %v2188_v6, %v2186_v26  ;;  %v2196_v63 = vmul.f32 %v2195_v47, %v2186_v26  ;;  %v2419_v55 = vand.u32 65535, %v2415_v58  ;;  %14812 = vst [vmem:[#allocation107_spill] sm:$0xff] %v9877_v8 }
 0x235   :  { %v2310_v62 = vsel %vm2308_vm11, %v2309_v1, %v2305_v27  ;;  %v2420_v45 = vshrl.u32 %v2415_v58, 16  ;;  %v2442_v22 = vshrl.u32 %v9819_v28, 16  ;;  %v9847_v24 = vsub.s32 32, %v9466_v39 }
 0x236   :  { %v2417_v5 = vand.u32 65535, %v9829_v40  ;;  %v2311_v0 = vadd.s32 %v2310_v62, %v2306_v18  ;;  %v2418_v20 = vshrl.u32 %v9829_v40, 16  ;;  %v2190_v10 = vadd.f32 -0.4999988, %v2189_v15  ;;  %v737_v15 = vpop.permute.xlu0 %736 }
 0x237   :  { %14810 = vst [vmem:[#allocation43_spill] sm:$0xff] %v9847_v24  ;;  %v2197_v54 = vadd.f32 -0.16666654, %v2196_v63  ;;  %v2203_v52 = vand.u32 3, %v9748_v33  ;;  %v9857_v43 = vadd.f32 %v9853_v13, %v9531_v32  ;;  %v9866_v7 = vsel %vm5789_vm14, %v9469_v11, 0 }
 0x238   :  { %v2312_v12 = vadd.s32 536870912, %v2311_v0  ;;  %v9859_v60 = vmul.u32 %v2420_v45, %v2417_v5  ;;  %v9861_v2 = vmul.u32 %v2419_v55, %v2418_v20  ;;  %v2191_v33 = vmul.f32 %v2190_v10, %v2186_v26 }
 0x239   :  { %14811 = vst [vmem:[#allocation45_spill] sm:$0xff] %v9857_v43  ;;  %v2198_v56 = vmul.f32 %v2197_v54, %v2186_v26  ;;  %v9868_v27 = vmul.u32 %v2442_v22, %v2417_v5  ;;  %vm2201_vm12 = vweird.f32 %v14778_v59  ;;  %v2421_v32 = vmul.u32 %v2419_v55, %v2417_v5  ;;  %v14813_v59 = vld [vmem:[#allocation131_spill] sm:$0xff] }
 0x23a   :  { %v9871_v16 = vshrl.u32 %v2312_v12, 30  ;;  %v2425_v61 = vshll.u32 %v9859_v60, 16  ;;  %v2441_v9 = vand.u32 65535, %v9819_v28  ;;  %v2192_v53 = vadd.f32 1.0, %v2191_v33 }
 0x23b   :  { %v2199_v6 = vadd.f32 1.0, %v2198_v56  ;;  %vm2204_vm15 = vcmp.lt.s32.totalorder %v2203_v52, 2  ;;  %v2424_v47 = vmul.u32 %v2420_v45, %v2418_v20  ;;  %v2427_v1 = vshll.u32 %v9861_v2, 16 }
 0x23c   :  { %v2314_v11 = vshll.u32 %v9871_v16, 30  ;;  %vm2429_vm3 = vc.u32 %v2421_v32, %v2425_v61  ;;  %v2431_v26 = vadd.s32 %v2425_v61, %v2421_v32  ;;  %v2209_v58 = vxor.u32 2147483648, %v2192_v53  ;;  %v994_v61 = vpop.permute.xlu1 %993 }
 0x23d   :  { %v2200_v18 = vmul.f32 %v2199_v6, %v9794_v21  ;;  %v2430_v63 = vsel %vm2429_vm3, 1, %v14643_v51  ;;  %v2447_v28 = vshll.u32 %v9868_v27, 16  ;;  %v9884_v45 = vmul.u32 %v2441_v9, %v2418_v20 }
 0x23e   :  { %v9882_v62 = vsub.s32 %v2311_v0, %v2314_v11  ;;  %v2432_v55 = vadd.s32 %v2430_v63, %v2424_v47  ;;  %vm2433_vm0 = vc.u32 %v2431_v26, %v2427_v1  ;;  %vm2205_vm6 = vcmp.eq.s32.totalorder %v2203_v52, 0 }
 0x23f   :  { %v2206_v10 = vxor.u32 2147483648, %v2200_v18  ;;  %vm2215_vm9 = vcmp.lt.s32.totalorder %v14790_v42, 0  ;;  %v2434_v54 = vsel %vm2433_vm0, 1, %v14643_v51  ;;  %v2443_v12 = vmul.u32 %v2441_v9, %v2417_v5 }
 0x240   :  { %vm2208_vm1 = vcmp.eq.s32.totalorder %v2203_v52, 2  ;;  %vm821_vm11 = vcmp.eq.s32.totalorder %v737_v15, 1  ;;  %vm2316_vm14 = vcmp.lt.s32.totalorder %v9882_v62, 0  ;;  %v2317_v21 = vsub.s32 0, %v9882_v62 }
 0x241   :  { %v2207_v33 = vsel %vm2205_vm6, %v2192_v53, %v2206_v10  ;;  %v2210_v0 = vsel %vm2208_vm1, %v2209_v58, %v2200_v18  ;;  %v2446_v56 = vmul.u32 %v2442_v22, %v2418_v20  ;;  %vm2451_vm3 = vc.u32 %v2443_v12, %v2447_v28 }
 0x242   :  { %v2211_v32 = vsel %vm2204_vm15, %v2207_v33, %v2210_v0  ;;  %v2318_v6 = vsel %vm2316_vm14, %v2317_v21, %v9882_v62  ;;  %v2436_v47 = vadd.s32 %v2434_v54, %v2432_v55  ;;  %v2449_v11 = vshll.u32 %v9884_v45, 16  ;;  %v740_v55 = vpop.permute.xlu2 %739 }
 0x243   :  { %v2212_v5 = vsel %vm2201_vm12, nan, %v2211_v32  ;;  %v2319_v9 = vclz %v2318_v6  ;;  %v2452_v1 = vsel %vm2451_vm3, 1, %v14643_v51  ;;  %v2453_v26 = vadd.s32 %v2447_v28, %v2443_v12 }
 0x244   :  { %6446 = vmatmul.f32.gmra.mxu0 %v2212_v5  ;;  %v2337_v53 = vsub.s32 4, %v9871_v16  ;;  %v2384_v20 = vshrl.u32 %v14744_v49, %v14799_v31  ;;  %v2405_v22 = vsel %vm2403_vm7, %v9780_v36, 2102212464  ;;  %v2426_v52 = vshrl.u32 %v9859_v60, 16 }
 0x245   :  { %vm5014_vm15 = vcmp.gt.s32.totalorder %v9472_v57, 0  ;;  %vm565_vm12 = vcmp.eq.s32.totalorder %v14813_v59, 1  ;;  %vm1078_vm0 = vcmp.eq.s32.totalorder %v994_v61, 1  ;;  %v7157_v18 = vadd.s32 4294967294, %v2319_v9 }
 0x246   :  { %v2454_v58 = vadd.s32 %v2452_v1, %v2446_v56  ;;  %vm2455_vm6 = vc.u32 %v2453_v26, %v2449_v11  ;;  %v854_v63 = vsel %vm821_vm11, %v8876_v23, 0.0  ;;  %v2404_v31 = vsel %vm2400_vm4, %v2384_v20, %v9630_v29 }
 0x247   :  { %v2437_v28 = vadd.s32 %v2436_v47, %v2426_v52  ;;  %v2456_v36 = vsel %vm2455_vm6, 1, %v14643_v51  ;;  %vm7158_vm7 = vcmp.lt.s32.totalorder %v7157_v18, 0  ;;  %v2406_v60 = vsel %vm2402_vm13, %v9699_v14, %v2405_v22  ;;  %v14817_v22 = vld [vmem:[#allocation56_spill] sm:$0xff] }
 0x248   :  { %v2448_v10 = vshrl.u32 %v9868_v27, 16  ;;  %v2458_v54 = vadd.s32 %v2456_v36, %v2454_v58  ;;  %v2307_v15 = vadd.s32 %v9798_v19, %v9796_v38  ;;  %v2322_v12 = vsel %vm7158_vm7, 0, %v7157_v18 }
 0x249   :  { %v2338_v29 = vsel %vm2215_vm9, %v2337_v53, %v9871_v16  ;;  %v2428_v21 = vshrl.u32 %v9861_v2, 16  ;;  %v2323_v33 = vsub.s32 32, %v2322_v12  ;;  %v2327_v0 = vsub.s32 4294967266, %v2322_v12 }
 0x24a   :  { %v2450_v56 = vshrl.u32 %v9884_v45, 16  ;;  %v2459_v32 = vadd.s32 %v2458_v54, %v2448_v10  ;;  %vm822_vm4 = vcmp.eq.s32.totalorder %v740_v55, 1  ;;  %v886_v14 = vadd.f32 %v854_v63, %v9316_v17  ;;  %v14820_v54 = vld [vmem:[#allocation23_spill] sm:$0xff] }
 0x24b   :  { %v14814_v27 = vand.u32 2147483647, %v14790_v42  ;;  %v9929_v38 = vadd.s32 %v2437_v28, %v2428_v21  ;;  %v2324_v19 = vshll.u32 %v9882_v62, %v2322_v12  ;;  %v2325_v16 = vshrl.u32 %v2307_v15, %v2323_v33  ;;  %v9944_v62 = vld [vmem:[%s14370_s0 + $0xa8] sm:$0xff] }
 0x24c   :  { %v2328_v2 = vadd.s32 127, %v2327_v0  ;;  %v2460_v47 = vadd.s32 %v2459_v32, %v2450_v56  ;;  %v1111_v45 = vsel %vm1078_vm0, %v8889_v4, 0.0  ;;  %v2407_v17 = vsel %vm2401_vm10, %v2404_v31, %v2406_v60 }
 0x24d   :  { %vm9925_vm13 = vcmp.le.f32.partialorder %v14814_v27, 0.7853982  ;;  %v9938_v9 = vadd.s32 %v2453_v26, %v2449_v11  ;;  %v2326_v1 = vor.u32 %v2325_v16, %v2324_v19  ;;  %v14556_v52 = vand.u32 2147483647, %v14817_v22  ;;  %v14824_v16 = vld [vmem:[#allocation82_spill] sm:$0xff] }
 0x24e   :  { %v2340_v5 = vsel %vm9925_vm13, 0, %v2338_v29  ;;  %v2329_v53 = vshll.u32 %v2328_v2, 23  ;;  %v2464_v20 = vadd.s32 1, %v2460_v47  ;;  %vm677_vm1 = vcmp.eq.s32.totalorder %v9944_v62, 2  ;;  %v997_v29 = vpop.permute.xlu0 %996 }
 0x24f   :  { %vm420_vm11 = vcmp.eq.s32.totalorder %v9944_v62, 1  ;;  %vm933_vm14 = vcmp.eq.s32.totalorder %v9756_v50, 3  ;;  %v1143_v48 = vadd.f32 %v1111_v45, %v886_v14  ;;  %v709_v11 = vsel %vm677_vm1, 1, %v14643_v51 }
 0x250   :  { %v2330_v61 = vor.u32 4788187, %v2329_v53  ;;  %v452_v26 = vsel %vm420_vm11, 1, %v14643_v51  ;;  %vm2463_vm10 = vc.u32 %v9929_v38, %v9938_v9  ;;  %v5015_v18 = vsel %vm5014_vm15, %v9472_v57, 0  ;;  %784 = vperm.xlu2 %7253, %v709_v11  }
 0x251   :  { %v598_v58 = vsel %vm565_vm12, %v8133_v35, 0.0  ;;  %v9961_v50 = vadd.f32 %v9853_v13, %v9604_v30  ;;  %527 = vperm.xlu1 %7252, %v452_v26   ;;  %v965_v63 = vsel %vm933_vm14, 1, %v14643_v51  ;;  %v2333_v28 = vcvt.s32.f32 %v2326_v1 }
 0x252   :  { %v2331_v31 = vand.u32 2147483647, %v2330_v61  ;;  %1038 = vperm.xlu0 %7251, %v965_v63   ;;  %v2461_v36 = vmul.u32 %v9829_v40, %v2407_v17  ;;  %v2530_v57 = vand.u32 8388607, %v14556_v52  ;;  %v855_v59 = vsel %vm822_vm4, %v8876_v23, 0.0 }
 0x253   :  { %14818 = vst [vmem:[#allocation49_spill] sm:$0xff] %v9961_v50  ;;  %v2357_v60 = vadd.s32 3, %v2340_v5  ;;  %v1179_v10 = vadd.f32 %v9772_v44, %v1143_v48  ;;  %v2465_v30 = vsel %vm2463_vm10, %v2464_v20, %v2460_v47  ;;  %v9971_v13 = vshrl.u32 %v9866_v7, 5  ;;  %v14825_v5 = vld [vmem:[#allocation78_spill] sm:$0xff] }
 0x254   :  { %v630_v15 = vadd.f32 %v598_v58, %v14820_v54  ;;  %v2334_v12 = vmul.f32 %v2333_v28, %v2331_v31  ;;  %v2466_v21 = vadd.s32 %v2465_v30, %v2461_v36  ;;  %v9975_v40 = vand.u32 31, %v9866_v7 }
 0x255   :  { %14819 = vst [vmem:[#allocation130_spill] sm:$0xff] %v9971_v13  ;;  %v9977_v33 = vshrl.u32 %v5015_v18, 5  ;;  %v9979_v0 = vand.u32 31, %v5015_v18  ;;  %v5936_v55 = vand.u32 2139095040, %v9857_v43  ;;  %6707 = vmatmul.f32.gmra.mxu2 %v1179_v10  ;;  %v2531_v27 = vor.u32 8388608, %v2530_v57 }
 0x256   :  { %14821 = vst [vmem:[#allocation53_spill] sm:$0xff] %v9975_v40  ;;  %v887_v56 = vadd.f32 %v855_v59, %v630_v15  ;;  %v2335_v32 = vxor.u32 2147483648, %v2334_v12  ;;  %v2467_v14 = vadd.s32 536870912, %v2466_v21  ;;  %v9982_v19 = vand.u32 3, %v2357_v60  ;;  %v14826_v60 = vld [vmem:[#allocation20_spill] sm:$0xff] }
 0x257   :  { %14822 = vst [vmem:[#allocation83_spill] sm:$0xff] %v9977_v33  ;;  %vm1079_vm3 = vcmp.eq.s32.totalorder %v997_v29, 1  ;;  %v2544_v2 = vshrl.u32 %v14728_v34, %v14824_v16  ;;  %v2547_v7 = vshrl.u32 %v14724_v25, %v14824_v16  ;;  %v2543_v17 = vshll.u32 %v14725_v37, %v14825_v5  ;;  %v14827_v15 = vld [vmem:[#allocation80_spill] sm:$0xff] }
 0x258   :  { %14823 = vst [vmem:[#allocation47_spill] sm:$0xff] %v9979_v0  ;;  %v2336_v47 = vsel %vm2215_vm9, %v2335_v32, %v2334_v12  ;;  %v2468_v45 = vshrl.u32 %v2467_v14, 30  ;;  %v2546_v1 = vshll.u32 %v14728_v34, %v14825_v5  ;;  %v2550_v20 = vshrl.u32 %v14726_v41, %v14824_v16 }
 0x259   :  { %7059 = vst [vmem:[#allocation10 + $0x28] sm:$0xff] %v1179_v10  ;;  %v9997_v53 = vsel %vm9925_vm13, %v14790_v42, %v2336_v47  ;;  %v2552_v48 = vshll.u32 %v14726_v41, %v14825_v5  ;;  %v2553_v61 = vshrl.u32 %v14731_v46, %v14824_v16  ;;  %v2541_v18 = vshrl.u32 %v14725_v37, %v14824_v16 }
 0x25a   :  { %v2341_v11 = vmul.f32 %v9997_v53, %v9997_v53  ;;  %v2469_v26 = vshll.u32 %v2468_v45, 30  ;;  %v10009_v58 = vshll.u32 %v2531_v27, 8  ;;  %v10011_v6 = vor.u32 %v2544_v2, %v2543_v17 }
 0x25b   :  { %v10013_v63 = vor.u32 %v2547_v7, %v2546_v1  ;;  %v2549_v31 = vshll.u32 %v14724_v25, %v14825_v5  ;;  %v2554_v28 = vor.u32 %v2553_v61, %v2552_v48  ;;  %v1112_v59 = vsel %vm1079_vm3, %v8889_v4, 0.0 }
 0x25c   :  { %v2342_v36 = vmul.f32 -0.001358992, %v2341_v11  ;;  %v2349_v57 = vmul.f32 -0.00019511016, %v2341_v11  ;;  %vm2370_vm9 = vcmp.lt.s32.totalorder %v14826_v60, 0  ;;  %v10020_v10 = vsub.s32 %v2466_v21, %v2469_v26 }
 0x25d   :  { %v2540_v30 = vshll.u32 %v14744_v49, %v14825_v5  ;;  %v2551_v54 = vor.u32 %v2550_v20, %v2549_v31  ;;  %vm2555_vm15 = vcmp.lt.s32.totalorder %v14827_v15, 1  ;;  %vm2558_vm12 = vcmp.lt.s32.totalorder %v14827_v15, 4 }
 0x25e   :  { %v2343_v12 = vadd.f32 0.041655596, %v2342_v36  ;;  %v2350_v32 = vadd.f32 0.008332121, %v2349_v57  ;;  %vm2471_vm0 = vcmp.lt.s32.totalorder %v10020_v10, 0  ;;  %v2472_v14 = vsub.s32 0, %v10020_v10 }
 0x25f   :  { %v14828_v29 = vand.u32 2147483647, %v14826_v60  ;;  %v10034_v21 = vor.u32 %v2541_v18, %v2540_v30  ;;  %vm2556_vm7 = vcmp.lt.s32.totalorder %v14827_v15, 2  ;;  %v2567_v2 = vsel %vm2555_vm15, %v10011_v6, %v10013_v63 }
 0x260   :  { %v2568_v7 = vsel %vm2558_vm12, %v2554_v28, 1326507024  ;;  %v2344_v47 = vmul.f32 %v2343_v12, %v2341_v11  ;;  %v2351_v5 = vmul.f32 %v2350_v32, %v2341_v11  ;;  %v2473_v17 = vsel %vm2471_vm0, %v2472_v14, %v10020_v10  ;;  %v14831_v12 = vld [vmem:[#allocation28_spill] sm:$0xff] }
 0x261   :  { %vm10030_vm6 = vcmp.le.f32.partialorder %v14828_v29, 0.7853982  ;;  %vm2557_vm4 = vcmp.lt.s32.totalorder %v14827_v15, 3  ;;  %v2474_v1 = vclz %v2473_v17  ;;  %v2492_v20 = vsub.s32 4, %v2468_v45 }
 0x262   :  { %v2564_v48 = vsel %vm2558_vm12, %v2551_v54, 920167782  ;;  %v2569_v61 = vsel %vm2557_vm4, %v2551_v54, %v2568_v7  ;;  %v2345_v26 = vadd.f32 -0.4999988, %v2344_v47  ;;  %v2352_v18 = vadd.f32 -0.16666654, %v2351_v5 }
 0x263   :  { %vm2363_vm13 = vcmp.eq.s32.totalorder %v9982_v19, 2  ;;  %v2462_v31 = vadd.s32 %v9938_v9, %v9929_v38  ;;  %v2570_v28 = vsel %vm2556_vm7, %v2567_v2, %v2569_v61  ;;  %vm2360_vm1 = vcmp.eq.s32.totalorder %v9982_v19, 0 }
 0x264   :  { %v1144_v36 = vadd.f32 %v1112_v59, %v887_v56  ;;  %v7160_v57 = vadd.s32 4294967294, %v2474_v1  ;;  %v10057_v30 = vshrl.u32 %v14744_v49, %v14824_v16  ;;  %v14557_v54 = vand.u32 2147483647, %v14831_v12 }
 0x265   :  { %v2346_v32 = vmul.f32 %v2345_v26, %v2341_v11  ;;  %v2353_v14 = vmul.f32 %v2352_v18, %v2341_v11  ;;  %vm2359_vm11 = vcmp.lt.s32.totalorder %v9982_v19, 2  ;;  %v2563_v38 = vsel %vm2555_vm15, %v10034_v21, %v10011_v6 }
 0x266   :  { %v2565_v9 = vsel %vm2557_vm4, %v10013_v63, %v2564_v48  ;;  %vm2356_vm14 = vweird.f32 %v14790_v42  ;;  %vm7161_vm10 = vcmp.lt.s32.totalorder %v7160_v57, 0  ;;  %v2493_v56 = vsel %vm2370_vm9, %v2492_v20, %v2468_v45 }
 0x267   :  { %v10072_v16 = vand.u32 65535, %v10009_v58  ;;  %v2575_v11 = vshrl.u32 %v2570_v28, 16  ;;  %v2347_v59 = vadd.f32 1.0, %v2346_v32  ;;  %v2354_v29 = vadd.f32 1.0, %v2353_v14 }
 0x268   :  { %v2477_v2 = vsel %vm7161_vm10, 0, %v7160_v57  ;;  %v2574_v7 = vand.u32 65535, %v2570_v28  ;;  %v10076_v17 = vsel %vm2556_vm7, %v2563_v38, %v2565_v9  ;;  %v2495_v20 = vsel %vm10030_vm6, 0, %v2493_v56 }
 0x269   :  { %v2478_v47 = vsub.s32 32, %v2477_v2  ;;  %v2482_v5 = vsub.s32 4294967266, %v2477_v2  ;;  %v10079_v1 = vmul.u32 %v2575_v11, %v10072_v16  ;;  %v2355_v48 = vmul.f32 %v2354_v29, %v9997_v53 }
 0x26a   :  { %v2364_v45 = vxor.u32 2147483648, %v2347_v59  ;;  %v2573_v61 = vshrl.u32 %v10009_v58, 16  ;;  %v2479_v26 = vshll.u32 %v10020_v10, %v2477_v2  ;;  %v2560_v14 = vsel %vm2558_vm12, %v10013_v63, 2102212464 }
 0x26b   :  { %v2480_v18 = vshrl.u32 %v2462_v31, %v2478_v47  ;;  %v2483_v28 = vadd.s32 127, %v2482_v5  ;;  %v2580_v57 = vshll.u32 %v10079_v1, 16  ;;  %v2361_v32 = vxor.u32 2147483648, %v2355_v48  ;;  %v10101_v31 = vld [vmem:[%s14370_s0 + $0xb0] sm:$0xff] }
 0x26c   :  { %v2576_v38 = vmul.u32 %v2574_v7, %v10072_v16  ;;  %v2596_v53 = vand.u32 65535, %v10076_v17  ;;  %v2365_v9 = vsel %vm2363_vm13, %v2364_v45, %v2355_v48  ;;  %v10094_v52 = vmul.u32 %v2574_v7, %v2573_v61 }
 0x26d   :  { %v2481_v56 = vor.u32 %v2480_v18, %v2479_v26  ;;  %v2484_v29 = vshll.u32 %v2483_v28, 23  ;;  %v2362_v10 = vsel %vm2360_vm1, %v2347_v59, %v2361_v32  ;;  %vm678_vm3 = vcmp.eq.s32.totalorder %v10101_v31, 2 }
 0x26e   :  { %vm421_vm12 = vcmp.eq.s32.totalorder %v10101_v31, 1  ;;  %vm934_vm0 = vcmp.eq.s32.totalorder %v9944_v62, 3  ;;  %v2366_v63 = vsel %vm2359_vm11, %v2362_v10, %v2365_v9  ;;  %v710_v7 = vsel %vm678_vm3, 1, %v14643_v51 }
 0x26f   :  { %v2485_v2 = vor.u32 4788187, %v2484_v29  ;;  %vm10109_vm13 = vc.u32 %v2576_v38, %v2580_v57  ;;  %v2367_v59 = vsel %vm2356_vm14, nan, %v2366_v63  ;;  %787 = vperm.xlu2 %7253, %v710_v7   ;;  %v453_v5 = vsel %vm421_vm12, 1, %v14643_v51 }
 0x270   :  { %v966_v48 = vsel %vm934_vm0, 1, %v14643_v51  ;;  %v2586_v45 = vadd.s32 %v2580_v57, %v2576_v38  ;;  %6449 = vmatmul.f32.gmra.mxu0 %v2367_v59  ;;  %v2488_v19 = vcvt.s32.f32 %v2481_v56  ;;  %530 = vperm.xlu1 %7252, %v453_v5   ;;  %v2579_v26 = vmul.u32 %v2575_v11, %v2573_v61 }
 0x271   :  { %v2486_v62 = vand.u32 2147483647, %v2485_v2  ;;  %v2597_v18 = vshrl.u32 %v10076_v17, 16  ;;  %v2512_v28 = vadd.s32 3, %v2495_v20  ;;  %1041 = vperm.xlu0 %7251, %v966_v48   ;;  %v1180_v32 = vadd.f32 %v9772_v44, %v1144_v36 }
 0x272   :  { %v2582_v42 = vshll.u32 %v10094_v52, 16  ;;  %v2585_v9 = vsel %vm10109_vm13, 1, %v14643_v51  ;;  %v2559_v57 = vsel %vm2555_vm15, %v10057_v30, %v10034_v21  ;;  %v2561_v11 = vsel %vm2557_vm4, %v10011_v6, %v2560_v14 }
 0x273   :  { %v2489_v29 = vmul.f32 %v2488_v19, %v2486_v62  ;;  %v2587_v17 = vadd.s32 %v2585_v9, %v2579_v26  ;;  %v10131_v20 = vsub.s32 32, %v9975_v40  ;;  %v5316_v44 = vand.u32 2139095040, %v9961_v50  ;;  %6710 = vmatmul.f32.gmra.mxu2 %v1180_v32  ;;  %7060 = vst [vmem:[#allocation10 + $0x30] sm:$0xff] %v1180_v32  ;;  %v14835_v32 = vld [vmem:[#allocation52_spill] sm:$0xff] }
 0x274   :  { %vm2588_vm1 = vc.u32 %v2586_v45, %v2582_v42  ;;  %v10136_v36 = vand.u32 8388607, %v14557_v54  ;;  %v2599_v30 = vmul.u32 %v2597_v18, %v10072_v16  ;;  %v2600_v56 = vmul.u32 %v2596_v53, %v2573_v61  ;;  %v14836_v42 = vld [vmem:[#allocation57_spill] sm:$0xff] }
 0x275   :  { %14834 = vst [vmem:[#allocation74_spill] sm:$0xff] %v10131_v20  ;;  %v2490_v38 = vxor.u32 2147483648, %v2489_v29  ;;  %v2589_v21 = vsel %vm2588_vm1, 1, %v14643_v51  ;;  %v10140_v6 = vand.u32 3, %v2512_v28  ;;  %v10144_v14 = vsel %vm2556_vm7, %v2559_v57, %v2561_v11 }
 0x276   :  { %v2581_v10 = vshrl.u32 %v10079_v1, 16  ;;  %v2591_v63 = vadd.s32 %v2589_v21, %v2587_v17  ;;  %v2583_v7 = vshrl.u32 %v10094_v52, 16  ;;  %v2598_v47 = vmul.u32 %v2596_v53, %v10072_v16 }
 0x277   :  { %v2491_v2 = vsel %vm2370_vm9, %v2490_v38, %v2489_v29  ;;  %v2602_v59 = vshll.u32 %v2599_v30, 16  ;;  %v2601_v45 = vmul.u32 %v2597_v18, %v2573_v61  ;;  %v2603_v15 = vshrl.u32 %v2599_v30, 16 }
 0x278   :  { %v2494_v5 = vsel %vm10030_vm6, %v14826_v60, %v2491_v2  ;;  %v2592_v48 = vadd.s32 %v2591_v63, %v2581_v10  ;;  %v2604_v19 = vshll.u32 %v2600_v56, 16  ;;  %v2605_v26 = vshrl.u32 %v2600_v56, 16 }
 0x279   :  { %v2496_v62 = vmul.f32 %v2494_v5, %v2494_v5  ;;  %vm2606_vm15 = vc.u32 %v2598_v47, %v2602_v59  ;;  %v2608_v1 = vadd.s32 %v2602_v59, %v2598_v47  ;;  %v2695_v52 = vshll.u32 %v14744_v49, %v14835_v32 }
 0x27a   :  { %v2607_v28 = vsel %vm2606_vm15, 1, %v14643_v51  ;;  %v2696_v16 = vshrl.u32 %v14725_v37, %v14836_v42  ;;  %v10159_v29 = vadd.s32 %v2592_v48, %v2583_v7  ;;  %v2698_v18 = vshll.u32 %v14725_v37, %v14835_v32 }
 0x27b   :  { %v2497_v53 = vmul.f32 -0.001358992, %v2496_v62  ;;  %v2504_v9 = vmul.f32 -0.00019511016, %v2496_v62  ;;  %v2609_v27 = vadd.s32 %v2607_v28, %v2601_v45  ;;  %vm2610_vm9 = vc.u32 %v2608_v1, %v2604_v19 }
 0x27c   :  { %v2611_v61 = vsel %vm2610_vm9, 1, %v14643_v51  ;;  %v2699_v57 = vshrl.u32 %v14728_v34, %v14836_v42  ;;  %v10166_v38 = vadd.s32 %v2608_v1, %v2604_v19  ;;  %v10168_v30 = vor.u32 %v2696_v16, %v2695_v52 }
 0x27d   :  { %v2498_v11 = vadd.f32 0.041655596, %v2497_v53  ;;  %v2505_v17 = vadd.f32 0.008332121, %v2504_v9  ;;  %v2613_v21 = vadd.s32 %v2611_v61, %v2609_v27  ;;  %v2701_v56 = vshll.u32 %v14728_v34, %v14835_v32  ;;  %v14837_v27 = vld [vmem:[#allocation55_spill] sm:$0xff] }
 0x27e   :  { %v2702_v10 = vshrl.u32 %v14724_v25, %v14836_v42  ;;  %v2704_v63 = vshll.u32 %v14724_v25, %v14835_v32  ;;  %v2705_v59 = vshrl.u32 %v14726_v41, %v14836_v42  ;;  %v10178_v48 = vor.u32 %v2699_v57, %v2698_v18 }
 0x27f   :  { %v2499_v2 = vmul.f32 %v2498_v11, %v2496_v62  ;;  %v2506_v7 = vmul.f32 %v2505_v17, %v2496_v62  ;;  %v2614_v47 = vadd.s32 %v2613_v21, %v2603_v15  ;;  %v2707_v19 = vshll.u32 %v14726_v41, %v14835_v32  ;;  %v486_v11 = vpop.permute.xlu1 %485 }
 0x280   :  { %v10180_v45 = vor.u32 %v2702_v10, %v2701_v56  ;;  %v2708_v1 = vshrl.u32 %v14731_v46, %v14836_v42  ;;  %v2706_v53 = vor.u32 %v2705_v59, %v2704_v63  ;;  %vm2618_vm6 = vc.u32 %v10159_v29, %v10166_v38 }
 0x281   :  { %v2500_v28 = vadd.f32 -0.4999988, %v2499_v2  ;;  %v2507_v52 = vadd.f32 -0.16666654, %v2506_v7  ;;  %v2615_v16 = vadd.s32 %v2614_v47, %v2605_v26  ;;  %v2686_v15 = vor.u32 8388608, %v10136_v36 }
 0x282   :  { %v2709_v9 = vor.u32 %v2708_v1, %v2707_v19  ;;  %vm2710_vm7 = vcmp.lt.s32.totalorder %v14837_v27, 1  ;;  %vm2713_vm4 = vcmp.lt.s32.totalorder %v14837_v27, 4  ;;  %v2616_v32 = vmul.u32 %v10009_v58, %v10144_v14 }
 0x283   :  { %v2501_v61 = vmul.f32 %v2500_v28, %v2496_v62  ;;  %v2508_v18 = vmul.f32 %v2507_v52, %v2496_v62  ;;  %v2619_v57 = vadd.s32 1, %v2615_v16  ;;  %vm2712_vm11 = vcmp.lt.s32.totalorder %v14837_v27, 3 }
 0x284   :  { %v2718_v26 = vsel %vm2710_vm7, %v10168_v30, %v10178_v48  ;;  %v2719_v36 = vsel %vm2713_vm4, %v2706_v53, 920167782  ;;  %v2722_v56 = vsel %vm2710_vm7, %v10178_v48, %v10180_v45  ;;  %vm2711_vm14 = vcmp.lt.s32.totalorder %v14837_v27, 2 }
 0x285   :  { %v2502_v17 = vadd.f32 1.0, %v2501_v61  ;;  %v2509_v21 = vadd.f32 1.0, %v2508_v18  ;;  %v2620_v62 = vsel %vm2618_vm6, %v2619_v57, %v2615_v16  ;;  %v2720_v14 = vsel %vm2712_vm11, %v10180_v45, %v2719_v36  ;;  %v743_v36 = vpop.permute.xlu2 %742 }
 0x286   :  { %v2621_v58 = vadd.s32 %v2620_v62, %v2616_v32  ;;  %v2723_v10 = vsel %vm2713_vm4, %v2709_v9, 1326507024  ;;  %v2721_v7 = vsel %vm2711_vm14, %v2718_v26, %v2720_v14  ;;  %vm566_vm10 = vcmp.eq.s32.totalorder %v486_v11, 1 }
 0x287   :  { %v2510_v63 = vmul.f32 %v2509_v21, %v2494_v5  ;;  %v2519_v2 = vxor.u32 2147483648, %v2502_v17  ;;  %v2724_v47 = vsel %vm2712_vm11, %v2706_v53, %v2723_v10  ;;  %v10216_v1 = vshll.u32 %v2686_v15, 8 }
 0x288   :  { %v2622_v59 = vadd.s32 536870912, %v2621_v58  ;;  %v2725_v19 = vsel %vm2711_vm14, %v2722_v56, %v2724_v47  ;;  %vm2514_vm3 = vcmp.lt.s32.totalorder %v10140_v6, 2  ;;  %vm2515_vm12 = vcmp.eq.s32.totalorder %v10140_v6, 0 }
 0x289   :  { %v2516_v28 = vxor.u32 2147483648, %v2510_v63  ;;  %v2729_v52 = vand.u32 65535, %v2725_v19  ;;  %v2730_v16 = vshrl.u32 %v2725_v19, 16  ;;  %vm2518_vm0 = vcmp.eq.s32.totalorder %v10140_v6, 2 }
 0x28a   :  { %v10221_v5 = vshrl.u32 %v2622_v59, 30  ;;  %v2752_v9 = vshrl.u32 %v2721_v7, 16  ;;  %v2520_v61 = vsel %vm2518_vm0, %v2519_v2, %v2510_v63  ;;  %v2727_v18 = vand.u32 65535, %v10216_v1  ;;  %v14839_v59 = vld [vmem:[#allocation22_spill] sm:$0xff] }
 0x28b   :  { %v2517_v53 = vsel %vm2515_vm12, %v2502_v17, %v2516_v28  ;;  %v2728_v57 = vshrl.u32 %v10216_v1, 16  ;;  %v10227_v15 = vshll.u32 %v14724_v25, %v9975_v40  ;;  %vm2511_vm13 = vweird.f32 %v14826_v60 }
 0x28c   :  { %v2521_v32 = vsel %vm2514_vm3, %v2517_v53, %v2520_v61  ;;  %v2624_v26 = vshll.u32 %v10221_v5, 30  ;;  %v599_v6 = vsel %vm566_vm10, %v8133_v35, 0.0  ;;  %v2732_v17 = vmul.u32 %v2730_v16, %v2727_v18  ;;  %v1000_v61 = vpop.permute.xlu0 %999 }
 0x28d   :  { %v2522_v21 = vsel %vm2511_vm13, nan, %v2521_v32  ;;  %v10233_v62 = vmul.u32 %v2729_v52, %v2728_v57  ;;  %v10237_v56 = vshll.u32 %v14726_v41, %v9975_v40  ;;  %v2751_v10 = vand.u32 65535, %v2721_v7 }
 0x28e   :  { %6452 = vmatmul.f32.gmra.mxu0 %v2522_v21  ;;  %v10239_v14 = vsub.s32 %v2621_v58, %v2624_v26  ;;  %v10241_v60 = vmul.u32 %v2752_v9, %v2727_v18  ;;  %v10244_v63 = vsub.s32 32, %v9979_v0  ;;  %v10248_v11 = vshrl.u32 %v5936_v55, 23 }
 0x28f   :  { %v2731_v2 = vmul.u32 %v2729_v52, %v2727_v18  ;;  %v2735_v47 = vshll.u32 %v2732_v17, 16  ;;  %vm823_vm1 = vcmp.eq.s32.totalorder %v743_v36, 1  ;;  %v631_v19 = vadd.f32 %v599_v6, %v14839_v59 }
 0x290   :  { %14838 = vst [vmem:[#allocation70_spill] sm:$0xff] %v10244_v63  ;;  %vm2626_vm15 = vcmp.lt.s32.totalorder %v10239_v14, 0  ;;  %v2627_v58 = vsub.s32 0, %v10239_v14  ;;  %v2734_v28 = vmul.u32 %v2730_v16, %v2728_v57  ;;  %v2737_v7 = vshll.u32 %v10233_v62, 16 }
 0x291   :  { %vm2739_vm9 = vc.u32 %v2731_v2, %v2735_v47  ;;  %v2741_v53 = vadd.s32 %v2735_v47, %v2731_v2  ;;  %v10256_v26 = vmul.u32 %v2751_v10, %v2728_v57  ;;  %v2757_v52 = vshll.u32 %v10241_v60, 16 }
 0x292   :  { %v2628_v32 = vsel %vm2626_vm15, %v2627_v58, %v10239_v14  ;;  %v2740_v55 = vsel %vm2739_vm9, 1, %v14643_v51  ;;  %v10261_v6 = vshrl.u32 %v5316_v44, 23  ;;  %v10265_v16 = vshrl.u32 %v14726_v41, %v10131_v20 }
 0x293   :  { %v2629_v21 = vclz %v2628_v32  ;;  %v2742_v59 = vadd.s32 %v2740_v55, %v2734_v28  ;;  %vm2743_vm6 = vc.u32 %v2741_v53, %v2737_v7  ;;  %v856_v2 = vsel %vm823_vm1, %v8876_v23, 0.0 }
 0x294   :  { %v2744_v47 = vsel %vm2743_vm6, 1, %v14643_v51  ;;  %v2753_v58 = vmul.u32 %v2751_v10, %v2727_v18  ;;  %v888_v54 = vadd.f32 %v856_v2, %v631_v19  ;;  %vm1080_vm10 = vcmp.eq.s32.totalorder %v1000_v61, 1 }
 0x295   :  { %v7163_v43 = vadd.s32 4294967294, %v2629_v21  ;;  %v2756_v40 = vmul.u32 %v2752_v9, %v2728_v57  ;;  %v2746_v50 = vadd.s32 %v2744_v47, %v2742_v59  ;;  %v2759_v44 = vshll.u32 %v10256_v26, 16  ;;  %v489_v57 = vpop.permute.xlu1 %488 }
 0x296   :  { %vm2761_vm3 = vc.u32 %v2753_v58, %v2757_v52  ;;  %v2763_v28 = vadd.s32 %v2757_v52, %v2753_v58  ;;  %vm2525_vm12 = vcmp.lt.s32.totalorder %v14817_v22, 0  ;;  %v2694_v7 = vshrl.u32 %v14744_v49, %v14836_v42 }
 0x297   :  { %vm7164_vm0 = vcmp.lt.s32.totalorder %v7163_v43, 0  ;;  %v2715_v36 = vsel %vm2713_vm4, %v10180_v45, 2102212464  ;;  %v2762_v18 = vsel %vm2761_vm3, 1, %v14643_v51  ;;  %v2736_v19 = vshrl.u32 %v2732_v17, 16 }
 0x298   :  { %v2632_v10 = vsel %vm7164_vm0, 0, %v7163_v43  ;;  %v2764_v9 = vadd.s32 %v2762_v18, %v2756_v40  ;;  %vm2765_vm13 = vc.u32 %v2763_v28, %v2759_v44  ;;  %v1113_v53 = vsel %vm1080_vm10, %v8889_v4, 0.0 }
 0x299   :  { %v2617_v32 = vadd.s32 %v10166_v38, %v10159_v29  ;;  %v2633_v55 = vsub.s32 32, %v2632_v10  ;;  %v2637_v52 = vsub.s32 4294967266, %v2632_v10  ;;  %v14840_v42 = vand.u32 2147483647, %v14817_v22 }
 0x29a   :  { %v2714_v43 = vsel %vm2710_vm7, %v2694_v7, %v10168_v30  ;;  %v2716_v40 = vsel %vm2712_vm11, %v10178_v48, %v2715_v36  ;;  %v2747_v45 = vadd.s32 %v2746_v50, %v2736_v19  ;;  %v2766_v17 = vsel %vm2765_vm13, 1, %v14643_v51  ;;  %v10301_v48 = vpop.permute.xlu2 %745 }
 0x29b   :  { %vm10284_vm1 = vcmp.le.f32.partialorder %v14840_v42, 0.7853982  ;;  %v2634_v29 = vshll.u32 %v10239_v14, %v2632_v10  ;;  %v2635_v38 = vshrl.u32 %v2617_v32, %v2633_v55  ;;  %v2638_v61 = vadd.s32 127, %v2637_v52  ;;  %v10306_v14 = vld [vmem:[%s14370_s0 + $0xb8] sm:$0xff] }
 0x29c   :  { %v2768_v59 = vadd.s32 %v2766_v17, %v2764_v9  ;;  %vm567_vm4 = vcmp.eq.s32.totalorder %v489_v57, 1  ;;  %v1145_v2 = vadd.f32 %v1113_v53, %v888_v54  ;;  %v2647_v47 = vsub.s32 4, %v10221_v5  ;;  %v14843_v53 = vld [vmem:[#allocation62_spill] sm:$0xff] }
 0x29d   :  { %v2758_v58 = vshrl.u32 %v10241_v60, 16  ;;  %v2636_v18 = vor.u32 %v2635_v38, %v2634_v29  ;;  %v2639_v30 = vshll.u32 %v2638_v61, 23  ;;  %v2717_v7 = vsel %vm2711_vm14, %v2714_v43, %v2716_v40  ;;  %v10326_v43 = vld [vmem:[#allocation5] ss:$0 sm:$0xff] }
 0x29e   :  { %v2738_v50 = vshrl.u32 %v10233_v62, 16  ;;  %vm679_vm7 = vcmp.eq.s32.totalorder %v10306_v14, 2  ;;  %vm422_vm11 = vcmp.eq.s32.totalorder %v10306_v14, 1  ;;  %vm935_vm15 = vcmp.eq.s32.totalorder %v10101_v31, 3 }
 0x29f   :  { %v2769_v54 = vadd.s32 %v2768_v59, %v2758_v58  ;;  %v2640_v60 = vor.u32 4788187, %v2639_v30  ;;  %v711_v27 = vsel %vm679_vm7, 1, %v14643_v51  ;;  %v454_v36 = vsel %vm422_vm11, 1, %v14643_v51 }
 0x2a0   :  { %v10313_v62 = vadd.s32 %v2747_v45, %v2738_v50  ;;  %v2648_v10 = vsel %vm2525_vm12, %v2647_v47, %v10221_v5  ;;  %790 = vperm.xlu2 %7253, %v711_v27   ;;  %533 = vperm.xlu1 %7252, %v454_v36   ;;  %v967_v19 = vsel %vm935_vm15, 1, %v14643_v51  ;;  %v2760_v9 = vshrl.u32 %v10256_v26, 16  ;;  %v14844_v26 = vld [vmem:[#allocation98_spill] sm:$0xff] }
 0x2a1   :  { %v14564_v31 = vand.u32 2147483647, %v14843_v53  ;;  %vm824_vm14 = vcmp.eq.s32.totalorder %v10301_v48, 1  ;;  %v600_v32 = vsel %vm567_vm4, %v8133_v35, 0.0  ;;  %v2641_v55 = vand.u32 2147483647, %v2640_v60  ;;  %1044 = vperm.xlu0 %7251, %v967_v19  }
 0x2a2   :  { %v2643_v52 = vcvt.s32.f32 %v2636_v18  ;;  %v10324_v42 = vadd.s32 %v2763_v28, %v2759_v44  ;;  %v1181_v5 = vadd.f32 %v10326_v43, %v1145_v2  ;;  %v2770_v40 = vadd.s32 %v2769_v54, %v2760_v9 }
 0x2a3   :  { %v2771_v45 = vmul.u32 %v10216_v1, %v2717_v7  ;;  %v2854_v17 = vshrl.u32 %v14728_v34, %v14844_v26  ;;  %v2650_v57 = vsel %vm10284_vm1, 0, %v2648_v10  ;;  %v2857_v44 = vshrl.u32 %v14724_v25, %v14844_v26  ;;  %v14845_v1 = vld [vmem:[#allocation91_spill] sm:$0xff] }
 0x2a4   :  { %v2644_v29 = vmul.f32 %v2643_v52, %v2641_v55  ;;  %vm2773_vm9 = vc.u32 %v10313_v62, %v10324_v42  ;;  %6713 = vmatmul.f32.gmra.mxu2 %v1181_v5  ;;  %7061 = vst [vmem:[#allocation10 + $0x38] sm:$0xff] %v1181_v5  ;;  %v2774_v28 = vadd.s32 1, %v2770_v40  ;;  %v2840_v38 = vand.u32 8388607, %v14564_v31 }
 0x2a5   :  { %v2853_v61 = vshll.u32 %v14725_v37, %v14845_v1  ;;  %v2860_v59 = vshrl.u32 %v14726_v41, %v14844_v26  ;;  %v2856_v47 = vshll.u32 %v14728_v34, %v14845_v1  ;;  %v2862_v58 = vshll.u32 %v14726_v41, %v14845_v1 }
 0x2a6   :  { %v2645_v2 = vxor.u32 2147483648, %v2644_v29  ;;  %v2863_v18 = vshrl.u32 %v14731_v46, %v14844_v26  ;;  %v2775_v30 = vsel %vm2773_vm9, %v2774_v28, %v2770_v40  ;;  %v2851_v7 = vshrl.u32 %v14725_v37, %v14844_v26 }
 0x2a7   :  { %v10352_v50 = vor.u32 %v2854_v17, %v2853_v61  ;;  %v2859_v54 = vshll.u32 %v14724_v25, %v14845_v1  ;;  %v2776_v27 = vadd.s32 %v2775_v30, %v2771_v45  ;;  %v10358_v36 = vor.u32 %v2857_v44, %v2856_v47 }
 0x2a8   :  { %v2646_v60 = vsel %vm2525_vm12, %v2645_v2, %v2644_v29  ;;  %v2864_v10 = vor.u32 %v2863_v18, %v2862_v58  ;;  %v2841_v9 = vor.u32 8388608, %v2840_v38  ;;  %v2850_v55 = vshll.u32 %v14744_v49, %v14845_v1  ;;  %v14846_v29 = vld [vmem:[#allocation90_spill] sm:$0xff]  ;;  %v1003_v18 = vpop.permute.xlu0 %1002 }
 0x2a9   :  { %v10363_v19 = vsel %vm10284_vm1, %v14817_v22, %v2646_v60  ;;  %v2861_v52 = vor.u32 %v2860_v59, %v2859_v54  ;;  %v2667_v40 = vadd.s32 3, %v2650_v57  ;;  %v2777_v17 = vadd.s32 536870912, %v2776_v27 }
 0x2aa   :  { %v2651_v5 = vmul.f32 %v10363_v19, %v10363_v19  ;;  %vm2868_vm6 = vcmp.lt.s32.totalorder %v14846_v29, 4  ;;  %v10370_v45 = vor.u32 %v2851_v7, %v2850_v55  ;;  %vm2865_vm10 = vcmp.lt.s32.totalorder %v14846_v29, 1  ;;  %v14847_v7 = vld [vmem:[#allocation17_spill] sm:$0xff] }
 0x2ab   :  { %vm2867_vm3 = vcmp.lt.s32.totalorder %v14846_v29, 3  ;;  %v2878_v21 = vsel %vm2868_vm6, %v2864_v10, 1326507024  ;;  %v10376_v38 = vshrl.u32 %v2777_v17, 30  ;;  %v2877_v57 = vsel %vm2865_vm10, %v10352_v50, %v10358_v36 }
 0x2ac   :  { %v2652_v44 = vmul.f32 -0.001358992, %v2651_v5  ;;  %v2659_v28 = vmul.f32 -0.00019511016, %v2651_v5  ;;  %v857_v1 = vsel %vm824_vm14, %v8876_v23, 0.0  ;;  %v2879_v59 = vsel %vm2867_vm3, %v2861_v52, %v2878_v21 }
 0x2ad   :  { %v2874_v61 = vsel %vm2868_vm6, %v2861_v52, 920167782  ;;  %v10389_v2 = vshll.u32 %v2841_v9, 8  ;;  %v2779_v30 = vshll.u32 %v10376_v38, 30  ;;  %vm2866_vm12 = vcmp.lt.s32.totalorder %v14846_v29, 2 }
 0x2ae   :  { %v2653_v47 = vadd.f32 0.041655596, %v2652_v44  ;;  %v2660_v58 = vadd.f32 0.008332121, %v2659_v28  ;;  %v632_v54 = vadd.f32 %v600_v32, %v14847_v7  ;;  %v2668_v60 = vand.u32 3, %v2667_v40 }
 0x2af   :  { %v2873_v48 = vsel %vm2865_vm10, %v10370_v45, %v10352_v50  ;;  %v2880_v10 = vsel %vm2866_vm12, %v2877_v57, %v2879_v59  ;;  %v10400_v52 = vsub.s32 %v2776_v27, %v2779_v30  ;;  %v2875_v17 = vsel %vm2867_vm3, %v10358_v36, %v2874_v61 }
 0x2b0   :  { %v2654_v9 = vmul.f32 %v2653_v47, %v2651_v5  ;;  %v2661_v55 = vmul.f32 %v2660_v58, %v2651_v5  ;;  %vm1081_vm0 = vcmp.eq.s32.totalorder %v1003_v18, 1  ;;  %v10406_v32 = vand.u32 65535, %v10389_v2 }
 0x2b1   :  { %v2884_v40 = vand.u32 65535, %v2880_v10  ;;  %v2885_v21 = vshrl.u32 %v2880_v10, 16  ;;  %vm2781_vm13 = vcmp.lt.s32.totalorder %v10400_v52, 0  ;;  %v2782_v57 = vsub.s32 0, %v10400_v52 }
 0x2b2   :  { %v2655_v44 = vadd.f32 -0.4999988, %v2654_v9  ;;  %v2662_v28 = vadd.f32 -0.16666654, %v2661_v55  ;;  %vm2670_vm1 = vcmp.eq.s32.totalorder %v2668_v60, 0  ;;  %vm2673_vm4 = vcmp.eq.s32.totalorder %v2668_v60, 2 }
 0x2b3   :  { %v2849_v27 = vshrl.u32 %v14744_v49, %v14844_v26  ;;  %v10414_v61 = vsel %vm2866_vm12, %v2873_v48, %v2875_v17  ;;  %v10417_v59 = vshrl.u32 %v10389_v2, 16  ;;  %v10420_v47 = vmul.u32 %v2885_v21, %v10406_v32 }
 0x2b4   :  { %v2656_v58 = vmul.f32 %v2655_v44, %v2651_v5  ;;  %v2663_v30 = vmul.f32 %v2662_v28, %v2651_v5  ;;  %vm2669_vm7 = vcmp.lt.s32.totalorder %v2668_v60, 2  ;;  %v1114_v7 = vsel %vm1081_vm0, %v8889_v4, 0.0 }
 0x2b5   :  { %v2783_v10 = vsel %vm2781_vm13, %v2782_v57, %v10400_v52  ;;  %vm2666_vm11 = vweird.f32 %v14817_v22  ;;  %v889_v26 = vadd.f32 %v857_v1, %v632_v54  ;;  %v10427_v48 = vmul.u32 %v2884_v40, %v10417_v59  ;;  %v10464_v22 = vld [vmem:[%s14370_s0 + $0xc0] sm:$0xff] }
 0x2b6   :  { %v2784_v9 = vclz %v2783_v10  ;;  %v2890_v55 = vshll.u32 %v10420_v47, 16  ;;  %v2657_v17 = vadd.f32 1.0, %v2656_v58  ;;  %v2664_v31 = vadd.f32 1.0, %v2663_v30 }
 0x2b7   :  { %v2886_v44 = vmul.u32 %v2884_v40, %v10406_v32  ;;  %v2907_v5 = vshrl.u32 %v10414_v61, 16  ;;  %v1146_v28 = vadd.f32 %v1114_v7, %v889_v26  ;;  %v2772_v18 = vadd.s32 %v10324_v42, %v10313_v62 }
 0x2b8   :  { %v7166_v57 = vadd.s32 4294967294, %v2784_v9  ;;  %v2889_v33 = vmul.u32 %v2885_v21, %v10417_v59  ;;  %v2665_v1 = vmul.f32 %v2664_v31, %v10363_v19  ;;  %v2674_v54 = vxor.u32 2147483648, %v2657_v17 }
 0x2b9   :  { %vm2894_vm15 = vc.u32 %v2886_v44, %v2890_v55  ;;  %v2896_v10 = vadd.s32 %v2890_v55, %v2886_v44  ;;  %v2870_v58 = vsel %vm2868_vm6, %v10358_v36, 2102212464  ;;  %v2892_v40 = vshll.u32 %v10427_v48, 16 }
 0x2ba   :  { %vm7167_vm14 = vcmp.lt.s32.totalorder %v7166_v57, 0  ;;  %v2895_v30 = vsel %vm2894_vm15, 1, %v14643_v51  ;;  %v2671_v7 = vxor.u32 2147483648, %v2665_v1  ;;  %v10442_v42 = vmul.u32 %v2907_v5, %v10406_v32 }
 0x2bb   :  { %v2787_v26 = vsel %vm7167_vm14, 0, %v7166_v57  ;;  %v2897_v62 = vadd.s32 %v2895_v30, %v2889_v33  ;;  %vm2898_vm9 = vc.u32 %v2896_v10, %v2892_v40  ;;  %v2906_v19 = vand.u32 65535, %v10414_v61 }
 0x2bc   :  { %v2788_v21 = vsub.s32 32, %v2787_v26  ;;  %v2792_v31 = vsub.s32 4294967266, %v2787_v26  ;;  %v2672_v9 = vsel %vm2670_vm1, %v2657_v17, %v2671_v7  ;;  %v2675_v55 = vsel %vm2673_vm4, %v2674_v54, %v2665_v1  ;;  %v749_v54 = vpop.permute.xlu2 %748 }
 0x2bd   :  { %v2869_v36 = vsel %vm2865_vm10, %v2849_v27, %v10370_v45  ;;  %v2899_v44 = vsel %vm2898_vm9, 1, %v14643_v51  ;;  %v2676_v33 = vsel %vm2669_vm7, %v2672_v9, %v2675_v55  ;;  %v2789_v57 = vshll.u32 %v10400_v52, %v2787_v26 }
 0x2be   :  { %v2790_v30 = vshrl.u32 %v2772_v18, %v2788_v21  ;;  %v2793_v0 = vadd.s32 127, %v2792_v31  ;;  %v2677_v10 = vsel %vm2666_vm11, nan, %v2676_v33  ;;  %v2871_v61 = vsel %vm2867_vm3, %v10352_v50, %v2870_v58 }
 0x2bf   :  { %v2901_v17 = vadd.s32 %v2899_v44, %v2897_v62  ;;  %v2912_v1 = vshll.u32 %v10442_v42, 16  ;;  %6455 = vmatmul.f32.gmra.mxu0 %v2677_v10  ;;  %v2802_v60 = vsub.s32 4, %v10376_v38  ;;  %v2908_v52 = vmul.u32 %v2906_v19, %v10406_v32  ;;  %v492_v10 = vpop.permute.xlu1 %491 }
 0x2c0   :  { %v2791_v45 = vor.u32 %v2790_v30, %v2789_v57  ;;  %v2794_v27 = vshll.u32 %v2793_v0, 23  ;;  %vm680_vm6 = vcmp.eq.s32.totalorder %v10464_v22, 2  ;;  %vm423_vm10 = vcmp.eq.s32.totalorder %v10464_v22, 1 }
 0x2c1   :  { %vm936_vm3 = vcmp.eq.s32.totalorder %v10306_v14, 3  ;;  %v2891_v50 = vshrl.u32 %v10420_v47, 16  ;;  %v712_v0 = vsel %vm680_vm6, 1, %v14643_v51  ;;  %v455_v58 = vsel %vm423_vm10, 1, %v14643_v51 }
 0x2c2   :  { %v2795_v18 = vor.u32 4788187, %v2794_v27  ;;  %v2910_v32 = vmul.u32 %v2906_v19, %v10417_v59  ;;  %vm825_vm0 = vcmp.eq.s32.totalorder %v749_v54, 1  ;;  %793 = vperm.xlu2 %7253, %v712_v0   ;;  %536 = vperm.xlu1 %7252, %v455_v58   ;;  %v968_v40 = vsel %vm936_vm3, 1, %v14643_v51  ;;  %v14852_v54 = vld [vmem:[#allocation95_spill] sm:$0xff] }
 0x2c3   :  { %v2902_v7 = vadd.s32 %v2901_v17, %v2891_v50  ;;  %vm2916_vm13 = vc.u32 %v2908_v52, %v2912_v1  ;;  %vm2680_vm1 = vcmp.lt.s32.totalorder %v14831_v12, 0  ;;  %v2798_v14 = vcvt.s32.f32 %v2791_v45  ;;  %1047 = vperm.xlu0 %7251, %v968_v40   ;;  %v14853_v50 = vld [vmem:[#allocation89_spill] sm:$0xff] }
 0x2c4   :  { %v2796_v26 = vand.u32 2147483647, %v2795_v18  ;;  %v2872_v47 = vsel %vm2866_vm12, %v2869_v36, %v2871_v61  ;;  %v2803_v62 = vsel %vm2680_vm1, %v2802_v60, %v10376_v38  ;;  %v1182_v21 = vadd.f32 %v10326_v43, %v1146_v28  ;;  %v14848_v36 = vld [vmem:[#allocation61_spill] sm:$0xff] }
 0x2c5   :  { %v2893_v31 = vshrl.u32 %v10427_v48, 16  ;;  %v2911_v19 = vmul.u32 %v2907_v5, %v10417_v59  ;;  %v2914_v55 = vshll.u32 %v2910_v32, 16  ;;  %v2917_v44 = vsel %vm2916_vm13, 1, %v14643_v51 }
 0x2c6   :  { %v2799_v9 = vmul.f32 %v2798_v14, %v2796_v26  ;;  %v2918_v33 = vadd.s32 %v2912_v1, %v2908_v52  ;;  %v10486_v57 = vsel %vm825_vm0, %v8876_v23, 0.0  ;;  %6716 = vmatmul.f32.gmra.mxu2 %v1182_v21  ;;  %7062 = vst [vmem:[#allocation10 + $0x40] sm:$0xff] %v1182_v21  ;;  %v14568_v28 = vand.u32 2147483647, %v14848_v36 }
 0x2c7   :  { %v10488_v29 = vadd.s32 %v2902_v7, %v2893_v31  ;;  %v2919_v38 = vadd.s32 %v2917_v44, %v2911_v19  ;;  %v14849_v48 = vand.u32 2147483647, %v14831_v12  ;;  %v2926_v30 = vmul.u32 %v10389_v2, %v2872_v47 }
 0x2c8   :  { %v2800_v5 = vxor.u32 2147483648, %v2799_v9  ;;  %vm2920_vm4 = vc.u32 %v2918_v33, %v2914_v55  ;;  %v10501_v1 = vadd.s32 %v2918_v33, %v2914_v55  ;;  %v3006_v45 = vshrl.u32 %v14725_v37, %v14852_v54 }
 0x2c9   :  { %vm10493_vm12 = vcmp.le.f32.partialorder %v14849_v48, 0.7853982  ;;  %v2921_v17 = vsel %vm2920_vm4, 1, %v14643_v51  ;;  %v2913_v60 = vshrl.u32 %v10442_v42, 16  ;;  %v3005_v2 = vshll.u32 %v14744_v49, %v14853_v50 }
 0x2ca   :  { %v2805_v61 = vsel %vm10493_vm12, 0, %v2803_v62  ;;  %v2801_v27 = vsel %vm2680_vm1, %v2800_v5, %v2799_v9  ;;  %v2923_v52 = vadd.s32 %v2921_v17, %v2919_v38  ;;  %v2915_v0 = vshrl.u32 %v2910_v32, 16 }
 0x2cb   :  { %v10513_v18 = vsel %vm10493_vm12, %v14831_v12, %v2801_v27  ;;  %vm2928_vm7 = vc.u32 %v10488_v29, %v10501_v1  ;;  %v2995_v58 = vand.u32 8388607, %v14568_v28  ;;  %vm568_vm11 = vcmp.eq.s32.totalorder %v492_v10, 1 }
 0x2cc   :  { %v2806_v42 = vmul.f32 %v10513_v18, %v10513_v18  ;;  %v2924_v40 = vadd.s32 %v2923_v52, %v2913_v60  ;;  %v10521_v7 = vor.u32 %v3006_v45, %v3005_v2  ;;  %v3009_v26 = vshrl.u32 %v14728_v34, %v14852_v54  ;;  %v14854_v52 = vld [vmem:[#allocation87_spill] sm:$0xff] }
 0x2cd   :  { %v3008_v14 = vshll.u32 %v14725_v37, %v14853_v50  ;;  %v3012_v32 = vshrl.u32 %v14724_v25, %v14852_v54  ;;  %v3014_v47 = vshll.u32 %v14724_v25, %v14853_v50  ;;  %v3015_v62 = vshrl.u32 %v14726_v41, %v14852_v54 }
 0x2ce   :  { %v2807_v21 = vmul.f32 -0.001358992, %v2806_v42  ;;  %v2814_v31 = vmul.f32 -0.00019511016, %v2806_v42  ;;  %v2925_v19 = vadd.s32 %v2924_v40, %v2915_v0  ;;  %v3011_v9 = vshll.u32 %v14728_v34, %v14853_v50 }
 0x2cf   :  { %v10535_v55 = vor.u32 %v3009_v26, %v3008_v14  ;;  %v3016_v44 = vor.u32 %v3015_v62, %v3014_v47  ;;  %v3017_v33 = vshll.u32 %v14726_v41, %v14853_v50  ;;  %v3018_v38 = vshrl.u32 %v14731_v46, %v14852_v54 }
 0x2d0   :  { %v2808_v48 = vadd.f32 0.041655596, %v2807_v21  ;;  %v2815_v59 = vadd.f32 0.008332121, %v2814_v31  ;;  %v2929_v5 = vadd.s32 1, %v2925_v19  ;;  %v10541_v17 = vor.u32 %v3012_v32, %v3011_v9 }
 0x2d1   :  { %v2822_v45 = vadd.s32 3, %v2805_v61  ;;  %v2996_v27 = vor.u32 8388608, %v2995_v58  ;;  %v3019_v60 = vor.u32 %v3018_v38, %v3017_v33  ;;  %vm3020_vm15 = vcmp.lt.s32.totalorder %v14854_v52, 1 }
 0x2d2   :  { %v2809_v2 = vmul.f32 %v2808_v48, %v2806_v42  ;;  %v2816_v0 = vmul.f32 %v2815_v59, %v2806_v42  ;;  %v2930_v40 = vsel %vm2928_vm7, %v2929_v5, %v2925_v19  ;;  %vm3023_vm14 = vcmp.lt.s32.totalorder %v14854_v52, 4 }
 0x2d3   :  { %v2931_v50 = vadd.s32 %v2930_v40, %v2926_v30  ;;  %vm3022_vm9 = vcmp.lt.s32.totalorder %v14854_v52, 3  ;;  %v3028_v61 = vsel %vm3020_vm15, %v10521_v7, %v10535_v55  ;;  %v3029_v58 = vsel %vm3023_vm14, %v3016_v44, 920167782 }
 0x2d4   :  { %v2810_v26 = vadd.f32 -0.4999988, %v2809_v2  ;;  %v2817_v14 = vadd.f32 -0.16666654, %v2816_v0  ;;  %vm3021_vm6 = vcmp.lt.s32.totalorder %v14854_v52, 2  ;;  %v3030_v32 = vsel %vm3022_vm9, %v10541_v17, %v3029_v58 }
 0x2d5   :  { %v2932_v47 = vadd.s32 536870912, %v2931_v50  ;;  %v10561_v30 = vsel %vm3021_vm6, %v3028_v61, %v3030_v32  ;;  %v3032_v62 = vsel %vm3020_vm15, %v10535_v55, %v10541_v17  ;;  %v3033_v21 = vsel %vm3023_vm14, %v3019_v60, 1326507024  ;;  %v1006_v60 = vpop.permute.xlu0 %1005  ;;  %v14855_v61 = vld [vmem:[#allocation26_spill] sm:$0xff] }
 0x2d6   :  { %v2811_v31 = vmul.f32 %v2810_v26, %v2806_v42  ;;  %v2818_v19 = vmul.f32 %v2817_v14, %v2806_v42  ;;  %v3034_v9 = vsel %vm3022_vm9, %v3016_v44, %v3033_v21  ;;  %v10571_v33 = vshll.u32 %v2996_v27, 8 }
 0x2d7   :  { %v601_v38 = vsel %vm568_vm11, %v8133_v35, 0.0  ;;  %v2823_v48 = vand.u32 3, %v2822_v45  ;;  %v10575_v59 = vshrl.u32 %v2932_v47, 30  ;;  %v3035_v5 = vsel %vm3021_vm6, %v3032_v62, %v3034_v9 }
 0x2d8   :  { %v2812_v2 = vadd.f32 1.0, %v2811_v31  ;;  %v2819_v0 = vadd.f32 1.0, %v2818_v19  ;;  %vm2821_vm10 = vweird.f32 %v14831_v12  ;;  %v3062_v42 = vshrl.u32 %v10561_v30, 16 }
 0x2d9   :  { %v2934_v44 = vshll.u32 %v10575_v59, 30  ;;  %v3037_v27 = vand.u32 65535, %v10571_v33  ;;  %v3039_v40 = vand.u32 65535, %v3035_v5  ;;  %v3040_v10 = vshrl.u32 %v3035_v5, 16 }
 0x2da   :  { %v633_v45 = vadd.f32 %v601_v38, %v14855_v61  ;;  %v2820_v58 = vmul.f32 %v2819_v0, %v10513_v18  ;;  %v2829_v26 = vxor.u32 2147483648, %v2812_v2  ;;  %v3038_v14 = vshrl.u32 %v10571_v33, 16 }
 0x2db   :  { %vm2824_vm3 = vcmp.lt.s32.totalorder %v2823_v48, 2  ;;  %vm2825_vm0 = vcmp.eq.s32.totalorder %v2823_v48, 0  ;;  %v2935_v32 = vsub.s32 %v2931_v50, %v2934_v44  ;;  %v10586_v47 = vmul.u32 %v3040_v10, %v3037_v27 }
 0x2dc   :  { %v2826_v62 = vxor.u32 2147483648, %v2820_v58  ;;  %vm2828_vm13 = vcmp.eq.s32.totalorder %v2823_v48, 2  ;;  %vm1082_vm1 = vcmp.eq.s32.totalorder %v1006_v60, 1  ;;  %v10588_v21 = vmul.u32 %v3039_v40, %v3038_v14 }
 0x2dd   :  { %vm2936_vm12 = vcmp.lt.s32.totalorder %v2935_v32, 0  ;;  %v2937_v31 = vsub.s32 0, %v2935_v32  ;;  %v3061_v19 = vand.u32 65535, %v10561_v30  ;;  %v10591_v9 = vmul.u32 %v3062_v42, %v3037_v27 }
 0x2de   :  { %v2827_v18 = vsel %vm2825_vm0, %v2812_v2, %v2826_v62  ;;  %v2830_v38 = vsel %vm2828_vm13, %v2829_v26, %v2820_v58  ;;  %v3041_v5 = vmul.u32 %v3039_v40, %v3037_v27  ;;  %v3045_v0 = vshll.u32 %v10586_v47, 16 }
 0x2df   :  { %v2831_v50 = vsel %vm2824_vm3, %v2827_v18, %v2830_v38  ;;  %v2938_v44 = vsel %vm2936_vm12, %v2937_v31, %v2935_v32  ;;  %v3044_v61 = vmul.u32 %v3040_v10, %v3038_v14  ;;  %v3047_v28 = vshll.u32 %v10588_v21, 16 }
 0x2e0   :  { %v2832_v63 = vsel %vm2821_vm10, nan, %v2831_v50  ;;  %v2939_v8 = vclz %v2938_v44  ;;  %vm3049_vm4 = vc.u32 %v3041_v5, %v3045_v0  ;;  %v3051_v39 = vadd.s32 %v3045_v0, %v3041_v5 }
 0x2e1   :  { %v10600_v30 = vshrl.u32 %v14731_v46, %v10131_v20  ;;  %6458 = vmatmul.f32.gmra.mxu0 %v2832_v63  ;;  %v890_v2 = vadd.f32 %v10486_v57, %v633_v45  ;;  %vm2835_vm7 = vcmp.lt.s32.totalorder %v14843_v53, 0  ;;  %v3050_v48 = vsel %vm3049_vm4, 1, %v14643_v51 }
 0x2e2   :  { %v7169_v40 = vadd.s32 4294967294, %v2939_v8  ;;  %v3052_v10 = vadd.s32 %v3050_v48, %v3044_v61  ;;  %vm3053_vm11 = vc.u32 %v3051_v39, %v3047_v28  ;;  %v10605_v58 = vmul.u32 %v3061_v19, %v3038_v14 }
 0x2e3   :  { %v1115_v12 = vsel %vm1082_vm1, %v8889_v4, 0.0  ;;  %v3054_v26 = vsel %vm3053_vm11, 1, %v14643_v51  ;;  %v3063_v62 = vmul.u32 %v3061_v19, %v3037_v27  ;;  %v3067_v31 = vshll.u32 %v10591_v9, 16 }
 0x2e4   :  { %v14856_v63 = vand.u32 2147483647, %v14843_v53  ;;  %v2927_v8 = vadd.s32 %v10501_v1, %v10488_v29  ;;  %vm7170_vm3 = vcmp.lt.s32.totalorder %v7169_v40, 0  ;;  %v2957_v39 = vsub.s32 4, %v10575_v59 }
 0x2e5   :  { %v3025_v28 = vsel %vm3023_vm14, %v10541_v17, 2102212464  ;;  %v2942_v60 = vsel %vm7170_vm3, 0, %v7169_v40  ;;  %v3069_v27 = vshll.u32 %v10605_v58, 16  ;;  %vm3071_vm0 = vc.u32 %v3063_v62, %v3067_v31 }
 0x2e6   :  { %vm10613_vm10 = vcmp.le.f32.partialorder %v14856_v63, 0.7853982  ;;  %v3073_v45 = vadd.s32 %v3067_v31, %v3063_v62  ;;  %v2943_v19 = vsub.s32 32, %v2942_v60  ;;  %v2947_v18 = vsub.s32 4294967266, %v2942_v60 }
 0x2e7   :  { %v3056_v38 = vadd.s32 %v3054_v26, %v3052_v10  ;;  %v3066_v5 = vmul.u32 %v3062_v42, %v3038_v14  ;;  %v3004_v0 = vshrl.u32 %v14744_v49, %v14852_v54  ;;  %v3046_v29 = vshrl.u32 %v10586_v47, 16 }
 0x2e8   :  { %v3072_v1 = vsel %vm3071_vm0, 1, %v14643_v51  ;;  %vm3075_vm13 = vc.u32 %v3073_v45, %v3069_v27  ;;  %v2944_v50 = vshll.u32 %v2935_v32, %v2942_v60  ;;  %v2945_v44 = vshrl.u32 %v2927_v8, %v2943_v19  ;;  %v495_v8 = vpop.permute.xlu1 %494  ;;  %v14859_v19 = vld [vmem:[#allocation66_spill] sm:$0xff] }
 0x2e9   :  { %v2948_v17 = vadd.s32 127, %v2947_v18  ;;  %v3074_v61 = vadd.s32 %v3072_v1, %v3066_v5  ;;  %v1147_v48 = vadd.f32 %v1115_v12, %v890_v2  ;;  %v3024_v40 = vsel %vm3020_vm15, %v3004_v0, %v10521_v7  ;;  %v10641_v2 = vld [vmem:[%s14370_s0 + $0xc8] sm:$0xff] }
 0x2ea   :  { %v3026_v42 = vsel %vm3022_vm9, %v10535_v55, %v3025_v28  ;;  %v3076_v54 = vsel %vm3075_vm13, 1, %v14643_v51  ;;  %v2946_v14 = vor.u32 %v2945_v44, %v2944_v50  ;;  %v2958_v32 = vsel %vm2835_vm7, %v2957_v39, %v10575_v59  ;;  %v752_v50 = vpop.permute.xlu2 %751 }
 0x2eb   :  { %v2949_v47 = vshll.u32 %v2948_v17, 23  ;;  %v3057_v10 = vadd.s32 %v3056_v38, %v3046_v29  ;;  %vm681_vm15 = vcmp.eq.s32.totalorder %v10641_v2, 2  ;;  %vm424_vm14 = vcmp.eq.s32.totalorder %v10641_v2, 1 }
 0x2ec   :  { %vm937_vm9 = vcmp.eq.s32.totalorder %v10464_v22, 3  ;;  %v3078_v7 = vadd.s32 %v3076_v54, %v3074_v61  ;;  %v713_v12 = vsel %vm681_vm15, 1, %v14643_v51  ;;  %v456_v26 = vsel %vm424_vm14, 1, %v14643_v51 }
 0x2ed   :  { %v2950_v55 = vor.u32 4788187, %v2949_v47  ;;  %v3048_v59 = vshrl.u32 %v10588_v21, 16  ;;  %v2960_v62 = vsel %vm10613_vm10, 0, %v2958_v32  ;;  %796 = vperm.xlu2 %7253, %v713_v12   ;;  %539 = vperm.xlu1 %7252, %v456_v26   ;;  %v969_v31 = vsel %vm937_vm9, 1, %v14643_v51 }
 0x2ee   :  { %v3027_v63 = vsel %vm3021_vm6, %v3024_v40, %v3026_v42  ;;  %v3068_v22 = vshrl.u32 %v10591_v9, 16  ;;  %v2953_v28 = vcvt.s32.f32 %v2946_v14  ;;  %1050 = vperm.xlu0 %7251, %v969_v31   ;;  %v3143_v21 = vand.u32 2147483647, %v14859_v19 }
 0x2ef   :  { %v2951_v39 = vand.u32 2147483647, %v2950_v55  ;;  %v10655_v60 = vadd.s32 %v3057_v10, %v3048_v59  ;;  %v7228_v18 = vadd.s32 4294967169, %v10248_v11  ;;  %v1183_v38 = vadd.f32 %v10326_v43, %v1147_v48 }
 0x2f0   :  { %v3070_v5 = vshrl.u32 %v10605_v58, 16  ;;  %v3079_v0 = vadd.s32 %v3078_v7, %v3068_v22  ;;  %v10663_v52 = vor.u32 %v10265_v16, %v10227_v15  ;;  %v10666_v9 = vadd.s32 4294967169, %v10261_v6  ;;  %v14861_v6 = vld [vmem:[#allocation97_spill] sm:$0xff] }
 0x2f1   :  { %v2954_v29 = vmul.f32 %v2953_v28, %v2951_v39  ;;  %v10668_v1 = vadd.s32 %v3073_v45, %v3069_v27  ;;  %vm569_vm6 = vcmp.eq.s32.totalorder %v495_v8, 1  ;;  %v2977_v44 = vadd.s32 3, %v2960_v62  ;;  %6719 = vmatmul.f32.gmra.mxu2 %v1183_v38  ;;  %7063 = vst [vmem:[#allocation10 + $0x48] sm:$0xff] %v1183_v38  ;;  %v14862_v45 = vld [vmem:[#allocation106_spill] sm:$0xff] }
 0x2f2   :  { %14860 = vst [vmem:[#allocation72_spill] sm:$0xff] %v10663_v52  ;;  %v3080_v11 = vadd.s32 %v3079_v0, %v3070_v5  ;;  %v3081_v17 = vmul.u32 %v10571_v33, %v3027_v63  ;;  %v3150_v15 = vand.u32 8388607, %v3143_v21  ;;  %v3160_v16 = vshll.u32 %v14744_v49, %v14861_v6  ;;  %v14863_v63 = vld [vmem:[#allocation105_spill] sm:$0xff] }
 0x2f3   :  { %v2955_v58 = vxor.u32 2147483648, %v2954_v29  ;;  %vm3083_vm1 = vc.u32 %v10655_v60, %v10668_v1  ;;  %v3161_v61 = vshrl.u32 %v14725_v37, %v14862_v45  ;;  %v3164_v48 = vshrl.u32 %v14728_v34, %v14862_v45 }
 0x2f4   :  { %v3084_v27 = vadd.s32 1, %v3080_v11  ;;  %v3167_v33 = vshrl.u32 %v14724_v25, %v14862_v45  ;;  %vm826_vm12 = vcmp.eq.s32.totalorder %v752_v50, 1  ;;  %v3163_v42 = vshll.u32 %v14725_v37, %v14861_v6 }
 0x2f5   :  { %v2956_v40 = vsel %vm2835_vm7, %v2955_v58, %v2954_v29  ;;  %v3169_v54 = vshll.u32 %v14724_v25, %v14861_v6  ;;  %v3170_v14 = vshrl.u32 %v14726_v41, %v14862_v45  ;;  %v3166_v10 = vshll.u32 %v14728_v34, %v14861_v6 }
 0x2f6   :  { %v10694_v47 = vsel %vm10613_vm10, %v14843_v53, %v2956_v40  ;;  %v3085_v32 = vsel %vm3083_vm1, %v3084_v27, %v3080_v11  ;;  %v3172_v7 = vshll.u32 %v14726_v41, %v14861_v6  ;;  %v3173_v59 = vshrl.u32 %v14731_v46, %v14862_v45 }
 0x2f7   :  { %v2961_v55 = vmul.f32 %v10694_v47, %v10694_v47  ;;  %v3086_v12 = vadd.s32 %v3085_v32, %v3081_v17  ;;  %v3171_v26 = vor.u32 %v3170_v14, %v3169_v54  ;;  %v10704_v62 = vor.u32 %v3161_v61, %v3160_v16 }
 0x2f8   :  { %v10706_v57 = vor.u32 %v3164_v48, %v3163_v42  ;;  %v10708_v31 = vor.u32 %v3167_v33, %v3166_v10  ;;  %vm3178_vm4 = vcmp.lt.s32.totalorder %v14863_v63, 4  ;;  %v3174_v38 = vor.u32 %v3173_v59, %v3172_v7  ;;  %v1009_v10 = vpop.permute.xlu0 %1008 }
 0x2f9   :  { %v2962_v22 = vmul.f32 -0.001358992, %v2961_v55  ;;  %v2969_v39 = vmul.f32 -0.00019511016, %v2961_v55  ;;  %v3087_v28 = vadd.s32 536870912, %v3086_v12  ;;  %v602_v5 = vsel %vm569_vm6, %v8133_v35, 0.0 }
 0x2fa   :  { %v10713_v0 = vand.u32 3, %v2977_v44  ;;  %v3151_v29 = vor.u32 8388608, %v3150_v15  ;;  %v3184_v11 = vsel %vm3178_vm4, %v3171_v26, 920167782  ;;  %vm3175_vm7 = vcmp.lt.s32.totalorder %v14863_v63, 1 }
 0x2fb   :  { %v2963_v17 = vadd.f32 0.041655596, %v2962_v22  ;;  %v2970_v58 = vadd.f32 0.008332121, %v2969_v39  ;;  %v10717_v6 = vshrl.u32 %v3087_v28, 30  ;;  %vm3177_vm11 = vcmp.lt.s32.totalorder %v14863_v63, 3 }
 0x2fc   :  { %v3183_v8 = vsel %vm3175_vm7, %v10704_v62, %v10706_v57  ;;  %v3187_v44 = vsel %vm3175_vm7, %v10706_v57, %v10708_v31  ;;  %v3188_v15 = vsel %vm3178_vm4, %v3174_v38, 1326507024  ;;  %v3185_v48 = vsel %vm3177_vm11, %v10708_v31, %v3184_v11  ;;  %v14864_v22 = vld [vmem:[#allocation25_spill] sm:$0xff] }
 0x2fd   :  { %v2964_v16 = vmul.f32 %v2963_v17, %v2961_v55  ;;  %v2971_v27 = vmul.f32 %v2970_v58, %v2961_v55  ;;  %v3089_v61 = vshll.u32 %v10717_v6, 30  ;;  %v5809_v33 = vor.u32 %v10600_v30, %v10237_v56 }
 0x2fe   :  { %v10737_v40 = vadd.s32 1, %v7228_v18  ;;  %v3189_v42 = vsel %vm3177_vm11, %v3171_v26, %v3188_v15  ;;  %v10741_v54 = vshll.u32 %v3151_v29, 8  ;;  %vm3176_vm10 = vcmp.lt.s32.totalorder %v14863_v63, 2 }
 0x2ff   :  { %v2965_v14 = vadd.f32 -0.4999988, %v2964_v16  ;;  %v2972_v32 = vadd.f32 -0.16666654, %v2971_v27  ;;  %v10743_v7 = vsub.s32 %v3086_v12, %v3089_v61  ;;  %v859_v59 = vsel %vm826_vm12, %v8876_v23, 0.0 }
 0x300   :  { %v634_v39 = vadd.f32 %v602_v5, %v14864_v22  ;;  %v10751_v18 = vsel %vm3176_vm10, %v3183_v8, %v3185_v48  ;;  %v3190_v26 = vsel %vm3176_vm10, %v3187_v44, %v3189_v42  ;;  %vm2979_vm3 = vcmp.lt.s32.totalorder %v10713_v0, 2 }
 0x301   :  { %v2966_v28 = vmul.f32 %v2965_v14, %v2961_v55  ;;  %v2973_v38 = vmul.f32 %v2972_v32, %v2961_v55  ;;  %vm3091_vm0 = vcmp.lt.s32.totalorder %v10743_v7, 0  ;;  %v3092_v12 = vsub.s32 0, %v10743_v7 }
 0x302   :  { %vm2976_vm13 = vweird.f32 %v14843_v53  ;;  %vm1083_vm15 = vcmp.eq.s32.totalorder %v1009_v10, 1  ;;  %v10760_v50 = vand.u32 65535, %v10741_v54  ;;  %v3194_v5 = vand.u32 65535, %v3190_v26 }
 0x303   :  { %v3195_v29 = vshrl.u32 %v3190_v26, 16  ;;  %v2967_v11 = vadd.f32 1.0, %v2966_v28  ;;  %v2974_v17 = vadd.f32 1.0, %v2973_v38  ;;  %v3093_v58 = vsel %vm3091_vm0, %v3092_v12, %v10743_v7 }
 0x304   :  { %v10764_v55 = vshrl.u32 %v10741_v54, 16  ;;  %vm2980_vm14 = vcmp.eq.s32.totalorder %v10713_v0, 0  ;;  %v3094_v8 = vclz %v3093_v58  ;;  %v3217_v15 = vshrl.u32 %v10751_v18, 16 }
 0x305   :  { %v10768_v44 = vmul.u32 %v3195_v29, %v10760_v50  ;;  %v2975_v16 = vmul.f32 %v2974_v17, %v10694_v47  ;;  %vm2983_vm9 = vcmp.eq.s32.totalorder %v10713_v0, 2  ;;  %v2984_v27 = vxor.u32 2147483648, %v2967_v11 }
 0x306   :  { %v10774_v61 = vmul.u32 %v3194_v5, %v10764_v55  ;;  %v891_v48 = vadd.f32 %v859_v59, %v634_v39  ;;  %v1116_v42 = vsel %vm1083_vm15, %v8889_v4, 0.0  ;;  %v3082_v14 = vadd.s32 %v10668_v1, %v10655_v60 }
 0x307   :  { %v7172_v32 = vadd.s32 4294967294, %v3094_v8  ;;  %v2981_v22 = vxor.u32 2147483648, %v2975_v16  ;;  %v3196_v26 = vmul.u32 %v3194_v5, %v10760_v50  ;;  %v3200_v28 = vshll.u32 %v10768_v44, 16 }
 0x308   :  { %v3216_v47 = vand.u32 65535, %v10751_v18  ;;  %v2985_v38 = vsel %vm2983_vm9, %v2984_v27, %v2975_v16  ;;  %v3202_v12 = vshll.u32 %v10774_v61, 16  ;;  %v10787_v10 = vmul.u32 %v3217_v15, %v10760_v50 }
 0x309   :  { %vm7173_vm6 = vcmp.lt.s32.totalorder %v7172_v32, 0  ;;  %v2982_v60 = vsel %vm2980_vm14, %v2967_v11, %v2981_v22  ;;  %vm2990_vm1 = vcmp.lt.s32.totalorder %v14848_v36, 0  ;;  %vm3204_vm12 = vc.u32 %v3196_v26, %v3200_v28 }
 0x30a   :  { %v3097_v1 = vsel %vm7173_vm6, 0, %v7172_v32  ;;  %v3206_v59 = vadd.s32 %v3200_v28, %v3196_v26  ;;  %v2986_v39 = vsel %vm2979_vm3, %v2982_v60, %v2985_v38  ;;  %v3199_v58 = vmul.u32 %v3195_v29, %v10764_v55 }
 0x30b   :  { %v3098_v5 = vsub.s32 32, %v3097_v1  ;;  %v3102_v17 = vsub.s32 4294967266, %v3097_v1  ;;  %v2987_v8 = vsel %vm2976_vm13, nan, %v2986_v39  ;;  %v3099_v16 = vshll.u32 %v10743_v7, %v3097_v1 }
 0x30c   :  { %v3205_v27 = vsel %vm3204_vm12, 1, %v14643_v51  ;;  %vm3208_vm0 = vc.u32 %v3206_v59, %v3202_v12  ;;  %6461 = vmatmul.f32.gmra.mxu0 %v2987_v8  ;;  %v1148_v0 = vadd.f32 %v1116_v42, %v891_v48  ;;  %v14865_v28 = vand.u32 2147483647, %v14848_v36  ;;  %v10819_v42 = vld [vmem:[%s14370_s0 + $0xd0] sm:$0xff] }
 0x30d   :  { %v3100_v11 = vshrl.u32 %v3082_v14, %v3098_v5  ;;  %v3103_v32 = vadd.s32 127, %v3102_v17  ;;  %v3207_v22 = vadd.s32 %v3205_v27, %v3199_v58  ;;  %v3209_v26 = vsel %vm3208_vm0, 1, %v14643_v51 }
 0x30e   :  { %vm10802_vm3 = vcmp.le.f32.partialorder %v14865_v28, 0.7853982  ;;  %v3159_v53 = vshrl.u32 %v14744_v49, %v14862_v45  ;;  %v3180_v7 = vsel %vm3178_vm4, %v10708_v31, 2102212464  ;;  %vm14573_vm13 = vcmp.lt.s32.totalorder %v9971_v13, 4 }
 0x30f   :  { %v3101_v29 = vor.u32 %v3100_v11, %v3099_v16  ;;  %v3104_v14 = vshll.u32 %v3103_v32, 23  ;;  %v3112_v12 = vsub.s32 4, %v10717_v6  ;;  %v10814_v48 = vmul.u32 %v3216_v47, %v10764_v55 }
 0x310   :  { %vm682_vm15 = vcmp.eq.s32.totalorder %v10819_v42, 2  ;;  %vm425_vm14 = vcmp.eq.s32.totalorder %v10819_v42, 1  ;;  %vm938_vm4 = vcmp.eq.s32.totalorder %v10641_v2, 3  ;;  %v3211_v45 = vadd.s32 %v3209_v26, %v3207_v22 }
 0x311   :  { %v3105_v31 = vor.u32 4788187, %v3104_v14  ;;  %v714_v60 = vsel %vm682_vm15, 1, %v14643_v51  ;;  %v457_v1 = vsel %vm425_vm14, 1, %v14643_v51  ;;  %v3222_v59 = vshll.u32 %v10787_v10, 16 }
 0x312   :  { %799 = vperm.xlu2 %7253, %v714_v60   ;;  %542 = vperm.xlu1 %7252, %v457_v1   ;;  %v970_v39 = vsel %vm938_vm4, 1, %v14643_v51  ;;  %v3179_v5 = vsel %vm3175_vm7, %v3159_v53, %v10704_v62  ;;  %v3181_v2 = vsel %vm3177_vm11, %v10706_v57, %v3180_v7  ;;  %v3201_v17 = vshrl.u32 %v10768_v44, 16 }
 0x313   :  { %v3106_v58 = vand.u32 2147483647, %v3105_v31  ;;  %v3108_v8 = vcvt.s32.f32 %v3101_v29  ;;  %v3113_v16 = vsel %vm2990_vm1, %v3112_v12, %v10717_v6  ;;  %1053 = vperm.xlu0 %7251, %v970_v39   ;;  %v3218_v27 = vmul.u32 %v3216_v47, %v10760_v50 }
 0x314   :  { %v1184_v11 = vadd.f32 %v10326_v43, %v1148_v0  ;;  %v3203_v32 = vshrl.u32 %v10774_v61, 16  ;;  %v3212_v62 = vadd.s32 %v3211_v45, %v3201_v17  ;;  %v3221_v57 = vmul.u32 %v3217_v15, %v10764_v55  ;;  %v14868_v61 = vld [vmem:[#allocation65_spill] sm:$0xff]  ;;  %v498_v45 = vpop.permute.xlu1 %497  ;;  %v14871_v17 = vld [vmem:[#allocation104_spill] sm:$0xff] }
 0x315   :  { %v3109_v22 = vmul.f32 %v3108_v8, %v3106_v58  ;;  %v3224_v44 = vshll.u32 %v10814_v48, 16  ;;  %vm3226_vm7 = vc.u32 %v3218_v27, %v3222_v59  ;;  %v3228_v26 = vadd.s32 %v3222_v59, %v3218_v27 }
 0x316   :  { %v3115_v6 = vsel %vm10802_vm3, 0, %v3113_v16  ;;  %6722 = vmatmul.f32.gmra.mxu2 %v1184_v11  ;;  %7064 = vst [vmem:[#allocation10 + $0x50] sm:$0xff] %v1184_v11  ;;  %v3182_v43 = vsel %vm3176_vm10, %v3179_v5, %v3181_v2  ;;  %v3227_v50 = vsel %vm3226_vm7, 1, %v14643_v51  ;;  %v14572_v47 = vand.u32 2147483647, %v14868_v61  ;;  %v14870_v5 = vld [vmem:[#allocation96_spill] sm:$0xff] }
 0x317   :  { %v3110_v0 = vxor.u32 2147483648, %v3109_v22  ;;  %v10851_v18 = vadd.s32 %v3212_v62, %v3203_v32  ;;  %v3229_v55 = vadd.s32 %v3227_v50, %v3221_v57  ;;  %vm3230_vm11 = vc.u32 %v3228_v26, %v3224_v44 }
 0x318   :  { %v10856_v15 = vsel %vm14573_vm13, %v10663_v52, 920167782  ;;  %v10859_v28 = vadd.s32 1, %v10666_v9  ;;  %v3231_v63 = vsel %vm3230_vm11, 1, %v14643_v51  ;;  %v3305_v53 = vand.u32 8388607, %v14572_v47 }
 0x319   :  { %14869 = vst [vmem:[#allocation51_spill] sm:$0xff] %v10856_v15  ;;  %v3111_v7 = vsel %vm2990_vm1, %v3110_v0, %v3109_v22  ;;  %v3223_v29 = vshrl.u32 %v10787_v10, 16  ;;  %v10867_v14 = vadd.s32 %v3228_v26, %v3224_v44  ;;  %v3233_v12 = vadd.s32 %v3231_v63, %v3229_v55 }
 0x31a   :  { %v10872_v31 = vsel %vm10802_vm3, %v14848_v36, %v3111_v7  ;;  %v3132_v9 = vadd.s32 3, %v3115_v6  ;;  %v3225_v60 = vshrl.u32 %v10814_v48, 16  ;;  %v3236_v1 = vmul.u32 %v10741_v54, %v3182_v43 }
 0x31b   :  { %v3116_v59 = vmul.f32 %v10872_v31, %v10872_v31  ;;  %v3234_v39 = vadd.s32 %v3233_v12, %v3223_v29  ;;  %vm3238_vm10 = vc.u32 %v10851_v18, %v10867_v14  ;;  %v3306_v10 = vor.u32 8388608, %v3305_v53 }
 0x31c   :  { %v3315_v2 = vshll.u32 %v14744_v49, %v14870_v5  ;;  %v3316_v38 = vshrl.u32 %v14725_v37, %v14871_v17  ;;  %v3319_v58 = vshrl.u32 %v14728_v34, %v14871_v17  ;;  %v3322_v54 = vshrl.u32 %v14724_v25, %v14871_v17 }
 0x31d   :  { %vm570_vm9 = vcmp.eq.s32.totalorder %v498_v45, 1  ;;  %v3117_v48 = vmul.f32 -0.001358992, %v3116_v59  ;;  %v3124_v8 = vmul.f32 -0.00019511016, %v3116_v59  ;;  %v3235_v16 = vadd.s32 %v3234_v39, %v3225_v60  ;;  %v14872_v60 = vld [vmem:[#allocation99_spill] sm:$0xff] }
 0x31e   :  { %v3318_v27 = vshll.u32 %v14725_v37, %v14870_v5  ;;  %v3321_v11 = vshll.u32 %v14728_v34, %v14870_v5  ;;  %v3324_v32 = vshll.u32 %v14724_v25, %v14870_v5  ;;  %v3325_v62 = vshrl.u32 %v14726_v41, %v14871_v17  ;;  %v7282_v39 = vld [vmem:[%s14372_s2] ss:$0 sm:$0xff] }
 0x31f   :  { %v3328_v57 = vshrl.u32 %v14731_v46, %v14871_v17  ;;  %v3118_v22 = vadd.f32 0.041655596, %v3117_v48  ;;  %v3125_v44 = vadd.f32 0.008332121, %v3124_v8  ;;  %v3239_v26 = vadd.s32 1, %v3235_v16  ;;  %v755_v8 = vpop.permute.xlu2 %754 }
 0x320   :  { %v3327_v6 = vshll.u32 %v14726_v41, %v14870_v5  ;;  %v10900_v43 = vor.u32 %v3316_v38, %v3315_v2  ;;  %v10902_v50 = vor.u32 %v3319_v58, %v3318_v27  ;;  %v10904_v0 = vor.u32 %v3322_v54, %v3321_v11 }
 0x321   :  { %v3326_v55 = vor.u32 %v3325_v62, %v3324_v32  ;;  %v3119_v63 = vmul.f32 %v3118_v22, %v3116_v59  ;;  %v3126_v53 = vmul.f32 %v3125_v44, %v3116_v59  ;;  %v3240_v7 = vsel %vm3238_vm10, %v3239_v26, %v3235_v16 }
 0x322   :  { %v3329_v29 = vor.u32 %v3328_v57, %v3327_v6  ;;  %v3241_v12 = vadd.s32 %v3240_v7, %v3236_v1  ;;  %vm3330_vm6 = vcmp.lt.s32.totalorder %v14872_v60, 1  ;;  %vm3332_vm1 = vcmp.lt.s32.totalorder %v14872_v60, 3 }
 0x323   :  { %vm3333_vm12 = vcmp.lt.s32.totalorder %v14872_v60, 4  ;;  %v10916_v5 = vmul.f32 %v7282_v39, %v9831_v3  ;;  %v3120_v2 = vadd.f32 -0.4999988, %v3119_v63  ;;  %v3127_v38 = vadd.f32 -0.16666654, %v3126_v53 }
 0x324   :  { %v3339_v58 = vsel %vm3333_vm12, %v3326_v55, 920167782  ;;  %v3242_v54 = vadd.s32 536870912, %v3241_v12  ;;  %v3338_v1 = vsel %vm3330_vm6, %v10900_v43, %v10902_v50  ;;  %v3342_v3 = vsel %vm3330_vm6, %v10902_v50, %v10904_v0 }
 0x325   :  { %v3340_v48 = vsel %vm3332_vm1, %v10904_v0, %v3339_v58  ;;  %v3121_v16 = vmul.f32 %v3120_v2, %v3116_v59  ;;  %v3128_v27 = vmul.f32 %v3127_v38, %v3116_v59  ;;  %v3133_v11 = vand.u32 3, %v3132_v9 }
 0x326   :  { %v3343_v32 = vsel %vm3333_vm12, %v3329_v29, 1326507024  ;;  %v10933_v62 = vshrl.u32 %v3242_v54, 30  ;;  %vm3331_vm0 = vcmp.lt.s32.totalorder %v14872_v60, 2  ;;  %v10938_v22 = vshll.u32 %v3306_v10, 8  ;;  %v1012_v29 = vpop.permute.xlu0 %1011 }
 0x327   :  { %v3344_v57 = vsel %vm3332_vm1, %v3326_v55, %v3343_v32  ;;  %v3122_v44 = vadd.f32 1.0, %v3121_v16  ;;  %v3129_v26 = vadd.f32 1.0, %v3128_v27  ;;  %v3341_v6 = vsel %vm3331_vm0, %v3338_v1, %v3340_v48 }
 0x328   :  { %v3345_v9 = vsel %vm3331_vm0, %v3342_v3, %v3344_v57  ;;  %vm827_vm3 = vcmp.eq.s32.totalorder %v755_v8, 1  ;;  %v603_v59 = vsel %vm570_vm9, %v8133_v35, 0.0  ;;  %vm3131_vm15 = vweird.f32 %v14848_v36 }
 0x329   :  { %v3244_v63 = vshll.u32 %v10933_v62, 30  ;;  %v3130_v55 = vmul.f32 %v3129_v26, %v10872_v31  ;;  %v3139_v10 = vxor.u32 2147483648, %v3122_v44  ;;  %v3349_v53 = vand.u32 65535, %v3345_v9 }
 0x32a   :  { %v3350_v7 = vshrl.u32 %v3345_v9, 16  ;;  %vm3134_vm14 = vcmp.lt.s32.totalorder %v3133_v11, 2  ;;  %v3347_v2 = vand.u32 65535, %v10938_v22  ;;  %v3372_v38 = vshrl.u32 %v3341_v6, 16 }
 0x32b   :  { %v3245_v39 = vsub.s32 %v3241_v12, %v3244_v63  ;;  %vm3135_vm4 = vcmp.eq.s32.totalorder %v3133_v11, 0  ;;  %v3136_v58 = vxor.u32 2147483648, %v3130_v55  ;;  %v3348_v45 = vshrl.u32 %v10938_v22, 16 }
 0x32c   :  { %v3371_v54 = vand.u32 65535, %v3341_v6  ;;  %vm3138_vm7 = vcmp.eq.s32.totalorder %v3133_v11, 2  ;;  %v3352_v48 = vmul.u32 %v3350_v7, %v3347_v2  ;;  %vm1084_vm10 = vcmp.eq.s32.totalorder %v1012_v29, 1 }
 0x32d   :  { %vm3246_vm11 = vcmp.lt.s32.totalorder %v3245_v39, 0  ;;  %v3247_v1 = vsub.s32 0, %v3245_v39  ;;  %v3137_v3 = vsel %vm3135_vm4, %v3122_v44, %v3136_v58  ;;  %v3140_v31 = vsel %vm3138_vm7, %v3139_v10, %v3130_v55  ;;  %v14873_v55 = vld [vmem:[#allocation18_spill] sm:$0xff] }
 0x32e   :  { %v10951_v16 = vmul.u32 %v3349_v53, %v3348_v45  ;;  %v3141_v27 = vsel %vm3134_vm14, %v3137_v3, %v3140_v31  ;;  %v3355_v32 = vshll.u32 %v3352_v48, 16  ;;  %v10954_v57 = vmul.u32 %v3372_v38, %v3347_v2 }
 0x32f   :  { %v3248_v12 = vsel %vm3246_vm11, %v3247_v1, %v3245_v39  ;;  %v3142_v26 = vsel %vm3131_vm15, nan, %v3141_v27  ;;  %v3351_v6 = vmul.u32 %v3349_v53, %v3347_v2  ;;  %v10958_v63 = vmul.u32 %v3371_v54, %v3348_v45 }
 0x330   :  { %v3249_v9 = vclz %v3248_v12  ;;  %v860_v44 = vsel %vm827_vm3, %v8876_v23, 0.0  ;;  %v635_v10 = vadd.f32 %v603_v59, %v14873_v55  ;;  %6464 = vmatmul.f32.gmra.mxu0 %v3142_v26  ;;  %v1117_v11 = vsel %vm1084_vm10, %v8889_v4, 0.0 }
 0x331   :  { %v3354_v29 = vmul.u32 %v3350_v7, %v3348_v45  ;;  %v3357_v1 = vshll.u32 %v10951_v16, 16  ;;  %vm3359_vm9 = vc.u32 %v3351_v6, %v3355_v32  ;;  %v3361_v3 = vadd.s32 %v3355_v32, %v3351_v6 }
 0x332   :  { %v7175_v58 = vadd.s32 4294967294, %v3249_v9  ;;  %v3237_v36 = vadd.s32 %v10867_v14, %v10851_v18  ;;  %v3360_v53 = vsel %vm3359_vm9, 1, %v14643_v51  ;;  %v3373_v31 = vmul.u32 %v3371_v54, %v3347_v2 }
 0x333   :  { %v3377_v8 = vshll.u32 %v10954_v57, 16  ;;  %vm3145_vm3 = vcmp.lt.s32.totalorder %v14859_v19, 0  ;;  %v3362_v59 = vadd.s32 %v3360_v53, %v3354_v29  ;;  %vm3363_vm14 = vc.u32 %v3361_v3, %v3357_v1 }
 0x334   :  { %vm7176_vm15 = vcmp.lt.s32.totalorder %v7175_v58, 0  ;;  %v3379_v7 = vshll.u32 %v10958_v63, 16  ;;  %v3364_v12 = vsel %vm3363_vm14, 1, %v14643_v51  ;;  %v3376_v14 = vmul.u32 %v3372_v38, %v3348_v45 }
 0x335   :  { %v3252_v27 = vsel %vm7176_vm15, 0, %v7175_v58  ;;  %vm3381_vm4 = vc.u32 %v3373_v31, %v3377_v8  ;;  %v3383_v32 = vadd.s32 %v3377_v8, %v3373_v31  ;;  %v3366_v18 = vadd.s32 %v3364_v12, %v3362_v59 }
 0x336   :  { %v3253_v26 = vsub.s32 32, %v3252_v27  ;;  %v3257_v9 = vsub.s32 4294967266, %v3252_v27  ;;  %v892_v6 = vadd.f32 %v860_v44, %v635_v10  ;;  %v3356_v2 = vshrl.u32 %v3352_v48, 16 }
 0x337   :  { %v3382_v54 = vsel %vm3381_vm4, 1, %v14643_v51  ;;  %vm3385_vm7 = vc.u32 %v3383_v32, %v3379_v7  ;;  %v3254_v55 = vshll.u32 %v3245_v39, %v3252_v27  ;;  %v3267_v58 = vsub.s32 4, %v10933_v62  ;;  %v10983_v39 = vld [vmem:[%s14370_s0 + $0xd8] sm:$0xff] }
 0x338   :  { %v3255_v47 = vshrl.u32 %v3237_v36, %v3253_v26  ;;  %v3258_v29 = vadd.s32 127, %v3257_v9  ;;  %v3384_v1 = vadd.s32 %v3382_v54, %v3376_v14  ;;  %v1149_v3 = vadd.f32 %v1117_v11, %v892_v6  ;;  %v501_v9 = vpop.permute.xlu1 %500 }
 0x339   :  { %v3314_v53 = vshrl.u32 %v14744_v49, %v14871_v17  ;;  %v3386_v31 = vsel %vm3385_vm7, 1, %v14643_v51  ;;  %v3335_v38 = vsel %vm3333_vm12, %v10904_v0, 2102212464  ;;  %v3367_v45 = vadd.s32 %v3366_v18, %v3356_v2 }
 0x33a   :  { %v3256_v8 = vor.u32 %v3255_v47, %v3254_v55  ;;  %v3259_v59 = vshll.u32 %v3258_v29, 23  ;;  %vm683_vm11 = vcmp.eq.s32.totalorder %v10983_v39, 2  ;;  %vm426_vm10 = vcmp.eq.s32.totalorder %v10983_v39, 1  ;;  %v14876_v55 = vld [vmem:[#allocation50_spill] sm:$0xff] }
 0x33b   :  { %vm939_vm9 = vcmp.eq.s32.totalorder %v10819_v42, 3  ;;  %v3388_v17 = vadd.s32 %v3386_v31, %v3384_v1  ;;  %v715_v47 = vsel %vm683_vm11, 1, %v14643_v51  ;;  %v458_v44 = vsel %vm426_vm10, 1, %v14643_v51 }
 0x33c   :  { %v3260_v48 = vor.u32 4788187, %v3259_v59  ;;  %v3358_v0 = vshrl.u32 %v10951_v16, 16  ;;  %v3268_v10 = vsel %vm3145_vm3, %v3267_v58, %v10933_v62  ;;  %802 = vperm.xlu2 %7253, %v715_v47   ;;  %545 = vperm.xlu1 %7252, %v458_v44   ;;  %v971_v11 = vsel %vm939_vm9, 1, %v14643_v51  ;;  %v758_v62 = vpop.permute.xlu2 %757 }
 0x33d   :  { %v3334_v42 = vsel %vm3330_vm6, %v3314_v53, %v10900_v43  ;;  %v3378_v36 = vshrl.u32 %v10954_v57, 16  ;;  %v3263_v12 = vcvt.s32.f32 %v3256_v8  ;;  %1056 = vperm.xlu0 %7251, %v971_v11   ;;  %v3336_v16 = vsel %vm3332_vm1, %v10902_v50, %v3335_v38  ;;  %v11010_v43 = vld [vmem:[#allocation5] ss:$0 sm:$0xff]  ;;  %v14880_v8 = vld [vmem:[#allocation71_spill] sm:$0xff] }
 0x33e   :  { %v3261_v27 = vand.u32 2147483647, %v3260_v48  ;;  %v11002_v26 = vadd.s32 %v3367_v45, %v3358_v0  ;;  %vm11006_vm12 = vcmp.le.f32.partialorder %v3143_v21, 0.7853982  ;;  %v1185_v57 = vadd.f32 %v11010_v43, %v1149_v3  ;;  %v14879_v3 = vld [vmem:[#allocation76_spill] sm:$0xff] }
 0x33f   :  { %v3380_v14 = vshrl.u32 %v10958_v63, 16  ;;  %v3389_v6 = vadd.s32 %v3388_v17, %v3378_v36  ;;  %v3270_v50 = vsel %vm11006_vm12, 0, %v3268_v10  ;;  %v11016_v54 = vadd.s32 %v3383_v32, %v3379_v7  ;;  %v7285_v63 = vld [vmem:[%s14373_s3] ss:$0 sm:$0xff] }
 0x340   :  { %v3264_v2 = vmul.f32 %v3263_v12, %v3261_v27  ;;  %v14576_v29 = vand.u32 2147483647, %v14876_v55  ;;  %v11024_v21 = vsel %vm14573_vm13, %v5809_v33, 1326507024  ;;  %v11030_v1 = vadd.f32 %v7285_v63, %v10916_v5  ;;  %6725 = vmatmul.f32.gmra.mxu2 %v1185_v57  ;;  %7065 = vst [vmem:[#allocation10 + $0x58] sm:$0xff] %v1185_v57 }
 0x341   :  { %14877 = vst [vmem:[#allocation131_spill] sm:$0xff] %v11024_v21  ;;  %v3337_v7 = vsel %vm3331_vm0, %v3334_v42, %v3336_v16  ;;  %v3390_v32 = vadd.s32 %v3389_v6, %v3380_v14  ;;  %vm828_vm6 = vcmp.eq.s32.totalorder %v758_v62, 1  ;;  %vm571_vm1 = vcmp.eq.s32.totalorder %v501_v9, 1 }
 0x342   :  { %14878 = vst [vmem:[#allocation56_spill] sm:$0xff] %v11030_v1  ;;  %v3265_v56 = vxor.u32 2147483648, %v3264_v2  ;;  %vm3393_vm15 = vc.u32 %v11002_v26, %v11016_v54  ;;  %v3287_v30 = vadd.s32 3, %v3270_v50  ;;  %v3474_v58 = vshrl.u32 %v14728_v34, %v14879_v3 }
 0x343   :  { %v3394_v33 = vadd.s32 1, %v3390_v32  ;;  %v3477_v5 = vshrl.u32 %v14724_v25, %v14879_v3  ;;  %v3391_v60 = vmul.u32 %v10938_v22, %v3337_v7  ;;  %v3460_v31 = vand.u32 8388607, %v14576_v29  ;;  %v14881_v7 = vld [vmem:[#allocation75_spill] sm:$0xff] }
 0x344   :  { %v3266_v53 = vsel %vm3145_vm3, %v3265_v56, %v3264_v2  ;;  %v3473_v59 = vshll.u32 %v14725_v37, %v14880_v8  ;;  %v3476_v17 = vshll.u32 %v14728_v34, %v14880_v8  ;;  %v3480_v48 = vshrl.u32 %v14726_v41, %v14879_v3 }
 0x345   :  { %v11050_v38 = vsel %vm11006_vm12, %v14859_v19, %v3266_v53  ;;  %v3395_v45 = vsel %vm3393_vm15, %v3394_v33, %v3390_v32  ;;  %v3482_v44 = vshll.u32 %v14726_v41, %v14880_v8  ;;  %v3483_v0 = vshrl.u32 %v14731_v46, %v14879_v3  ;;  %v1015_v33 = vpop.permute.xlu0 %1014  ;;  %v14882_v53 = vld [vmem:[#allocation30_spill] sm:$0xff] }
 0x346   :  { %v3271_v22 = vmul.f32 %v11050_v38, %v11050_v38  ;;  %v3396_v47 = vadd.s32 %v3395_v45, %v3391_v60  ;;  %v861_v10 = vsel %vm828_vm6, %v8876_v23, 0.0  ;;  %v11064_v11 = vor.u32 %v3474_v58, %v3473_v59 }
 0x347   :  { %v11066_v42 = vor.u32 %v3477_v5, %v3476_v17  ;;  %v3479_v36 = vshll.u32 %v14724_v25, %v14880_v8  ;;  %v3484_v18 = vor.u32 %v3483_v0, %v3482_v44  ;;  %v604_v57 = vsel %vm571_vm1, %v8133_v35, 0.0 }
 0x348   :  { %v3272_v27 = vmul.f32 -0.001358992, %v3271_v22  ;;  %v3279_v12 = vmul.f32 -0.00019511016, %v3271_v22  ;;  %v3397_v16 = vadd.s32 536870912, %v3396_v47  ;;  %v11072_v14 = vand.u32 3, %v3287_v30 }
 0x349   :  { %v3461_v6 = vor.u32 8388608, %v3460_v31  ;;  %v3481_v2 = vor.u32 %v3480_v48, %v3479_v36  ;;  %vm3488_vm0 = vcmp.lt.s32.totalorder %v14881_v7, 4  ;;  %v3471_v32 = vshrl.u32 %v14725_v37, %v14879_v3 }
 0x34a   :  { %v3273_v62 = vadd.f32 0.041655596, %v3272_v27  ;;  %v3280_v50 = vadd.f32 0.008332121, %v3279_v12  ;;  %v11074_v63 = vshrl.u32 %v3397_v16, 30  ;;  %vm3485_vm3 = vcmp.lt.s32.totalorder %v14881_v7, 1 }
 0x34b   :  { %vm3487_vm14 = vcmp.lt.s32.totalorder %v14881_v7, 3  ;;  %v3498_v9 = vsel %vm3488_vm0, %v3484_v18, 1326507024  ;;  %v3497_v5 = vsel %vm3485_vm3, %v11064_v11, %v11066_v42  ;;  %v636_v60 = vadd.f32 %v604_v57, %v14882_v53 }
 0x34c   :  { %v3274_v56 = vmul.f32 %v3273_v62, %v3271_v22  ;;  %v3281_v30 = vmul.f32 %v3280_v50, %v3271_v22  ;;  %v3399_v58 = vshll.u32 %v11074_v63, 30  ;;  %v3470_v31 = vshll.u32 %v14744_v49, %v14880_v8 }
 0x34d   :  { %v3499_v59 = vsel %vm3487_vm14, %v3481_v2, %v3498_v9  ;;  %v11093_v45 = vshll.u32 %v3461_v6, 8  ;;  %vm3486_vm4 = vcmp.lt.s32.totalorder %v14881_v7, 2  ;;  %vm3290_vm7 = vcmp.eq.s32.totalorder %v11072_v14, 0 }
 0x34e   :  { %v3275_v17 = vadd.f32 -0.4999988, %v3274_v56  ;;  %v3282_v48 = vadd.f32 -0.16666654, %v3281_v30  ;;  %v11095_v44 = vsub.s32 %v3396_v47, %v3399_v58  ;;  %vm1085_vm11 = vcmp.eq.s32.totalorder %v1015_v33, 1 }
 0x34f   :  { %v11099_v0 = vor.u32 %v3471_v32, %v3470_v31  ;;  %v3500_v36 = vsel %vm3486_vm4, %v3497_v5, %v3499_v59  ;;  %vm3289_vm10 = vcmp.lt.s32.totalorder %v11072_v14, 2  ;;  %vm3300_vm9 = vcmp.lt.s32.totalorder %v14868_v61, 0 }
 0x350   :  { %v3276_v8 = vmul.f32 %v3275_v17, %v3271_v22  ;;  %v3283_v27 = vmul.f32 %v3282_v48, %v3271_v22  ;;  %vm3401_vm12 = vcmp.lt.s32.totalorder %v11095_v44, 0  ;;  %v3402_v47 = vsub.s32 0, %v11095_v44 }
 0x351   :  { %vm3286_vm6 = vweird.f32 %v14859_v19  ;;  %v3494_v12 = vsel %vm3488_vm0, %v3481_v2, 920167782  ;;  %v11111_v16 = vand.u32 65535, %v11093_v45  ;;  %v3504_v18 = vand.u32 65535, %v3500_v36 }
 0x352   :  { %v3505_v57 = vshrl.u32 %v3500_v36, 16  ;;  %v3277_v6 = vadd.f32 1.0, %v3276_v8  ;;  %v3284_v22 = vadd.f32 1.0, %v3283_v27  ;;  %v3403_v62 = vsel %vm3401_vm12, %v3402_v47, %v11095_v44 }
 0x353   :  { %v11115_v50 = vshrl.u32 %v11093_v45, 16  ;;  %vm3293_vm1 = vcmp.eq.s32.totalorder %v11072_v14, 2  ;;  %v3404_v32 = vclz %v3403_v62  ;;  %v3493_v2 = vsel %vm3485_vm3, %v11099_v0, %v11064_v11 }
 0x354   :  { %v11123_v9 = vmul.u32 %v3505_v57, %v11111_v16  ;;  %v3285_v56 = vmul.f32 %v3284_v22, %v11050_v38  ;;  %v3294_v30 = vxor.u32 2147483648, %v3277_v6  ;;  %v3495_v58 = vsel %vm3487_vm14, %v11066_v42, %v3494_v12 }
 0x355   :  { %v11130_v5 = vmul.u32 %v3504_v18, %v11115_v50  ;;  %vm5944_vm15 = vcmp.gt.s32.totalorder %v10737_v40, 0  ;;  %v893_v53 = vadd.f32 %v861_v10, %v636_v60  ;;  %v1118_v31 = vsel %vm1085_vm11, %v8889_v4, 0.0 }
 0x356   :  { %v14883_v59 = vand.u32 2147483647, %v14868_v61  ;;  %v7178_v38 = vadd.s32 4294967294, %v3404_v32  ;;  %v3422_v48 = vsub.s32 4, %v11074_v63  ;;  %v3291_v36 = vxor.u32 2147483648, %v3285_v56 }
 0x357   :  { %v3392_v8 = vadd.s32 %v11016_v54, %v11002_v26  ;;  %v3506_v27 = vmul.u32 %v3504_v18, %v11111_v16  ;;  %v3510_v10 = vshll.u32 %v11123_v9, 16  ;;  %vm5324_vm13 = vcmp.gt.s32.totalorder %v10859_v28, 0 }
 0x358   :  { %vm11137_vm12 = vcmp.le.f32.partialorder %v14883_v59, 0.7853982  ;;  %v3295_v33 = vsel %vm3293_vm1, %v3294_v30, %v3285_v56  ;;  %vm7179_vm11 = vcmp.lt.s32.totalorder %v7178_v38, 0  ;;  %v11151_v60 = vsel %vm3486_vm4, %v3493_v2, %v3495_v58 }
 0x359   :  { %v3512_v47 = vshll.u32 %v11130_v5, 16  ;;  %v3292_v12 = vsel %vm3290_vm7, %v3277_v6, %v3291_v36  ;;  %v3407_v26 = vsel %vm7179_vm11, 0, %v7178_v38  ;;  %vm3514_vm5 = vc.u32 %v3506_v27, %v3510_v10 }
 0x35a   :  { %v3516_v54 = vadd.s32 %v3510_v10, %v3506_v27  ;;  %v3296_v18 = vsel %vm3289_vm10, %v3292_v12, %v3295_v33  ;;  %v3408_v22 = vsub.s32 32, %v3407_v26  ;;  %v3412_v62 = vsub.s32 4294967266, %v3407_v26  ;;  %v6560_v12 = vld [vmem:[%s14379_s9 + $0x68] sm:$0xff] }
 0x35b   :  { %v3423_v32 = vsel %vm3300_vm9, %v3422_v48, %v11074_v63  ;;  %v3297_v2 = vsel %vm3286_vm6, nan, %v3296_v18  ;;  %v3509_v56 = vmul.u32 %v3505_v57, %v11115_v50  ;;  %v3515_v30 = vsel %vm3514_vm5, 1, %v14643_v51 }
 0x35c   :  { %vm3518_vm7 = vc.u32 %v3516_v54, %v3512_v47  ;;  %6467 = vmatmul.f32.gmra.mxu0 %v3297_v2  ;;  %v3409_v6 = vshll.u32 %v11095_v44, %v3407_v26  ;;  %v3410_v58 = vshrl.u32 %v3392_v8, %v3408_v22  ;;  %v3413_v14 = vadd.s32 127, %v3412_v62 }
 0x35d   :  { %v3527_v59 = vshrl.u32 %v11151_v60, 16  ;;  %v1150_v38 = vadd.f32 %v1118_v31, %v893_v53  ;;  %v3469_v36 = vshrl.u32 %v14744_v49, %v14879_v3  ;;  %v3490_v19 = vsel %vm3488_vm0, %v11066_v42, 2102212464  ;;  %v6562_v53 = vld [vmem:[%s14379_s9 + $0x78] sm:$0xff]  ;;  %v11182_v3 = vld [vmem:[%s14370_s0 + $0xe0] sm:$0xff]  ;;  %v6561_v42 = vld [vmem:[%s14379_s9 + $0x70] sm:$0xff] }
 0x35e   :  { %v3517_v63 = vadd.s32 %v3515_v30, %v3509_v56  ;;  %v3411_v57 = vor.u32 %v3410_v58, %v3409_v6  ;;  %v3414_v48 = vshll.u32 %v3413_v14, 23  ;;  %v3519_v27 = vsel %vm3518_vm7, 1, %v14643_v51  ;;  %6563 = vmatpush.msra.mxu1 %v6562_v53  ;;  %v504_v53 = vpop.permute.xlu1 %503 }
 0x35f   :  { %v3526_v10 = vand.u32 65535, %v11151_v60  ;;  %v3425_v44 = vsel %vm11137_vm12, 0, %v3423_v32  ;;  %vm684_vm5 = vcmp.eq.s32.totalorder %v11182_v3, 2  ;;  %vm427_vm0 = vcmp.eq.s32.totalorder %v11182_v3, 1 }
 0x360   :  { %vm940_vm10 = vcmp.eq.s32.totalorder %v10983_v39, 3  ;;  %v3415_v31 = vor.u32 4788187, %v3414_v48  ;;  %v716_v8 = vsel %vm684_vm5, 1, %v14643_v51  ;;  %v459_v33 = vsel %vm427_vm0, 1, %v14643_v51  ;;  %6564 = vmatpush.msra.mxu1 %v6561_v42 }
 0x361   :  { %v3529_v60 = vmul.u32 %v3527_v59, %v11111_v16  ;;  %v11196_v47 = vsel %vm5944_vm15, %v10737_v40, 0  ;;  %805 = vperm.xlu2 %7253, %v716_v8   ;;  %548 = vperm.xlu1 %7252, %v459_v33   ;;  %v972_v39 = vsel %vm940_vm10, 1, %v14643_v51  ;;  %v3489_v26 = vsel %vm3485_vm3, %v3469_v36, %v11099_v0  ;;  %v6559_v0 = vld [vmem:[%s14379_s9 + $0x60] sm:$0xff] }
 0x362   :  { %v3521_v54 = vadd.s32 %v3519_v27, %v3517_v63  ;;  %v3416_v18 = vand.u32 2147483647, %v3415_v31  ;;  %v3418_v22 = vcvt.s32.f32 %v3411_v57  ;;  %1059 = vperm.xlu0 %7251, %v972_v39   ;;  %v3491_v40 = vsel %vm3487_vm14, %v11064_v11, %v3490_v19  ;;  %6565 = vmatpush.msra.mxu1 %v6560_v12  ;;  %v14886_v19 = vld [vmem:[#allocation69_spill] sm:$0xff]  ;;  %v14888_v33 = vld [vmem:[#allocation102_spill] sm:$0xff] }
 0x363   :  { %v3530_v62 = vmul.u32 %v3526_v10, %v11115_v50  ;;  %v11212_v32 = vsel %vm5324_vm13, %v10859_v28, 0  ;;  %v3442_v2 = vadd.s32 3, %v3425_v44  ;;  %v1186_v56 = vadd.f32 %v11010_v43, %v1150_v38  ;;  %v14887_v44 = vld [vmem:[#allocation112_spill] sm:$0xff] }
 0x364   :  { %v3511_v30 = vshrl.u32 %v11123_v9, 16  ;;  %v6091_v6 = vand.u32 2139095040, %v11030_v1  ;;  %v3419_v58 = vmul.f32 %v3418_v22, %v3416_v18  ;;  %v3528_v11 = vmul.u32 %v3526_v10, %v11111_v16  ;;  %6566 = vmatpush.msra.mxu1 %v6559_v0 }
 0x365   :  { %v3532_v14 = vshll.u32 %v3529_v60, 16  ;;  %6728 = vmatmul.f32.gmra.mxu2 %v1186_v56  ;;  %7066 = vst [vmem:[#allocation10 + $0x60] sm:$0xff] %v1186_v56  ;;  %v3492_v28 = vsel %vm3486_vm4, %v3489_v26, %v3491_v40  ;;  %v3531_v38 = vmul.u32 %v3527_v59, %v11115_v50  ;;  %v14575_v63 = vand.u32 2147483647, %v14886_v19 }
 0x366   :  { %v3522_v36 = vadd.s32 %v3521_v54, %v3511_v30  ;;  %v3420_v57 = vxor.u32 2147483648, %v3419_v58  ;;  %v3534_v9 = vshll.u32 %v3530_v62, 16  ;;  %v11225_v27 = vand.u32 3, %v3442_v2 }
 0x367   :  { %vm3536_vm13 = vc.u32 %v3528_v11, %v3532_v14  ;;  %v3538_v48 = vadd.s32 %v3532_v14, %v3528_v11  ;;  %v3513_v16 = vshrl.u32 %v11130_v5, 16  ;;  %v3626_v7 = vshrl.u32 %v14725_v37, %v14887_v44 }
 0x368   :  { %v3537_v10 = vsel %vm3536_vm13, 1, %v14643_v51  ;;  %v3421_v50 = vsel %vm3300_vm9, %v3420_v57, %v3419_v58  ;;  %v3533_v59 = vshrl.u32 %v3529_v60, 16  ;;  %v3625_v39 = vshll.u32 %v14744_v49, %v14888_v33 }
 0x369   :  { %v3539_v42 = vadd.s32 %v3537_v10, %v3531_v38  ;;  %vm3540_vm3 = vc.u32 %v3538_v48, %v3534_v9  ;;  %v11236_v31 = vsel %vm11137_vm12, %v14868_v61, %v3421_v50  ;;  %v11238_v8 = vadd.s32 %v3522_v36, %v3513_v16 }
 0x36a   :  { %v3541_v5 = vsel %vm3540_vm3, 1, %v14643_v51  ;;  %v3426_v12 = vmul.f32 %v11236_v31, %v11236_v31  ;;  %v3535_v26 = vshrl.u32 %v3530_v62, 16  ;;  %v3615_v60 = vand.u32 8388607, %v14575_v63 }
 0x36b   :  { %v3543_v54 = vadd.s32 %v3541_v5, %v3539_v42  ;;  %vm572_vm14 = vcmp.eq.s32.totalorder %v504_v53, 1  ;;  %v11247_v18 = vadd.s32 %v3538_v48, %v3534_v9  ;;  %v11249_v17 = vor.u32 %v3626_v7, %v3625_v39  ;;  %v14889_v39 = vld [vmem:[#allocation111_spill] sm:$0xff] }
 0x36c   :  { %v3629_v22 = vshrl.u32 %v14728_v34, %v14887_v44  ;;  %v3632_v40 = vshrl.u32 %v14724_v25, %v14887_v44  ;;  %v3427_v2 = vmul.f32 -0.001358992, %v3426_v12  ;;  %v3434_v56 = vmul.f32 -0.00019511016, %v3426_v12 }
 0x36d   :  { %v3544_v0 = vadd.s32 %v3543_v54, %v3533_v59  ;;  %v3628_v62 = vshll.u32 %v14725_v37, %v14888_v33  ;;  %v3631_v30 = vshll.u32 %v14728_v34, %v14888_v33  ;;  %v3634_v58 = vshll.u32 %v14724_v25, %v14888_v33 }
 0x36e   :  { %v3635_v11 = vshrl.u32 %v14726_v41, %v14887_v44  ;;  %v3637_v14 = vshll.u32 %v14726_v41, %v14888_v33  ;;  %v3428_v36 = vadd.f32 0.041655596, %v3427_v2  ;;  %v3435_v38 = vadd.f32 0.008332121, %v3434_v56 }
 0x36f   :  { %v3545_v57 = vadd.s32 %v3544_v0, %v3535_v26  ;;  %v3638_v9 = vshrl.u32 %v14731_v46, %v14887_v44  ;;  %vm3548_vm4 = vc.u32 %v11238_v8, %v11247_v18  ;;  %v11269_v48 = vor.u32 %v3629_v22, %v3628_v62  ;;  %v761_v22 = vpop.permute.xlu2 %760 }
 0x370   :  { %v11271_v16 = vor.u32 %v3632_v40, %v3631_v30  ;;  %v3636_v10 = vor.u32 %v3635_v11, %v3634_v58  ;;  %v3429_v7 = vmul.f32 %v3428_v36, %v3426_v12  ;;  %v3436_v50 = vmul.f32 %v3435_v38, %v3426_v12 }
 0x371   :  { %v3549_v59 = vadd.s32 1, %v3545_v57  ;;  %v3639_v42 = vor.u32 %v3638_v9, %v3637_v14  ;;  %v3546_v5 = vmul.u32 %v11093_v45, %v3492_v28  ;;  %v3616_v33 = vor.u32 8388608, %v3615_v60 }
 0x372   :  { %vm3640_vm9 = vcmp.lt.s32.totalorder %v14889_v39, 1  ;;  %vm3642_vm6 = vcmp.lt.s32.totalorder %v14889_v39, 3  ;;  %v3430_v26 = vadd.f32 -0.4999988, %v3429_v7  ;;  %v3437_v54 = vadd.f32 -0.16666654, %v3436_v50 }
 0x373   :  { %v3550_v2 = vsel %vm3548_vm4, %v3549_v59, %v3545_v57  ;;  %vm3643_vm1 = vcmp.lt.s32.totalorder %v14889_v39, 4  ;;  %v3652_v45 = vsel %vm3640_vm9, %v11269_v48, %v11271_v16  ;;  %v3648_v62 = vsel %vm3640_vm9, %v11249_v17, %v11269_v48 }
 0x374   :  { %v3551_v40 = vadd.s32 %v3550_v2, %v3546_v5  ;;  %v3649_v56 = vsel %vm3643_vm1, %v3636_v10, 920167782  ;;  %v3653_v28 = vsel %vm3643_vm1, %v3639_v42, 1326507024  ;;  %v3431_v60 = vmul.f32 %v3430_v26, %v3426_v12 }
 0x375   :  { %v3438_v0 = vmul.f32 %v3437_v54, %v3426_v12  ;;  %v3650_v30 = vsel %vm3642_vm6, %v11271_v16, %v3649_v56  ;;  %vm3641_vm15 = vcmp.lt.s32.totalorder %v14889_v39, 2  ;;  %v3654_v11 = vsel %vm3642_vm6, %v3636_v10, %v3653_v28  ;;  %v6557_v39 = vld [vmem:[%s14379_s9 + $0x50] sm:$0xff] }
 0x376   :  { %v3552_v58 = vadd.s32 536870912, %v3551_v40  ;;  %v11295_v14 = vshll.u32 %v3616_v33, 8  ;;  %vm829_vm12 = vcmp.eq.s32.totalorder %v761_v22, 1  ;;  %v605_v12 = vsel %vm572_vm14, %v8133_v35, 0.0  ;;  %v14890_v33 = vld [vmem:[#allocation29_spill] sm:$0xff] }
 0x377   :  { %v3432_v36 = vadd.f32 1.0, %v3431_v60  ;;  %v3439_v38 = vadd.f32 1.0, %v3438_v0  ;;  %v3655_v57 = vsel %vm3641_vm15, %v3652_v45, %v3654_v11  ;;  %v3651_v7 = vsel %vm3641_vm15, %v3648_v62, %v3650_v30 }
 0x378   :  { %v11301_v9 = vshrl.u32 %v3552_v58, 30  ;;  %v3657_v50 = vand.u32 65535, %v11295_v14  ;;  %v3659_v59 = vand.u32 65535, %v3655_v57  ;;  %v3658_v5 = vshrl.u32 %v11295_v14, 16 }
 0x379   :  { %v3440_v10 = vmul.f32 %v3439_v38, %v11236_v31  ;;  %v3449_v42 = vxor.u32 2147483648, %v3432_v36  ;;  %v3660_v53 = vshrl.u32 %v3655_v57, 16  ;;  %v637_v26 = vadd.f32 %v605_v12, %v14890_v33  ;;  %v1018_v12 = vpop.permute.xlu0 %1017 }
 0x37a   :  { %vm3441_vm11 = vweird.f32 %v14868_v61  ;;  %vm3444_vm7 = vcmp.lt.s32.totalorder %v11225_v27, 2  ;;  %v3554_v54 = vshll.u32 %v11301_v9, 30  ;;  %vm3445_vm5 = vcmp.eq.s32.totalorder %v11225_v27, 0 }
 0x37b   :  { %v3446_v2 = vxor.u32 2147483648, %v3440_v10  ;;  %v3662_v56 = vmul.u32 %v3660_v53, %v3657_v50  ;;  %v11313_v45 = vmul.u32 %v3659_v59, %v3658_v5  ;;  %vm3448_vm0 = vcmp.eq.s32.totalorder %v11225_v27, 2 }
 0x37c   :  { %v3555_v31 = vsub.s32 %v3551_v40, %v3554_v54  ;;  %v3681_v28 = vand.u32 65535, %v3651_v7  ;;  %v3682_v60 = vshrl.u32 %v3651_v7, 16  ;;  %v3450_v62 = vsel %vm3448_vm0, %v3449_v42, %v3440_v10 }
 0x37d   :  { %v3447_v0 = vsel %vm3445_vm5, %v3432_v36, %v3446_v2  ;;  %v3661_v30 = vmul.u32 %v3659_v59, %v3657_v50  ;;  %v3665_v58 = vshll.u32 %v3662_v56, 16  ;;  %v3664_v57 = vmul.u32 %v3660_v53, %v3658_v5 }
 0x37e   :  { %v3451_v11 = vsel %vm3444_vm7, %v3447_v0, %v3450_v62  ;;  %vm3556_vm10 = vcmp.lt.s32.totalorder %v3555_v31, 0  ;;  %v3557_v38 = vsub.s32 0, %v3555_v31  ;;  %v3667_v63 = vshll.u32 %v11313_v45, 16 }
 0x37f   :  { %v3452_v33 = vsel %vm3441_vm11, nan, %v3451_v11  ;;  %vm3669_vm13 = vc.u32 %v3661_v30, %v3665_v58  ;;  %v3671_v29 = vadd.s32 %v3665_v58, %v3661_v30  ;;  %v11320_v27 = vshrl.u32 %v11196_v47, 5 }
 0x380   :  { %6470 = vmatmul.f32.gmra.mxu0 %v3452_v33  ;;  %v3558_v40 = vsel %vm3556_vm10, %v3557_v38, %v3555_v31  ;;  %v3670_v36 = vsel %vm3669_vm13, 1, %v14643_v51  ;;  %v11323_v7 = vmul.u32 %v3682_v60, %v3657_v50  ;;  %vm1086_vm3 = vcmp.eq.s32.totalorder %v1018_v12, 1 }
 0x381   :  { %14891 = vst [vmem:[#allocation23_spill] sm:$0xff] %v11320_v27  ;;  %v3559_v59 = vclz %v3558_v40  ;;  %v3672_v10 = vadd.s32 %v3670_v36, %v3664_v57  ;;  %vm3673_vm14 = vc.u32 %v3671_v29, %v3667_v63  ;;  %v11326_v61 = vand.u32 31, %v11196_v47 }
 0x382   :  { %v862_v42 = vsel %vm829_vm12, %v8876_v23, 0.0  ;;  %v3674_v53 = vsel %vm3673_vm14, 1, %v14643_v51  ;;  %v11331_v54 = vmul.u32 %v3681_v28, %v3658_v5  ;;  %v3683_v62 = vmul.u32 %v3681_v28, %v3657_v50 }
 0x383   :  { %14892 = vst [vmem:[#allocation82_spill] sm:$0xff] %v11326_v61  ;;  %v894_v2 = vadd.f32 %v862_v42, %v637_v26  ;;  %v7181_v0 = vadd.s32 4294967294, %v3559_v59  ;;  %v3687_v30 = vshll.u32 %v11323_v7, 16  ;;  %v1119_v58 = vsel %vm1086_vm3, %v8889_v4, 0.0 }
 0x384   :  { %v3624_v29 = vshrl.u32 %v14744_v49, %v14887_v44  ;;  %v3645_v47 = vsel %vm3643_vm1, %v11271_v16, 2102212464  ;;  %v3676_v63 = vadd.s32 %v3674_v53, %v3672_v10  ;;  %v3666_v22 = vshrl.u32 %v3662_v56, 16  ;;  %v6558_v53 = vld [vmem:[%s14379_s9 + $0x58] sm:$0xff] }
 0x385   :  { %vm7182_vm4 = vcmp.lt.s32.totalorder %v7181_v0, 0  ;;  %vm3691_vm12 = vc.u32 %v3683_v62, %v3687_v30  ;;  %v3693_v11 = vadd.s32 %v3687_v30, %v3683_v62  ;;  %v3686_v26 = vmul.u32 %v3682_v60, %v3658_v5  ;;  %6567 = vmatpush.msra.mxu1 %v6558_v53  ;;  %v764_v53 = vpop.permute.xlu2 %763 }
 0x386   :  { %v3562_v12 = vsel %vm7182_vm4, 0, %v7181_v0  ;;  %v3689_v50 = vshll.u32 %v11331_v54, 16  ;;  %v3692_v28 = vsel %vm3691_vm12, 1, %v14643_v51  ;;  %v3547_v38 = vadd.s32 %v11247_v18, %v11238_v8 }
 0x387   :  { %v3563_v57 = vsub.s32 32, %v3562_v12  ;;  %v3567_v44 = vsub.s32 4294967266, %v3562_v12  ;;  %v3644_v16 = vsel %vm3640_vm9, %v3624_v29, %v11249_v17  ;;  %v3646_v56 = vsel %vm3642_vm6, %v11269_v48, %v3645_v47  ;;  %v6556_v47 = vld [vmem:[%s14379_s9 + $0x48] sm:$0xff]  ;;  %6568 = vmatpush.msra.mxu1 %v6557_v39 }
 0x388   :  { %v3677_v33 = vadd.s32 %v3676_v63, %v3666_v22  ;;  %v3694_v40 = vadd.s32 %v3692_v28, %v3686_v26  ;;  %vm3695_vm1 = vc.u32 %v3693_v11, %v3689_v50  ;;  %v3564_v5 = vshll.u32 %v3555_v31, %v3562_v12  ;;  %v14894_v22 = vld [vmem:[#allocation54_spill] sm:$0xff] }
 0x389   :  { %v3565_v60 = vshrl.u32 %v3547_v38, %v3563_v57  ;;  %v3568_v36 = vadd.s32 127, %v3567_v44  ;;  %v3696_v59 = vsel %vm3695_vm1, 1, %v14643_v51  ;;  %v11352_v8 = vand.u32 31, %v11212_v32  ;;  %6569 = vmatpush.msra.mxu1 %v6556_v47 }
 0x38a   :  { %v1151_v18 = vadd.f32 %v1119_v58, %v894_v2  ;;  %vm3455_vm11 = vcmp.lt.s32.totalorder %v14876_v55, 0  ;;  %v3577_v17 = vsub.s32 4, %v11301_v9  ;;  %v11358_v48 = vsel %vm3641_vm15, %v3644_v16, %v3646_v56  ;;  %v11367_v2 = vld [vmem:[%s14370_s0 + $0xe8] sm:$0xff]  ;;  %v6555_v16 = vld [vmem:[%s14379_s9 + $0x40] sm:$0xff] }
 0x38b   :  { %14893 = vst [vmem:[#allocation78_spill] sm:$0xff] %v11352_v8  ;;  %v3566_v10 = vor.u32 %v3565_v60, %v3564_v5  ;;  %v3569_v42 = vshll.u32 %v3568_v36, 23  ;;  %v3668_v31 = vshrl.u32 %v11313_v45, 16  ;;  %vm685_vm9 = vcmp.eq.s32.totalorder %v11367_v2, 2  ;;  %v14898_v5 = vld [vmem:[#allocation77_spill] sm:$0xff]  ;;  %6570 = vmatpush.msra.mxu1 %v6555_v16 }
 0x38c   :  { %vm428_vm6 = vcmp.eq.s32.totalorder %v11367_v2, 1  ;;  %vm941_vm7 = vcmp.eq.s32.totalorder %v11182_v3, 3  ;;  %v3698_v45 = vadd.s32 %v3696_v59, %v3694_v40  ;;  %v717_v62 = vsel %vm685_vm9, 1, %v14643_v51  ;;  %v14899_v60 = vld [vmem:[#allocation81_spill] sm:$0xff] }
 0x38d   :  { %v3570_v0 = vor.u32 4788187, %v3569_v42  ;;  %v460_v30 = vsel %vm428_vm6, 1, %v14643_v51  ;;  %v11377_v58 = vadd.s32 %v3677_v33, %v3668_v31  ;;  %v3578_v29 = vsel %vm3455_vm11, %v3577_v17, %v11301_v9  ;;  %808 = vperm.xlu2 %7253, %v717_v62  }
 0x38e   :  { %551 = vperm.xlu1 %7252, %v460_v30   ;;  %v973_v3 = vsel %vm941_vm7, 1, %v14643_v51  ;;  %v3688_v63 = vshrl.u32 %v11323_v7, 16  ;;  %v14577_v12 = vand.u32 2147483647, %v14894_v22  ;;  %v11390_v26 = vshrl.u32 %v6091_v6, 23  ;;  %v507_v30 = vpop.permute.xlu1 %506 }
 0x38f   :  { %v3571_v28 = vand.u32 2147483647, %v3570_v0  ;;  %v3573_v38 = vcvt.s32.f32 %v3566_v10  ;;  %1062 = vperm.xlu0 %7251, %v973_v3   ;;  %v11392_v9 = vadd.s32 %v3693_v11, %v3689_v50  ;;  %v14895_v57 = vand.u32 2147483647, %v14876_v55 }
 0x390   :  { %v1187_v7 = vadd.f32 %v11010_v43, %v1151_v18  ;;  %v3690_v6 = vshrl.u32 %v11331_v54, 16  ;;  %v3699_v56 = vadd.s32 %v3698_v45, %v3688_v63  ;;  %v3701_v50 = vmul.u32 %v11295_v14, %v11358_v48 }
 0x391   :  { %vm11396_vm15 = vcmp.le.f32.partialorder %v14895_v57, 0.7853982  ;;  %v3574_v33 = vmul.f32 %v3573_v38, %v3571_v28  ;;  %vm3703_vm5 = vc.u32 %v11377_v58, %v11392_v9  ;;  %v3770_v40 = vand.u32 8388607, %v14577_v12 }
 0x392   :  { %v3580_v11 = vsel %vm11396_vm15, 0, %v3578_v29  ;;  %6731 = vmatmul.f32.gmra.mxu2 %v1187_v7  ;;  %7067 = vst [vmem:[#allocation10 + $0x68] sm:$0xff] %v1187_v7  ;;  %v3700_v43 = vadd.s32 %v3699_v56, %v3690_v6  ;;  %v3780_v54 = vshll.u32 %v14744_v49, %v14898_v5  ;;  %v3784_v36 = vshrl.u32 %v14728_v34, %v14899_v60  ;;  %v14900_v7 = vld [vmem:[#allocation79_spill] sm:$0xff] }
 0x393   :  { %v3575_v59 = vxor.u32 2147483648, %v3574_v33  ;;  %v3781_v14 = vshrl.u32 %v14725_v37, %v14899_v60  ;;  %v3783_v18 = vshll.u32 %v14725_v37, %v14898_v5  ;;  %v3787_v17 = vshrl.u32 %v14724_v25, %v14899_v60 }
 0x394   :  { %v3704_v10 = vadd.s32 1, %v3700_v43  ;;  %v3786_v42 = vshll.u32 %v14728_v34, %v14898_v5  ;;  %v3789_v48 = vshll.u32 %v14724_v25, %v14898_v5  ;;  %v3790_v31 = vshrl.u32 %v14726_v41, %v14899_v60 }
 0x395   :  { %v3576_v39 = vsel %vm3455_vm11, %v3575_v59, %v3574_v33  ;;  %v11431_v45 = vor.u32 %v3784_v36, %v3783_v18  ;;  %v3792_v0 = vshll.u32 %v14726_v41, %v14898_v5  ;;  %v3793_v62 = vshrl.u32 %v14731_v46, %v14899_v60 }
 0x396   :  { %v3579_v29 = vsel %vm11396_vm15, %v14876_v55, %v3576_v39  ;;  %v3705_v3 = vsel %vm3703_vm5, %v3704_v10, %v3700_v43  ;;  %v11443_v47 = vor.u32 %v3787_v17, %v3786_v42  ;;  %v3791_v63 = vor.u32 %v3790_v31, %v3789_v48 }
 0x397   :  { %v3581_v28 = vmul.f32 %v3579_v29, %v3579_v29  ;;  %v3706_v38 = vadd.s32 %v3705_v3, %v3701_v50  ;;  %v3794_v57 = vor.u32 %v3793_v62, %v3792_v0  ;;  %vm3798_vm0 = vcmp.lt.s32.totalorder %v14900_v7, 4 }
 0x398   :  { %vm830_vm10 = vcmp.eq.s32.totalorder %v764_v53, 1  ;;  %v3771_v16 = vor.u32 8388608, %v3770_v40  ;;  %v11446_v6 = vor.u32 %v3781_v14, %v3780_v54  ;;  %v3804_v44 = vsel %vm3798_vm0, %v3791_v63, 920167782 }
 0x399   :  { %vm573_vm13 = vcmp.eq.s32.totalorder %v507_v30, 1  ;;  %v3582_v56 = vmul.f32 -0.001358992, %v3581_v28  ;;  %v3589_v33 = vmul.f32 -0.00019511016, %v3581_v28  ;;  %v3707_v5 = vadd.s32 536870912, %v3706_v38 }
 0x39a   :  { %v3597_v43 = vadd.s32 3, %v3580_v11  ;;  %vm3795_vm3 = vcmp.lt.s32.totalorder %v14900_v7, 1  ;;  %vm3797_vm14 = vcmp.lt.s32.totalorder %v14900_v7, 3  ;;  %v3808_v50 = vsel %vm3798_vm0, %v3794_v57, 1326507024 }
 0x39b   :  { %v3583_v36 = vadd.f32 0.041655596, %v3582_v56  ;;  %v3590_v59 = vadd.f32 0.008332121, %v3589_v33  ;;  %v11454_v40 = vshrl.u32 %v3707_v5, 30  ;;  %v3807_v54 = vsel %vm3795_vm3, %v11431_v45, %v11443_v47 }
 0x39c   :  { %v3803_v11 = vsel %vm3795_vm3, %v11446_v6, %v11431_v45  ;;  %v3805_v14 = vsel %vm3797_vm14, %v11443_v47, %v3804_v44  ;;  %v3809_v18 = vsel %vm3797_vm14, %v3791_v63, %v3808_v50  ;;  %v11469_v17 = vshll.u32 %v3771_v16, 8  ;;  %v14901_v50 = vld [vmem:[#allocation19_spill] sm:$0xff] }
 0x39d   :  { %v3584_v10 = vmul.f32 %v3583_v36, %v3581_v28  ;;  %v3591_v42 = vmul.f32 %v3590_v59, %v3581_v28  ;;  %v3709_v48 = vshll.u32 %v11454_v40, 30  ;;  %vm3796_vm4 = vcmp.lt.s32.totalorder %v14900_v7, 2 }
 0x39e   :  { %v863_v31 = vsel %vm830_vm10, %v8876_v23, 0.0  ;;  %v606_v39 = vsel %vm573_vm13, %v8133_v35, 0.0  ;;  %v3598_v0 = vand.u32 3, %v3597_v43  ;;  %v3810_v62 = vsel %vm3796_vm4, %v3807_v54, %v3809_v18 }
 0x39f   :  { %v3585_v3 = vadd.f32 -0.4999988, %v3584_v10  ;;  %v3592_v63 = vadd.f32 -0.16666654, %v3591_v42  ;;  %v11479_v57 = vsub.s32 %v3706_v38, %v3709_v48  ;;  %v11483_v16 = vsel %vm3796_vm4, %v3803_v11, %v3805_v14  ;;  %v1021_v11 = vpop.permute.xlu0 %1020 }
 0x3a0   :  { %v3812_v44 = vand.u32 65535, %v11469_v17  ;;  %v11487_v53 = vshrl.u32 %v11469_v17, 16  ;;  %v3814_v56 = vand.u32 65535, %v3810_v62  ;;  %v3815_v30 = vshrl.u32 %v3810_v62, 16 }
 0x3a1   :  { %v3586_v33 = vmul.f32 %v3585_v3, %v3581_v28  ;;  %v3593_v5 = vmul.f32 %v3592_v63, %v3581_v28  ;;  %vm3711_vm12 = vcmp.lt.s32.totalorder %v11479_v57, 0  ;;  %v3712_v43 = vsub.s32 0, %v11479_v57 }
 0x3a2   :  { %v638_v38 = vadd.f32 %v606_v39, %v14901_v50  ;;  %vm3596_vm1 = vweird.f32 %v14876_v55  ;;  %vm3599_vm11 = vcmp.lt.s32.totalorder %v3598_v0, 2  ;;  %vm3600_vm9 = vcmp.eq.s32.totalorder %v3598_v0, 0 }
 0x3a3   :  { %v11493_v36 = vmul.u32 %v3815_v30, %v3812_v44  ;;  %v3587_v59 = vadd.f32 1.0, %v3586_v33  ;;  %v3594_v54 = vadd.f32 1.0, %v3593_v5  ;;  %v3713_v14 = vsel %vm3711_vm12, %v3712_v43, %v11479_v57 }
 0x3a4   :  { %v11497_v18 = vmul.u32 %v3814_v56, %v11487_v53  ;;  %vm3603_vm6 = vcmp.eq.s32.totalorder %v3598_v0, 2  ;;  %v3714_v28 = vclz %v3713_v14  ;;  %v14580_v42 = vshrl.u32 %v11483_v16, 16 }
 0x3a5   :  { %v3820_v10 = vshll.u32 %v11493_v36, 16  ;;  %v3595_v48 = vmul.f32 %v3594_v54, %v3579_v29  ;;  %v3604_v39 = vxor.u32 2147483648, %v3587_v59  ;;  %v3702_v62 = vadd.s32 %v11392_v9, %v11377_v58 }
 0x3a6   :  { %v3816_v3 = vmul.u32 %v3814_v56, %v3812_v44  ;;  %v895_v63 = vadd.f32 %v863_v31, %v638_v38  ;;  %vm1087_vm7 = vcmp.eq.s32.totalorder %v1021_v11, 1  ;;  %v7184_v33 = vadd.s32 4294967294, %v3714_v28 }
 0x3a7   :  { %v3836_v5 = vand.u32 65535, %v11483_v16  ;;  %v3601_v43 = vxor.u32 2147483648, %v3595_v48  ;;  %v3822_v50 = vshll.u32 %v11497_v18, 16  ;;  %v3819_v12 = vmul.u32 %v3815_v30, %v11487_v53 }
 0x3a8   :  { %vm3824_vm15 = vc.u32 %v3816_v3, %v3820_v10  ;;  %v3826_v14 = vadd.s32 %v3820_v10, %v3816_v3  ;;  %vm7185_vm5 = vcmp.lt.s32.totalorder %v7184_v33, 0  ;;  %v11509_v54 = vmul.u32 %v14580_v42, %v3812_v44 }
 0x3a9   :  { %v3825_v29 = vsel %vm3824_vm15, 1, %v14643_v51  ;;  %v3602_v58 = vsel %vm3600_vm9, %v3587_v59, %v3601_v43  ;;  %v3605_v9 = vsel %vm3603_vm6, %v3604_v39, %v3595_v48  ;;  %v3717_v31 = vsel %vm7185_vm5, 0, %v7184_v33 }
 0x3aa   :  { %vm3828_vm10 = vc.u32 %v3826_v14, %v3822_v50  ;;  %v3606_v56 = vsel %vm3599_vm11, %v3602_v58, %v3605_v9  ;;  %v1120_v38 = vsel %vm1087_vm7, %v8889_v4, 0.0  ;;  %v3718_v28 = vsub.s32 32, %v3717_v31  ;;  %v510_v9 = vpop.permute.xlu1 %509 }
 0x3ab   :  { %v3722_v10 = vsub.s32 4294967266, %v3717_v31  ;;  %v3607_v30 = vsel %vm3596_vm1, nan, %v3606_v56  ;;  %v3827_v3 = vadd.s32 %v3825_v29, %v3819_v12  ;;  %v3838_v1 = vmul.u32 %v3836_v5, %v3812_v44  ;;  %v11548_v29 = vld [vmem:[%s14370_s0 + $0xf0] sm:$0xff] }
 0x3ac   :  { %v3842_v42 = vshll.u32 %v11509_v54, 16  ;;  %6473 = vmatmul.f32.gmra.mxu0 %v3607_v30  ;;  %v3719_v59 = vshll.u32 %v11479_v57, %v3717_v31  ;;  %v3720_v48 = vshrl.u32 %v3702_v62, %v3718_v28  ;;  %v3829_v0 = vsel %vm3828_vm10, 1, %v14643_v51 }
 0x3ad   :  { %v3723_v39 = vadd.s32 127, %v3722_v10  ;;  %v11522_v33 = vsub.s32 32, %v11326_v61  ;;  %v11526_v11 = vshll.u32 %v14724_v25, %v11326_v61  ;;  %v1152_v55 = vadd.f32 %v1120_v38, %v895_v63  ;;  %v6554_v63 = vld [vmem:[%s14379_s9 + $0x38] sm:$0xff] }
 0x3ae   :  { %v3732_v12 = vsub.s32 4, %v11454_v40  ;;  %v14903_v44 = vand.u32 2147483647, %v14886_v19  ;;  %v3721_v57 = vor.u32 %v3720_v48, %v3719_v59  ;;  %v11536_v50 = vmul.u32 %v3836_v5, %v11487_v53  ;;  %v6553_v5 = vld [vmem:[%s14379_s9 + $0x30] sm:$0xff]  ;;  %6571 = vmatpush.msra.mxu1 %v6554_v63 }
 0x3af   :  { %14902 = vst [vmem:[#allocation20_spill] sm:$0xff] %v11522_v33  ;;  %v3724_v62 = vshll.u32 %v3723_v39, 23  ;;  %vm11538_vm12 = vc.u32 %v3838_v1, %v3842_v42  ;;  %vm686_vm1 = vcmp.eq.s32.totalorder %v11548_v29, 2  ;;  %vm429_vm11 = vcmp.eq.s32.totalorder %v11548_v29, 1 }
 0x3b0   :  { %vm11531_vm13 = vcmp.le.f32.partialorder %v14903_v44, 0.7853982  ;;  %vm942_vm9 = vcmp.eq.s32.totalorder %v11367_v2, 3  ;;  %v3831_v58 = vadd.s32 %v3829_v0, %v3827_v3  ;;  %v718_v56 = vsel %vm686_vm1, 1, %v14643_v51  ;;  %v6552_v2 = vld [vmem:[%s14379_s9 + $0x28] sm:$0xff]  ;;  %6572 = vmatpush.msra.mxu1 %v6553_v5 }
 0x3b1   :  { %v3725_v31 = vor.u32 4788187, %v3724_v62  ;;  %v461_v38 = vsel %vm429_vm11, 1, %v14643_v51  ;;  %v3848_v28 = vadd.s32 %v3842_v42, %v3838_v1  ;;  %vm3610_vm6 = vcmp.lt.s32.totalorder %v14886_v19, 0  ;;  %811 = vperm.xlu2 %7253, %v718_v56   ;;  %v11571_v0 = vld [vmem:[#allocation5] ss:$0 sm:$0xff] }
 0x3b2   :  { %554 = vperm.xlu1 %7252, %v461_v38   ;;  %v974_v10 = vsel %vm942_vm9, 1, %v14643_v51  ;;  %v3821_v30 = vshrl.u32 %v11493_v36, 16  ;;  %v3847_v3 = vsel %vm11538_vm12, 1, %v14643_v51  ;;  %v3728_v48 = vcvt.s32.f32 %v3721_v57  ;;  %v6551_v36 = vld [vmem:[%s14379_s9 + $0x20] sm:$0xff]  ;;  %6573 = vmatpush.msra.mxu1 %v6552_v2 }
 0x3b3   :  { %v3726_v59 = vand.u32 2147483647, %v3725_v31  ;;  %1065 = vperm.xlu0 %7251, %v974_v10   ;;  %v14908_v1 = vshrl.u32 %v11483_v16, 16  ;;  %v3844_v39 = vshll.u32 %v11536_v50, 16  ;;  %vm574_vm7 = vcmp.eq.s32.totalorder %v510_v9, 1  ;;  %v14909_v31 = vld [vmem:[#allocation73_spill] sm:$0xff] }
 0x3b4   :  { %v1188_v44 = vadd.f32 %v11571_v0, %v1152_v55  ;;  %v3800_v57 = vsel %vm3798_vm0, %v11443_v47, 2102212464  ;;  %v3832_v62 = vadd.s32 %v3831_v58, %v3821_v30  ;;  %v3733_v16 = vsel %vm3610_vm6, %v3732_v12, %v11454_v40  ;;  %v767_v58 = vpop.permute.xlu2 %766  ;;  %6574 = vmatpush.msra.mxu1 %v6551_v36  ;;  %v1024_v30 = vpop.permute.xlu0 %1023 }
 0x3b5   :  { %v3841_v42 = vmul.u32 %v14908_v1, %v11487_v53  ;;  %v3729_v14 = vmul.f32 %v3728_v48, %v3726_v59  ;;  %vm3850_vm15 = vc.u32 %v3848_v28, %v3844_v39  ;;  %v3779_v55 = vshrl.u32 %v14744_v49, %v14899_v60  ;;  %v14910_v1 = vld [vmem:[#allocation33_spill] sm:$0xff] }
 0x3b6   :  { %6734 = vmatmul.f32.gmra.mxu2 %v1188_v44  ;;  %7068 = vst [vmem:[#allocation10 + $0x70] sm:$0xff] %v1188_v44  ;;  %v3823_v63 = vshrl.u32 %v11497_v18, 16  ;;  %v3851_v5 = vsel %vm3850_vm15, 1, %v14643_v51  ;;  %v14582_v47 = vand.u32 2147483647, %v14909_v31  ;;  %v607_v56 = vsel %vm574_vm7, %v8133_v35, 0.0  ;;  %v513_v44 = vpop.permute.xlu1 %512 }
 0x3b7   :  { %v3849_v53 = vadd.s32 %v3847_v3, %v3841_v42  ;;  %v3730_v38 = vxor.u32 2147483648, %v3729_v14  ;;  %v3843_v40 = vshrl.u32 %v11509_v54, 16  ;;  %v3735_v10 = vsel %vm11531_vm13, 0, %v3733_v16 }
 0x3b8   :  { %v3799_v60 = vsel %vm3795_vm3, %v3779_v55, %v11446_v6  ;;  %v3801_v18 = vsel %vm3797_vm14, %v11431_v45, %v3800_v57  ;;  %v3833_v2 = vadd.s32 %v3832_v62, %v3823_v63  ;;  %v3845_v3 = vshrl.u32 %v11536_v50, 16 }
 0x3b9   :  { %v3853_v12 = vadd.s32 %v3851_v5, %v3849_v53  ;;  %v3731_v9 = vsel %vm3610_vm6, %v3730_v38, %v3729_v14  ;;  %v3925_v59 = vand.u32 8388607, %v14582_v47  ;;  %v11606_v48 = vshll.u32 %v14726_v41, %v11326_v61  ;;  %v14911_v14 = vld [vmem:[#allocation60_spill] sm:$0xff] }
 0x3ba   :  { %vm831_vm0 = vcmp.eq.s32.totalorder %v767_v58, 1  ;;  %v11611_v45 = vsel %vm11531_vm13, %v14886_v19, %v3731_v9  ;;  %v3852_v6 = vadd.s32 %v3848_v28, %v3844_v39  ;;  %v639_v42 = vadd.f32 %v607_v56, %v14910_v1 }
 0x3bb   :  { %v3854_v54 = vadd.s32 %v3853_v12, %v3843_v40  ;;  %v3736_v50 = vmul.f32 %v11611_v45, %v11611_v45  ;;  %v3802_v36 = vsel %vm3796_vm4, %v3799_v60, %v3801_v18  ;;  %v3752_v62 = vadd.s32 3, %v3735_v10 }
 0x3bc   :  { %vm1088_vm3 = vcmp.eq.s32.totalorder %v1024_v30, 1  ;;  %vm3858_vm14 = vc.u32 %v3833_v2, %v3852_v6  ;;  %v14581_v16 = vand.u32 2147483647, %v14911_v14  ;;  %v3926_v63 = vor.u32 8388608, %v3925_v59 }
 0x3bd   :  { %v3855_v57 = vadd.s32 %v3854_v54, %v3845_v3  ;;  %v3737_v53 = vmul.f32 -0.001358992, %v3736_v50  ;;  %v3744_v43 = vmul.f32 -0.00019511016, %v3736_v50  ;;  %v11620_v28 = vsub.s32 32, %v11352_v8  ;;  %v14913_v3 = vld [vmem:[#allocation93_spill] sm:$0xff] }
 0x3be   :  { %v864_v39 = vsel %vm831_vm0, %v8876_v23, 0.0  ;;  %vm575_vm5 = vcmp.eq.s32.totalorder %v513_v44, 1  ;;  %v3856_v7 = vmul.u32 %v11469_v17, %v3802_v36  ;;  %v1121_v38 = vsel %vm1088_vm3, %v8889_v4, 0.0 }
 0x3bf   :  { %v3859_v55 = vadd.s32 1, %v3855_v57  ;;  %14912 = vst [vmem:[#allocation80_spill] sm:$0xff] %v11620_v28  ;;  %v3738_v5 = vadd.f32 0.041655596, %v3737_v53  ;;  %v3745_v56 = vadd.f32 0.008332121, %v3744_v43  ;;  %v896_v10 = vadd.f32 %v864_v39, %v639_v42 }
 0x3c0   :  { %v11626_v12 = vand.u32 3, %v3752_v62  ;;  %v11630_v18 = vand.u32 8388607, %v14581_v16  ;;  %v11632_v58 = vshll.u32 %v3926_v63, 8  ;;  %v4091_v17 = vshrl.u32 %v14725_v37, %v14913_v3  ;;  %v14914_v62 = vld [vmem:[#allocation86_spill] sm:$0xff] }
 0x3c1   :  { %v3860_v40 = vsel %vm3858_vm14, %v3859_v55, %v3855_v57  ;;  %v3739_v9 = vmul.f32 %v3738_v5, %v3736_v50  ;;  %v3746_v30 = vmul.f32 %v3745_v56, %v3736_v50  ;;  %v11638_v54 = vshll.u32 %v14724_v25, %v11352_v8 }
 0x3c2   :  { %v3861_v60 = vadd.s32 %v3860_v40, %v3856_v7  ;;  %v11641_v59 = vsel %vm575_vm5, %v8133_v35, 0.0  ;;  %v11643_v1 = vadd.f32 %v1121_v38, %v896_v10  ;;  %v11645_v57 = vadd.s32 %v3852_v6, %v3833_v2  ;;  %v14915_v38 = vld [vmem:[#allocation114_spill] sm:$0xff]  ;;  %v14916_v10 = vld [vmem:[#allocation117_spill] sm:$0xff] }
 0x3c3   :  { %v3740_v44 = vadd.f32 -0.4999988, %v3739_v9  ;;  %v3747_v36 = vadd.f32 -0.16666654, %v3746_v30  ;;  %v4090_v53 = vshll.u32 %v14744_v49, %v14914_v62  ;;  %vm3755_vm4 = vcmp.eq.s32.totalorder %v11626_v12, 0 }
 0x3c4   :  { %v3862_v42 = vadd.s32 536870912, %v3861_v60  ;;  %vm3758_vm10 = vcmp.eq.s32.totalorder %v11626_v12, 2  ;;  %v4093_v63 = vshll.u32 %v14725_v37, %v14914_v62  ;;  %v4094_v39 = vshrl.u32 %v14728_v34, %v14913_v3 }
 0x3c5   :  { %v3741_v7 = vmul.f32 %v3740_v44, %v3736_v50  ;;  %v3748_v2 = vmul.f32 %v3747_v36, %v3736_v50  ;;  %vm3754_vm13 = vcmp.lt.s32.totalorder %v11626_v12, 2  ;;  %v11660_v6 = vand.u32 65535, %v11632_v58 }
 0x3c6   :  { %v11651_v43 = vshrl.u32 %v3862_v42, 30  ;;  %v11662_v5 = vor.u32 %v4091_v17, %v4090_v53  ;;  %vm3751_vm12 = vweird.f32 %v14886_v19  ;;  %v3935_v40 = vshll.u32 %v14744_v49, %v14915_v38 }
 0x3c7   :  { %v3936_v9 = vshrl.u32 %v14725_v37, %v14916_v10  ;;  %v3939_v50 = vshrl.u32 %v14728_v34, %v14916_v10  ;;  %v3742_v30 = vadd.f32 1.0, %v3741_v7  ;;  %v3749_v42 = vadd.f32 1.0, %v3748_v2 }
 0x3c8   :  { %v3864_v56 = vshll.u32 %v11651_v43, 30  ;;  %v3938_v44 = vshll.u32 %v14725_v37, %v14915_v38  ;;  %v3945_v17 = vshrl.u32 %v14726_v41, %v14916_v10  ;;  %v3941_v53 = vshll.u32 %v14728_v34, %v14915_v38 }
 0x3c9   :  { %v3942_v16 = vshrl.u32 %v14724_v25, %v14916_v10  ;;  %v3948_v47 = vshrl.u32 %v14731_v46, %v14916_v10  ;;  %v3750_v7 = vmul.f32 %v3749_v42, %v11611_v45  ;;  %v3759_v2 = vxor.u32 2147483648, %v3742_v30 }
 0x3ca   :  { %v11676_v36 = vsub.s32 %v3861_v60, %v3864_v56  ;;  %v3944_v55 = vshll.u32 %v14724_v25, %v14915_v38  ;;  %v3947_v61 = vshll.u32 %v14726_v41, %v14915_v38  ;;  %vm3765_vm1 = vcmp.lt.s32.totalorder %v14894_v22, 0 }
 0x3cb   :  { %v3937_v56 = vor.u32 %v3936_v9, %v3935_v40  ;;  %v3940_v15 = vor.u32 %v3939_v50, %v3938_v44  ;;  %v3756_v52 = vxor.u32 2147483648, %v3750_v7  ;;  %v11693_v13 = vshrl.u32 %v11632_v58, 16 }
 0x3cc   :  { %vm3866_vm11 = vcmp.lt.s32.totalorder %v11676_v36, 0  ;;  %v3867_v60 = vsub.s32 0, %v11676_v36  ;;  %v3946_v21 = vor.u32 %v3945_v17, %v3944_v55  ;;  %v11695_v45 = vor.u32 %v4094_v39, %v4093_v63  ;;  %v14920_v39 = vld [vmem:[#allocation113_spill] sm:$0xff] }
 0x3cd   :  { %v3943_v20 = vor.u32 %v3942_v16, %v3941_v53  ;;  %v3949_v24 = vor.u32 %v3948_v47, %v3947_v61  ;;  %v4096_v38 = vshll.u32 %v14728_v34, %v14914_v62  ;;  %v3757_v27 = vsel %vm3755_vm4, %v3742_v30, %v3756_v52 }
 0x3ce   :  { %v3868_v42 = vsel %vm3866_vm11, %v3867_v60, %v11676_v36  ;;  %v3760_v40 = vsel %vm3758_vm10, %v3759_v2, %v3750_v7  ;;  %v14917_v55 = vand.u32 2147483647, %v14894_v22  ;;  %vm3950_vm6 = vcmp.lt.s32.totalorder %v14920_v39, 1 }
 0x3cf   :  { %v3869_v63 = vclz %v3868_v42  ;;  %v3761_v61 = vsel %vm3754_vm13, %v3757_v27, %v3760_v40  ;;  %v3887_v47 = vsub.s32 4, %v11651_v43  ;;  %vm3953_vm7 = vcmp.lt.s32.totalorder %v14920_v39, 4 }
 0x3d0   :  { %vm11706_vm9 = vcmp.le.f32.partialorder %v14917_v55, 0.7853982  ;;  %v3958_v52 = vsel %vm3950_vm6, %v3937_v56, %v3940_v15  ;;  %v3762_v16 = vsel %vm3751_vm12, nan, %v3761_v61  ;;  %vm3952_vm15 = vcmp.lt.s32.totalorder %v14920_v39, 3 }
 0x3d1   :  { %v7187_v50 = vadd.s32 4294967294, %v3869_v63  ;;  %v3959_v30 = vsel %vm3953_vm7, %v3946_v21, 920167782  ;;  %6476 = vmatmul.f32.gmra.mxu0 %v3762_v16  ;;  %vm3951_vm0 = vcmp.lt.s32.totalorder %v14920_v39, 2  ;;  %v3962_v12 = vsel %vm3950_vm6, %v3940_v15, %v3943_v20 }
 0x3d2   :  { %v3960_v27 = vsel %vm3952_vm15, %v3943_v20, %v3959_v30  ;;  %v3963_v44 = vsel %vm3953_vm7, %v3949_v24, 1326507024  ;;  %v4097_v53 = vshrl.u32 %v14724_v25, %v14913_v3  ;;  %v11739_v42 = vshll.u32 %v14724_v25, %v14914_v62 }
 0x3d3   :  { %vm7188_vm3 = vcmp.lt.s32.totalorder %v7187_v50, 0  ;;  %v3961_v19 = vsel %vm3951_vm0, %v3958_v52, %v3960_v27  ;;  %v3964_v17 = vsel %vm3952_vm15, %v3946_v21, %v3963_v44  ;;  %v3888_v55 = vsel %vm3765_vm1, %v3887_v47, %v11651_v43 }
 0x3d4   :  { %v3872_v7 = vsel %vm7188_vm3, 0, %v7187_v50  ;;  %v3965_v2 = vsel %vm3951_vm0, %v3962_v12, %v3964_v17  ;;  %v3992_v60 = vshrl.u32 %v3961_v19, 16  ;;  %v11746_v21 = vshrl.u32 %v14726_v41, %v14913_v3 }
 0x3d5   :  { %v3873_v24 = vsub.s32 32, %v3872_v7  ;;  %v3877_v40 = vsub.s32 4294967266, %v3872_v7  ;;  %v3934_v63 = vshrl.u32 %v14744_v49, %v14916_v10  ;;  %v3955_v61 = vsel %vm3953_vm7, %v3943_v20, 2102212464 }
 0x3d6   :  { %v3970_v52 = vshrl.u32 %v3965_v2, 16  ;;  %v11754_v16 = vshll.u32 %v14726_v41, %v14914_v62  ;;  %v3874_v50 = vshll.u32 %v11676_v36, %v3872_v7  ;;  %v3969_v47 = vand.u32 65535, %v3965_v2 }
 0x3d7   :  { %v3875_v30 = vshrl.u32 %v11645_v57, %v3873_v24  ;;  %v3878_v43 = vadd.s32 127, %v3877_v40  ;;  %v3890_v27 = vsel %vm11706_vm9, 0, %v3888_v55  ;;  %v3991_v12 = vand.u32 65535, %v3961_v19  ;;  %v6550_v57 = vld [vmem:[%s14379_s9 + $0x18] sm:$0xff] }
 0x3d8   :  { %v11761_v10 = vmul.u32 %v3992_v60, %v11660_v6  ;;  %v11763_v44 = vor.u32 %v4097_v53, %v4096_v38  ;;  %v3954_v62 = vsel %vm3950_vm6, %v3934_v63, %v3937_v56  ;;  %v3956_v36 = vsel %vm3952_vm15, %v3940_v15, %v3955_v61  ;;  %v11775_v19 = vld [vmem:[%s14370_s0 + $0xf8] sm:$0xff]  ;;  %v6549_v56 = vld [vmem:[%s14379_s9 + $0x10] sm:$0xff]  ;;  %6575 = vmatpush.msra.mxu1 %v6550_v57  ;;  %v6547_v57 = vld [vmem:[%s14379_s9] sm:$0xff] }
 0x3d9   :  { %v3876_v20 = vor.u32 %v3875_v30, %v3874_v50  ;;  %v3879_v17 = vshll.u32 %v3878_v43, 23  ;;  %vm687_vm14 = vcmp.eq.s32.totalorder %v11775_v19, 2  ;;  %vm430_vm5 = vcmp.eq.s32.totalorder %v11775_v19, 1 }
 0x3da   :  { %vm943_vm4 = vcmp.eq.s32.totalorder %v11548_v29, 3  ;;  %v3972_v15 = vmul.u32 %v3970_v52, %v11660_v6  ;;  %v719_v53 = vsel %vm687_vm14, 1, %v14643_v51  ;;  %v462_v7 = vsel %vm430_vm5, 1, %v14643_v51  ;;  %v6548_v29 = vld [vmem:[%s14379_s9 + $0x8] sm:$0xff]  ;;  %6576 = vmatpush.msra.mxu1 %v6549_v56  ;;  %s7105_s9 = sshll.u32 %s14384_s14, 4  ;;  %s7442_s14 = smov [#allocation7]   ;;  %s7106_s9 = int_to_ptr.hbm [resolvable:$true] %s7105_s9 }
 0x3db   :  { %v3880_v38 = vor.u32 4788187, %v3879_v17  ;;  %v3973_v2 = vmul.u32 %v3969_v47, %v11693_v13  ;;  %814 = vperm.xlu2 %7253, %v719_v53   ;;  %557 = vperm.xlu1 %7252, %v462_v7   ;;  %v975_v24 = vsel %vm943_vm4, 1, %v14643_v51  ;;  %v3995_v40 = vmul.u32 %v3991_v12, %v11693_v13  ;;  %s7090_s15 = sshll.u32 %s7442_s14, 4  ;;  %s7091_s15 = int_to_ptr.vmem [resolvable:$true] %s7090_s15 }
 0x3dc   :  { %v3997_v55 = vshll.u32 %v11761_v10, 16  ;;  %v11795_v63 = vshrl.u32 %v14731_v46, %v14913_v3  ;;  %v3883_v50 = vcvt.s32.f32 %v3876_v20  ;;  %v11797_v30 = vadd.s32 3, %v3890_v27  ;;  %1068 = vperm.xlu0 %7251, %v975_v24   ;;  %6577 = vmatpush.msra.mxu1 %v6548_v29 }
 0x3dd   :  { %v3881_v61 = vand.u32 2147483647, %v3880_v38  ;;  %v11801_v43 = vsel %vm3951_vm0, %v3954_v62, %v3956_v36  ;;  %v1189_v17 = vadd.f32 %v11571_v0, %v11643_v1  ;;  %v3971_v53 = vmul.u32 %v3969_v47, %v11660_v6 }
 0x3de   :  { %v3975_v7 = vshll.u32 %v3972_v15, 16  ;;  %v3993_v20 = vmul.u32 %v3991_v12, %v11660_v6  ;;  %v3974_v56 = vmul.u32 %v3970_v52, %v11693_v13  ;;  %v3977_v38 = vshll.u32 %v3973_v2, 16  ;;  %6578 = vmatpush.msra.mxu1 %v6547_v57 }
 0x3df   :  { %v3884_v27 = vmul.f32 %v3883_v50, %v3881_v61  ;;  %v3996_v39 = vmul.u32 %v3992_v60, %v11693_v13  ;;  %6737 = vmatmul.f32.gmra.mxu2 %v1189_v17  ;;  %7069 = vst [vmem:[#allocation10 + $0x78] sm:$0xff] %v1189_v17  ;;  %v3999_v62 = vshll.u32 %v3995_v40, 16  ;;  %v4101_v52 = vor.u32 %v11746_v21, %v11739_v42 }
 0x3e0   :  { %vm3979_vm10 = vc.u32 %v3971_v53, %v3975_v7  ;;  %v3981_v1 = vadd.s32 %v3975_v7, %v3971_v53  ;;  %vm4001_vm13 = vc.u32 %v3993_v20, %v3997_v55  ;;  %v4003_v6 = vadd.s32 %v3997_v55, %v3993_v20 }
 0x3e1   :  { %v3885_v36 = vxor.u32 2147483648, %v3884_v27  ;;  %v3980_v47 = vsel %vm3979_vm10, 1, %v14643_v51  ;;  %v4002_v24 = vsel %vm4001_vm13, 1, %v14643_v51  ;;  %v3978_v60 = vshrl.u32 %v3973_v2, 16 }
 0x3e2   :  { %v3982_v12 = vadd.s32 %v3980_v47, %v3974_v56  ;;  %vm3983_vm12 = vc.u32 %v3981_v1, %v3977_v38  ;;  %v4004_v29 = vadd.s32 %v4002_v24, %v3996_v39  ;;  %vm4005_vm11 = vc.u32 %v4003_v6, %v3999_v62 }
 0x3e3   :  { %v3886_v13 = vsel %vm3765_vm1, %v3885_v36, %v3884_v27  ;;  %v3984_v61 = vsel %vm3983_vm12, 1, %v14643_v51  ;;  %v3976_v17 = vshrl.u32 %v3972_v15, 16  ;;  %v4006_v55 = vsel %vm4005_vm11, 1, %v14643_v51  ;;  %v14921_v27 = vld [vmem:[#allocation85_spill] sm:$0xff] }
 0x3e4   :  { %v3889_v50 = vsel %vm11706_vm9, %v14894_v22, %v3886_v13  ;;  %v3986_v57 = vadd.s32 %v3984_v61, %v3982_v12  ;;  %v3998_v7 = vshrl.u32 %v11761_v10, 16  ;;  %v4000_v20 = vshrl.u32 %v3995_v40, 16 }
 0x3e5   :  { %v3891_v53 = vmul.f32 %v3889_v50, %v3889_v50  ;;  %v4008_v42 = vadd.s32 %v4006_v55, %v4004_v29  ;;  %v11824_v56 = vadd.s32 %v4003_v6, %v3999_v62  ;;  %v4104_v2 = vor.u32 %v11795_v63, %v11754_v16  ;;  %v770_v55 = vpop.permute.xlu2 %769 }
 0x3e6   :  { %v3987_v21 = vadd.s32 %v3986_v57, %v3976_v17  ;;  %vm4105_vm1 = vcmp.lt.s32.totalorder %v14921_v27, 1  ;;  %vm4108_vm9 = vcmp.lt.s32.totalorder %v14921_v27, 4  ;;  %vm4106_vm6 = vcmp.lt.s32.totalorder %v14921_v27, 2 }
 0x3e7   :  { %v3892_v38 = vmul.f32 -0.001358992, %v3891_v53  ;;  %v3899_v9 = vmul.f32 -0.00019511016, %v3891_v53  ;;  %v4009_v39 = vadd.s32 %v4008_v42, %v3998_v7  ;;  %v4113_v10 = vsel %vm4105_vm1, %v11662_v5, %v11695_v45 }
 0x3e8   :  { %v11830_v15 = vadd.s32 %v3987_v21, %v3978_v60  ;;  %v4114_v40 = vsel %vm4108_vm9, %v4101_v52, 920167782  ;;  %vm4107_vm7 = vcmp.lt.s32.totalorder %v14921_v27, 3  ;;  %v4117_v36 = vsel %vm4105_vm1, %v11695_v45, %v11763_v44 }
 0x3e9   :  { %v3893_v16 = vadd.f32 0.041655596, %v3892_v38  ;;  %v3900_v63 = vadd.f32 0.008332121, %v3899_v9  ;;  %v4010_v1 = vadd.s32 %v4009_v39, %v4000_v20  ;;  %v4115_v62 = vsel %vm4107_vm7, %v11763_v44, %v4114_v40 }
 0x3ea   :  { %vm4013_vm15 = vc.u32 %v11830_v15, %v11824_v56  ;;  %v4118_v47 = vsel %vm4108_vm9, %v4104_v2, 1326507024  ;;  %v11853_v29 = vsel %vm4106_vm6, %v4113_v10, %v4115_v62  ;;  %v3908_v13 = vand.u32 3, %v11797_v30  ;;  %v14923_v10 = vld [vmem:[#allocation32_spill] sm:$0xff] }
 0x3eb   :  { %v3894_v24 = vmul.f32 %v3893_v16, %v3891_v53  ;;  %v3901_v6 = vmul.f32 %v3900_v63, %v3891_v53  ;;  %v4014_v12 = vadd.s32 1, %v4010_v1  ;;  %v4011_v60 = vmul.u32 %v11632_v58, %v11801_v43 }
 0x3ec   :  { %v4119_v61 = vsel %vm4107_vm7, %v4101_v52, %v4118_v47  ;;  %v14922_v17 = vor.u32 8388608, %v11630_v18  ;;  %v4147_v58 = vshrl.u32 %v11853_v29, 16  ;;  %v11871_v39 = vshrl.u32 %v14726_v41, %v11522_v33 }
 0x3ed   :  { %v3895_v7 = vadd.f32 -0.4999988, %v3894_v24  ;;  %v3902_v20 = vadd.f32 -0.16666654, %v3901_v6  ;;  %v4015_v42 = vsel %vm4013_vm15, %v4014_v12, %v4010_v1  ;;  %v4120_v21 = vsel %vm4106_vm6, %v4117_v36, %v4119_v61 }
 0x3ee   :  { %v11862_v57 = vshll.u32 %v14922_v17, 8  ;;  %v4016_v2 = vadd.s32 %v4015_v42, %v4011_v60  ;;  %v4124_v38 = vand.u32 65535, %v4120_v21  ;;  %v4125_v18 = vshrl.u32 %v4120_v21, 16 }
 0x3ef   :  { %v3896_v43 = vmul.f32 %v3895_v7, %v3891_v53  ;;  %v3903_v9 = vmul.f32 %v3902_v20, %v3891_v53  ;;  %vm832_vm0 = vcmp.eq.s32.totalorder %v770_v55, 1  ;;  %v640_v40 = vadd.f32 %v11641_v59, %v14923_v10 }
 0x3f0   :  { %v4122_v30 = vand.u32 65535, %v11862_v57  ;;  %v4123_v52 = vshrl.u32 %v11862_v57, 16  ;;  %v4017_v16 = vadd.s32 536870912, %v4016_v2  ;;  %vm3909_vm3 = vcmp.lt.s32.totalorder %v3908_v13, 2 }
 0x3f1   :  { %v3897_v63 = vadd.f32 1.0, %v3896_v43  ;;  %v3904_v1 = vadd.f32 1.0, %v3903_v9  ;;  %v4146_v24 = vand.u32 65535, %v11853_v29  ;;  %vm3910_vm14 = vcmp.eq.s32.totalorder %v3908_v13, 0  ;;  %v1027_v43 = vpop.permute.xlu0 %1026 }
 0x3f2   :  { %v4127_v62 = vmul.u32 %v4125_v18, %v4122_v30  ;;  %v11875_v36 = vmul.u32 %v4124_v38, %v4123_v52  ;;  %v11877_v47 = vshrl.u32 %v4017_v16, 30  ;;  %v4126_v53 = vmul.u32 %v4124_v38, %v4122_v30 }
 0x3f3   :  { %v3905_v6 = vmul.f32 %v3904_v1, %v3889_v50  ;;  %v3914_v12 = vxor.u32 2147483648, %v3897_v63  ;;  %v11880_v61 = vmul.u32 %v4147_v58, %v4122_v30  ;;  %vm3913_vm5 = vcmp.eq.s32.totalorder %v3908_v13, 2 }
 0x3f4   :  { %v4130_v60 = vshll.u32 %v4127_v62, 16  ;;  %v4019_v59 = vshll.u32 %v11877_v47, 30  ;;  %v4129_v17 = vmul.u32 %v4125_v18, %v4123_v52  ;;  %v4132_v20 = vshll.u32 %v11875_v36, 16 }
 0x3f5   :  { %v3911_v7 = vxor.u32 2147483648, %v3905_v6  ;;  %v3915_v21 = vsel %vm3913_vm5, %v3914_v12, %v3905_v6  ;;  %v4150_v29 = vmul.u32 %v4146_v24, %v4123_v52  ;;  %v4152_v16 = vshll.u32 %v11880_v61, 16 }
 0x3f6   :  { %vm4134_vm4 = vc.u32 %v4126_v53, %v4130_v60  ;;  %v4136_v42 = vadd.s32 %v4130_v60, %v4126_v53  ;;  %v11884_v38 = vsub.s32 %v4016_v2, %v4019_v59  ;;  %vm3906_vm13 = vweird.f32 %v14894_v22 }
 0x3f7   :  { %v4135_v50 = vsel %vm4134_vm4, 1, %v14643_v51  ;;  %v3912_v9 = vsel %vm3910_vm14, %v3897_v63, %v3911_v7  ;;  %vm1089_vm11 = vcmp.eq.s32.totalorder %v1027_v43, 1  ;;  %v4148_v6 = vmul.u32 %v4146_v24, %v4122_v30 }
 0x3f8   :  { %v4137_v10 = vadd.s32 %v4135_v50, %v4129_v17  ;;  %vm4138_vm10 = vc.u32 %v4136_v42, %v4132_v20  ;;  %v3916_v18 = vsel %vm3909_vm3, %v3912_v9, %v3915_v21  ;;  %vm4021_vm12 = vcmp.lt.s32.totalorder %v11884_v38, 0 }
 0x3f9   :  { %v4022_v1 = vsub.s32 0, %v11884_v38  ;;  %v3917_v53 = vsel %vm3906_vm13, nan, %v3916_v18  ;;  %v4139_v2 = vsel %vm4138_vm10, 1, %v14643_v51  ;;  %v11895_v63 = vshrl.u32 %v14731_v46, %v11522_v33 }
 0x3fa   :  { %v865_v12 = vsel %vm832_vm0, %v8876_v23, 0.0  ;;  %6479 = vmatmul.f32.gmra.mxu0 %v3917_v53  ;;  %v4141_v13 = vadd.s32 %v4139_v2, %v4137_v10  ;;  %v4154_v59 = vshll.u32 %v4150_v29, 16  ;;  %vm4156_vm15 = vc.u32 %v4148_v6, %v4152_v16 }
 0x3fb   :  { %v4023_v22 = vsel %vm4021_vm12, %v4022_v1, %v11884_v38  ;;  %v4158_v17 = vadd.s32 %v4152_v16, %v4148_v6  ;;  %v1122_v7 = vsel %vm1089_vm11, %v8889_v4, 0.0  ;;  %vm3920_vm3 = vcmp.lt.s32.totalorder %v14909_v31, 0  ;;  %v516_v1 = vpop.permute.xlu1 %515 }
 0x3fc   :  { %v4024_v60 = vclz %v4023_v22  ;;  %v4131_v30 = vshrl.u32 %v4127_v62, 16  ;;  %v4151_v24 = vmul.u32 %v4147_v58, %v4123_v52  ;;  %v897_v20 = vadd.f32 %v865_v12, %v640_v40 }
 0x3fd   :  { %v4157_v21 = vsel %vm4156_vm15, 1, %v14643_v51  ;;  %vm4160_vm14 = vc.u32 %v4158_v17, %v4154_v59  ;;  %v4089_v55 = vshrl.u32 %v14744_v49, %v14913_v3  ;;  %v4110_v16 = vsel %vm4108_vm9, %v11763_v44, 2102212464 }
 0x3fe   :  { %v7190_v42 = vadd.s32 4294967294, %v4024_v60  ;;  %v4142_v43 = vadd.s32 %v4141_v13, %v4131_v30  ;;  %v4159_v50 = vadd.s32 %v4157_v21, %v4151_v24  ;;  %v4161_v9 = vsel %vm4160_vm14, 1, %v14643_v51  ;;  %v6435_v30 = vpop.f32.mrf.mxu0 }
 0x3ff   :  { %v1154_v10 = vadd.f32 %v1122_v7, %v897_v20  ;;  %v4133_v58 = vshrl.u32 %v11875_v36, 16  ;;  %v4042_v40 = vsub.s32 4, %v11877_v47  ;;  %v4153_v62 = vshrl.u32 %v11880_v61, 16 }
 0x400   :  { %vm7191_vm0 = vcmp.lt.s32.totalorder %v7190_v42, 0  ;;  %v4163_v18 = vadd.s32 %v4161_v9, %v4159_v50  ;;  %v4012_v3 = vadd.s32 %v11824_v56, %v11830_v15  ;;  %v4109_v6 = vsel %vm4105_vm1, %v4089_v55, %v11662_v5  ;;  %v773_v55 = vpop.permute.xlu2 %772  ;;  %v14928_v50 = vld [vmem:[#allocation88_spill] sm:$0xff] }
 0x401   :  { %v4027_v52 = vsel %vm7191_vm0, 0, %v7190_v42  ;;  %v4111_v44 = vsel %vm4107_vm7, %v11695_v45, %v4110_v16  ;;  %v4143_v36 = vadd.s32 %v4142_v43, %v4133_v58  ;;  %v4155_v12 = vshrl.u32 %v4150_v29, 16  ;;  %v14927_v42 = vld [vmem:[#allocation92_spill] sm:$0xff] }
 0x402   :  { %v4028_v53 = vsub.s32 32, %v4027_v52  ;;  %v4032_v2 = vsub.s32 4294967266, %v4027_v52  ;;  %v4164_v22 = vadd.s32 %v4163_v18, %v4153_v62  ;;  %v14924_v61 = vand.u32 2147483647, %v14909_v31 }
 0x403   :  { %v4029_v56 = vshll.u32 %v11884_v38, %v4027_v52  ;;  %vm576_vm5 = vcmp.eq.s32.totalorder %v516_v1, 1  ;;  %v4043_v5 = vsel %vm3920_vm3, %v4042_v40, %v11877_v47  ;;  %v4162_v7 = vadd.s32 %v4158_v17, %v4154_v59  ;;  %v11936_v38 = vld [vmem:[%s14377_s7] ss:$0 sm:$0xff] }
 0x404   :  { %vm11922_vm9 = vcmp.le.f32.partialorder %v14924_v61, 0.7853982  ;;  %v4030_v15 = vshrl.u32 %v4012_v3, %v4028_v53  ;;  %v4033_v60 = vadd.s32 127, %v4032_v2  ;;  %v4165_v45 = vadd.s32 %v4164_v22, %v4155_v12 }
 0x405   :  { %v4112_v20 = vsel %vm4106_vm6, %v4109_v6, %v4111_v44  ;;  %v14593_v21 = vand.u32 2147483647, %v14927_v42  ;;  %vm944_vm1 = vcmp.eq.s32.totalorder %v11775_v19, 3  ;;  %v1190_v47 = vadd.f32 %v11571_v0, %v1154_v10 }
 0x406   :  { %v4031_v29 = vor.u32 %v4030_v15, %v4029_v56  ;;  %v4034_v24 = vshll.u32 %v4033_v60, 23  ;;  %vm4168_vm7 = vc.u32 %v4143_v36, %v4162_v7  ;;  %v4169_v59 = vadd.s32 1, %v4165_v45  ;;  %v14931_v15 = vld [vmem:[#allocation21_spill] sm:$0xff] }
 0x407   :  { %v4045_v43 = vsel %vm11922_vm9, 0, %v4043_v5  ;;  %v976_v27 = vsel %vm944_vm1, 1, %v14643_v51  ;;  %v14592_v9 = vand.u32 2147483647, %v14928_v50  ;;  %v11945_v16 = vshrl.u32 %v11212_v32, 5  ;;  %6740 = vmatmul.f32.gmra.mxu2 %v1190_v47  ;;  %7070 = vst [vmem:[#allocation10 + $0x80] sm:$0xff] %v1190_v47 }
 0x408   :  { %v4035_v17 = vor.u32 4788187, %v4034_v24  ;;  %v7231_v58 = vadd.s32 4294967169, %v11390_v26  ;;  %v6436_v52 = vadd.f32 %v11936_v38, %v6435_v30  ;;  %1071 = vperm.xlu0 %7251, %v976_v27   ;;  %v4166_v19 = vmul.u32 %v11862_v57, %v4112_v20  ;;  %v14932_v24 = vld [vmem:[#allocation132_spill] sm:$0xff]  ;;  %v14933_v27 = vld [vmem:[#allocation129_spill] sm:$0xff] }
 0x409   :  { %vm833_vm6 = vcmp.eq.s32.totalorder %v773_v55, 1  ;;  %v4038_v40 = vcvt.s32.f32 %v4031_v29  ;;  %v4170_v62 = vsel %vm4168_vm7, %v4169_v59, %v4165_v45  ;;  %v609_v18 = vsel %vm576_vm5, %v8133_v35, 0.0 }
 0x40a   :  { %v4036_v10 = vand.u32 2147483647, %v4035_v17  ;;  %v4062_v3 = vadd.s32 3, %v4045_v43  ;;  %6579 = vmatmul.f32.vlgmr.msra.gmra.mxu1 %v6436_v52  ;;  %7022 = vst [vmem:[#allocation8] sm:$0xff] %v6436_v52  ;;  %v4171_v32 = vadd.s32 %v4170_v62, %v4166_v19  ;;  %v11955_v26 = vand.u32 8388607, %v14593_v21  ;;  %v1030_v19 = vpop.permute.xlu0 %1029 }
 0x40b   :  { %v11959_v53 = vshrl.u32 %v14726_v41, %v11620_v28  ;;  %v11963_v57 = vshll.u32 %v14726_v41, %v11352_v8  ;;  %v11967_v1 = vand.u32 8388607, %v14592_v9  ;;  %v11971_v6 = vor.u32 %v11871_v39, %v11526_v11  ;;  %v6438_v8 = vpop.f32.mrf.mxu0 }
 0x40c   :  { %v4039_v2 = vmul.f32 %v4038_v40, %v4036_v10  ;;  %v11977_v12 = vshrl.u32 %v14731_v46, %v11620_v28  ;;  %v4172_v22 = vadd.s32 536870912, %v4171_v32  ;;  %v11979_v61 = vadd.s32 1, %v7231_v58 }
 0x40d   :  { %14929 = vst [vmem:[#allocation28_spill] sm:$0xff] %v11963_v57  ;;  %v866_v56 = vsel %vm833_vm6, %v8876_v23, 0.0  ;;  %v641_v60 = vadd.f32 %v609_v18, %v14931_v15  ;;  %v11984_v45 = vand.u32 3, %v4062_v3  ;;  %v11986_v11 = vadd.s32 %v4162_v7, %v4143_v36 }
 0x40e   :  { %14930 = vst [vmem:[#allocation52_spill] sm:$0xff] %v11971_v6  ;;  %v4040_v5 = vxor.u32 2147483648, %v4039_v2  ;;  %v11988_v39 = vshrl.u32 %v4172_v22, 30  ;;  %v4236_v30 = vor.u32 8388608, %v11955_v26  ;;  %v4249_v20 = vshrl.u32 %v14728_v34, %v14932_v24 }
 0x40f   :  { %v4252_v55 = vshrl.u32 %v14724_v25, %v14932_v24  ;;  %v4255_v59 = vshrl.u32 %v14726_v41, %v14932_v24  ;;  %v4258_v17 = vshrl.u32 %v14731_v46, %v14932_v24  ;;  %v4245_v58 = vshll.u32 %v14744_v49, %v14933_v27 }
 0x410   :  { %v4041_v29 = vsel %vm3920_vm3, %v4040_v5, %v4039_v2  ;;  %v4174_v7 = vshll.u32 %v11988_v39, 30  ;;  %v4248_v52 = vshll.u32 %v14725_v37, %v14933_v27  ;;  %v4251_v13 = vshll.u32 %v14728_v34, %v14933_v27 }
 0x411   :  { %v12001_v36 = vsel %vm11922_vm9, %v14909_v31, %v4041_v29  ;;  %v4246_v40 = vshrl.u32 %v14725_v37, %v14932_v24  ;;  %v4254_v62 = vshll.u32 %v14724_v25, %v14933_v27  ;;  %v4257_v18 = vshll.u32 %v14726_v41, %v14933_v27  ;;  %v14934_v27 = vld [vmem:[#allocation128_spill] sm:$0xff] }
 0x412   :  { %v4046_v43 = vmul.f32 %v12001_v36, %v12001_v36  ;;  %v12016_v10 = vsub.s32 %v4171_v32, %v4174_v7  ;;  %v12024_v2 = vor.u32 %v4249_v20, %v4248_v52  ;;  %v12026_v22 = vor.u32 %v4252_v55, %v4251_v13 }
 0x413   :  { %v4256_v15 = vor.u32 %v4255_v59, %v4254_v62  ;;  %v4259_v5 = vor.u32 %v4258_v17, %v4257_v18  ;;  %v898_v44 = vadd.f32 %v866_v56, %v641_v60  ;;  %vm1090_vm10 = vcmp.eq.s32.totalorder %v1030_v19, 1 }
 0x414   :  { %v4047_v3 = vmul.f32 -0.001358992, %v4046_v43  ;;  %v4054_v26 = vmul.f32 -0.00019511016, %v4046_v43  ;;  %vm4176_vm4 = vcmp.lt.s32.totalorder %v12016_v10, 0  ;;  %v4177_v32 = vsub.s32 0, %v12016_v10 }
 0x415   :  { %v12031_v21 = vor.u32 %v4246_v40, %v4245_v58  ;;  %vm4260_vm13 = vcmp.lt.s32.totalorder %v14934_v27, 1  ;;  %vm4263_vm12 = vcmp.lt.s32.totalorder %v14934_v27, 4  ;;  %vm4075_vm11 = vcmp.lt.s32.totalorder %v14911_v14, 0 }
 0x416   :  { %v4048_v29 = vadd.f32 0.041655596, %v4047_v3  ;;  %v4055_v7 = vadd.f32 0.008332121, %v4054_v26  ;;  %v4178_v9 = vsel %vm4176_vm4, %v4177_v32, %v12016_v10  ;;  %v4272_v59 = vsel %vm4260_vm13, %v12024_v2, %v12026_v22 }
 0x417   :  { %v4179_v52 = vclz %v4178_v9  ;;  %vm4261_vm15 = vcmp.lt.s32.totalorder %v14934_v27, 2  ;;  %vm4262_vm3 = vcmp.lt.s32.totalorder %v14934_v27, 3  ;;  %v4269_v56 = vsel %vm4263_vm12, %v4256_v15, 920167782 }
 0x418   :  { %v4049_v20 = vmul.f32 %v4048_v29, %v4046_v43  ;;  %v4056_v55 = vmul.f32 %v4055_v7, %v4046_v43  ;;  %v4273_v60 = vsel %vm4263_vm12, %v4259_v5, 1326507024  ;;  %vm4065_vm14 = vcmp.eq.s32.totalorder %v11984_v45, 0 }
 0x419   :  { %v7193_v9 = vadd.s32 4294967294, %v4179_v52  ;;  %v4274_v13 = vsel %vm4262_vm3, %v4256_v15, %v4273_v60  ;;  %vm4068_vm0 = vcmp.eq.s32.totalorder %v11984_v45, 2  ;;  %v1123_v40 = vsel %vm1090_vm10, %v8889_v4, 0.0  ;;  %v12061_v15 = vpop.permute.xlu1 %518 }
 0x41a   :  { %v4050_v17 = vadd.f32 -0.4999988, %v4049_v20  ;;  %v4057_v58 = vadd.f32 -0.16666654, %v4056_v55  ;;  %v4268_v62 = vsel %vm4260_vm13, %v12031_v21, %v12024_v2  ;;  %v4275_v18 = vsel %vm4261_vm15, %v4272_v59, %v4274_v13 }
 0x41b   :  { %v12058_v3 = vshll.u32 %v4236_v30, 8  ;;  %vm4064_vm9 = vcmp.lt.s32.totalorder %v11984_v45, 2  ;;  %vm7194_vm5 = vcmp.lt.s32.totalorder %v7193_v9, 0  ;;  %v4270_v19 = vsel %vm4262_vm3, %v12026_v22, %v4269_v56 }
 0x41c   :  { %v4051_v26 = vmul.f32 %v4050_v17, %v4046_v43  ;;  %v4058_v32 = vmul.f32 %v4057_v58, %v4046_v43  ;;  %vm4061_vm1 = vweird.f32 %v14909_v31  ;;  %v14935_v5 = vand.u32 2147483647, %v14911_v14 }
 0x41d   :  { %v4182_v30 = vsel %vm7194_vm5, 0, %v7193_v9  ;;  %v4197_v43 = vsub.s32 4, %v11988_v39  ;;  %v4277_v7 = vand.u32 65535, %v12058_v3  ;;  %v4280_v20 = vshrl.u32 %v4275_v18, 16 }
 0x41e   :  { %vm12069_vm7 = vcmp.le.f32.partialorder %v14935_v5, 0.7853982  ;;  %v4052_v55 = vadd.f32 1.0, %v4051_v26  ;;  %v4059_v52 = vadd.f32 1.0, %v4058_v32  ;;  %v4183_v59 = vsub.s32 32, %v4182_v30 }
 0x41f   :  { %v4279_v60 = vand.u32 65535, %v4275_v18  ;;  %vm577_vm6 = vcmp.eq.s32.totalorder %v12061_v15, 1  ;;  %v1155_v56 = vadd.f32 %v1123_v40, %v898_v44  ;;  %v4187_v17 = vsub.s32 4294967266, %v4182_v30 }
 0x420   :  { %v4271_v58 = vsel %vm4261_vm15, %v4268_v62, %v4270_v19  ;;  %v4282_v13 = vmul.u32 %v4280_v20, %v4277_v7  ;;  %v4060_v5 = vmul.f32 %v4059_v52, %v12001_v36  ;;  %v4069_v9 = vxor.u32 2147483648, %v4052_v55 }
 0x421   :  { %v4185_v47 = vshrl.u32 %v11986_v11, %v4183_v59  ;;  %v4278_v33 = vshrl.u32 %v12058_v3, 16  ;;  %v4184_v26 = vshll.u32 %v12016_v10, %v4182_v30  ;;  %v4188_v32 = vadd.s32 127, %v4187_v17 }
 0x422   :  { %v4244_v18 = vshrl.u32 %v14744_v49, %v14932_v24  ;;  %v4285_v44 = vshll.u32 %v4282_v13, 16  ;;  %v4066_v40 = vxor.u32 2147483648, %v4060_v5  ;;  %v4198_v62 = vsel %vm4075_vm11, %v4197_v43, %v11988_v39 }
 0x423   :  { %v4281_v19 = vmul.u32 %v4279_v60, %v4277_v7  ;;  %v4283_v36 = vmul.u32 %v4279_v60, %v4278_v33  ;;  %v4186_v52 = vor.u32 %v4185_v47, %v4184_v26  ;;  %v4189_v28 = vshll.u32 %v4188_v32, 23 }
 0x424   :  { %v4265_v11 = vsel %vm4263_vm12, %v12026_v22, 2102212464  ;;  %v4302_v59 = vshrl.u32 %v4271_v58, 16  ;;  %v4067_v10 = vsel %vm4065_vm14, %v4052_v55, %v4066_v40  ;;  %v4070_v24 = vsel %vm4068_vm0, %v4069_v9, %v4060_v5 }
 0x425   :  { %v6439_v30 = vadd.f32 %v11936_v38, %v6438_v8  ;;  %v4291_v17 = vadd.s32 %v4285_v44, %v4281_v19  ;;  %v4071_v39 = vsel %vm4064_vm9, %v4067_v10, %v4070_v24  ;;  %v4190_v43 = vor.u32 4788187, %v4189_v28 }
 0x426   :  { %vm4289_vm4 = vc.u32 %v4281_v19, %v4285_v44  ;;  %v4301_v47 = vand.u32 65535, %v4271_v58  ;;  %v4072_v60 = vsel %vm4061_vm1, nan, %v4071_v39  ;;  %v4200_v22 = vsel %vm12069_vm7, 0, %v4198_v62  ;;  %v14938_v39 = vld [vmem:[#allocation127_spill] sm:$0xff] }
 0x427   :  { %6582 = vmatmul.f32.gmra.mxu1 %v6439_v30  ;;  %7023 = vst [vmem:[#allocation8 + $0x8] sm:$0xff] %v6439_v30  ;;  %v4264_v55 = vsel %vm4260_vm13, %v4244_v18, %v12031_v21  ;;  %v4287_v8 = vshll.u32 %v4283_v36, 16  ;;  %6482 = vmatmul.f32.gmra.mxu0 %v4072_v60  ;;  %v4191_v5 = vand.u32 2147483647, %v4190_v43  ;;  %v4193_v45 = vcvt.s32.f32 %v4186_v52  ;;  %v14939_v60 = vld [vmem:[#allocation125_spill] sm:$0xff] }
 0x428   :  { %v1191_v28 = vadd.f32 %v11571_v0, %v1155_v56  ;;  %v4284_v9 = vmul.u32 %v4280_v20, %v4278_v33  ;;  %v4266_v31 = vsel %vm4262_vm3, %v12024_v2, %v4265_v11  ;;  %v4290_v58 = vsel %vm4289_vm4, 1, %v14643_v51 }
 0x429   :  { %vm4293_vm10 = vc.u32 %v4291_v17, %v4287_v8  ;;  %v4304_v26 = vmul.u32 %v4302_v59, %v4277_v7  ;;  %v4194_v32 = vmul.f32 %v4193_v45, %v4191_v5  ;;  %v4305_v18 = vmul.u32 %v4301_v47, %v4278_v33 }
 0x42a   :  { %6743 = vmatmul.f32.gmra.mxu2 %v1191_v28  ;;  %7071 = vst [vmem:[#allocation10 + $0x88] sm:$0xff] %v1191_v28  ;;  %v4292_v44 = vadd.s32 %v4290_v58, %v4284_v9  ;;  %v4294_v21 = vsel %vm4293_vm10, 1, %v14643_v51  ;;  %v12113_v0 = vsel %vm577_vm6, %v8133_v35, 0.0  ;;  %v4217_v20 = vadd.s32 3, %v4200_v22 }
 0x42b   :  { %v4303_v56 = vmul.u32 %v4301_v47, %v4277_v7  ;;  %v4307_v40 = vshll.u32 %v4304_v26, 16  ;;  %v4195_v2 = vxor.u32 2147483648, %v4194_v32  ;;  %v4267_v62 = vsel %vm4261_vm15, %v4264_v55, %v4266_v31 }
 0x42c   :  { %v4286_v19 = vshrl.u32 %v4282_v13, 16  ;;  %v4296_v52 = vadd.s32 %v4294_v21, %v4292_v44  ;;  %v4306_v11 = vmul.u32 %v4302_v59, %v4278_v33  ;;  %v4309_v10 = vshll.u32 %v4305_v18, 16 }
 0x42d   :  { %vm4311_vm13 = vc.u32 %v4303_v56, %v4307_v40  ;;  %v4313_v24 = vadd.s32 %v4307_v40, %v4303_v56  ;;  %v4196_v30 = vsel %vm4075_vm11, %v4195_v2, %v4194_v32  ;;  %v4401_v7 = vshrl.u32 %v14725_v37, %v14938_v39 }
 0x42e   :  { %v4297_v17 = vadd.s32 %v4296_v52, %v4286_v19  ;;  %v4312_v15 = vsel %vm4311_vm13, 1, %v14643_v51  ;;  %v12125_v27 = vsel %vm12069_vm7, %v14911_v14, %v4196_v30  ;;  %v4288_v13 = vshrl.u32 %v4283_v36, 16 }
 0x42f   :  { %v4314_v43 = vadd.s32 %v4312_v15, %v4306_v11  ;;  %vm4315_vm12 = vc.u32 %v4313_v24, %v4309_v10  ;;  %v4201_v33 = vmul.f32 %v12125_v27, %v12125_v27  ;;  %v4308_v59 = vshrl.u32 %v4304_v26, 16 }
 0x430   :  { %v4316_v47 = vsel %vm4315_vm12, 1, %v14643_v51  ;;  %v4400_v22 = vshll.u32 %v14744_v49, %v14939_v60  ;;  %v12132_v55 = vadd.s32 %v4297_v17, %v4288_v13  ;;  %v4310_v8 = vshrl.u32 %v4305_v18, 16  ;;  %v776_v13 = vpop.permute.xlu2 %775 }
 0x431   :  { %v12134_v5 = vadd.s32 %v4313_v24, %v4309_v10  ;;  %v4318_v29 = vadd.s32 %v4316_v47, %v4314_v43  ;;  %v4202_v45 = vmul.f32 -0.001358992, %v4201_v33  ;;  %v4209_v28 = vmul.f32 -0.00019511016, %v4201_v33 }
 0x432   :  { %v12136_v36 = vor.u32 %v4401_v7, %v4400_v22  ;;  %v4404_v9 = vshrl.u32 %v14728_v34, %v14938_v39  ;;  %v4403_v58 = vshll.u32 %v14725_v37, %v14939_v60  ;;  %v4406_v26 = vshll.u32 %v14728_v34, %v14939_v60  ;;  %v14940_v22 = vld [vmem:[#allocation124_spill] sm:$0xff] }
 0x433   :  { %v4319_v31 = vadd.s32 %v4318_v29, %v4308_v59  ;;  %v4407_v32 = vshrl.u32 %v14724_v25, %v14938_v39  ;;  %v4203_v44 = vadd.f32 0.041655596, %v4202_v45  ;;  %v4210_v21 = vadd.f32 0.008332121, %v4209_v28 }
 0x434   :  { %v4409_v18 = vshll.u32 %v14724_v25, %v14939_v60  ;;  %v4410_v56 = vshrl.u32 %v14726_v41, %v14938_v39  ;;  %vm4323_vm11 = vc.u32 %v12132_v55, %v12134_v5  ;;  %v4412_v2 = vshll.u32 %v14726_v41, %v14939_v60 }
 0x435   :  { %v4320_v40 = vadd.s32 %v4319_v31, %v4310_v8  ;;  %v4413_v19 = vshrl.u32 %v14731_v46, %v14938_v39  ;;  %v4204_v52 = vmul.f32 %v4203_v44, %v4201_v33  ;;  %v4211_v11 = vmul.f32 %v4210_v21, %v4201_v33  ;;  %v14942_v44 = vld [vmem:[#allocation36_spill] sm:$0xff] }
 0x436   :  { %v12156_v10 = vor.u32 %v4404_v9, %v4403_v58  ;;  %v4411_v24 = vor.u32 %v4410_v56, %v4409_v18  ;;  %v4218_v30 = vand.u32 3, %v4217_v20  ;;  %v12158_v15 = vor.u32 %v4407_v32, %v4406_v26 }
 0x437   :  { %v4324_v17 = vadd.s32 1, %v4320_v40  ;;  %v4414_v7 = vor.u32 %v4413_v19, %v4412_v2  ;;  %v4205_v43 = vadd.f32 -0.4999988, %v4204_v52  ;;  %v4212_v59 = vadd.f32 -0.16666654, %v4211_v11  ;;  %v1033_v52 = vpop.permute.xlu0 %1032 }
 0x438   :  { %v4321_v47 = vmul.u32 %v12058_v3, %v4267_v62  ;;  %vm4418_vm15 = vcmp.lt.s32.totalorder %v14940_v22, 4  ;;  %vm4415_vm3 = vcmp.lt.s32.totalorder %v14940_v22, 1  ;;  %vm4417_vm14 = vcmp.lt.s32.totalorder %v14940_v22, 3 }
 0x439   :  { %v4325_v60 = vsel %vm4323_vm11, %v4324_v17, %v4320_v40  ;;  %v4424_v20 = vsel %vm4418_vm15, %v4411_v24, 920167782  ;;  %v4206_v8 = vmul.f32 %v4205_v43, %v4201_v33  ;;  %v4213_v29 = vmul.f32 %v4212_v59, %v4201_v33 }
 0x43a   :  { %v4326_v45 = vadd.s32 %v4325_v60, %v4321_v47  ;;  %v4423_v3 = vsel %vm4415_vm3, %v12136_v36, %v12156_v10  ;;  %vm834_vm0 = vcmp.eq.s32.totalorder %v776_v13, 1  ;;  %v4425_v62 = vsel %vm4417_vm14, %v12158_v15, %v4424_v20 }
 0x43b   :  { %v4427_v28 = vsel %vm4415_vm3, %v12156_v10, %v12158_v15  ;;  %v4428_v9 = vsel %vm4418_vm15, %v4414_v7, 1326507024  ;;  %v14941_v33 = vor.u32 8388608, %v11967_v1  ;;  %v4207_v58 = vadd.f32 1.0, %v4206_v8 }
 0x43c   :  { %v4214_v26 = vadd.f32 1.0, %v4213_v29  ;;  %v4327_v32 = vadd.s32 536870912, %v4326_v45  ;;  %vm4416_vm9 = vcmp.lt.s32.totalorder %v14940_v22, 2  ;;  %v642_v21 = vadd.f32 %v12113_v0, %v14942_v44 }
 0x43d   :  { %v12184_v31 = vshll.u32 %v14941_v33, 8  ;;  %vm4216_vm5 = vweird.f32 %v14911_v14  ;;  %v4426_v18 = vsel %vm4416_vm9, %v4423_v3, %v4425_v62  ;;  %v4429_v56 = vsel %vm4417_vm14, %v4411_v24, %v4428_v9 }
 0x43e   :  { %v4215_v1 = vmul.f32 %v4214_v26, %v12125_v27  ;;  %v4224_v40 = vxor.u32 2147483648, %v4207_v58  ;;  %v12195_v2 = vshrl.u32 %v4327_v32, 30  ;;  %v4430_v19 = vsel %vm4416_vm9, %v4427_v28, %v4429_v56 }
 0x43f   :  { %v4432_v11 = vand.u32 65535, %v12184_v31  ;;  %v4433_v0 = vshrl.u32 %v12184_v31, 16  ;;  %v4434_v17 = vand.u32 65535, %v4430_v19  ;;  %v4435_v7 = vshrl.u32 %v4430_v19, 16 }
 0x440   :  { %vm4219_vm1 = vcmp.lt.s32.totalorder %v4218_v30, 2  ;;  %vm4220_vm7 = vcmp.eq.s32.totalorder %v4218_v30, 0  ;;  %v4221_v43 = vxor.u32 2147483648, %v4215_v1  ;;  %v4329_v24 = vshll.u32 %v12195_v2, 30 }
 0x441   :  { %vm4223_vm6 = vcmp.eq.s32.totalorder %v4218_v30, 2  ;;  %v4437_v27 = vmul.u32 %v4435_v7, %v4432_v11  ;;  %v12202_v59 = vmul.u32 %v4434_v17, %v4433_v0  ;;  %v4457_v47 = vshrl.u32 %v4426_v18, 16 }
 0x442   :  { %v4222_v60 = vsel %vm4220_vm7, %v4207_v58, %v4221_v43  ;;  %v4225_v20 = vsel %vm4223_vm6, %v4224_v40, %v4215_v1  ;;  %vm1091_vm4 = vcmp.eq.s32.totalorder %v1033_v52, 1  ;;  %v4330_v8 = vsub.s32 %v4326_v45, %v4329_v24 }
 0x443   :  { %v4226_v29 = vsel %vm4219_vm1, %v4222_v60, %v4225_v20  ;;  %v4436_v3 = vmul.u32 %v4434_v17, %v4432_v11  ;;  %v4440_v62 = vshll.u32 %v4437_v27, 16  ;;  %v4456_v28 = vand.u32 65535, %v4426_v18 }
 0x444   :  { %v4227_v9 = vsel %vm4216_vm5, nan, %v4226_v29  ;;  %vm4331_vm10 = vcmp.lt.s32.totalorder %v4330_v8, 0  ;;  %v4332_v33 = vsub.s32 0, %v4330_v8  ;;  %v4439_v26 = vmul.u32 %v4435_v7, %v4433_v0 }
 0x445   :  { %6485 = vmatmul.f32.gmra.mxu0 %v4227_v9  ;;  %v4442_v30 = vshll.u32 %v12202_v59, 16  ;;  %vm4444_vm13 = vc.u32 %v4436_v3, %v4440_v62  ;;  %v4446_v32 = vadd.s32 %v4440_v62, %v4436_v3  ;;  %v4459_v44 = vmul.u32 %v4457_v47, %v4432_v11 }
 0x446   :  { %v12209_v58 = vor.u32 %v11959_v53, %v11638_v54  ;;  %v867_v45 = vsel %vm834_vm0, %v8876_v23, 0.0  ;;  %v4333_v18 = vsel %vm4331_vm10, %v4332_v33, %v4330_v8  ;;  %v4445_v14 = vsel %vm4444_vm13, 1, %v14643_v51 }
 0x447   :  { %v1124_v56 = vsel %vm1091_vm4, %v8889_v4, 0.0  ;;  %v4334_v1 = vclz %v4333_v18  ;;  %v4447_v40 = vadd.s32 %v4445_v14, %v4439_v26  ;;  %vm4448_vm12 = vc.u32 %v4446_v32, %v4442_v30  ;;  %v6441_v30 = vpop.f32.mrf.mxu0  ;;  %v779_v18 = vpop.permute.xlu2 %778 }
 0x448   :  { %v899_v19 = vadd.f32 %v867_v45, %v642_v21  ;;  %vm4230_vm11 = vcmp.lt.s32.totalorder %v14927_v42, 0  ;;  %v4449_v17 = vsel %vm4448_vm12, 1, %v14643_v51  ;;  %v4460_v7 = vmul.u32 %v4456_v28, %v4433_v0 }
 0x449   :  { %v7196_v54 = vadd.s32 4294967294, %v4334_v1  ;;  %v4451_v53 = vadd.s32 %v4449_v17, %v4447_v40  ;;  %v4458_v43 = vmul.u32 %v4456_v28, %v4432_v11  ;;  %v4462_v13 = vshll.u32 %v4459_v44, 16  ;;  %v14943_v28 = vld [vmem:[#allocation23_spill] sm:$0xff] }
 0x44a   :  { %v1156_v24 = vadd.f32 %v1124_v56, %v899_v19  ;;  %v4322_v60 = vadd.s32 %v12134_v5, %v12132_v55  ;;  %v4399_v52 = vshrl.u32 %v14744_v49, %v14938_v39  ;;  %v4420_v21 = vsel %vm4418_vm15, %v12158_v15, 2102212464  ;;  %v14944_v40 = vld [vmem:[#allocation119_spill] sm:$0xff] }
 0x44b   :  { %vm7197_vm0 = vcmp.lt.s32.totalorder %v7196_v54, 0  ;;  %v4441_v20 = vshrl.u32 %v4437_v27, 16  ;;  %vm4466_vm5 = vc.u32 %v4458_v43, %v4462_v13  ;;  %v4468_v29 = vadd.s32 %v4462_v13, %v4458_v43 }
 0x44c   :  { %v4337_v3 = vsel %vm7197_vm0, 0, %v7196_v54  ;;  %v4461_v62 = vmul.u32 %v4457_v47, %v4433_v0  ;;  %v4464_v9 = vshll.u32 %v4460_v7, 16  ;;  %v4467_v11 = vsel %vm4466_vm5, 1, %v14643_v51 }
 0x44d   :  { %vm14614_vm1 = vcmp.lt.s32.totalorder %v14943_v28, 4  ;;  %v4338_v33 = vsub.s32 32, %v4337_v3  ;;  %v4342_v55 = vsub.s32 4294967266, %v4337_v3  ;;  %v4352_v5 = vsub.s32 4, %v12195_v2 }
 0x44e   :  { %v4452_v39 = vadd.s32 %v4451_v53, %v4441_v20  ;;  %v4419_v15 = vsel %vm4415_vm3, %v4399_v52, %v12136_v36  ;;  %v4443_v27 = vshrl.u32 %v12202_v59, 16  ;;  %v4469_v26 = vadd.s32 %v4467_v11, %v4461_v62  ;;  %v12243_v53 = vld [vmem:[#allocation5] ss:$0 sm:$0xff] }
 0x44f   :  { %vm4470_vm15 = vc.u32 %v4468_v29, %v4464_v9  ;;  %v4339_v0 = vshll.u32 %v4330_v8, %v4337_v3  ;;  %v4340_v47 = vshrl.u32 %v4322_v60, %v4338_v33  ;;  %v4343_v32 = vadd.s32 127, %v4342_v55  ;;  %v522_v60 = vpop.permute.xlu1 %521 }
 0x450   :  { %v4471_v45 = vsel %vm4470_vm15, 1, %v14643_v51  ;;  %v4421_v14 = vsel %vm4417_vm14, %v12156_v10, %v4420_v21  ;;  %v4463_v56 = vshrl.u32 %v4459_v44, 16  ;;  %v14600_v19 = vand.u32 2147483647, %v14944_v40 }
 0x451   :  { %v4473_v1 = vadd.s32 %v4471_v45, %v4469_v26  ;;  %v4341_v36 = vor.u32 %v4340_v47, %v4339_v0  ;;  %v4344_v17 = vshll.u32 %v4343_v32, 23  ;;  %v4353_v59 = vsel %vm4230_vm11, %v4352_v5, %v12195_v2 }
 0x452   :  { %v12240_v8 = vadd.s32 %v4452_v39, %v4443_v27  ;;  %v6442_v54 = vadd.f32 %v11936_v38, %v6441_v30  ;;  %v1192_v43 = vadd.f32 %v12243_v53, %v1156_v24  ;;  %v4465_v13 = vshrl.u32 %v4460_v7, 16  ;;  %v14949_v39 = vld [vmem:[#allocation43_spill] sm:$0xff] }
 0x453   :  { %v4474_v10 = vadd.s32 %v4473_v1, %v4463_v56  ;;  %vm835_vm3 = vcmp.eq.s32.totalorder %v779_v18, 1  ;;  %v4345_v52 = vor.u32 4788187, %v4344_v17  ;;  %v12248_v21 = vadd.s32 %v4468_v29, %v4464_v9  ;;  %v14950_v18 = vld [vmem:[#allocation100_spill] sm:$0xff] }
 0x454   :  { %v14945_v2 = vand.u32 2147483647, %v14927_v42  ;;  %6585 = vmatmul.f32.gmra.mxu1 %v6442_v54  ;;  %7024 = vst [vmem:[#allocation8 + $0x10] sm:$0xff] %v6442_v54  ;;  %6746 = vmatmul.f32.gmra.mxu2 %v1192_v43  ;;  %v4422_v7 = vsel %vm4416_vm9, %v4419_v15, %v4421_v14  ;;  %v4545_v3 = vand.u32 8388607, %v14600_v19  ;;  %v4348_v11 = vcvt.s32.f32 %v4341_v36 }
 0x455   :  { %v4475_v24 = vadd.s32 %v4474_v10, %v4465_v13  ;;  %v4346_v62 = vand.u32 2147483647, %v4345_v52  ;;  %7072 = vst [vmem:[#allocation10 + $0x90] sm:$0xff] %v1192_v43  ;;  %vm4478_vm7 = vc.u32 %v12240_v8, %v12248_v21  ;;  %v12267_v9 = vsel %vm14614_vm1, %v11971_v6, 920167782 }
 0x456   :  { %vm12252_vm14 = vcmp.le.f32.partialorder %v14945_v2, 0.7853982  ;;  %14948 = vst [vmem:[#allocation57_spill] sm:$0xff] %v12267_v9  ;;  %v12271_v22 = vsel %vm835_vm3, %v8876_v23, 0.0  ;;  %vm578_vm9 = vcmp.eq.s32.totalorder %v522_v60, 1  ;;  %v4476_v5 = vmul.u32 %v12184_v31, %v4422_v7  ;;  %v1036_v60 = vpop.permute.xlu0 %1035 }
 0x457   :  { %v4355_v29 = vsel %vm12252_vm14, 0, %v4353_v59  ;;  %v4479_v33 = vadd.s32 1, %v4475_v24  ;;  %v4349_v55 = vmul.f32 %v4348_v11, %v4346_v62  ;;  %v4559_v15 = vshrl.u32 %v14728_v34, %v14949_v39  ;;  %v14951_v11 = vld [vmem:[#allocation15_spill] sm:$0xff] }
 0x458   :  { %v4562_v27 = vshrl.u32 %v14724_v25, %v14949_v39  ;;  %v4372_v26 = vadd.s32 3, %v4355_v29  ;;  %v4546_v0 = vor.u32 8388608, %v4545_v3  ;;  %v4565_v47 = vshrl.u32 %v14726_v41, %v14949_v39 }
 0x459   :  { %v4480_v30 = vsel %vm4478_vm7, %v4479_v33, %v4475_v24  ;;  %v4350_v32 = vxor.u32 2147483648, %v4349_v55  ;;  %v4558_v14 = vshll.u32 %v14725_v37, %v14950_v18  ;;  %v4561_v31 = vshll.u32 %v14728_v34, %v14950_v18 }
 0x45a   :  { %v4481_v45 = vadd.s32 %v4480_v30, %v4476_v5  ;;  %v4556_v56 = vshrl.u32 %v14725_v37, %v14949_v39  ;;  %v4564_v1 = vshll.u32 %v14724_v25, %v14950_v18  ;;  %v4567_v36 = vshll.u32 %v14726_v41, %v14950_v18 }
 0x45b   :  { %v4568_v17 = vshrl.u32 %v14731_v46, %v14949_v39  ;;  %v4351_v59 = vsel %vm4230_vm11, %v4350_v32, %v4349_v55  ;;  %v12294_v43 = vor.u32 %v4559_v15, %v4558_v14  ;;  %v12296_v13 = vor.u32 %v4562_v27, %v4561_v31 }
 0x45c   :  { %v4482_v54 = vadd.s32 536870912, %v4481_v45  ;;  %v12301_v10 = vsel %vm12252_vm14, %v14927_v42, %v4351_v59  ;;  %v4555_v52 = vshll.u32 %v14744_v49, %v14950_v18  ;;  %v4566_v2 = vor.u32 %v4565_v47, %v4564_v1 }
 0x45d   :  { %v4569_v7 = vor.u32 %v4568_v17, %v4567_v36  ;;  %v611_v24 = vsel %vm578_vm9, %v8133_v35, 0.0  ;;  %v4356_v3 = vmul.f32 %v12301_v10, %v12301_v10  ;;  %vm4573_vm6 = vcmp.lt.s32.totalorder %v14951_v11, 4 }
 0x45e   :  { %v12309_v62 = vshrl.u32 %v4482_v54, 30  ;;  %v12312_v29 = vor.u32 %v4556_v56, %v4555_v52  ;;  %vm4570_vm4 = vcmp.lt.s32.totalorder %v14951_v11, 1  ;;  %vm4572_vm10 = vcmp.lt.s32.totalorder %v14951_v11, 3  ;;  %v14952_v56 = vld [vmem:[#allocation35_spill] sm:$0xff] }
 0x45f   :  { %v4583_v20 = vsel %vm4573_vm6, %v4569_v7, 1326507024  ;;  %v4357_v33 = vmul.f32 -0.001358992, %v4356_v3  ;;  %v4364_v55 = vmul.f32 -0.00019511016, %v4356_v3  ;;  %v4582_v15 = vsel %vm4570_vm4, %v12294_v43, %v12296_v13 }
 0x460   :  { %v4484_v5 = vshll.u32 %v12309_v62, 30  ;;  %v12323_v27 = vand.u32 3, %v4372_v26  ;;  %vm4571_vm13 = vcmp.lt.s32.totalorder %v14951_v11, 2  ;;  %v4584_v30 = vsel %vm4572_vm10, %v4566_v2, %v4583_v20 }
 0x461   :  { %v12328_v47 = vshll.u32 %v4546_v0, 8  ;;  %v4358_v32 = vadd.f32 0.041655596, %v4357_v33  ;;  %v4365_v18 = vadd.f32 0.008332121, %v4364_v55  ;;  %v643_v1 = vadd.f32 %v611_v24, %v14952_v56 }
 0x462   :  { %v12330_v14 = vsub.s32 %v4481_v45, %v4484_v5  ;;  %v4579_v31 = vsel %vm4573_vm6, %v4566_v2, 920167782  ;;  %vm1092_vm12 = vcmp.eq.s32.totalorder %v1036_v60, 1  ;;  %v4578_v26 = vsel %vm4570_vm4, %v12312_v29, %v12294_v43 }
 0x463   :  { %v4585_v36 = vsel %vm4571_vm13, %v4582_v15, %v4584_v30  ;;  %v4359_v0 = vmul.f32 %v4358_v32, %v4356_v3  ;;  %v4366_v17 = vmul.f32 %v4365_v18, %v4356_v3  ;;  %v4580_v59 = vsel %vm4572_vm10, %v12296_v13, %v4579_v31 }
 0x464   :  { %vm4486_vm11 = vcmp.lt.s32.totalorder %v12330_v14, 0  ;;  %v4487_v45 = vsub.s32 0, %v12330_v14  ;;  %v12347_v54 = vand.u32 65535, %v12328_v47  ;;  %v4589_v52 = vand.u32 65535, %v4585_v36 }
 0x465   :  { %v4590_v2 = vshrl.u32 %v4585_v36, 16  ;;  %v4360_v7 = vadd.f32 -0.4999988, %v4359_v0  ;;  %v4367_v24 = vadd.f32 -0.16666654, %v4366_v17  ;;  %vm4378_vm0 = vcmp.eq.s32.totalorder %v12323_v27, 2  ;;  %v12376_v17 = vpop.permute.xlu2 %781 }
 0x466   :  { %v4488_v20 = vsel %vm4486_vm11, %v4487_v45, %v12330_v14  ;;  %vm4375_vm5 = vcmp.eq.s32.totalorder %v12323_v27, 0  ;;  %v1125_v33 = vsel %vm1092_vm12, %v8889_v4, 0.0  ;;  %v4477_v55 = vadd.s32 %v12248_v21, %v12240_v8 }
 0x467   :  { %v4489_v5 = vclz %v4488_v20  ;;  %v12357_v15 = vmul.u32 %v4590_v2, %v12347_v54  ;;  %v4361_v30 = vmul.f32 %v4360_v7, %v4356_v3  ;;  %v4368_v32 = vmul.f32 %v4367_v24, %v4356_v3 }
 0x468   :  { %vm4374_vm15 = vcmp.lt.s32.totalorder %v12323_v27, 2  ;;  %v12362_v18 = vsel %vm4571_vm13, %v4578_v26, %v4580_v59  ;;  %v12365_v31 = vshrl.u32 %v12328_v47, 16  ;;  %vm4371_vm3 = vweird.f32 %v14927_v42 }
 0x469   :  { %v900_v60 = vadd.f32 %v12271_v22, %v643_v1  ;;  %v7199_v8 = vadd.s32 4294967294, %v4489_v5  ;;  %v4554_v21 = vshrl.u32 %v14744_v49, %v14949_v39  ;;  %v4591_v56 = vmul.u32 %v4589_v52, %v12347_v54 }
 0x46a   :  { %v4362_v3 = vadd.f32 1.0, %v4361_v30  ;;  %v4369_v36 = vadd.f32 1.0, %v4368_v32  ;;  %v12373_v0 = vmul.u32 %v4589_v52, %v12365_v31  ;;  %v4595_v26 = vshll.u32 %v12357_v15, 16 }
 0x46b   :  { %v1157_v45 = vadd.f32 %v1125_v33, %v900_v60  ;;  %vm7200_vm14 = vcmp.lt.s32.totalorder %v7199_v8, 0  ;;  %v4507_v59 = vsub.s32 4, %v12309_v62  ;;  %v4612_v22 = vshrl.u32 %v12362_v18, 16 }
 0x46c   :  { %v4370_v1 = vmul.f32 %v4369_v36, %v12301_v10  ;;  %v4379_v39 = vxor.u32 2147483648, %v4362_v3  ;;  %v4492_v7 = vsel %vm7200_vm14, 0, %v7199_v8  ;;  %vm4599_vm7 = vc.u32 %v4591_v56, %v4595_v26  ;;  %v6444_v36 = vpop.f32.mrf.mxu0 }
 0x46d   :  { %v4493_v24 = vsub.s32 32, %v4492_v7  ;;  %v4497_v20 = vsub.s32 4294967266, %v4492_v7  ;;  %v4600_v52 = vsel %vm4599_vm7, 1, %v14643_v51  ;;  %v4611_v5 = vand.u32 65535, %v12362_v18 }
 0x46e   :  { %vm836_vm9 = vcmp.eq.s32.totalorder %v12376_v17, 1  ;;  %v4376_v30 = vxor.u32 2147483648, %v4370_v1  ;;  %v4594_v33 = vmul.u32 %v4590_v2, %v12365_v31  ;;  %v4597_v32 = vshll.u32 %v12373_v0, 16 }
 0x46f   :  { %v4601_v60 = vadd.s32 %v4595_v26, %v4591_v56  ;;  %v4380_v10 = vsel %vm4378_vm0, %v4379_v39, %v4370_v1  ;;  %v14953_v8 = vand.u32 2147483647, %v14928_v50  ;;  %v4494_v18 = vshll.u32 %v12330_v14, %v4492_v7  ;;  %v525_v1 = vpop.permute.xlu1 %524 }
 0x470   :  { %v4495_v19 = vshrl.u32 %v4477_v55, %v4493_v24  ;;  %v4498_v9 = vadd.s32 127, %v4497_v20  ;;  %v4377_v2 = vsel %vm4375_vm5, %v4362_v3, %v4376_v30  ;;  %v4602_v6 = vadd.s32 %v4600_v52, %v4594_v33 }
 0x471   :  { %vm12390_vm12 = vcmp.le.f32.partialorder %v14953_v8, 0.7853982  ;;  %vm4603_vm11 = vc.u32 %v4601_v60, %v4597_v32  ;;  %v4614_v56 = vmul.u32 %v4612_v22, %v12347_v54  ;;  %v4381_v26 = vsel %vm4374_vm15, %v4377_v2, %v4380_v10 }
 0x472   :  { %v4496_v39 = vor.u32 %v4495_v19, %v4494_v18  ;;  %v4499_v8 = vshll.u32 %v4498_v9, 23  ;;  %v4604_v57 = vsel %vm4603_vm11, 1, %v14643_v51  ;;  %v4382_v14 = vsel %vm4371_vm3, nan, %v4381_v26 }
 0x473   :  { %vm4385_vm0 = vcmp.lt.s32.totalorder %v14928_v50, 0  ;;  %v6445_v55 = vadd.f32 %v11936_v38, %v6444_v36  ;;  %v1193_v3 = vadd.f32 %v12243_v53, %v1157_v45  ;;  %6488 = vmatmul.f32.gmra.mxu0 %v4382_v14  ;;  %v4574_v27 = vsel %vm4570_vm4, %v4554_v21, %v12312_v29 }
 0x474   :  { %v4500_v7 = vor.u32 4788187, %v4499_v8  ;;  %v4575_v19 = vsel %vm4573_vm6, %v12296_v13, 2102212464  ;;  %v4615_v9 = vmul.u32 %v4611_v5, %v12365_v31  ;;  %vm579_vm5 = vcmp.eq.s32.totalorder %v525_v1, 1 }
 0x475   :  { %v4508_v42 = vsel %vm4385_vm0, %v4507_v59, %v12309_v62  ;;  %6588 = vmatmul.f32.gmra.mxu1 %v6445_v55  ;;  %7025 = vst [vmem:[#allocation8 + $0x18] sm:$0xff] %v6445_v55  ;;  %6749 = vmatmul.f32.gmra.mxu2 %v1193_v3  ;;  %v4596_v38 = vshrl.u32 %v12357_v15, 16  ;;  %v4606_v45 = vadd.s32 %v4604_v57, %v4602_v6  ;;  %v4503_v20 = vcvt.s32.f32 %v4496_v39  ;;  %v14957_v55 = vld [vmem:[#allocation64_spill] sm:$0xff] }
 0x476   :  { %v4501_v24 = vand.u32 2147483647, %v4500_v7  ;;  %7073 = vst [vmem:[#allocation10 + $0x98] sm:$0xff] %v1193_v3  ;;  %v4613_v29 = vmul.u32 %v4611_v5, %v12347_v54  ;;  %v4617_v21 = vshll.u32 %v4614_v56, 16  ;;  %v4576_v13 = vsel %vm4572_vm10, %v12294_v43, %v4575_v19  ;;  %v14956_v5 = vld [vmem:[#allocation118_spill] sm:$0xff]  ;;  %v14958_v7 = vld [vmem:[#allocation63_spill] sm:$0xff] }
 0x477   :  { %v4598_v52 = vshrl.u32 %v12373_v0, 16  ;;  %v4607_v30 = vadd.s32 %v4606_v45, %v4596_v38  ;;  %v4616_v62 = vmul.u32 %v4612_v22, %v12365_v31  ;;  %v4619_v33 = vshll.u32 %v4615_v9, 16 }
 0x478   :  { %v4504_v59 = vmul.f32 %v4503_v20, %v4501_v24  ;;  %vm4621_vm6 = vc.u32 %v4613_v29, %v4617_v21  ;;  %v4623_v15 = vadd.s32 %v4617_v21, %v4613_v29  ;;  %v4510_v57 = vsel %vm12390_vm12, 0, %v4508_v42 }
 0x479   :  { %v12425_v6 = vadd.s32 %v4607_v30, %v4598_v52  ;;  %v4622_v54 = vsel %vm4621_vm6, 1, %v14643_v51  ;;  %v4693_v32 = vand.u32 2147483647, %v14956_v5  ;;  %v12432_v43 = vsel %vm836_vm9, %v8876_v23, 0.0 }
 0x47a   :  { %v4505_v0 = vxor.u32 2147483648, %v4504_v59  ;;  %v4624_v31 = vadd.s32 %v4622_v54, %v4616_v62  ;;  %vm4625_vm4 = vc.u32 %v4623_v15, %v4619_v33  ;;  %v612_v22 = vsel %vm579_vm5, %v8133_v35, 0.0 }
 0x47b   :  { %v4577_v60 = vsel %vm4571_vm13, %v4574_v27, %v4576_v13  ;;  %v4626_v10 = vsel %vm4625_vm4, 1, %v14643_v51  ;;  %v12439_v36 = vadd.s32 %v4623_v15, %v4619_v33  ;;  %v4527_v2 = vadd.s32 3, %v4510_v57 }
 0x47c   :  { %v4506_v18 = vsel %vm4385_vm0, %v4505_v0, %v4504_v59  ;;  %v4618_v17 = vshrl.u32 %v4614_v56, 16  ;;  %v4628_v26 = vadd.s32 %v4626_v10, %v4624_v31  ;;  %v4620_v8 = vshrl.u32 %v4615_v9, 16 }
 0x47d   :  { %v4509_v39 = vsel %vm12390_vm12, %v14928_v50, %v4506_v18  ;;  %vm4633_vm10 = vc.u32 %v12425_v6, %v12439_v36  ;;  %v4700_v11 = vand.u32 8388607, %v4693_v32  ;;  %v4710_v3 = vshll.u32 %v14744_v49, %v14957_v55 }
 0x47e   :  { %v4511_v1 = vmul.f32 %v4509_v39, %v4509_v39  ;;  %v4629_v14 = vadd.s32 %v4628_v26, %v4618_v17  ;;  %v4711_v56 = vshrl.u32 %v14725_v37, %v14958_v7  ;;  %v4713_v27 = vshll.u32 %v14725_v37, %v14957_v55 }
 0x47f   :  { %v4714_v44 = vshrl.u32 %v14728_v34, %v14958_v7  ;;  %v4716_v19 = vshll.u32 %v14728_v34, %v14957_v55  ;;  %v4717_v9 = vshrl.u32 %v14724_v25, %v14958_v7  ;;  %v4719_v24 = vshll.u32 %v14724_v25, %v14957_v55 }
 0x480   :  { %v4512_v42 = vmul.f32 -0.001358992, %v4511_v1  ;;  %v4519_v38 = vmul.f32 -0.00019511016, %v4511_v1  ;;  %v4630_v45 = vadd.s32 %v4629_v14, %v4620_v8  ;;  %v12464_v20 = vor.u32 %v4711_v56, %v4710_v3  ;;  %v14959_v8 = vld [vmem:[#allocation37_spill] sm:$0xff]  ;;  %v14960_v56 = vld [vmem:[#allocation24_spill] sm:$0xff] }
 0x481   :  { %v12466_v29 = vor.u32 %v4714_v44, %v4713_v27  ;;  %v4720_v21 = vshrl.u32 %v14726_v41, %v14958_v7  ;;  %v4722_v13 = vshll.u32 %v14726_v41, %v14957_v55  ;;  %v4723_v59 = vshrl.u32 %v14731_v46, %v14958_v7 }
 0x482   :  { %v4513_v52 = vadd.f32 0.041655596, %v4512_v42  ;;  %v4520_v30 = vadd.f32 0.008332121, %v4519_v38  ;;  %v4634_v62 = vadd.s32 1, %v4630_v45  ;;  %v4528_v33 = vand.u32 3, %v4527_v2 }
 0x483   :  { %v4631_v15 = vmul.u32 %v12328_v47, %v4577_v60  ;;  %v12475_v57 = vor.u32 %v4717_v9, %v4716_v19  ;;  %v4721_v54 = vor.u32 %v4720_v21, %v4719_v24  ;;  %v4724_v18 = vor.u32 %v4723_v59, %v4722_v13  ;;  %v1039_v9 = vpop.permute.xlu0 %1038 }
 0x484   :  { %v4514_v0 = vmul.f32 %v4513_v52, %v4511_v1  ;;  %v4521_v31 = vmul.f32 %v4520_v30, %v4511_v1  ;;  %v4635_v10 = vsel %vm4633_vm10, %v4634_v62, %v4630_v45  ;;  %v4701_v26 = vor.u32 8388608, %v4700_v11 }
 0x485   :  { %v4636_v17 = vadd.s32 %v4635_v10, %v4631_v15  ;;  %vm4725_vm13 = vcmp.lt.s32.totalorder %v14959_v8, 1  ;;  %vm4727_vm15 = vcmp.lt.s32.totalorder %v14959_v8, 3  ;;  %vm4728_vm3 = vcmp.lt.s32.totalorder %v14959_v8, 4 }
 0x486   :  { %v4515_v14 = vadd.f32 -0.4999988, %v4514_v0  ;;  %v4522_v2 = vadd.f32 -0.16666654, %v4521_v31  ;;  %v4733_v47 = vsel %vm4725_vm13, %v12464_v20, %v12466_v29  ;;  %vm6099_vm14 = vcmp.gt.s32.totalorder %v11979_v61, 0 }
 0x487   :  { %v4637_v60 = vadd.s32 536870912, %v4636_v17  ;;  %v4734_v55 = vsel %vm4728_vm3, %v4721_v54, 920167782  ;;  %v4737_v11 = vsel %vm4725_vm13, %v12466_v29, %v12475_v57  ;;  %v4738_v3 = vsel %vm4728_vm3, %v4724_v18, 1326507024 }
 0x488   :  { %v644_v27 = vadd.f32 %v612_v22, %v14960_v56  ;;  %v4516_v44 = vmul.f32 %v4515_v14, %v4511_v1  ;;  %v4523_v19 = vmul.f32 %v4522_v2, %v4511_v1  ;;  %v4735_v42 = vsel %vm4727_vm15, %v12475_v57, %v4734_v55 }
 0x489   :  { %v12500_v38 = vshrl.u32 %v4637_v60, 30  ;;  %vm4726_vm7 = vcmp.lt.s32.totalorder %v14959_v8, 2  ;;  %v4739_v45 = vsel %vm4727_vm15, %v4721_v54, %v4738_v3  ;;  %v12505_v24 = vshll.u32 %v4701_v26, 8 }
 0x48a   :  { %v4517_v21 = vadd.f32 1.0, %v4516_v44  ;;  %v4524_v13 = vadd.f32 1.0, %v4523_v19  ;;  %v4736_v22 = vsel %vm4726_vm7, %v4733_v47, %v4735_v42  ;;  %v4740_v1 = vsel %vm4726_vm7, %v4737_v11, %v4739_v45 }
 0x48b   :  { %vm4526_vm9 = vweird.f32 %v14928_v50  ;;  %vm4529_vm12 = vcmp.lt.s32.totalorder %v4528_v33, 2  ;;  %vm1093_vm11 = vcmp.eq.s32.totalorder %v1039_v9, 1  ;;  %v4639_v52 = vshll.u32 %v12500_v38, 30 }
 0x48c   :  { %v4525_v30 = vmul.f32 %v4524_v13, %v4509_v39  ;;  %v4534_v62 = vxor.u32 2147483648, %v4517_v21  ;;  %v4744_v59 = vand.u32 65535, %v4740_v1  ;;  %v4745_v15 = vshrl.u32 %v4740_v1, 16 }
 0x48d   :  { %vm4530_vm0 = vcmp.eq.s32.totalorder %v4528_v33, 0  ;;  %v12513_v54 = vsub.s32 %v4636_v17, %v4639_v52  ;;  %v4742_v0 = vand.u32 65535, %v12505_v24  ;;  %v4767_v31 = vshrl.u32 %v4736_v22, 16 }
 0x48e   :  { %v4531_v10 = vxor.u32 2147483648, %v4525_v30  ;;  %vm4533_vm5 = vcmp.eq.s32.totalorder %v4528_v33, 2  ;;  %v901_v18 = vadd.f32 %v12432_v43, %v644_v27  ;;  %v4743_v26 = vshrl.u32 %v12505_v24, 16 }
 0x48f   :  { %v1126_v14 = vsel %vm1093_vm11, %v8889_v4, 0.0  ;;  %vm4641_vm6 = vcmp.lt.s32.totalorder %v12513_v54, 0  ;;  %v4642_v39 = vsub.s32 0, %v12513_v54  ;;  %v4747_v2 = vmul.u32 %v4745_v15, %v4742_v0 }
 0x490   :  { %v4532_v47 = vsel %vm4530_vm0, %v4517_v21, %v4531_v10  ;;  %v4535_v60 = vsel %vm4533_vm5, %v4534_v62, %v4525_v30  ;;  %v12521_v17 = vmul.u32 %v4744_v59, %v4743_v26  ;;  %v4766_v55 = vand.u32 65535, %v4736_v22 }
 0x491   :  { %v4536_v11 = vsel %vm4529_vm12, %v4532_v47, %v4535_v60  ;;  %v4643_v3 = vsel %vm4641_vm6, %v4642_v39, %v12513_v54  ;;  %v4750_v56 = vshll.u32 %v4747_v2, 16  ;;  %v12525_v43 = vmul.u32 %v4767_v31, %v4742_v0 }
 0x492   :  { %v12530_v27 = vsel %vm6099_vm14, %v11979_v61, 0  ;;  %v4537_v44 = vsel %vm4526_vm9, nan, %v4536_v11  ;;  %v4644_v19 = vclz %v4643_v3  ;;  %v4746_v9 = vmul.u32 %v4744_v59, %v4742_v0  ;;  %v12538_v61 = vpop.permute.xlu2 %784  ;;  %v6447_v11 = vpop.f32.mrf.mxu0 }
 0x493   :  { %6491 = vmatmul.f32.gmra.mxu0 %v4537_v44  ;;  %v1158_v42 = vadd.f32 %v1126_v14, %v901_v18  ;;  %vm4540_vm4 = vcmp.lt.s32.totalorder %v14944_v40, 0  ;;  %v4632_v33 = vadd.s32 %v12439_v36, %v12425_v6  ;;  %v4749_v45 = vmul.u32 %v4745_v15, %v4743_v26 }
 0x494   :  { %v7202_v21 = vadd.s32 4294967294, %v4644_v19  ;;  %v4752_v13 = vshll.u32 %v12521_v17, 16  ;;  %vm4754_vm10 = vc.u32 %v4746_v9, %v4750_v56  ;;  %v4756_v22 = vadd.s32 %v4750_v56, %v4746_v9 }
 0x495   :  { %v4755_v50 = vsel %vm4754_vm10, 1, %v14643_v51  ;;  %v4768_v1 = vmul.u32 %v4766_v55, %v4742_v0  ;;  %v4770_v52 = vmul.u32 %v4766_v55, %v4743_v26  ;;  %v4772_v30 = vshll.u32 %v12525_v43, 16 }
 0x496   :  { %vm7203_vm14 = vcmp.lt.s32.totalorder %v7202_v21, 0  ;;  %v4662_v62 = vsub.s32 4, %v12500_v38  ;;  %v4757_v59 = vadd.s32 %v4755_v50, %v4749_v45  ;;  %vm4758_vm9 = vc.u32 %v4756_v22, %v4752_v13  ;;  %v12560_v13 = vld [vmem:[%s14377_s7] ss:$0 sm:$0xff] }
 0x497   :  { %v4647_v6 = vsel %vm7203_vm14, 0, %v7202_v21  ;;  %v4751_v36 = vshrl.u32 %v4747_v2, 16  ;;  %v4759_v15 = vsel %vm4758_vm9, 1, %v14643_v51  ;;  %vm4776_vm12 = vc.u32 %v4768_v1, %v4772_v30 }
 0x498   :  { %vm837_vm11 = vcmp.eq.s32.totalorder %v12538_v61, 1  ;;  %v4648_v10 = vsub.s32 32, %v4647_v6  ;;  %v4652_v18 = vsub.s32 4294967266, %v4647_v6  ;;  %v4761_v14 = vadd.s32 %v4759_v15, %v4757_v59 }
 0x499   :  { %v4771_v39 = vmul.u32 %v4767_v31, %v4743_v26  ;;  %v4649_v0 = vshll.u32 %v12513_v54, %v4647_v6  ;;  %v4774_v47 = vshll.u32 %v4770_v52, 16  ;;  %v4777_v60 = vsel %vm4776_vm12, 1, %v14643_v51  ;;  %v528_v31 = vpop.permute.xlu1 %527 }
 0x49a   :  { %v4778_v55 = vadd.s32 %v4772_v30, %v4768_v1  ;;  %v4650_v3 = vshrl.u32 %v4632_v33, %v4648_v10  ;;  %v4653_v56 = vadd.s32 127, %v4652_v18  ;;  %v4762_v44 = vadd.s32 %v4761_v14, %v4751_v36  ;;  %v14966_v14 = vld [vmem:[#allocation68_spill] sm:$0xff] }
 0x49b   :  { %v4779_v2 = vadd.s32 %v4777_v60, %v4771_v39  ;;  %v4663_v19 = vsel %vm4540_vm4, %v4662_v62, %v12500_v38  ;;  %v4709_v9 = vshrl.u32 %v14744_v49, %v14958_v7  ;;  %v4730_v54 = vsel %vm4728_vm3, %v12475_v57, 2102212464  ;;  %v14968_v60 = vld [vmem:[#allocation107_spill] sm:$0xff] }
 0x49c   :  { %vm4780_vm0 = vc.u32 %v4778_v55, %v4774_v47  ;;  %v4651_v26 = vor.u32 %v4650_v3, %v4649_v0  ;;  %v4654_v45 = vshll.u32 %v4653_v56, 23  ;;  %v4753_v33 = vshrl.u32 %v12521_v17, 16 }
 0x49d   :  { %v4781_v21 = vsel %vm4780_vm0, 1, %v14643_v51  ;;  %v6448_v38 = vadd.f32 %v12560_v13, %v6447_v11  ;;  %v1194_v7 = vadd.f32 %v12243_v53, %v1158_v42  ;;  %v4773_v22 = vshrl.u32 %v12525_v43, 16 }
 0x49e   :  { %v4783_v57 = vadd.s32 %v4781_v21, %v4779_v2  ;;  %v4655_v50 = vor.u32 4788187, %v4654_v45  ;;  %v4729_v1 = vsel %vm4725_vm13, %v4709_v9, %v12464_v20  ;;  %v4731_v17 = vsel %vm4727_vm15, %v12466_v29, %v4730_v54  ;;  %v14969_v2 = vld [vmem:[#allocation110_spill] sm:$0xff] }
 0x49f   :  { %v12571_v30 = vadd.s32 %v4762_v44, %v4753_v33  ;;  %vm580_vm3 = vcmp.eq.s32.totalorder %v528_v31, 1  ;;  %v14961_v62 = vand.u32 2147483647, %v14944_v40  ;;  %6591 = vmatmul.f32.gmra.mxu1 %v6448_v38  ;;  %7026 = vst [vmem:[#allocation8 + $0x20] sm:$0xff] %v6448_v38  ;;  %6752 = vmatmul.f32.gmra.mxu2 %v1194_v7  ;;  %v4775_v43 = vshrl.u32 %v4770_v52, 16  ;;  %v14970_v31 = vld [vmem:[#allocation101_spill] sm:$0xff] }
 0x4a0   :  { %v4784_v42 = vadd.s32 %v4783_v57, %v4773_v22  ;;  %v4656_v6 = vand.u32 2147483647, %v4655_v50  ;;  %v4658_v20 = vcvt.s32.f32 %v4651_v26  ;;  %7074 = vst [vmem:[#allocation10 + $0xa0] sm:$0xff] %v1194_v7  ;;  %v12581_v29 = vadd.s32 %v4778_v55, %v4774_v47  ;;  %v7293_v47 = vld [vmem:[%s14372_s2] ss:$0 sm:$0xff] }
 0x4a1   :  { %vm12575_vm5 = vcmp.le.f32.partialorder %v14961_v62, 0.7853982  ;;  %v14964_v15 = vor.u32 %v11895_v63, %v11606_v48  ;;  %v4732_v18 = vsel %vm4726_vm7, %v4729_v1, %v4731_v17  ;;  %v14603_v39 = vand.u32 2147483647, %v14966_v14 }
 0x4a2   :  { %v4665_v36 = vsel %vm12575_vm5, 0, %v4663_v19  ;;  %v4785_v52 = vadd.s32 %v4784_v42, %v4775_v43  ;;  %v12594_v0 = vand.u32 31, %v12530_v27  ;;  %v12600_v55 = vmul.f32 %v7293_v47, %v14968_v60 }
 0x4a3   :  { %v12588_v10 = vsel %vm14614_vm1, %v14964_v15, 1326507024  ;;  %v4659_v48 = vmul.f32 %v4658_v20, %v4656_v6  ;;  %vm4788_vm13 = vc.u32 %v12571_v30, %v12581_v29  ;;  %v12607_v63 = vsel %vm837_vm11, %v8876_v23, 0.0 }
 0x4a4   :  { %14965 = vst [vmem:[#allocation55_spill] sm:$0xff] %v12588_v10  ;;  %v613_v8 = vsel %vm580_vm3, %v8133_v35, 0.0  ;;  %v4682_v11 = vadd.s32 3, %v4665_v36  ;;  %v4789_v3 = vadd.s32 1, %v4785_v52  ;;  %v4786_v44 = vmul.u32 %v12505_v24, %v4732_v18 }
 0x4a5   :  { %14967 = vst [vmem:[#allocation22_spill] sm:$0xff] %v12594_v0  ;;  %v4660_v56 = vxor.u32 2147483648, %v4659_v48  ;;  %v4869_v19 = vshrl.u32 %v14728_v34, %v14969_v2  ;;  %v4872_v9 = vshrl.u32 %v14724_v25, %v14969_v2  ;;  %v4855_v61 = vand.u32 8388607, %v14603_v39 }
 0x4a6   :  { %v4790_v54 = vsel %vm4788_vm13, %v4789_v3, %v4785_v52  ;;  %v4866_v26 = vshrl.u32 %v14725_v37, %v14969_v2  ;;  %v4868_v45 = vshll.u32 %v14725_v37, %v14970_v31  ;;  %v4871_v21 = vshll.u32 %v14728_v34, %v14970_v31  ;;  %v14971_v52 = vld [vmem:[#allocation108_spill] sm:$0xff] }
 0x4a7   :  { %v4661_v33 = vsel %vm4540_vm4, %v4660_v56, %v4659_v48  ;;  %v4791_v24 = vadd.s32 %v4790_v54, %v4786_v44  ;;  %v4875_v38 = vshrl.u32 %v14726_v41, %v14969_v2  ;;  %v4874_v22 = vshll.u32 %v14724_v25, %v14970_v31  ;;  %v1042_v56 = vpop.permute.xlu0 %1041 }
 0x4a8   :  { %v12631_v7 = vsel %vm12575_vm5, %v14944_v40, %v4661_v33  ;;  %v4877_v57 = vshll.u32 %v14726_v41, %v14970_v31  ;;  %v4878_v50 = vshrl.u32 %v14731_v46, %v14969_v2  ;;  %v12641_v62 = vor.u32 %v4869_v19, %v4868_v45 }
 0x4a9   :  { %v4666_v1 = vmul.f32 %v12631_v7, %v12631_v7  ;;  %v4792_v17 = vadd.s32 536870912, %v4791_v24  ;;  %v12643_v43 = vor.u32 %v4872_v9, %v4871_v21  ;;  %v4856_v59 = vor.u32 8388608, %v4855_v61  ;;  %v14972_v9 = vld [vmem:[#allocation40_spill] sm:$0xff] }
 0x4aa   :  { %v4865_v42 = vshll.u32 %v14744_v49, %v14970_v31  ;;  %v4876_v6 = vor.u32 %v4875_v38, %v4874_v22  ;;  %v4879_v20 = vor.u32 %v4878_v50, %v4877_v57  ;;  %vm4883_vm15 = vcmp.lt.s32.totalorder %v14971_v52, 4 }
 0x4ab   :  { %v4667_v36 = vmul.f32 -0.001358992, %v4666_v1  ;;  %v4674_v15 = vmul.f32 -0.00019511016, %v4666_v1  ;;  %v12647_v18 = vshrl.u32 %v4792_v17, 30  ;;  %vm4880_vm7 = vcmp.lt.s32.totalorder %v14971_v52, 1 }
 0x4ac   :  { %v12650_v47 = vor.u32 %v4866_v26, %v4865_v42  ;;  %vm4882_vm6 = vcmp.lt.s32.totalorder %v14971_v52, 3  ;;  %v4893_v60 = vsel %vm4883_vm15, %v4879_v20, 1326507024  ;;  %v4892_v19 = vsel %vm4880_vm7, %v12641_v62, %v12643_v43 }
 0x4ad   :  { %v4668_v48 = vadd.f32 0.041655596, %v4667_v36  ;;  %v4675_v3 = vadd.f32 0.008332121, %v4674_v15  ;;  %v4794_v44 = vshll.u32 %v12647_v18, 30  ;;  %v645_v54 = vadd.f32 %v613_v8, %v14972_v9 }
 0x4ae   :  { %vm4881_vm4 = vcmp.lt.s32.totalorder %v14971_v52, 2  ;;  %v4894_v61 = vsel %vm4882_vm6, %v4876_v6, %v4893_v60  ;;  %v12665_v26 = vshll.u32 %v4856_v59, 8  ;;  %v4889_v21 = vsel %vm4883_vm15, %v4876_v6, 920167782 }
 0x4af   :  { %v4669_v31 = vmul.f32 %v4668_v48, %v4666_v1  ;;  %v4676_v45 = vmul.f32 %v4675_v3, %v4666_v1  ;;  %v12667_v33 = vsub.s32 %v4791_v24, %v4794_v44  ;;  %v4683_v38 = vand.u32 3, %v4682_v11 }
 0x4b0   :  { %vm1094_vm10 = vcmp.eq.s32.totalorder %v1042_v56, 1  ;;  %v4888_v8 = vsel %vm4880_vm7, %v12650_v47, %v12641_v62  ;;  %v4895_v22 = vsel %vm4881_vm4, %v4892_v19, %v4894_v61  ;;  %v4890_v17 = vsel %vm4882_vm6, %v12643_v43, %v4889_v21 }
 0x4b1   :  { %v4670_v57 = vadd.f32 -0.4999988, %v4669_v31  ;;  %v4677_v50 = vadd.f32 -0.16666654, %v4676_v45  ;;  %vm4796_vm14 = vcmp.lt.s32.totalorder %v12667_v33, 0  ;;  %v4797_v24 = vsub.s32 0, %v12667_v33 }
 0x4b2   :  { %v12683_v11 = vand.u32 65535, %v12665_v26  ;;  %v12686_v59 = vshrl.u32 %v12665_v26, 16  ;;  %v4899_v42 = vand.u32 65535, %v4895_v22  ;;  %v4900_v15 = vshrl.u32 %v4895_v22, 16 }
 0x4b3   :  { %v4671_v6 = vmul.f32 %v4670_v57, %v4666_v1  ;;  %v4678_v20 = vmul.f32 %v4677_v50, %v4666_v1  ;;  %v4798_v36 = vsel %vm4796_vm14, %v4797_v24, %v12667_v33  ;;  %vm5348_vm9 = vcmp.lt.s32.totalorder %v11945_v16, 4 }
 0x4b4   :  { %vm4681_vm12 = vweird.f32 %v14944_v40  ;;  %vm4684_vm11 = vcmp.lt.s32.totalorder %v4683_v38, 2  ;;  %vm4685_vm0 = vcmp.eq.s32.totalorder %v4683_v38, 0  ;;  %v1127_v60 = vsel %vm1094_vm10, %v8889_v4, 0.0 }
 0x4b5   :  { %v4799_v48 = vclz %v4798_v36  ;;  %v4672_v3 = vadd.f32 1.0, %v4671_v6  ;;  %v4679_v44 = vadd.f32 1.0, %v4678_v20  ;;  %v12694_v19 = vmul.u32 %v4900_v15, %v12683_v11 }
 0x4b6   :  { %v12697_v1 = vmul.u32 %v4899_v42, %v12686_v59  ;;  %vm4688_vm3 = vcmp.eq.s32.totalorder %v4683_v38, 2  ;;  %v902_v9 = vadd.f32 %v12607_v63, %v645_v54  ;;  %v4891_v31 = vsel %vm4881_vm4, %v4888_v8, %v4890_v17 }
 0x4b7   :  { %v7205_v61 = vadd.s32 4294967294, %v4799_v48  ;;  %v4680_v45 = vmul.f32 %v4679_v44, %v12631_v7  ;;  %v4689_v56 = vxor.u32 2147483648, %v4672_v3  ;;  %v4901_v21 = vmul.u32 %v4899_v42, %v12683_v11 }
 0x4b8   :  { %v4905_v22 = vshll.u32 %v12694_v19, 16  ;;  %v1159_v57 = vadd.f32 %v1127_v60, %v902_v9  ;;  %v4787_v50 = vadd.s32 %v12581_v29, %v12571_v30  ;;  %v4904_v24 = vmul.u32 %v4900_v15, %v12686_v59  ;;  %v6450_v29 = vpop.f32.mrf.mxu0 }
 0x4b9   :  { %vm7206_vm5 = vcmp.lt.s32.totalorder %v7205_v61, 0  ;;  %v4686_v6 = vxor.u32 2147483648, %v4680_v45  ;;  %v4907_v54 = vshll.u32 %v12697_v1, 16  ;;  %v4921_v20 = vand.u32 65535, %v4891_v31 }
 0x4ba   :  { %v4802_v63 = vsel %vm7206_vm5, 0, %v7205_v61  ;;  %vm4909_vm13 = vc.u32 %v4901_v21, %v4905_v22  ;;  %v4690_v36 = vsel %vm4688_vm3, %v4689_v56, %v4680_v45  ;;  %v4911_v60 = vadd.s32 %v4905_v22, %v4901_v21 }
 0x4bb   :  { %v4803_v8 = vsub.s32 32, %v4802_v63  ;;  %v4807_v17 = vsub.s32 4294967266, %v4802_v63  ;;  %v4910_v7 = vsel %vm4909_vm13, 1, %v14643_v51  ;;  %v4687_v42 = vsel %vm4685_vm0, %v4672_v3, %v4686_v6  ;;  %v7294_v6 = vld [vmem:[%s14373_s3] ss:$0 sm:$0xff]  ;;  %s7441_s3 = smov [#allocation10]  }
 0x4bc   :  { %v4922_v48 = vshrl.u32 %v4891_v31, 16  ;;  %v4691_v30 = vsel %vm4684_vm11, %v4687_v42, %v4690_v36  ;;  %v4804_v15 = vshll.u32 %v12667_v33, %v4802_v63  ;;  %v12717_v61 = vsel %vm5348_vm9, %v12209_v58, 920167782  ;;  %v14973_v33 = vld [vmem:[#allocation28_spill] sm:$0xff]  ;;  %v531_v63 = vpop.permute.xlu1 %530  ;;  %s7116_s23 = sshll.u32 %s7441_s3, 4  ;;  %s7117_s23 = int_to_ptr.vmem [resolvable:$true] %s7116_s23 }
 0x4bd   :  { %v4805_v44 = vshrl.u32 %v4787_v50, %v4803_v8  ;;  %v4808_v9 = vadd.s32 127, %v4807_v17  ;;  %v4692_v39 = vsel %vm4681_vm12, nan, %v4691_v30  ;;  %v4912_v3 = vadd.s32 %v4910_v7, %v4904_v24 }
 0x4be   :  { %vm4913_vm10 = vc.u32 %v4911_v60, %v4907_v54  ;;  %6494 = vmatmul.f32.gmra.mxu0 %v4692_v39  ;;  %v4924_v56 = vmul.u32 %v4922_v48, %v12683_v11  ;;  %v14974_v21 = vor.u32 %v11977_v12, %v14973_v33  ;;  %v12731_v50 = vshrl.u32 %v12530_v27, 5 }
 0x4bf   :  { %v4806_v45 = vor.u32 %v4805_v44, %v4804_v15  ;;  %v4809_v31 = vshll.u32 %v4808_v9, 23  ;;  %v4914_v38 = vsel %vm4913_vm10, 1, %v14643_v51  ;;  %v6451_v40 = vadd.f32 %v12560_v13, %v6450_v29 }
 0x4c0   :  { %v12728_v22 = vsel %vm5348_vm9, %v14974_v21, 1326507024  ;;  %v1195_v39 = vadd.f32 %v12243_v53, %v1159_v57  ;;  %v12736_v24 = vsub.s32 32, %v12594_v0  ;;  %v12742_v12 = vadd.f32 %v7294_v6, %v12600_v55 }
 0x4c1   :  { %v4810_v54 = vor.u32 4788187, %v4809_v31  ;;  %v4925_v8 = vmul.u32 %v4921_v20, %v12686_v59  ;;  %vm12747_vm14 = vcmp.le.f32.partialorder %v4693_v32, 0.7853982  ;;  %vm4695_vm12 = vcmp.lt.s32.totalorder %v14956_v5, 0  ;;  %6594 = vmatmul.f32.gmra.mxu1 %v6451_v40  ;;  %7027 = vst [vmem:[#allocation8 + $0x28] sm:$0xff] %v6451_v40 }
 0x4c2   :  { %14975 = vst [vmem:[#allocation62_spill] sm:$0xff] %v12736_v24  ;;  %v4817_v53 = vsub.s32 4, %v12647_v18  ;;  %6755 = vmatmul.f32.gmra.mxu2 %v1195_v39  ;;  %v4916_v57 = vadd.s32 %v4914_v38, %v4912_v3  ;;  %v4813_v17 = vcvt.s32.f32 %v4806_v45  ;;  %v4923_v7 = vmul.u32 %v4921_v20, %v12683_v11  ;;  %v788_v3 = vpop.permute.xlu2 %787 }
 0x4c3   :  { %14976 = vst [vmem:[#allocation98_spill] sm:$0xff] %v12742_v12  ;;  %v4811_v55 = vand.u32 2147483647, %v4810_v54  ;;  %v4927_v42 = vshll.u32 %v4924_v56, 16  ;;  %vm581_vm11 = vcmp.eq.s32.totalorder %v531_v63, 1  ;;  %v4906_v36 = vshrl.u32 %v12694_v19, 16 }
 0x4c4   :  { %7075 = vst [vmem:[#allocation10 + $0xa8] sm:$0xff] %v1195_v39  ;;  %v4885_v32 = vsel %vm4883_vm15, %v12643_v43, 2102212464  ;;  %v4926_v60 = vmul.u32 %v4922_v48, %v12686_v59  ;;  %v4929_v29 = vshll.u32 %v4925_v8, 16  ;;  %v4818_v44 = vsel %vm4695_vm12, %v4817_v53, %v12647_v18  ;;  %v14979_v39 = vld [vmem:[#allocation39_spill] sm:$0xff] }
 0x4c5   :  { %v4814_v30 = vmul.f32 %v4813_v17, %v4811_v55  ;;  %vm4931_vm0 = vc.u32 %v4923_v7, %v4927_v42  ;;  %v4933_v15 = vadd.s32 %v4927_v42, %v4923_v7  ;;  %v4864_v11 = vshrl.u32 %v14744_v49, %v14969_v2  ;;  %v14980_v17 = vld [vmem:[#allocation137_spill] sm:$0xff] }
 0x4c6   :  { %v4917_v20 = vadd.s32 %v4916_v57, %v4906_v36  ;;  %v4932_v9 = vsel %vm4931_vm0, 1, %v14643_v51  ;;  %v614_v43 = vsel %vm581_vm11, %v8133_v35, 0.0  ;;  %v4886_v18 = vsel %vm4882_vm6, %v12641_v62, %v4885_v32  ;;  %v1045_v62 = vpop.permute.xlu0 %1044 }
 0x4c7   :  { %v4815_v19 = vxor.u32 2147483648, %v4814_v30  ;;  %v4934_v45 = vadd.s32 %v4932_v9, %v4926_v60  ;;  %vm4935_vm15 = vc.u32 %v4933_v15, %v4929_v29  ;;  %v4884_v59 = vsel %vm4880_vm7, %v4864_v11, %v12650_v47 }
 0x4c8   :  { %v4908_v48 = vshrl.u32 %v12697_v1, 16  ;;  %v4936_v2 = vsel %vm4935_vm15, 1, %v14643_v51  ;;  %v4820_v38 = vsel %vm12747_vm14, 0, %v4818_v44  ;;  %v4928_v33 = vshrl.u32 %v4924_v56, 16 }
 0x4c9   :  { %v4816_v31 = vsel %vm4695_vm12, %v4815_v19, %v4814_v30  ;;  %v4938_v21 = vadd.s32 %v4936_v2, %v4934_v45  ;;  %v6246_v40 = vand.u32 2139095040, %v12742_v12  ;;  %vm838_vm3 = vcmp.eq.s32.totalorder %v788_v3, 1 }
 0x4ca   :  { %v12782_v47 = vsel %vm12747_vm14, %v14956_v5, %v4816_v31  ;;  %v12784_v1 = vadd.s32 %v4917_v20, %v4908_v48  ;;  %v646_v6 = vadd.f32 %v614_v43, %v14979_v39  ;;  %v4930_v54 = vshrl.u32 %v4925_v8, 16 }
 0x4cb   :  { %v4821_v63 = vmul.f32 %v12782_v47, %v12782_v47  ;;  %v4939_v53 = vadd.s32 %v4938_v21, %v4928_v33  ;;  %v4837_v56 = vadd.s32 3, %v4820_v38  ;;  %v4887_v57 = vsel %vm4881_vm4, %v4884_v59, %v4886_v18 }
 0x4cc   :  { %v12791_v55 = vadd.s32 %v4933_v15, %v4929_v29  ;;  %v14605_v27 = vand.u32 2147483647, %v14980_v17  ;;  %vm1095_vm7 = vcmp.eq.s32.totalorder %v1045_v62, 1  ;;  %v6114_v36 = vshll.u32 %v14724_v25, %v12594_v0  ;;  %v14981_v62 = vld [vmem:[#allocation70_spill] sm:$0xff] }
 0x4cd   :  { %v4822_v7 = vmul.f32 -0.001358992, %v4821_v63  ;;  %v4829_v42 = vmul.f32 -0.00019511016, %v4821_v63  ;;  %v4940_v32 = vadd.s32 %v4939_v53, %v4930_v54  ;;  %v6115_v60 = vshrl.u32 %v14726_v41, %v12736_v24 }
 0x4ce   :  { %v6247_v8 = vshrl.u32 %v6246_v40, 23  ;;  %vm4943_vm6 = vc.u32 %v12784_v1, %v12791_v55  ;;  %v871_v52 = vsel %vm838_vm3, %v8876_v23, 0.0  ;;  %v12802_v44 = vand.u32 3, %v4837_v56 }
 0x4cf   :  { %v4823_v30 = vadd.f32 0.041655596, %v4822_v7  ;;  %v4830_v29 = vadd.f32 0.008332121, %v4829_v42  ;;  %v4944_v15 = vadd.s32 1, %v4940_v32  ;;  %v1128_v11 = vsel %vm1095_vm7, %v8889_v4, 0.0 }
 0x4d0   :  { %v4941_v20 = vmul.u32 %v12665_v26, %v4887_v57  ;;  %v5010_v9 = vand.u32 8388607, %v14605_v27  ;;  %v903_v45 = vadd.f32 %v871_v52, %v646_v6  ;;  %v12808_v18 = vor.u32 %v6115_v60, %v6114_v36  ;;  %v14982_v6 = vld [vmem:[#allocation67_spill] sm:$0xff] }
 0x4d1   :  { %v4824_v43 = vmul.f32 %v4823_v30, %v4821_v63  ;;  %v4831_v19 = vmul.f32 %v4830_v29, %v4821_v63  ;;  %v4945_v59 = vsel %vm4943_vm6, %v4944_v15, %v4940_v32  ;;  %v12812_v3 = vshll.u32 %v14726_v41, %v12594_v0  ;;  %v14983_v32 = vld [vmem:[#allocation47_spill] sm:$0xff] }
 0x4d2   :  { %v12816_v48 = vshrl.u32 %v14731_v46, %v12736_v24  ;;  %v4946_v2 = vadd.s32 %v4945_v59, %v4941_v20  ;;  %v12818_v31 = vadd.s32 4294967169, %v6247_v8  ;;  %v12820_v33 = vadd.f32 %v1128_v11, %v903_v45 }
 0x4d3   :  { %v4825_v26 = vadd.f32 -0.4999988, %v4824_v43  ;;  %v4832_v38 = vadd.f32 -0.16666654, %v4831_v19  ;;  %vm4840_vm4 = vcmp.eq.s32.totalorder %v12802_v44, 0  ;;  %vm4843_vm5 = vcmp.eq.s32.totalorder %v12802_v44, 2 }
 0x4d4   :  { %v4947_v21 = vadd.s32 536870912, %v4946_v2  ;;  %v5011_v40 = vor.u32 8388608, %v5010_v9  ;;  %v5021_v39 = vshrl.u32 %v14725_v37, %v14981_v62  ;;  %v14604_v54 = vand.u32 2147483647, %v14982_v6 }
 0x4d5   :  { %v4826_v53 = vmul.f32 %v4825_v26, %v4821_v63  ;;  %v4833_v56 = vmul.f32 %v4832_v38, %v4821_v63  ;;  %vm4839_vm13 = vcmp.lt.s32.totalorder %v12802_v44, 2  ;;  %v5024_v57 = vshrl.u32 %v14728_v34, %v14981_v62 }
 0x4d6   :  { %v5030_v7 = vshrl.u32 %v14726_v41, %v14981_v62  ;;  %vm4836_vm10 = vweird.f32 %v14956_v5  ;;  %v12833_v42 = vshrl.u32 %v4947_v21, 30  ;;  %v5020_v36 = vshll.u32 %v14744_v49, %v14983_v32 }
 0x4d7   :  { %v5023_v60 = vshll.u32 %v14725_v37, %v14983_v32  ;;  %v5027_v63 = vshrl.u32 %v14724_v25, %v14981_v62  ;;  %v4827_v8 = vadd.f32 1.0, %v4826_v53  ;;  %v4834_v52 = vadd.f32 1.0, %v4833_v56 }
 0x4d8   :  { %v5029_v30 = vshll.u32 %v14724_v25, %v14983_v32  ;;  %v5033_v29 = vshrl.u32 %v14731_v46, %v14981_v62  ;;  %v4949_v15 = vshll.u32 %v12833_v42, 30  ;;  %v5022_v11 = vor.u32 %v5021_v39, %v5020_v36  ;;  %v14984_v36 = vld [vmem:[#allocation83_spill] sm:$0xff]  ;;  %v12941_v46 = vpop.permute.xlu1 %533 }
 0x4d9   :  { %v5026_v20 = vshll.u32 %v14728_v34, %v14983_v32  ;;  %v5032_v9 = vshll.u32 %v14726_v41, %v14983_v32  ;;  %v4835_v43 = vmul.f32 %v4834_v52, %v12782_v47  ;;  %v4844_v19 = vxor.u32 2147483648, %v4827_v8  ;;  %v14985_v32 = vld [vmem:[#allocation103_spill] sm:$0xff] }
 0x4da   :  { %v12851_v45 = vor.u32 %v5024_v57, %v5023_v60  ;;  %v5031_v59 = vor.u32 %v5030_v7, %v5029_v30  ;;  %v12853_v26 = vsub.s32 %v4946_v2, %v4949_v15  ;;  %v12855_v21 = vshll.u32 %v5011_v40, 8 }
 0x4db   :  { %v5028_v38 = vor.u32 %v5027_v63, %v5026_v20  ;;  %v12859_v39 = vand.u32 8388607, %v14604_v54  ;;  %v4841_v53 = vxor.u32 2147483648, %v4835_v43  ;;  %v5034_v56 = vor.u32 %v5033_v29, %v5032_v9 }
 0x4dc   :  { %vm5035_vm14 = vcmp.lt.s32.totalorder %v14984_v36, 1  ;;  %v5176_v47 = vshrl.u32 %v14725_v37, %v14985_v32  ;;  %vm4850_vm12 = vcmp.lt.s32.totalorder %v14966_v14, 0  ;;  %vm4951_vm11 = vcmp.lt.s32.totalorder %v12853_v26, 0 }
 0x4dd   :  { %v4952_v2 = vsub.s32 0, %v12853_v26  ;;  %vm5037_vm0 = vcmp.lt.s32.totalorder %v14984_v36, 3  ;;  %vm5038_vm15 = vcmp.lt.s32.totalorder %v14984_v36, 4  ;;  %v4842_v40 = vsel %vm4840_vm4, %v4827_v8, %v4841_v53  ;;  %v14989_v53 = vld [vmem:[#allocation94_spill] sm:$0xff] }
 0x4de   :  { %v4845_v57 = vsel %vm4843_vm5, %v4844_v19, %v4835_v43  ;;  %v5043_v7 = vsel %vm5035_vm14, %v5022_v11, %v12851_v45  ;;  %v5044_v60 = vsel %vm5038_vm15, %v5031_v59, 920167782  ;;  %vm5036_vm3 = vcmp.lt.s32.totalorder %v14984_v36, 2 }
 0x4df   :  { %v4846_v63 = vsel %vm4839_vm13, %v4842_v40, %v4845_v57  ;;  %v4953_v52 = vsel %vm4951_vm11, %v4952_v2, %v12853_v26  ;;  %v5045_v8 = vsel %vm5037_vm0, %v5028_v38, %v5044_v60  ;;  %v14986_v29 = vand.u32 2147483647, %v14966_v14 }
 0x4e0   :  { %v4847_v30 = vsel %vm4836_vm10, nan, %v4846_v63  ;;  %v4954_v20 = vclz %v4953_v52  ;;  %v5046_v44 = vsel %vm5036_vm3, %v5043_v7, %v5045_v8  ;;  %v5047_v9 = vsel %vm5035_vm14, %v12851_v45, %v5028_v38 }
 0x4e1   :  { %vm12888_vm7 = vcmp.le.f32.partialorder %v14986_v29, 0.7853982  ;;  %6497 = vmatmul.f32.gmra.mxu0 %v4847_v30  ;;  %v4942_v43 = vadd.s32 %v12791_v55, %v12784_v1  ;;  %v5048_v5 = vsel %vm5038_vm15, %v5034_v56, 1326507024  ;;  %v5052_v19 = vand.u32 65535, %v12855_v21 }
 0x4e2   :  { %v5175_v2 = vshll.u32 %v14744_v49, %v14989_v53  ;;  %v7208_v40 = vadd.s32 4294967294, %v4954_v20  ;;  %v4972_v57 = vsub.s32 4, %v12833_v42  ;;  %v5049_v7 = vsel %vm5037_vm0, %v5031_v59, %v5048_v5 }
 0x4e3   :  { %v5077_v60 = vshrl.u32 %v5046_v44, 16  ;;  %v5050_v63 = vsel %vm5036_vm3, %v5047_v9, %v5049_v7  ;;  %v5053_v1 = vshrl.u32 %v12855_v21, 16  ;;  %v5178_v56 = vshll.u32 %v14725_v37, %v14989_v53 }
 0x4e4   :  { %vm7209_vm6 = vcmp.lt.s32.totalorder %v7208_v40, 0  ;;  %v5055_v52 = vshrl.u32 %v5050_v63, 16  ;;  %v12913_v8 = vor.u32 %v5176_v47, %v5175_v2  ;;  %v5179_v30 = vshrl.u32 %v14728_v34, %v14985_v32 }
 0x4e5   :  { %v4957_v29 = vsel %vm7209_vm6, 0, %v7208_v40  ;;  %v5019_v59 = vshrl.u32 %v14744_v49, %v14981_v62  ;;  %v5054_v20 = vand.u32 65535, %v5050_v63  ;;  %v12919_v9 = vmul.u32 %v5077_v60, %v5052_v19  ;;  %v6453_v63 = vpop.f32.mrf.mxu0 }
 0x4e6   :  { %v4958_v5 = vsub.s32 32, %v4957_v29  ;;  %v4962_v7 = vsub.s32 4294967266, %v4957_v29  ;;  %v4973_v54 = vsel %vm4850_vm12, %v4972_v57, %v12833_v42  ;;  %v5076_v27 = vand.u32 65535, %v5046_v44 }
 0x4e7   :  { %v12926_v47 = vsel %vm5035_vm14, %v5019_v59, %v5022_v11  ;;  %v12928_v2 = vmul.u32 %v5055_v52, %v5052_v19  ;;  %v5181_v40 = vshll.u32 %v14728_v34, %v14989_v53  ;;  %v5182_v62 = vshrl.u32 %v14724_v25, %v14985_v32 }
 0x4e8   :  { %v4959_v55 = vshll.u32 %v12853_v26, %v4957_v29  ;;  %v4960_v12 = vshrl.u32 %v4942_v43, %v4958_v5  ;;  %v4963_v24 = vadd.s32 127, %v4962_v7  ;;  %v5082_v42 = vshll.u32 %v12919_v9, 16  ;;  %v12944_v43 = vld [vmem:[#allocation5] ss:$0 sm:$0xff]  ;;  %v14990_v5 = vld [vmem:[#allocation109_spill] sm:$0xff] }
 0x4e9   :  { %v4975_v44 = vsel %vm12888_vm7, 0, %v4973_v54  ;;  %v5040_v11 = vsel %vm5038_vm15, %v5028_v38, 2102212464  ;;  %v5056_v57 = vmul.u32 %v5054_v20, %v5052_v19  ;;  %v5060_v59 = vshll.u32 %v12928_v2, 16 }
 0x4ea   :  { %v4961_v53 = vor.u32 %v4960_v12, %v4959_v55  ;;  %v4964_v0 = vshll.u32 %v4963_v24, 23  ;;  %v5058_v10 = vmul.u32 %v5054_v20, %v5053_v1  ;;  %v5078_v28 = vmul.u32 %v5076_v27, %v5052_v19 }
 0x4eb   :  { %v6454_v26 = vadd.f32 %v12560_v13, %v6453_v63  ;;  %v1196_v29 = vadd.f32 %v12944_v43, %v12820_v33  ;;  %vm5064_vm4 = vc.u32 %v5056_v57, %v5060_v59  ;;  %v5080_v54 = vmul.u32 %v5076_v27, %v5053_v1 }
 0x4ec   :  { %vm5190_vm5 = vcmp.lt.s32.totalorder %v14990_v5, 1  ;;  %v4965_v38 = vor.u32 4788187, %v4964_v0  ;;  %v5041_v24 = vsel %vm5037_vm0, %v12851_v45, %v5040_v11  ;;  %vm12952_vm13 = vc.u32 %v5078_v28, %v5082_v42 }
 0x4ed   :  { %v12956_v19 = vor.u32 %v5179_v30, %v5178_v56  ;;  %v4992_v55 = vadd.s32 3, %v4975_v44  ;;  %6597 = vmatmul.f32.gmra.mxu1 %v6454_v26  ;;  %7028 = vst [vmem:[#allocation8 + $0x30] sm:$0xff] %v6454_v26  ;;  %6758 = vmatmul.f32.gmra.mxu2 %v1196_v29  ;;  %v5059_v33 = vmul.u32 %v5055_v52, %v5053_v1  ;;  %v5065_v27 = vsel %vm5064_vm4, 1, %v14643_v51 }
 0x4ee   :  { %v5081_v20 = vmul.u32 %v5077_v60, %v5053_v1  ;;  %vm5191_vm10 = vcmp.lt.s32.totalorder %v14990_v5, 2  ;;  %vm582_vm14 = vcmp.eq.s32.totalorder %v12941_v46, 1  ;;  %v4966_v0 = vand.u32 2147483647, %v4965_v38  ;;  %7076 = vst [vmem:[#allocation10 + $0xb0] sm:$0xff] %v1196_v29 }
 0x4ef   :  { %v4968_v45 = vcvt.s32.f32 %v4961_v53  ;;  %v5062_v7 = vshll.u32 %v5058_v10, 16  ;;  %v5066_v63 = vadd.s32 %v5060_v59, %v5056_v57  ;;  %v5067_v11 = vadd.s32 %v5065_v27, %v5059_v33 }
 0x4f0   :  { %v5084_v56 = vshll.u32 %v5080_v54, 16  ;;  %v5087_v30 = vsel %vm12952_vm13, 1, %v14643_v51  ;;  %v5088_v44 = vadd.s32 %v5082_v42, %v5078_v28  ;;  %v12964_v60 = vor.u32 %v5182_v62, %v5181_v40  ;;  %v14993_v62 = vld [vmem:[#allocation120_spill] sm:$0xff] }
 0x4f1   :  { %v4969_v52 = vmul.f32 %v4968_v45, %v4966_v0  ;;  %vm5068_vm11 = vc.u32 %v5066_v63, %v5062_v7  ;;  %v5089_v26 = vadd.s32 %v5087_v30, %v5081_v20  ;;  %v5061_v1 = vshrl.u32 %v12928_v2, 16  ;;  %v14994_v0 = vld [vmem:[#allocation121_spill] sm:$0xff]  ;;  %v14995_v45 = vld [vmem:[#allocation116_spill] sm:$0xff] }
 0x4f2   :  { %v5069_v38 = vsel %vm5068_vm11, 1, %v14643_v51  ;;  %v5083_v53 = vshrl.u32 %v12919_v9, 16  ;;  %vm5090_vm0 = vc.u32 %v5088_v44, %v5084_v56  ;;  %v5063_v59 = vshrl.u32 %v5058_v10, 16 }
 0x4f3   :  { %v4970_v57 = vxor.u32 2147483648, %v4969_v52  ;;  %v5071_v29 = vadd.s32 %v5069_v38, %v5067_v11  ;;  %v5091_v33 = vsel %vm5090_vm0, 1, %v14643_v51  ;;  %v5085_v12 = vshrl.u32 %v5080_v54, 16 }
 0x4f4   :  { %v12970_v27 = vadd.s32 %v5088_v44, %v5084_v56  ;;  %v5093_v28 = vadd.s32 %v5091_v33, %v5089_v26  ;;  %vm5192_vm15 = vcmp.lt.s32.totalorder %v14990_v5, 3  ;;  %v5198_v9 = vsel %vm5190_vm5, %v12913_v8, %v12956_v19 }
 0x4f5   :  { %v4971_v40 = vsel %vm4850_vm12, %v4970_v57, %v4969_v52  ;;  %v5072_v2 = vadd.s32 %v5071_v29, %v5061_v1  ;;  %v5200_v10 = vsel %vm5192_vm15, %v12964_v60, %v14993_v62  ;;  %v5202_v20 = vsel %vm5190_vm5, %v12956_v19, %v12964_v60  ;;  %v14997_v62 = vld [vmem:[#allocation27_spill] sm:$0xff] }
 0x4f6   :  { %v12986_v42 = vsel %vm12888_vm7, %v14966_v14, %v4971_v40  ;;  %v5094_v54 = vadd.s32 %v5093_v28, %v5083_v53  ;;  %v5204_v7 = vsel %vm5192_vm15, %v14995_v45, %v14994_v0  ;;  %v14996_v56 = vor.u32 8388608, %v12859_v39 }
 0x4f7   :  { %v4976_v63 = vmul.f32 %v12986_v42, %v12986_v42  ;;  %v12998_v11 = vadd.s32 %v5072_v2, %v5063_v59  ;;  %v5205_v15 = vsel %vm5191_vm10, %v5202_v20, %v5204_v7  ;;  %v5042_v44 = vsel %vm5036_vm3, %v12926_v47, %v5041_v24 }
 0x4f8   :  { %v13004_v30 = vshll.u32 %v14996_v56, 8  ;;  %v5095_v52 = vadd.s32 %v5094_v54, %v5085_v12  ;;  %v5209_v26 = vand.u32 65535, %v5205_v15  ;;  %v5210_v1 = vshrl.u32 %v5205_v15, 16 }
 0x4f9   :  { %v4977_v38 = vmul.f32 -0.001358992, %v4976_v63  ;;  %v4984_v53 = vmul.f32 -0.00019511016, %v4976_v63  ;;  %vm5098_vm12 = vc.u32 %v12998_v11, %v12970_v27  ;;  %v13013_v57 = vsel %vm5191_vm10, %v5198_v9, %v5200_v10 }
 0x4fa   :  { %v615_v39 = vsel %vm582_vm14, %v8133_v35, 0.0  ;;  %v5099_v59 = vadd.s32 1, %v5095_v52  ;;  %v5207_v36 = vand.u32 65535, %v13004_v30  ;;  %v5208_v47 = vshrl.u32 %v13004_v30, 16 }
 0x4fb   :  { %v4978_v24 = vadd.f32 0.041655596, %v4977_v38  ;;  %v4985_v29 = vadd.f32 0.008332121, %v4984_v53  ;;  %v13020_v33 = vand.u32 3, %v4992_v55  ;;  %v5096_v12 = vmul.u32 %v12855_v21, %v5042_v44  ;;  %v13032_v21 = vpop.permute.xlu2 %790 }
 0x4fc   :  { %v5100_v28 = vsel %vm5098_vm12, %v5099_v59, %v5095_v52  ;;  %v5212_v40 = vmul.u32 %v5210_v1, %v5207_v36  ;;  %v13023_v2 = vmul.u32 %v5209_v26, %v5208_v47  ;;  %v5232_v9 = vshrl.u32 %v13013_v57, 16 }
 0x4fd   :  { %v13027_v46 = vadd.f32 %v615_v39, %v14997_v62  ;;  %v4979_v10 = vmul.f32 %v4978_v24, %v4976_v63  ;;  %v4986_v54 = vmul.f32 %v4985_v29, %v4976_v63  ;;  %v5101_v20 = vadd.s32 %v5100_v28, %v5096_v12 }
 0x4fe   :  { %v5174_v0 = vshrl.u32 %v14744_v49, %v14985_v32  ;;  %v5211_v45 = vmul.u32 %v5209_v26, %v5207_v36  ;;  %v5215_v55 = vshll.u32 %v5212_v40, 16  ;;  %v5231_v7 = vand.u32 65535, %v13013_v57  ;;  %v1048_v32 = vpop.permute.xlu0 %1047 }
 0x4ff   :  { %v4980_v15 = vadd.f32 -0.4999988, %v4979_v10  ;;  %v4987_v56 = vadd.f32 -0.16666654, %v4986_v54  ;;  %v5102_v44 = vadd.s32 536870912, %v5101_v20  ;;  %v5214_v52 = vmul.u32 %v5210_v1, %v5208_v47 }
 0x500   :  { %vm4995_vm3 = vcmp.eq.s32.totalorder %v13020_v33, 0  ;;  %v5217_v38 = vshll.u32 %v13023_v2, 16  ;;  %vm5219_vm7 = vc.u32 %v5211_v45, %v5215_v55  ;;  %v5221_v53 = vadd.s32 %v5215_v55, %v5211_v45 }
 0x501   :  { %v5234_v39 = vmul.u32 %v5232_v9, %v5207_v36  ;;  %v4981_v59 = vmul.f32 %v4980_v15, %v4976_v63  ;;  %v4988_v24 = vmul.f32 %v4987_v56, %v4976_v63  ;;  %vm4994_vm6 = vcmp.lt.s32.totalorder %v13020_v33, 2 }
 0x502   :  { %v13037_v26 = vshrl.u32 %v5102_v44, 30  ;;  %v5220_v57 = vsel %vm5219_vm7, 1, %v14643_v51  ;;  %vm839_vm4 = vcmp.eq.s32.totalorder %v13032_v21, 1  ;;  %vm4991_vm13 = vweird.f32 %v14966_v14 }
 0x503   :  { %v5222_v1 = vadd.s32 %v5220_v57, %v5214_v52  ;;  %vm5223_vm14 = vc.u32 %v5221_v53, %v5217_v38  ;;  %v5235_v29 = vmul.u32 %v5231_v7, %v5208_v47  ;;  %v5237_v12 = vshll.u32 %v5234_v39, 16 }
 0x504   :  { %vm6123_vm11 = vcmp.lt.s32.totalorder %v12731_v50, 4  ;;  %v4982_v28 = vadd.f32 1.0, %v4981_v59  ;;  %v4989_v62 = vadd.f32 1.0, %v4988_v24  ;;  %vm4998_vm0 = vcmp.eq.s32.totalorder %v13020_v33, 2 }
 0x505   :  { %v5104_v63 = vshll.u32 %v13037_v26, 30  ;;  %vm1096_vm12 = vcmp.eq.s32.totalorder %v1048_v32, 1  ;;  %v5195_v10 = vsel %vm5193_vm8, %v12964_v60, 2102212464  ;;  %v5224_v54 = vsel %vm5223_vm14, 1, %v14643_v51 }
 0x506   :  { %v5233_v45 = vmul.u32 %v5231_v7, %v5207_v36  ;;  %v4990_v55 = vmul.f32 %v4989_v62, %v12986_v42  ;;  %v4999_v15 = vxor.u32 2147483648, %v4982_v28  ;;  %v5216_v44 = vshrl.u32 %v5212_v40, 16 }
 0x507   :  { %v5105_v56 = vsub.s32 %v5101_v20, %v5104_v63  ;;  %v5226_v52 = vadd.s32 %v5224_v54, %v5222_v1  ;;  %v5239_v38 = vshll.u32 %v5235_v29, 16  ;;  %v5236_v57 = vmul.u32 %v5232_v9, %v5208_v47 }
 0x508   :  { %vm5241_vm7 = vc.u32 %v5233_v45, %v5237_v12  ;;  %v5243_v53 = vadd.s32 %v5237_v12, %v5233_v45  ;;  %v4996_v59 = vxor.u32 2147483648, %v4990_v55  ;;  %v5000_v41 = vsel %vm4998_vm0, %v4999_v15, %v4990_v55 }
 0x509   :  { %vm5106_vm1 = vcmp.lt.s32.totalorder %v5105_v56, 0  ;;  %v5107_v24 = vsub.s32 0, %v5105_v56  ;;  %v5227_v60 = vadd.s32 %v5226_v52, %v5216_v44  ;;  %v5242_v6 = vsel %vm5241_vm7, 1, %v14643_v51 }
 0x50a   :  { %vm5245_vm8 = vc.u32 %v5243_v53, %v5239_v38  ;;  %v4997_v42 = vsel %vm4995_vm3, %v4982_v28, %v4996_v59  ;;  %v5244_v40 = vadd.s32 %v5242_v6, %v5236_v57  ;;  %v5194_v47 = vsel %vm5190_vm5, %v5174_v0, %v12913_v8  ;;  %v6456_v8 = vpop.f32.mrf.mxu0 }
 0x50b   :  { %v5108_v36 = vsel %vm5106_vm1, %v5107_v24, %v5105_v56  ;;  %v5246_v20 = vsel %vm5245_vm8, 1, %v14643_v51  ;;  %v5001_v7 = vsel %vm4994_vm6, %v4997_v42, %v5000_v41  ;;  %v5218_v9 = vshrl.u32 %v13023_v2, 16 }
 0x50c   :  { %v5109_v1 = vclz %v5108_v36  ;;  %v5002_v12 = vsel %vm4991_vm13, nan, %v5001_v7  ;;  %v5196_v28 = vsel %vm5192_vm15, %v12956_v19, %v5195_v10  ;;  %v5238_v6 = vshrl.u32 %v5234_v39, 16  ;;  %v15000_v7 = vld [vmem:[#allocation78_spill] sm:$0xff] }
 0x50d   :  { %v5248_v62 = vadd.s32 %v5246_v20, %v5244_v40  ;;  %v6119_v33 = vor.u32 %v12816_v48, %v12812_v3  ;;  %v13072_v41 = vsel %vm6123_vm11, %v12808_v18, 920167782  ;;  %6500 = vmatmul.f32.gmra.mxu0 %v5002_v12  ;;  %v13074_v0 = vadd.s32 %v5227_v60, %v5218_v9 }
 0x50e   :  { %v7211_v2 = vadd.s32 4294967294, %v5109_v1  ;;  %v6253_v14 = vadd.s32 1, %v12818_v31  ;;  %v872_v19 = vsel %vm839_vm4, %v8876_v23, 0.0  ;;  %v5240_v39 = vshrl.u32 %v5235_v29, 16  ;;  %v14998_v31 = vld [vmem:[#allocation49_spill] sm:$0xff] }
 0x50f   :  { %v5249_v63 = vadd.s32 %v5248_v62, %v5238_v6  ;;  %v1129_v3 = vsel %vm1096_vm12, %v8889_v4, 0.0  ;;  %v5197_v48 = vsel %vm5191_vm10, %v5194_v47, %v5196_v28  ;;  %v13084_v10 = vadd.s32 %v5243_v53, %v5239_v38  ;;  %v13120_v62 = vld [vmem:[%s14377_s7] ss:$0 sm:$0xff] }
 0x510   :  { %vm7212_vm1 = vcmp.lt.s32.totalorder %v7211_v2, 0  ;;  %v904_v54 = vadd.f32 %v872_v19, %v13027_v46  ;;  %v5313_v15 = vand.u32 2147483647, %v14998_v31  ;;  %v5097_v21 = vadd.s32 %v12970_v27, %v12998_v11  ;;  %v14999_v27 = vld [vmem:[#allocation80_spill] sm:$0xff] }
 0x511   :  { %v5112_v45 = vsel %vm7212_vm1, 0, %v7211_v2  ;;  %v5250_v55 = vadd.s32 %v5249_v63, %v5240_v39  ;;  %vm5253_vm5 = vc.u32 %v13074_v0, %v13084_v10  ;;  %vm6254_vm15 = vcmp.gt.s32.totalorder %v6253_v14, 0 }
 0x512   :  { %v5113_v29 = vsub.s32 32, %v5112_v45  ;;  %v5117_v44 = vsub.s32 4294967266, %v5112_v45  ;;  %v1161_v32 = vadd.f32 %v1129_v3, %v904_v54  ;;  %v5251_v5 = vmul.u32 %v13004_v30, %v5197_v48  ;;  %v6459_v6 = vpop.f32.mrf.mxu0 }
 0x513   :  { %v5254_v52 = vadd.s32 1, %v5250_v55  ;;  %v5114_v38 = vshll.u32 %v5105_v56, %v5112_v45  ;;  %v5127_v59 = vsub.s32 4, %v13037_v26  ;;  %v5320_v57 = vand.u32 8388607, %v5313_v15 }
 0x514   :  { %v5115_v53 = vshrl.u32 %v5097_v21, %v5113_v29  ;;  %v5118_v46 = vadd.s32 127, %v5117_v44  ;;  %v5334_v11 = vshrl.u32 %v14728_v34, %v14999_v27  ;;  %v5337_v60 = vshrl.u32 %v14724_v25, %v14999_v27 }
 0x515   :  { %v5255_v24 = vsel %vm5253_vm5, %v5254_v52, %v5250_v55  ;;  %v5331_v30 = vshrl.u32 %v14725_v37, %v14999_v27  ;;  %v6457_v56 = vadd.f32 %v12560_v13, %v6456_v8  ;;  %v1197_v20 = vadd.f32 %v12944_v43, %v1161_v32  ;;  %v794_v55 = vpop.permute.xlu2 %793 }
 0x516   :  { %v5116_v42 = vor.u32 %v5115_v53, %v5114_v38  ;;  %v5119_v36 = vshll.u32 %v5118_v46, 23  ;;  %v5256_v40 = vadd.s32 %v5255_v24, %v5251_v5  ;;  %v5333_v1 = vshll.u32 %v14725_v37, %v15000_v7 }
 0x517   :  { %v5336_v47 = vshll.u32 %v14728_v34, %v15000_v7  ;;  %v13110_v9 = vsel %vm6123_vm11, %v6119_v33, 1326507024  ;;  %v13113_v12 = vsel %vm6254_vm15, %v6253_v14, 0  ;;  %v5330_v13 = vshll.u32 %v14744_v49, %v15000_v7  ;;  %6600 = vmatmul.f32.gmra.mxu1 %v6457_v56  ;;  %7029 = vst [vmem:[#allocation8 + $0x38] sm:$0xff] %v6457_v56  ;;  %6761 = vmatmul.f32.gmra.mxu2 %v1197_v20  ;;  %v537_v14 = vpop.permute.xlu1 %536 }
 0x518   :  { %v5120_v28 = vor.u32 4788187, %v5119_v36  ;;  %v6460_v8 = vadd.f32 %v13120_v62, %v6459_v6  ;;  %v13123_v33 = vor.u32 %v5334_v11, %v5333_v1  ;;  %vm5005_vm10 = vcmp.lt.s32.totalorder %v14980_v17, 0  ;;  %7077 = vst [vmem:[#allocation10 + $0xb8] sm:$0xff] %v1197_v20  ;;  %v15004_v1 = vld [vmem:[#allocation42_spill] sm:$0xff] }
 0x519   :  { %v13125_v2 = vor.u32 %v5337_v60, %v5336_v47  ;;  %v5123_v39 = vcvt.s32.f32 %v5116_v42  ;;  %v5257_v63 = vadd.s32 536870912, %v5256_v40  ;;  %v13129_v3 = vand.u32 31, %v13113_v12 }
 0x51a   :  { %v5121_v19 = vand.u32 2147483647, %v5120_v28  ;;  %v5128_v48 = vsel %vm5005_vm10, %v5127_v59, %v13037_v26  ;;  %7030 = vst [vmem:[#allocation8 + $0x40] sm:$0xff] %v6460_v8  ;;  %v5321_v54 = vor.u32 8388608, %v5320_v57  ;;  %v13134_v45 = vor.u32 %v5331_v30, %v5330_v13  ;;  %v1051_v28 = vpop.permute.xlu0 %1050 }
 0x51b   :  { %v13136_v29 = vshrl.u32 %v5257_v63, 30  ;;  %vm5345_vm3 = vcmp.lt.s32.totalorder %v11945_v16, 1  ;;  %vm5347_vm6 = vcmp.lt.s32.totalorder %v11945_v16, 3  ;;  %vm583_vm4 = vcmp.eq.s32.totalorder %v537_v14, 1 }
 0x51c   :  { %v5124_v21 = vmul.f32 %v5123_v39, %v5121_v19  ;;  %vm5346_vm13 = vcmp.lt.s32.totalorder %v11945_v16, 2  ;;  %v5357_v26 = vsel %vm5345_vm3, %v13123_v33, %v13125_v2  ;;  %v5359_v44 = vsel %vm5347_vm6, %v12209_v58, %v12728_v22 }
 0x51d   :  { %v15001_v32 = vand.u32 2147483647, %v14980_v17  ;;  %v5259_v38 = vshll.u32 %v13136_v29, 30  ;;  %v5360_v53 = vsel %vm5346_vm13, %v5357_v26, %v5359_v44  ;;  %vm840_vm0 = vcmp.eq.s32.totalorder %v794_v55, 1  ;;  %v15005_v44 = vld [vmem:[#allocation67_spill] sm:$0xff] }
 0x51e   :  { %v5125_v52 = vxor.u32 2147483648, %v5124_v21  ;;  %v13160_v59 = vshll.u32 %v5321_v54, 8  ;;  %v5365_v24 = vshrl.u32 %v5360_v53, 16  ;;  %v616_v58 = vsel %vm583_vm4, %v8133_v35, 0.0 }
 0x51f   :  { %vm13151_vm14 = vcmp.le.f32.partialorder %v15001_v32, 0.7853982  ;;  %v13165_v57 = vsub.s32 %v5256_v40, %v5259_v38  ;;  %v5353_v11 = vsel %vm5345_vm3, %v13134_v45, %v13123_v33  ;;  %6603 = vmatmul.f32.gmra.mxu1 %v6460_v8  ;;  %v5355_v42 = vsel %vm5347_vm6, %v13125_v2, %v12717_v61 }
 0x520   :  { %v5130_v46 = vsel %vm13151_vm14, 0, %v5128_v48  ;;  %v5126_v22 = vsel %vm5005_vm10, %v5125_v52, %v5124_v21  ;;  %v13181_v36 = vand.u32 65535, %v13160_v59  ;;  %v5364_v40 = vand.u32 65535, %v5360_v53 }
 0x521   :  { %v13174_v60 = vsel %vm13151_vm14, %v14980_v17, %v5126_v22  ;;  %v5147_v56 = vadd.s32 3, %v5130_v46  ;;  %vm5261_vm12 = vcmp.lt.s32.totalorder %v13165_v57, 0  ;;  %v5262_v20 = vsub.s32 0, %v13165_v57 }
 0x522   :  { %v5131_v30 = vmul.f32 %v13174_v60, %v13174_v60  ;;  %v873_v7 = vsel %vm840_vm0, %v8876_v23, 0.0  ;;  %v648_v47 = vadd.f32 %v616_v58, %v15004_v1  ;;  %v13191_v61 = vshrl.u32 %v13160_v59, 16 }
 0x523   :  { %v13194_v6 = vmul.u32 %v5365_v24, %v13181_v36  ;;  %v5263_v14 = vsel %vm5261_vm12, %v5262_v20, %v13165_v57  ;;  %v13199_v19 = vsel %vm5346_vm13, %v5353_v11, %v5355_v42  ;;  %v5366_v63 = vmul.u32 %v5364_v40, %v13181_v36 }
 0x524   :  { %v5132_v13 = vmul.f32 -0.001358992, %v5131_v30  ;;  %v5139_v8 = vmul.f32 -0.00019511016, %v5131_v30  ;;  %v5264_v39 = vclz %v5263_v14  ;;  %v13203_v48 = vmul.u32 %v5364_v40, %v13191_v61 }
 0x525   :  { %v5370_v54 = vshll.u32 %v13194_v6, 16  ;;  %v13206_v26 = vand.u32 3, %v5147_v56  ;;  %vm1097_vm7 = vcmp.eq.s32.totalorder %v1051_v28, 1  ;;  %vm5160_vm8 = vcmp.lt.s32.totalorder %v15005_v44, 0 }
 0x526   :  { %v5133_v55 = vadd.f32 0.041655596, %v5132_v13  ;;  %v5140_v21 = vadd.f32 0.008332121, %v5139_v8  ;;  %v905_v32 = vadd.f32 %v873_v7, %v648_v47  ;;  %v5252_v5 = vadd.s32 %v13084_v10, %v13074_v0 }
 0x527   :  { %v7214_v52 = vadd.s32 4294967294, %v5264_v39  ;;  %vm5374_vm1 = vc.u32 %v5366_v63, %v5370_v54  ;;  %v5376_v46 = vadd.s32 %v5370_v54, %v5366_v63  ;;  %v5387_v58 = vshrl.u32 %v13199_v19, 16 }
 0x528   :  { %v5134_v38 = vmul.f32 %v5133_v55, %v5131_v30  ;;  %v5141_v53 = vmul.f32 %v5140_v21, %v5131_v30  ;;  %v1130_v22 = vsel %vm1097_vm7, %v8889_v4, 0.0  ;;  %v15006_v11 = vand.u32 2147483647, %v15005_v44 }
 0x529   :  { %vm7215_vm15 = vcmp.lt.s32.totalorder %v7214_v52, 0  ;;  %v5282_v40 = vsub.s32 4, %v13136_v29  ;;  %v5372_v0 = vshll.u32 %v13203_v48, 16  ;;  %v5375_v7 = vsel %vm5374_vm1, 1, %v14643_v51 }
 0x52a   :  { %vm13215_vm5 = vcmp.le.f32.partialorder %v15006_v11, 0.7853982  ;;  %v5135_v10 = vadd.f32 -0.4999988, %v5134_v38  ;;  %v5142_v56 = vadd.f32 -0.16666654, %v5141_v53  ;;  %v5369_v28 = vmul.u32 %v5365_v24, %v13191_v61  ;;  %v540_v53 = vpop.permute.xlu1 %539 }
 0x52b   :  { %v5267_v20 = vsel %vm7215_vm15, 0, %v7214_v52  ;;  %vm5150_vm10 = vcmp.eq.s32.totalorder %v13206_v26, 0  ;;  %vm5153_vm4 = vcmp.eq.s32.totalorder %v13206_v26, 2  ;;  %vm5378_vm14 = vc.u32 %v5376_v46, %v5372_v0 }
 0x52c   :  { %v5268_v1 = vsub.s32 32, %v5267_v20  ;;  %v5272_v47 = vsub.s32 4294967266, %v5267_v20  ;;  %v5136_v13 = vmul.f32 %v5135_v10, %v5131_v30  ;;  %v5143_v8 = vmul.f32 %v5142_v56, %v5131_v30 }
 0x52d   :  { %vm5149_vm0 = vcmp.lt.s32.totalorder %v13206_v26, 2  ;;  %v1162_v14 = vadd.f32 %v1130_v22, %v905_v32  ;;  %v13227_v39 = vmul.u32 %v5387_v58, %v13181_v36  ;;  %vm5146_vm12 = vweird.f32 %v14980_v17 }
 0x52e   :  { %v5269_v63 = vshll.u32 %v13165_v57, %v5267_v20  ;;  %v5270_v54 = vshrl.u32 %v5252_v5, %v5268_v1  ;;  %v5273_v55 = vadd.s32 127, %v5272_v47  ;;  %v5377_v21 = vadd.s32 %v5375_v7, %v5369_v28  ;;  %v6462_v20 = vpop.f32.mrf.mxu0  ;;  %v13244_v1 = vpop.f32.mrf.mxu2 }
 0x52f   :  { %v5137_v52 = vadd.f32 1.0, %v5136_v13  ;;  %v5144_v38 = vadd.f32 1.0, %v5143_v8  ;;  %v5379_v24 = vsel %vm5378_vm14, 1, %v14643_v51  ;;  %v5386_v30 = vand.u32 65535, %v13199_v19  ;;  %15009 = vst [vmem:[#allocation91_spill] sm:$0xff] %v13244_v1 }
 0x530   :  { %v5271_v46 = vor.u32 %v5270_v54, %v5269_v63  ;;  %v5274_v11 = vshll.u32 %v5273_v55, 23  ;;  %v5283_v32 = vsel %vm5160_vm8, %v5282_v40, %v13136_v29  ;;  %v5329_v22 = vshrl.u32 %v14744_v49, %v14999_v27 }
 0x531   :  { %v5145_v57 = vmul.f32 %v5144_v38, %v13174_v60  ;;  %v5154_v5 = vxor.u32 2147483648, %v5137_v52  ;;  %v1198_v0 = vadd.f32 %v12944_v43, %v1162_v14  ;;  %v5392_v10 = vshll.u32 %v13227_v39, 16 }
 0x532   :  { %vm584_vm7 = vcmp.eq.s32.totalorder %v540_v53, 1  ;;  %v5275_v56 = vor.u32 4788187, %v5274_v11  ;;  %v5350_v19 = vsel %vm5348_vm9, %v13125_v2, 2102212464  ;;  %v5381_v7 = vadd.s32 %v5379_v24, %v5377_v21 }
 0x533   :  { %v5151_v29 = vxor.u32 2147483648, %v5145_v57  ;;  %v5285_v27 = vsel %vm13215_vm5, 0, %v5283_v32  ;;  %6764 = vmatmul.f32.gmra.mxu2 %v1198_v0  ;;  %7078 = vst [vmem:[#allocation10 + $0xc0] sm:$0xff] %v1198_v0  ;;  %v5388_v60 = vmul.u32 %v5386_v30, %v13181_v36  ;;  %v5390_v40 = vmul.u32 %v5386_v30, %v13191_v61  ;;  %v797_v30 = vpop.permute.xlu2 %796 }
 0x534   :  { %v5276_v47 = vand.u32 2147483647, %v5275_v56  ;;  %v5278_v28 = vcvt.s32.f32 %v5271_v46  ;;  %v6463_v13 = vadd.f32 %v13120_v62, %v6462_v20  ;;  %v5371_v8 = vshrl.u32 %v13194_v6, 16  ;;  %v15010_v46 = vld [vmem:[#allocation84_spill] sm:$0xff] }
 0x535   :  { %v5152_v2 = vsel %vm5150_vm10, %v5137_v52, %v5151_v29  ;;  %v5155_v14 = vsel %vm5153_vm4, %v5154_v5, %v5145_v57  ;;  %v5391_v63 = vmul.u32 %v5387_v58, %v13191_v61  ;;  %vm5396_vm9 = vc.u32 %v5388_v60, %v5392_v10 }
 0x536   :  { %v5156_v36 = vsel %vm5149_vm0, %v5152_v2, %v5155_v14  ;;  %v5279_v54 = vmul.f32 %v5278_v28, %v5276_v47  ;;  %7031 = vst [vmem:[#allocation8 + $0x48] sm:$0xff] %v6463_v13  ;;  %v5382_v55 = vadd.s32 %v5381_v7, %v5371_v8  ;;  %v5397_v21 = vsel %vm5396_vm9, 1, %v14643_v51  ;;  %6606 = vmatmul.f32.gmra.mxu1 %v6463_v13  ;;  %v15012_v7 = vld [vmem:[#allocation126_spill] sm:$0xff] }
 0x537   :  { %v5157_v6 = vsel %vm5146_vm12, nan, %v5156_v36  ;;  %v5394_v38 = vshll.u32 %v5390_v40, 16  ;;  %v5398_v52 = vadd.s32 %v5392_v10, %v5388_v60  ;;  %v5399_v24 = vadd.s32 %v5397_v21, %v5391_v63 }
 0x538   :  { %6503 = vmatmul.f32.gmra.mxu0 %v5157_v6  ;;  %v617_v61 = vsel %vm584_vm7, %v8133_v35, 0.0  ;;  %v5280_v58 = vxor.u32 2147483648, %v5279_v54  ;;  %v5349_v26 = vsel %vm5345_vm3, %v5329_v22, %v13134_v45  ;;  %v14618_v11 = vand.u32 2147483647, %v15010_v46 }
 0x539   :  { %v5302_v32 = vadd.s32 3, %v5285_v27  ;;  %v5351_v17 = vsel %vm5347_vm6, %v13123_v33, %v5350_v19  ;;  %v5373_v57 = vshrl.u32 %v13203_v48, 16  ;;  %vm5400_vm1 = vc.u32 %v5398_v52, %v5394_v38  ;;  %v15011_v33 = vld [vmem:[#allocation123_spill] sm:$0xff] }
 0x53a   :  { %v5281_v5 = vsel %vm5160_vm8, %v5280_v58, %v5279_v54  ;;  %v5393_v53 = vshrl.u32 %v13227_v39, 16  ;;  %v5395_v0 = vshrl.u32 %v5390_v40, 16  ;;  %v5401_v10 = vsel %vm5400_vm1, 1, %v14643_v51  ;;  %v15013_v58 = vld [vmem:[#allocation122_spill] sm:$0xff] }
 0x53b   :  { %vm841_vm15 = vcmp.eq.s32.totalorder %v797_v30, 1  ;;  %v5284_v45 = vsel %vm13215_vm5, %v15005_v44, %v5281_v5  ;;  %v13279_v22 = vadd.s32 %v5382_v55, %v5373_v57  ;;  %v5403_v56 = vadd.s32 %v5401_v10, %v5399_v24  ;;  %v15015_v57 = vld [vmem:[#allocation133_spill] sm:$0xff] }
 0x53c   :  { %v5485_v48 = vshll.u32 %v14744_v49, %v15011_v33  ;;  %v5286_v20 = vmul.f32 %v5284_v45, %v5284_v45  ;;  %v5475_v19 = vand.u32 8388607, %v14618_v11  ;;  %v5486_v39 = vshrl.u32 %v14725_v37, %v15012_v7 }
 0x53d   :  { %v5488_v29 = vshll.u32 %v14725_v37, %v15011_v33  ;;  %v5404_v27 = vadd.s32 %v5403_v56, %v5393_v53  ;;  %v5489_v42 = vshrl.u32 %v14728_v34, %v15012_v7  ;;  %v5491_v60 = vshll.u32 %v14728_v34, %v15011_v33  ;;  %v15016_v33 = vld [vmem:[#allocation135_spill] sm:$0xff] }
 0x53e   :  { %v5492_v40 = vshrl.u32 %v14724_v25, %v15012_v7  ;;  %v5287_v47 = vmul.f32 -0.001358992, %v5286_v20  ;;  %v5294_v28 = vmul.f32 -0.00019511016, %v5286_v20  ;;  %v5352_v13 = vsel %vm5346_vm13, %v5349_v26, %v5351_v17  ;;  %v15014_v17 = vld [vmem:[#allocation136_spill] sm:$0xff] }
 0x53f   :  { %v13297_v8 = vadd.s32 %v5398_v52, %v5394_v38  ;;  %v5405_v2 = vadd.s32 %v5404_v27, %v5395_v0  ;;  %v13299_v14 = vor.u32 %v5486_v39, %v5485_v48  ;;  %v13301_v63 = vor.u32 %v5489_v42, %v5488_v29 }
 0x540   :  { %v13303_v36 = vor.u32 %v5492_v40, %v5491_v60  ;;  %v5288_v54 = vadd.f32 0.041655596, %v5287_v47  ;;  %v5295_v55 = vadd.f32 0.008332121, %v5294_v28  ;;  %v5303_v21 = vand.u32 3, %v5302_v32  ;;  %v1054_v40 = vpop.permute.xlu0 %1053  ;;  %v15017_v28 = vld [vmem:[#allocation41_spill] sm:$0xff] }
 0x541   :  { %vm5408_vm3 = vc.u32 %v13279_v22, %v13297_v8  ;;  %v5406_v6 = vmul.u32 %v13160_v59, %v5352_v13  ;;  %v5409_v24 = vadd.s32 1, %v5405_v2  ;;  %v5476_v16 = vor.u32 8388608, %v5475_v19 }
 0x542   :  { %vm5500_vm6 = vcmp.lt.s32.totalorder %v15013_v58, 1  ;;  %v5289_v38 = vmul.f32 %v5288_v54, %v5286_v20  ;;  %v5296_v52 = vmul.f32 %v5295_v55, %v5286_v20  ;;  %vm5501_vm13 = vcmp.lt.s32.totalorder %v15013_v58, 2 }
 0x543   :  { %vm5502_vm8 = vcmp.lt.s32.totalorder %v15013_v58, 3  ;;  %v5410_v26 = vsel %vm5408_vm3, %v5409_v24, %v5405_v2  ;;  %v5508_v32 = vsel %vm5500_vm6, %v13299_v14, %v13301_v63  ;;  %v5512_v59 = vsel %vm5500_vm6, %v13301_v63, %v13303_v36  ;;  %v15022_v58 = vld [vmem:[#allocation139_spill] sm:$0xff] }
 0x544   :  { %v5514_v5 = vsel %vm5502_vm8, %v15015_v57, %v15014_v17  ;;  %v5290_v53 = vadd.f32 -0.4999988, %v5289_v38  ;;  %v5297_v0 = vadd.f32 -0.16666654, %v5296_v52  ;;  %v5411_v10 = vadd.s32 %v5410_v26, %v5406_v6 }
 0x545   :  { %v5515_v56 = vsel %vm5501_vm13, %v5512_v59, %v5514_v5  ;;  %v5510_v48 = vsel %vm5502_vm8, %v13303_v36, %v15016_v33  ;;  %v13329_v19 = vshll.u32 %v5476_v16, 8  ;;  %v874_v27 = vsel %vm841_vm15, %v8876_v23, 0.0 }
 0x546   :  { %v5519_v39 = vand.u32 65535, %v5515_v56  ;;  %v5520_v29 = vshrl.u32 %v5515_v56, 16  ;;  %v5291_v42 = vmul.f32 %v5290_v53, %v5286_v20  ;;  %v5298_v60 = vmul.f32 %v5297_v0, %v5286_v20 }
 0x547   :  { %v5412_v47 = vadd.s32 536870912, %v5411_v10  ;;  %v649_v13 = vadd.f32 %v617_v61, %v15017_v28  ;;  %vm5301_vm5 = vweird.f32 %v15005_v44  ;;  %v5517_v2 = vand.u32 65535, %v13329_v19 }
 0x548   :  { %v5518_v54 = vshrl.u32 %v13329_v19, 16  ;;  %v5292_v55 = vadd.f32 1.0, %v5291_v42  ;;  %v5299_v6 = vadd.f32 1.0, %v5298_v60  ;;  %v5511_v30 = vsel %vm5501_vm13, %v5508_v32, %v5510_v48 }
 0x549   :  { %v13337_v24 = vshrl.u32 %v5412_v47, 30  ;;  %vm5304_vm10 = vcmp.lt.s32.totalorder %v5303_v21, 2  ;;  %vm1098_vm4 = vcmp.eq.s32.totalorder %v1054_v40, 1  ;;  %v5522_v20 = vmul.u32 %v5520_v29, %v5517_v2 }
 0x54a   :  { %v13341_v16 = vmul.u32 %v5519_v39, %v5518_v54  ;;  %v5300_v38 = vmul.f32 %v5299_v6, %v5284_v45  ;;  %vm5305_vm14 = vcmp.eq.s32.totalorder %v5303_v21, 0  ;;  %v5309_v61 = vxor.u32 2147483648, %v5292_v55 }
 0x54b   :  { %v5414_v52 = vshll.u32 %v13337_v24, 30  ;;  %vm5308_vm0 = vcmp.eq.s32.totalorder %v5303_v21, 2  ;;  %v5521_v26 = vmul.u32 %v5519_v39, %v5517_v2  ;;  %v5525_v59 = vshll.u32 %v5522_v20, 16 }
 0x54c   :  { %v5542_v17 = vshrl.u32 %v5511_v30, 16  ;;  %v5306_v57 = vxor.u32 2147483648, %v5300_v38  ;;  %v1131_v5 = vsel %vm1098_vm4, %v8889_v4, 0.0  ;;  %v5541_v0 = vand.u32 65535, %v5511_v30 }
 0x54d   :  { %v5415_v53 = vsub.s32 %v5411_v10, %v5414_v52  ;;  %v5524_v32 = vmul.u32 %v5520_v29, %v5518_v54  ;;  %v5527_v56 = vshll.u32 %v13341_v16, 16  ;;  %vm5529_vm12 = vc.u32 %v5521_v26, %v5525_v59 }
 0x54e   :  { %v5531_v33 = vadd.s32 %v5525_v59, %v5521_v26  ;;  %v5307_v48 = vsel %vm5305_vm14, %v5292_v55, %v5306_v57  ;;  %v5310_v45 = vsel %vm5308_vm0, %v5309_v61, %v5300_v38  ;;  %v5530_v39 = vsel %vm5529_vm12, 1, %v14643_v51 }
 0x54f   :  { %vm5416_vm7 = vcmp.lt.s32.totalorder %v5415_v53, 0  ;;  %v5417_v42 = vsub.s32 0, %v5415_v53  ;;  %v5311_v60 = vsel %vm5304_vm10, %v5307_v48, %v5310_v45  ;;  %v5544_v40 = vmul.u32 %v5542_v17, %v5517_v2 }
 0x550   :  { %vm5533_vm9 = vc.u32 %v5531_v33, %v5527_v56  ;;  %v5312_v47 = vsel %vm5301_vm5, nan, %v5311_v60  ;;  %v906_v10 = vadd.f32 %v874_v27, %v649_v13  ;;  %v5532_v29 = vadd.s32 %v5530_v39, %v5524_v32 }
 0x551   :  { %v5418_v28 = vsel %vm5416_vm7, %v5417_v42, %v5415_v53  ;;  %v13351_v6 = vshrl.u32 %v13113_v12, 5  ;;  %v13354_v55 = vsub.s32 32, %v13129_v3  ;;  %6506 = vmatmul.f32.gmra.mxu0 %v5312_v47  ;;  %v5534_v21 = vsel %vm5533_vm9, 1, %v14643_v51 }
 0x552   :  { %v5419_v30 = vclz %v5418_v28  ;;  %v13359_v38 = vshll.u32 %v14724_v25, %v13129_v3  ;;  %v1163_v61 = vadd.f32 %v1131_v5, %v906_v10  ;;  %v5484_v44 = vshrl.u32 %v14744_v49, %v15012_v7 }
 0x553   :  { %v5545_v27 = vmul.u32 %v5541_v0, %v5518_v54  ;;  %v5536_v52 = vadd.s32 %v5534_v21, %v5532_v29  ;;  %v5543_v12 = vmul.u32 %v5541_v0, %v5517_v2  ;;  %v5547_v26 = vshll.u32 %v5544_v40, 16  ;;  %v15018_v0 = vld [vmem:[#allocation115_spill] sm:$0xff] }
 0x554   :  { %v7217_v13 = vadd.s32 4294967294, %v5419_v30  ;;  %v5407_v59 = vadd.s32 %v13297_v8, %v13279_v22  ;;  %v5504_v57 = vsel %vm5500_vm6, %v5484_v44, %v13299_v14  ;;  %v5505_v32 = vsel %vm5503_vm2, %v13303_v36, 2102212464 }
 0x555   :  { %v5526_v5 = vshrl.u32 %v5522_v20, 16  ;;  %v5546_v56 = vmul.u32 %v5542_v17, %v5518_v54  ;;  %vm5551_vm15 = vc.u32 %v5543_v12, %v5547_v26  ;;  %v5553_v7 = vadd.s32 %v5547_v26, %v5543_v12  ;;  %v543_v12 = vpop.permute.xlu1 %542 }
 0x556   :  { %vm7218_vm1 = vcmp.lt.s32.totalorder %v7217_v13, 0  ;;  %v5549_v48 = vshll.u32 %v5545_v27, 16  ;;  %v5552_v2 = vsel %vm5551_vm15, 1, %v14643_v51  ;;  %v14617_v45 = vand.u32 2147483647, %v15018_v0 }
 0x557   :  { %v5422_v33 = vsel %vm7218_vm1, 0, %v7217_v13  ;;  %v5537_v42 = vadd.s32 %v5536_v52, %v5526_v5  ;;  %v5554_v60 = vadd.s32 %v5552_v2, %v5546_v56  ;;  %v5437_v14 = vsub.s32 4, %v13337_v24  ;;  %v15021_v52 = vld [vmem:[#allocation140_spill] sm:$0xff]  ;;  %v13402_v56 = vpop.f32.mrf.mxu2 }
 0x558   :  { %v5423_v22 = vsub.s32 32, %v5422_v33  ;;  %v5427_v8 = vsub.s32 4294967266, %v5422_v33  ;;  %v5506_v36 = vsel %vm5502_vm8, %v13301_v63, %v5505_v32  ;;  %v5528_v54 = vshrl.u32 %v13341_v16, 16  ;;  %15023 = vst [vmem:[#allocation90_spill] sm:$0xff] %v13402_v56 }
 0x559   :  { %vm5555_vm2 = vc.u32 %v5553_v7, %v5549_v48  ;;  %vm13380_vm3 = vcmp.le.f32.partialorder %v5313_v15, 0.7853982  ;;  %v5424_v17 = vshll.u32 %v5415_v53, %v5422_v33  ;;  %vm5315_vm6 = vcmp.lt.s32.totalorder %v14998_v31, 0 }
 0x55a   :  { %v5425_v39 = vshrl.u32 %v5407_v59, %v5423_v22  ;;  %v5428_v47 = vadd.s32 127, %v5427_v8  ;;  %v5556_v10 = vsel %vm5555_vm2, 1, %v14643_v51  ;;  %v5548_v28 = vshrl.u32 %v5544_v40, 16  ;;  %v6465_v59 = vpop.f32.mrf.mxu0 }
 0x55b   :  { %v5558_v29 = vadd.s32 %v5556_v10, %v5554_v60  ;;  %v5630_v63 = vand.u32 8388607, %v14617_v45  ;;  %v5507_v15 = vsel %vm5501_vm13, %v5504_v57, %v5506_v36  ;;  %v13390_v21 = vadd.s32 %v5537_v42, %v5528_v54  ;;  %v800_v42 = vpop.permute.xlu2 %799  ;;  %v15024_v54 = vld [vmem:[#allocation138_spill] sm:$0xff] }
 0x55c   :  { %v5426_v16 = vor.u32 %v5425_v39, %v5424_v17  ;;  %v5429_v30 = vshll.u32 %v5428_v47, 23  ;;  %v5438_v53 = vsel %vm5315_vm6, %v5437_v14, %v13337_v24  ;;  %v1199_v44 = vadd.f32 %v12944_v43, %v1163_v61  ;;  %v15025_v10 = vld [vmem:[#allocation46_spill] sm:$0xff] }
 0x55d   :  { %v5559_v13 = vadd.s32 %v5558_v29, %v5548_v28  ;;  %v5644_v40 = vshrl.u32 %v14728_v34, %v15021_v52  ;;  %v5550_v32 = vshrl.u32 %v5545_v27, 16  ;;  %v13398_v5 = vadd.s32 %v5553_v7, %v5549_v48  ;;  %v15026_v28 = vld [vmem:[#allocation58_spill] sm:$0xff] }
 0x55e   :  { %v5430_v26 = vor.u32 4788187, %v5429_v30  ;;  %v5640_v57 = vshll.u32 %v14744_v49, %v15022_v58  ;;  %6767 = vmatmul.f32.gmra.mxu2 %v1199_v44  ;;  %7079 = vst [vmem:[#allocation10 + $0xc8] sm:$0xff] %v1199_v44  ;;  %v6466_v24 = vadd.f32 %v13120_v62, %v6465_v59  ;;  %v5631_v43 = vor.u32 8388608, %v5630_v63 }
 0x55f   :  { %v5641_v61 = vshrl.u32 %v14725_v37, %v15021_v52  ;;  %v5643_v33 = vshll.u32 %v14725_v37, %v15022_v58  ;;  %v5433_v27 = vcvt.s32.f32 %v5426_v16  ;;  %v5560_v7 = vadd.s32 %v5559_v13, %v5550_v32 }
 0x560   :  { %v5431_v2 = vand.u32 2147483647, %v5430_v26  ;;  %vm5563_vm13 = vc.u32 %v13390_v21, %v13398_v5  ;;  %vm585_vm8 = vcmp.eq.s32.totalorder %v543_v12, 1  ;;  %7032 = vst [vmem:[#allocation8 + $0x50] sm:$0xff] %v6466_v24  ;;  %6609 = vmatmul.f32.gmra.mxu1 %v6466_v24  ;;  %v5646_v22 = vshll.u32 %v14728_v34, %v15022_v58  ;;  %v15027_v12 = vld [vmem:[#allocation16_spill] sm:$0xff] }
 0x561   :  { %v13411_v48 = vor.u32 %v5644_v40, %v5643_v33  ;;  %v5647_v8 = vshrl.u32 %v14724_v25, %v15021_v52  ;;  %v5561_v14 = vmul.u32 %v13329_v19, %v5507_v15  ;;  %v5564_v36 = vadd.s32 1, %v5560_v7 }
 0x562   :  { %v5434_v60 = vmul.f32 %v5433_v27, %v5431_v2  ;;  %vm5657_vm5 = vcmp.lt.s32.totalorder %v15024_v54, 3  ;;  %v5440_v17 = vsel %vm13380_vm3, 0, %v5438_v53  ;;  %v13421_v39 = vor.u32 %v5641_v61, %v5640_v57 }
 0x563   :  { %v13423_v47 = vor.u32 %v5647_v8, %v5646_v22  ;;  %v5669_v29 = vsel %vm5657_vm5, %v15026_v28, %v15025_v10  ;;  %v5565_v19 = vsel %vm5563_vm13, %v5564_v36, %v5560_v7  ;;  %vm5655_vm10 = vcmp.lt.s32.totalorder %v15024_v54, 1 }
 0x564   :  { %v5435_v63 = vxor.u32 2147483648, %v5434_v60  ;;  %v13433_v16 = vshll.u32 %v5631_v43, 8  ;;  %vm842_vm4 = vcmp.eq.s32.totalorder %v800_v42, 1  ;;  %v5566_v30 = vadd.s32 %v5565_v19, %v5561_v14 }
 0x565   :  { %vm5656_vm14 = vcmp.lt.s32.totalorder %v15024_v54, 2  ;;  %v5667_v15 = vsel %vm5655_vm10, %v13411_v48, %v13423_v47  ;;  %v618_v53 = vsel %vm585_vm8, %v8133_v35, 0.0  ;;  %v5457_v13 = vadd.s32 3, %v5440_v17  ;;  %v15029_v17 = vld [vmem:[#allocation31_spill] sm:$0xff] }
 0x566   :  { %v5436_v44 = vsel %vm5315_vm6, %v5435_v63, %v5434_v60  ;;  %v5670_v40 = vsel %vm5656_vm14, %v5667_v15, %v5669_v29  ;;  %v5567_v59 = vadd.s32 536870912, %v5566_v30  ;;  %v5663_v32 = vsel %vm5655_vm10, %v13421_v39, %v13411_v48  ;;  %v1057_v60 = vpop.permute.xlu0 %1056 }
 0x567   :  { %v13449_v26 = vsel %vm13380_vm3, %v14998_v31, %v5436_v44  ;;  %v5665_v58 = vsel %vm5657_vm5, %v13423_v47, %v15027_v12  ;;  %v5672_v24 = vand.u32 65535, %v13433_v16  ;;  %v5674_v43 = vand.u32 65535, %v5670_v40 }
 0x568   :  { %v5441_v57 = vmul.f32 %v13449_v26, %v13449_v26  ;;  %v5675_v20 = vshrl.u32 %v5670_v40, 16  ;;  %v15028_v61 = vmov 920167782   ;;  %v875_v2 = vsel %vm842_vm4, %v8876_v23, 0.0 }
 0x569   :  { %v13464_v33 = vshll.u32 %v15028_v61, %v13129_v3  ;;  %v13468_v27 = vshrl.u32 %v5567_v59, 30  ;;  %v13471_v7 = vshrl.u32 %v13433_v16, 16  ;;  %v5666_v14 = vsel %vm5656_vm14, %v5663_v32, %v5665_v58 }
 0x56a   :  { %v5442_v22 = vmul.f32 -0.001358992, %v5441_v57  ;;  %v5449_v8 = vmul.f32 -0.00019511016, %v5441_v57  ;;  %v5677_v36 = vmul.u32 %v5675_v20, %v5672_v24  ;;  %v650_v10 = vadd.f32 %v618_v53, %v15029_v17 }
 0x56b   :  { %v13476_v28 = vand.u32 3, %v5457_v13  ;;  %v5569_v29 = vshll.u32 %v13468_v27, 30  ;;  %v13480_v42 = vmul.u32 %v5674_v43, %v13471_v7  ;;  %v5676_v15 = vmul.u32 %v5674_v43, %v5672_v24 }
 0x56c   :  { %v5443_v63 = vadd.f32 0.041655596, %v5442_v22  ;;  %v5450_v19 = vadd.f32 0.008332121, %v5449_v8  ;;  %v5680_v44 = vshll.u32 %v5677_v36, 16  ;;  %vm1099_vm0 = vcmp.eq.s32.totalorder %v1057_v60, 1 }
 0x56d   :  { %v13482_v40 = vsub.s32 %v5566_v30, %v5569_v29  ;;  %v5639_v59 = vshrl.u32 %v14744_v49, %v15021_v52  ;;  %v5697_v32 = vshrl.u32 %v5666_v14, 16  ;;  %v5679_v13 = vmul.u32 %v5675_v20, %v13471_v7 }
 0x56e   :  { %v5444_v12 = vmul.f32 %v5443_v63, %v5441_v57  ;;  %v5451_v53 = vmul.f32 %v5450_v19, %v5441_v57  ;;  %vm5684_vm12 = vc.u32 %v5676_v15, %v5680_v44  ;;  %v5682_v22 = vshll.u32 %v13480_v42, 16 }
 0x56f   :  { %vm5571_vm7 = vcmp.lt.s32.totalorder %v13482_v40, 0  ;;  %v5572_v58 = vsub.s32 0, %v13482_v40  ;;  %v5685_v43 = vsel %vm5684_vm12, 1, %v14643_v51  ;;  %v5686_v17 = vadd.s32 %v5680_v44, %v5676_v15 }
 0x570   :  { %v5445_v8 = vadd.f32 -0.4999988, %v5444_v12  ;;  %v5452_v30 = vadd.f32 -0.16666654, %v5451_v53  ;;  %v5687_v29 = vadd.s32 %v5685_v43, %v5679_v13  ;;  %vm5460_vm9 = vcmp.eq.s32.totalorder %v13476_v28, 0 }
 0x571   :  { %vm5463_vm1 = vcmp.eq.s32.totalorder %v13476_v28, 2  ;;  %v1132_v52 = vsel %vm1099_vm0, %v8889_v4, 0.0  ;;  %v5573_v20 = vsel %vm5571_vm7, %v5572_v58, %v13482_v40  ;;  %v5696_v63 = vand.u32 65535, %v5666_v14 }
 0x572   :  { %v13496_v19 = vmul.u32 %v5697_v32, %v5672_v24  ;;  %v5446_v45 = vmul.f32 %v5445_v8, %v5441_v57  ;;  %v5453_v11 = vmul.f32 %v5452_v30, %v5441_v57  ;;  %vm5459_vm15 = vcmp.lt.s32.totalorder %v13476_v28, 2 }
 0x573   :  { %v5574_v12 = vclz %v5573_v20  ;;  %vm5688_vm2 = vc.u32 %v5686_v17, %v5682_v22  ;;  %vm5456_vm3 = vweird.f32 %v14998_v31  ;;  %v907_v15 = vadd.f32 %v875_v2, %v650_v10 }
 0x574   :  { %v5562_v44 = vadd.s32 %v13398_v5, %v13390_v21  ;;  %vm15030_vm6 = vcmp.lt.s32.totalorder %v15024_v54, 4  ;;  %v5689_v14 = vsel %vm5688_vm2, 1, %v14643_v51  ;;  %v5447_v53 = vadd.f32 1.0, %v5446_v45 }
 0x575   :  { %v5660_v60 = vsel %vm15030_vm6, %v13423_v47, 2102212464  ;;  %v5454_v13 = vadd.f32 1.0, %v5453_v11  ;;  %v7220_v58 = vadd.s32 4294967294, %v5574_v12  ;;  %v5691_v57 = vadd.s32 %v5689_v14, %v5687_v29 }
 0x576   :  { %v1164_v43 = vadd.f32 %v1132_v52, %v907_v15  ;;  %v5698_v8 = vmul.u32 %v5696_v63, %v5672_v24  ;;  %v5700_v22 = vmul.u32 %v5696_v63, %v13471_v7  ;;  %v5702_v30 = vshll.u32 %v13496_v19, 16  ;;  %v546_v52 = vpop.permute.xlu1 %545 }
 0x577   :  { %v5455_v2 = vmul.f32 %v5454_v13, %v13449_v26  ;;  %v5464_v10 = vxor.u32 2147483648, %v5447_v53  ;;  %vm7221_vm13 = vcmp.lt.s32.totalorder %v7220_v58, 0  ;;  %v5681_v21 = vshrl.u32 %v5677_v36, 16  ;;  %v803_v13 = vpop.permute.xlu2 %802 }
 0x578   :  { %v5577_v5 = vsel %vm7221_vm13, 0, %v7220_v58  ;;  %v5659_v47 = vsel %vm5655_vm10, %v5639_v59, %v13421_v39  ;;  %v5661_v11 = vsel %vm5657_vm5, %v13411_v48, %v5660_v60  ;;  %vm5706_vm8 = vc.u32 %v5698_v8, %v5702_v30 }
 0x579   :  { %v5461_v45 = vxor.u32 2147483648, %v5455_v2  ;;  %v5578_v24 = vsub.s32 32, %v5577_v5  ;;  %v5692_v17 = vadd.s32 %v5691_v57, %v5681_v21  ;;  %v5701_v29 = vmul.u32 %v5697_v32, %v13471_v7 }
 0x57a   :  { %v5582_v26 = vsub.s32 4294967266, %v5577_v5  ;;  %v5704_v20 = vshll.u32 %v5700_v22, 16  ;;  %v5707_v36 = vsel %vm5706_vm8, 1, %v14643_v51  ;;  %v5708_v63 = vadd.s32 %v5702_v30, %v5698_v8  ;;  %v13529_v8 = vld [vmem:[#allocation5] ss:$0 sm:$0xff] }
 0x57b   :  { %v5462_v12 = vsel %vm5460_vm9, %v5447_v53, %v5461_v45  ;;  %v5465_v39 = vsel %vm5463_vm1, %v5464_v10, %v5455_v2  ;;  %v5580_v59 = vshrl.u32 %v5562_v44, %v5578_v24  ;;  %v5709_v48 = vadd.s32 %v5707_v36, %v5701_v29  ;;  %v15031_v2 = vld [vmem:[#allocation134_spill] sm:$0xff]  ;;  %v13542_v29 = vpop.f32.mrf.mxu2 }
 0x57c   :  { %v5466_v15 = vsel %vm5459_vm15, %v5462_v12, %v5465_v39  ;;  %v5579_v60 = vshll.u32 %v13482_v40, %v5577_v5  ;;  %v5583_v7 = vadd.s32 127, %v5582_v26  ;;  %vm5710_vm5 = vc.u32 %v5708_v63, %v5704_v20  ;;  %v6468_v5 = vpop.f32.mrf.mxu0  ;;  %15032 = vst [vmem:[#allocation17_spill] sm:$0xff] %v13542_v29  ;;  %v15034_v12 = vld [vmem:[#allocation53_spill] sm:$0xff] }
 0x57d   :  { %v5467_v32 = vsel %vm5456_vm3, nan, %v5466_v15  ;;  %vm586_vm10 = vcmp.eq.s32.totalorder %v546_v52, 1  ;;  %v5683_v14 = vshrl.u32 %v13480_v42, 16  ;;  %v5711_v53 = vsel %vm5710_vm5, 1, %v14643_v51 }
 0x57e   :  { %6509 = vmatmul.f32.gmra.mxu0 %v5467_v32  ;;  %v5581_v58 = vor.u32 %v5580_v59, %v5579_v60  ;;  %v5584_v44 = vshll.u32 %v5583_v7, 23  ;;  %v5703_v57 = vshrl.u32 %v13496_v19, 16  ;;  %v5713_v28 = vadd.s32 %v5711_v53, %v5709_v48  ;;  %v549_v56 = vpop.permute.xlu1 %548 }
 0x57f   :  { %v1200_v40 = vadd.f32 %v13529_v8, %v1164_v43  ;;  %v5662_v31 = vsel %vm5656_vm14, %v5659_v47, %v5661_v11  ;;  %v13534_v30 = vadd.s32 %v5692_v17, %v5683_v14  ;;  %v14619_v42 = vand.u32 2147483647, %v15031_v2 }
 0x580   :  { %v5585_v10 = vor.u32 4788187, %v5584_v44  ;;  %v5592_v21 = vsub.s32 4, %v13468_v27  ;;  %v5705_v45 = vshrl.u32 %v5700_v22, 16  ;;  %v5714_v24 = vadd.s32 %v5713_v28, %v5703_v57  ;;  %v15038_v28 = vld [vmem:[#allocation48_spill] sm:$0xff] }
 0x581   :  { %v13540_v19 = vshrl.u32 %v15028_v61, %v13354_v55  ;;  %vm843_vm4 = vcmp.eq.s32.totalorder %v803_v13, 1  ;;  %6770 = vmatmul.f32.gmra.mxu2 %v1200_v40  ;;  %7080 = vst [vmem:[#allocation10 + $0xd0] sm:$0xff] %v1200_v40  ;;  %v6469_v54 = vadd.f32 %v13120_v62, %v6468_v5  ;;  %v13545_v43 = vadd.s32 %v5708_v63, %v5704_v20  ;;  %v15033_v63 = vld [vmem:[#allocation74_spill] sm:$0xff]  ;;  %v1060_v5 = vpop.permute.xlu0 %1059 }
 0x582   :  { %vm5470_vm14 = vcmp.lt.s32.totalorder %v15010_v46, 0  ;;  %v5586_v47 = vand.u32 2147483647, %v5585_v10  ;;  %v5588_v11 = vcvt.s32.f32 %v5581_v58  ;;  %v5715_v17 = vadd.s32 %v5714_v24, %v5705_v45 }
 0x583   :  { %v619_v22 = vsel %vm586_vm10, %v8133_v35, 0.0  ;;  %7033 = vst [vmem:[#allocation8 + $0x58] sm:$0xff] %v6469_v54  ;;  %v5716_v61 = vmul.u32 %v13433_v16, %v5662_v31  ;;  %vm5718_vm0 = vc.u32 %v13534_v30, %v13545_v43  ;;  %6612 = vmatmul.f32.gmra.mxu1 %v6469_v54  ;;  %v5785_v62 = vand.u32 8388607, %v14619_v42  ;;  %v15039_v54 = vld [vmem:[#allocation130_spill] sm:$0xff] }
 0x584   :  { %v5589_v26 = vmul.f32 %v5588_v11, %v5586_v47  ;;  %v5593_v20 = vsel %vm5470_vm14, %v5592_v21, %v13468_v27  ;;  %v5719_v36 = vadd.s32 1, %v5715_v17  ;;  %v5796_v52 = vshrl.u32 %v14725_v37, %v15033_v63 }
 0x585   :  { %v5798_v39 = vshll.u32 %v14725_v37, %v15034_v12  ;;  %v5799_v16 = vshrl.u32 %v14728_v34, %v15033_v63  ;;  %v5801_v59 = vshll.u32 %v14728_v34, %v15034_v12  ;;  %v5802_v48 = vshrl.u32 %v14724_v25, %v15033_v63 }
 0x586   :  { %v15035_v15 = vand.u32 2147483647, %v15010_v46  ;;  %v5590_v60 = vxor.u32 2147483648, %v5589_v26  ;;  %v5720_v7 = vsel %vm5718_vm0, %v5719_v36, %v5715_v17  ;;  %v5786_v32 = vor.u32 8388608, %v5785_v62  ;;  %v15041_v62 = vld [vmem:[#allocation72_spill] sm:$0xff] }
 0x587   :  { %v5721_v14 = vadd.s32 %v5720_v7, %v5716_v61  ;;  %v5795_v53 = vshll.u32 %v14744_v49, %v15034_v12  ;;  %v13576_v58 = vor.u32 %v5799_v16, %v5798_v39  ;;  %v13578_v44 = vor.u32 %v5802_v48, %v5801_v59  ;;  %v15040_v61 = vld [vmem:[#allocation131_spill] sm:$0xff] }
 0x588   :  { %vm13570_vm12 = vcmp.le.f32.partialorder %v15035_v15, 0.7853982  ;;  %v876_v57 = vsel %vm843_vm4, %v8876_v23, 0.0  ;;  %v651_v40 = vadd.f32 %v619_v22, %v15038_v28  ;;  %v5591_v31 = vsel %vm5470_vm14, %v5590_v60, %v5589_v26  ;;  %v15042_v16 = vld [vmem:[#allocation51_spill] sm:$0xff] }
 0x589   :  { %v5595_v10 = vsel %vm13570_vm12, 0, %v5593_v20  ;;  %v13590_v21 = vsel %vm13570_vm12, %v15010_v46, %v5591_v31  ;;  %v5722_v45 = vadd.s32 536870912, %v5721_v14  ;;  %v13592_v24 = vor.u32 %v5796_v52, %v5795_v53 }
 0x58a   :  { %vm5810_vm7 = vcmp.lt.s32.totalorder %v15039_v54, 1  ;;  %v5596_v13 = vmul.f32 %v13590_v21, %v13590_v21  ;;  %vm5812_vm9 = vcmp.lt.s32.totalorder %v15039_v54, 3  ;;  %v13602_v11 = vshll.u32 %v5786_v32, 8 }
 0x58b   :  { %v5822_v47 = vsel %vm5810_vm7, %v13576_v58, %v13578_v44  ;;  %v5612_v17 = vadd.s32 3, %v5595_v10  ;;  %v13604_v22 = vshrl.u32 %v5722_v45, 30  ;;  %vm5811_vm1 = vcmp.lt.s32.totalorder %v15039_v54, 2 }
 0x58c   :  { %v5824_v26 = vsel %vm5812_vm9, %v15041_v62, %v15040_v61  ;;  %v5597_v20 = vmul.f32 -0.001358992, %v5596_v13  ;;  %v5604_v36 = vmul.f32 -0.00019511016, %v5596_v13  ;;  %vm1100_vm15 = vcmp.eq.s32.totalorder %v1060_v5, 1 }
 0x58d   :  { %v5825_v52 = vsel %vm5811_vm1, %v5822_v47, %v5824_v26  ;;  %v5724_v12 = vshll.u32 %v13604_v22, 30  ;;  %v5818_v39 = vsel %vm5810_vm7, %v13592_v24, %v13576_v58  ;;  %v5820_v59 = vsel %vm5812_vm9, %v13578_v44, %v15042_v16 }
 0x58e   :  { %v5829_v48 = vand.u32 65535, %v5825_v52  ;;  %v5598_v15 = vadd.f32 0.041655596, %v5597_v20  ;;  %v5605_v27 = vadd.f32 0.008332121, %v5604_v36  ;;  %v5827_v60 = vand.u32 65535, %v13602_v11 }
 0x58f   :  { %v5830_v7 = vshrl.u32 %v5825_v52, 16  ;;  %v5613_v32 = vand.u32 3, %v5612_v17  ;;  %v908_v53 = vadd.f32 %v876_v57, %v651_v40  ;;  %v13623_v28 = vsub.s32 %v5721_v14, %v5724_v12 }
 0x590   :  { %v5828_v31 = vshrl.u32 %v13602_v11, 16  ;;  %v5599_v10 = vmul.f32 %v5598_v15, %v5596_v13  ;;  %v5606_v45 = vmul.f32 %v5605_v27, %v5596_v13  ;;  %v1133_v47 = vsel %vm1100_vm15, %v8889_v4, 0.0 }
 0x591   :  { %v13628_v61 = vmul.u32 %v5830_v7, %v5827_v60  ;;  %vm5726_vm2 = vcmp.lt.s32.totalorder %v13623_v28, 0  ;;  %v5727_v62 = vsub.s32 0, %v13623_v28  ;;  %v5821_v26 = vsel %vm5811_vm1, %v5818_v39, %v5820_v59 }
 0x592   :  { %v13634_v17 = vmul.u32 %v5829_v48, %v5828_v31  ;;  %v5600_v14 = vadd.f32 -0.4999988, %v5599_v10  ;;  %v5607_v57 = vadd.f32 -0.16666654, %v5606_v45  ;;  %v5831_v40 = vmul.u32 %v5829_v48, %v5827_v60 }
 0x593   :  { %v5835_v20 = vshll.u32 %v13628_v61, 16  ;;  %vm5615_vm3 = vcmp.eq.s32.totalorder %v5613_v32, 0  ;;  %vm5618_vm6 = vcmp.eq.s32.totalorder %v5613_v32, 2  ;;  %v1165_v5 = vadd.f32 %v1133_v47, %v908_v53 }
 0x594   :  { %v5717_v36 = vadd.s32 %v13545_v43, %v13534_v30  ;;  %v5728_v52 = vsel %vm5726_vm2, %v5727_v62, %v13623_v28  ;;  %v5601_v12 = vmul.f32 %v5600_v14, %v5596_v13  ;;  %v5608_v16 = vmul.f32 %v5607_v57, %v5596_v13 }
 0x595   :  { %vm5614_vm13 = vcmp.lt.s32.totalorder %v5613_v32, 2  ;;  %v5729_v15 = vclz %v5728_v52  ;;  %vm5839_vm8 = vc.u32 %v5831_v40, %v5835_v20  ;;  %vm5611_vm5 = vweird.f32 %v15010_v46 }
 0x596   :  { %v5834_v39 = vmul.u32 %v5830_v7, %v5828_v31  ;;  %v5837_v59 = vshll.u32 %v13634_v17, 16  ;;  %v5840_v48 = vsel %vm5839_vm8, 1, %v14643_v51  ;;  %v5851_v27 = vand.u32 65535, %v5821_v26 }
 0x597   :  { %v5602_v10 = vadd.f32 1.0, %v5601_v12  ;;  %v5609_v53 = vadd.f32 1.0, %v5608_v16  ;;  %vm5625_vm10 = vcmp.lt.s32.totalorder %v15018_v0, 0  ;;  %v7223_v30 = vadd.s32 4294967294, %v5729_v15 }
 0x598   :  { %v5841_v43 = vadd.s32 %v5835_v20, %v5831_v40  ;;  %v5794_v13 = vshrl.u32 %v14744_v49, %v15033_v63  ;;  %vm15043_vm4 = vcmp.lt.s32.totalorder %v15039_v54, 4  ;;  %v5842_v47 = vadd.s32 %v5840_v48, %v5834_v39 }
 0x599   :  { %v5815_v45 = vsel %vm15043_vm4, %v13578_v44, 2102212464  ;;  %v5852_v7 = vshrl.u32 %v5821_v26, 16  ;;  %v5610_v62 = vmul.f32 %v5609_v53, %v13590_v21  ;;  %v5619_v14 = vxor.u32 2147483648, %v5602_v10 }
 0x59a   :  { %vm7224_vm14 = vcmp.lt.s32.totalorder %v7223_v30, 0  ;;  %vm5843_vm0 = vc.u32 %v5841_v43, %v5837_v59  ;;  %v5747_v52 = vsub.s32 4, %v13604_v22  ;;  %v5836_v63 = vshrl.u32 %v13628_v61, 16 }
 0x59b   :  { %v5732_v57 = vsel %vm7224_vm14, 0, %v7223_v30  ;;  %v5844_v12 = vsel %vm5843_vm0, 1, %v14643_v51  ;;  %v5854_v40 = vmul.u32 %v5852_v7, %v5827_v60  ;;  %v5616_v20 = vxor.u32 2147483648, %v5610_v62 }
 0x59c   :  { %v5733_v16 = vsub.s32 32, %v5732_v57  ;;  %v5855_v15 = vmul.u32 %v5851_v27, %v5828_v31  ;;  %v5737_v42 = vsub.s32 4294967266, %v5732_v57  ;;  %v5853_v44 = vmul.u32 %v5851_v27, %v5827_v60 }
 0x59d   :  { %v5856_v39 = vmul.u32 %v5852_v7, %v5828_v31  ;;  %v5857_v26 = vshll.u32 %v5854_v40, 16  ;;  %v5617_v21 = vsel %vm5615_vm3, %v5602_v10, %v5616_v20  ;;  %v5620_v48 = vsel %vm5618_vm6, %v5619_v14, %v5610_v62  ;;  %v6471_v62 = vpop.f32.mrf.mxu0  ;;  %v13674_v14 = vpop.f32.mrf.mxu2 }
 0x59e   :  { %v5735_v59 = vshrl.u32 %v5717_v36, %v5733_v16  ;;  %v5846_v53 = vadd.s32 %v5844_v12, %v5842_v47  ;;  %v5621_v30 = vsel %vm5614_vm13, %v5617_v21, %v5620_v48  ;;  %v5734_v43 = vshll.u32 %v13623_v28, %v5732_v57  ;;  %v15048_v48 = vld [vmem:[#allocation45_spill] sm:$0xff] }
 0x59f   :  { %v5738_v29 = vadd.s32 127, %v5737_v42  ;;  %vm5861_vm12 = vc.u32 %v5853_v44, %v5857_v26  ;;  %v5622_v61 = vsel %vm5611_vm5, nan, %v5621_v30  ;;  %v5859_v1 = vshll.u32 %v5855_v15, 16 }
 0x5a0   :  { %v5862_v60 = vsel %vm5861_vm12, 1, %v14643_v51  ;;  %v5863_v31 = vadd.s32 %v5857_v26, %v5853_v44  ;;  %6512 = vmatmul.f32.gmra.mxu0 %v5622_v61  ;;  %v5736_v27 = vor.u32 %v5735_v59, %v5734_v43  ;;  %v5748_v32 = vsel %vm5625_vm10, %v5747_v52, %v13604_v22 }
 0x5a1   :  { %v5739_v10 = vshll.u32 %v5738_v29, 23  ;;  %v5864_v36 = vadd.s32 %v5862_v60, %v5856_v39  ;;  %v15044_v28 = vand.u32 2147483647, %v15018_v0  ;;  %v1201_v46 = vadd.f32 %v13529_v8, %v1165_v5  ;;  %v13681_v5 = vld [vmem:[%s14377_s7] ss:$0 sm:$0xff] }
 0x5a2   :  { %v5847_v47 = vadd.s32 %v5846_v53, %v5836_v63  ;;  %vm5865_vm2 = vc.u32 %v5863_v31, %v5859_v1  ;;  %vm587_vm3 = vcmp.eq.s32.totalorder %v549_v56, 1  ;;  %v5814_v29 = vsel %vm5810_vm7, %v5794_v13, %v13592_v24  ;;  %v15049_v60 = vld [vmem:[#allocation82_spill] sm:$0xff] }
 0x5a3   :  { %vm13665_vm15 = vcmp.le.f32.partialorder %v15044_v28, 0.7853982  ;;  %v5740_v7 = vor.u32 4788187, %v5739_v10  ;;  %v5866_v22 = vsel %vm5865_vm2, 1, %v14643_v51  ;;  %6773 = vmatmul.f32.gmra.mxu2 %v1201_v46  ;;  %7081 = vst [vmem:[#allocation10 + $0xd8] sm:$0xff] %v1201_v46  ;;  %v6472_v52 = vadd.f32 %v13681_v5, %v6471_v62 }
 0x5a4   :  { %v5750_v57 = vsel %vm13665_vm15, 0, %v5748_v32  ;;  %v5816_v24 = vsel %vm5812_vm9, %v13576_v58, %v5815_v45  ;;  %v5838_v13 = vshrl.u32 %v13634_v17, 16  ;;  %v5743_v20 = vcvt.s32.f32 %v5736_v27  ;;  %v15050_v10 = vld [vmem:[#allocation20_spill] sm:$0xff]  ;;  %v806_v32 = vpop.permute.xlu2 %805 }
 0x5a5   :  { %v5741_v12 = vand.u32 2147483647, %v5740_v7  ;;  %v5858_v16 = vshrl.u32 %v5854_v40, 16  ;;  %v5868_v63 = vadd.s32 %v5866_v22, %v5864_v36  ;;  %v13690_v44 = vor.u32 %v13540_v19, %v13359_v38  ;;  %7034 = vst [vmem:[#allocation8 + $0x60] sm:$0xff] %v6472_v52  ;;  %6615 = vmatmul.f32.gmra.mxu1 %v6472_v52  ;;  %v15052_v52 = vld [vmem:[#allocation44_spill] sm:$0xff] }
 0x5a6   :  { %v15047_v39 = vmov 1326507024   ;;  %v13696_v21 = vadd.s32 %v5847_v47, %v5838_v13  ;;  %v5933_v58 = vand.u32 2147483647, %v15048_v48  ;;  %v620_v17 = vsel %vm587_vm3, %v8133_v35, 0.0  ;;  %v1063_v13 = vpop.permute.xlu0 %1062 }
 0x5a7   :  { %v13694_v26 = vshrl.u32 %v15047_v39, %v13354_v55  ;;  %v5744_v45 = vmul.f32 %v5743_v20, %v5741_v12  ;;  %v5860_v40 = vshrl.u32 %v5855_v15, 16  ;;  %v5869_v59 = vadd.s32 %v5868_v63, %v5858_v16 }
 0x5a8   :  { %v5767_v53 = vadd.s32 3, %v5750_v57  ;;  %v5817_v38 = vsel %vm5811_vm1, %v5814_v29, %v5816_v24  ;;  %v13703_v19 = vadd.s32 %v5863_v31, %v5859_v1  ;;  %v5940_v30 = vand.u32 8388607, %v5933_v58 }
 0x5a9   :  { %v5745_v43 = vxor.u32 2147483648, %v5744_v45  ;;  %v5870_v61 = vadd.s32 %v5869_v59, %v5860_v40  ;;  %v5953_v27 = vshll.u32 %v14725_v37, %v15049_v60  ;;  %v5954_v56 = vshrl.u32 %v14728_v34, %v15050_v10  ;;  %v15053_v40 = vld [vmem:[#allocation55_spill] sm:$0xff] }
 0x5aa   :  { %vm5873_vm7 = vc.u32 %v13696_v21, %v13703_v19  ;;  %v5951_v54 = vshrl.u32 %v14725_v37, %v15050_v10  ;;  %v5956_v1 = vshll.u32 %v14728_v34, %v15049_v60  ;;  %v5957_v15 = vshrl.u32 %v14724_v25, %v15050_v10 }
 0x5ab   :  { %v5746_v31 = vsel %vm5625_vm10, %v5745_v43, %v5744_v45  ;;  %v5871_v36 = vmul.u32 %v13602_v11, %v5817_v38  ;;  %v5874_v28 = vadd.s32 1, %v5870_v61  ;;  %v13722_v46 = vor.u32 %v5954_v56, %v5953_v27  ;;  %v15051_v11 = vld [vmem:[#allocation23_spill] sm:$0xff]  ;;  %v15055_v27 = vld [vmem:[#allocation57_spill] sm:$0xff] }
 0x5ac   :  { %v13727_v47 = vsel %vm13665_vm15, %v15018_v0, %v5746_v31  ;;  %v5941_v7 = vor.u32 8388608, %v5940_v30  ;;  %v5950_v62 = vshll.u32 %v14744_v49, %v15049_v60  ;;  %v13731_v29 = vor.u32 %v5957_v15, %v5956_v1 }
 0x5ad   :  { %vm844_vm9 = vcmp.eq.s32.totalorder %v806_v32, 1  ;;  %v5751_v22 = vmul.f32 %v13727_v47, %v13727_v47  ;;  %v5875_v57 = vsel %vm5873_vm7, %v5874_v28, %v5870_v61  ;;  %vm5965_vm1 = vcmp.lt.s32.totalorder %v15051_v11, 1 }
 0x5ae   :  { %v652_v24 = vadd.f32 %v620_v17, %v15052_v52  ;;  %v5876_v12 = vadd.s32 %v5875_v57, %v5871_v36  ;;  %v13737_v42 = vor.u32 %v5951_v54, %v5950_v62  ;;  %v5977_v20 = vsel %vm5965_vm1, %v13722_v46, %v13731_v29  ;;  %v15054_v17 = vld [vmem:[#allocation52_spill] sm:$0xff] }
 0x5af   :  { %v5752_v16 = vmul.f32 -0.001358992, %v5751_v22  ;;  %v5759_v63 = vmul.f32 -0.00019511016, %v5751_v22  ;;  %v13743_v39 = vand.u32 3, %v5767_v53  ;;  %vm5967_vm6 = vcmp.lt.s32.totalorder %v15051_v11, 3 }
 0x5b0   :  { %v5877_v45 = vadd.s32 536870912, %v5876_v12  ;;  %vm5966_vm13 = vcmp.lt.s32.totalorder %v15051_v11, 2  ;;  %v5979_v59 = vsel %vm5967_vm6, %v15054_v17, %v15053_v40  ;;  %v13751_v38 = vshll.u32 %v5941_v7, 8 }
 0x5b1   :  { %v5753_v30 = vadd.f32 0.041655596, %v5752_v16  ;;  %v5760_v43 = vadd.f32 0.008332121, %v5759_v63  ;;  %vm1101_vm8 = vcmp.eq.s32.totalorder %v1063_v13, 1  ;;  %v5980_v61 = vsel %vm5966_vm13, %v5977_v20, %v5979_v59 }
 0x5b2   :  { %v13755_v53 = vshrl.u32 %v5877_v45, 30  ;;  %v5973_v60 = vsel %vm5965_vm1, %v13737_v42, %v13722_v46  ;;  %v5975_v56 = vsel %vm5967_vm6, %v13731_v29, %v15055_v27  ;;  %v5984_v54 = vand.u32 65535, %v5980_v61 }
 0x5b3   :  { %v5754_v1 = vmul.f32 %v5753_v30, %v5751_v22  ;;  %v5761_v15 = vmul.f32 %v5760_v43, %v5751_v22  ;;  %v5982_v31 = vand.u32 65535, %v13751_v38  ;;  %v5985_v36 = vshrl.u32 %v5980_v61, 16 }
 0x5b4   :  { %v6274_v28 = vor.u32 %v13694_v26, %v13464_v33  ;;  %v877_v7 = vsel %vm844_vm9, %v8876_v23, 0.0  ;;  %v5879_v62 = vshll.u32 %v13755_v53, 30  ;;  %v5983_v57 = vshrl.u32 %v13751_v38, 16 }
 0x5b5   :  { %v5755_v52 = vadd.f32 -0.4999988, %v5754_v1  ;;  %v5762_v20 = vadd.f32 -0.16666654, %v5761_v15  ;;  %v5976_v16 = vsel %vm5966_vm13, %v5973_v60, %v5975_v56  ;;  %v13774_v63 = vmul.u32 %v5985_v36, %v5982_v31 }
 0x5b6   :  { %v909_v45 = vadd.f32 %v877_v7, %v652_v24  ;;  %v1134_v40 = vsel %vm1101_vm8, %v8889_v4, 0.0  ;;  %v13778_v17 = vsub.s32 %v5876_v12, %v5879_v62  ;;  %v13780_v59 = vmul.u32 %v5984_v54, %v5983_v57 }
 0x5b7   :  { %v5756_v32 = vmul.f32 %v5755_v52, %v5751_v22  ;;  %v5763_v30 = vmul.f32 %v5762_v20, %v5751_v22  ;;  %vm5769_vm5 = vcmp.lt.s32.totalorder %v13743_v39, 2  ;;  %v5986_v43 = vmul.u32 %v5984_v54, %v5982_v31 }
 0x5b8   :  { %v5990_v61 = vshll.u32 %v13774_v63, 16  ;;  %vm5766_vm10 = vweird.f32 %v15018_v0  ;;  %vm5881_vm4 = vcmp.lt.s32.totalorder %v13778_v17, 0  ;;  %v5882_v24 = vsub.s32 0, %v13778_v17 }
 0x5b9   :  { %v6006_v60 = vand.u32 65535, %v5976_v16  ;;  %v6007_v13 = vshrl.u32 %v5976_v16, 16  ;;  %v5757_v27 = vadd.f32 1.0, %v5756_v32  ;;  %v5764_v12 = vadd.f32 1.0, %v5763_v30 }
 0x5ba   :  { %vm5994_vm14 = vc.u32 %v5986_v43, %v5990_v61  ;;  %v5996_v56 = vadd.s32 %v5990_v61, %v5986_v43  ;;  %v5883_v1 = vsel %vm5881_vm4, %v5882_v24, %v13778_v17  ;;  %v5989_v22 = vmul.u32 %v5985_v36, %v5983_v57 }
 0x5bb   :  { %v5992_v15 = vshll.u32 %v13780_v59, 16  ;;  %v5995_v54 = vsel %vm5994_vm14, 1, %v14643_v51  ;;  %v5765_v7 = vmul.f32 %v5764_v12, %v13727_v47  ;;  %vm5770_vm0 = vcmp.eq.s32.totalorder %v13743_v39, 0 }
 0x5bc   :  { %v5774_v62 = vxor.u32 2147483648, %v5757_v27  ;;  %v5884_v52 = vclz %v5883_v1  ;;  %vm5773_vm12 = vcmp.eq.s32.totalorder %v13743_v39, 2  ;;  %v1166_v20 = vadd.f32 %v1134_v40, %v909_v45 }
 0x5bd   :  { %v5997_v16 = vadd.s32 %v5995_v54, %v5989_v22  ;;  %vm5998_vm15 = vc.u32 %v5996_v56, %v5992_v15  ;;  %v5771_v32 = vxor.u32 2147483648, %v5765_v7  ;;  %v5872_v30 = vadd.s32 %v13703_v19, %v13696_v21 }
 0x5be   :  { %v7226_v36 = vadd.s32 4294967294, %v5884_v52  ;;  %v5999_v43 = vsel %vm5998_vm15, 1, %v14643_v51  ;;  %vm6278_vm2 = vcmp.lt.s32.totalorder %v13351_v6, 4  ;;  %vm5780_vm3 = vcmp.lt.s32.totalorder %v15031_v2, 0 }
 0x5bf   :  { %v5949_v47 = vshrl.u32 %v14744_v49, %v15050_v10  ;;  %vm15056_vm7 = vcmp.lt.s32.totalorder %v15051_v11, 4  ;;  %v6009_v40 = vmul.u32 %v6007_v13, %v5982_v31  ;;  %v13803_v61 = vmul.u32 %v6006_v60, %v5983_v57 }
 0x5c0   :  { %v5970_v45 = vsel %vm15056_vm7, %v13731_v29, 2102212464  ;;  %v5772_v21 = vsel %vm5770_vm0, %v5757_v27, %v5771_v32  ;;  %v5775_v19 = vsel %vm5773_vm12, %v5774_v62, %v5765_v7  ;;  %vm7227_vm9 = vcmp.lt.s32.totalorder %v7226_v36, 0 }
 0x5c1   :  { %v5902_v24 = vsub.s32 4, %v13755_v53  ;;  %v5776_v12 = vsel %vm5769_vm5, %v5772_v21, %v5775_v19  ;;  %v5887_v56 = vsel %vm7227_vm9, 0, %v7226_v36  ;;  %v6001_v1 = vadd.s32 %v5999_v43, %v5997_v16  ;;  %v6872_v43 = vld [vmem:[%s14381_s11 + $0x78] sm:$0xff] }
 0x5c2   :  { %v6012_v10 = vshll.u32 %v6009_v40, 16  ;;  %v5777_v22 = vsel %vm5766_vm10, nan, %v5776_v12  ;;  %v5888_v29 = vsub.s32 32, %v5887_v56  ;;  %v5892_v15 = vsub.s32 4294967266, %v5887_v56  ;;  %6877 = vmatpush.msra.mxu3 %v6872_v43 }
 0x5c3   :  { %v6008_v54 = vmul.u32 %v6006_v60, %v5982_v31  ;;  %6515 = vmatmul.f32.gmra.mxu0 %v5777_v22  ;;  %v5889_v52 = vshll.u32 %v13778_v17, %v5887_v56  ;;  %v5991_v27 = vshrl.u32 %v13774_v63, 16  ;;  %v6011_v7 = vmul.u32 %v6007_v13, %v5983_v57  ;;  %v13822_v13 = vpop.permute.xlu1 %551 }
 0x5c4   :  { %v6014_v62 = vshll.u32 %v13803_v61, 16  ;;  %v5890_v32 = vshrl.u32 %v5872_v30, %v5888_v29  ;;  %v5893_v39 = vadd.s32 127, %v5892_v15  ;;  %v5969_v0 = vsel %vm5965_vm1, %v5949_v47, %v13737_v42  ;;  %v6871_v42 = vld [vmem:[%s14381_s11 + $0x70] sm:$0xff] }
 0x5c5   :  { %vm6016_vm8 = vc.u32 %v6008_v54, %v6012_v10  ;;  %v6018_v36 = vadd.s32 %v6012_v10, %v6008_v54  ;;  %v5971_v31 = vsel %vm5967_vm6, %v13722_v46, %v5970_v45  ;;  %v6002_v60 = vadd.s32 %v6001_v1, %v5991_v27  ;;  %v15057_v45 = vld [vmem:[#allocation56_spill] sm:$0xff]  ;;  %v6474_v1 = vpop.f32.mrf.mxu0  ;;  %v13848_v10 = vpop.f32.mrf.mxu2  ;;  %6878 = vmatpush.msra.mxu3 %v6871_v42 }
 0x5c6   :  { %v6017_v17 = vsel %vm6016_vm8, 1, %v14643_v51  ;;  %v5891_v16 = vor.u32 %v5890_v32, %v5889_v52  ;;  %v5894_v63 = vshll.u32 %v5893_v39, 23  ;;  %v1202_v30 = vadd.f32 %v13529_v8, %v1166_v20 }
 0x5c7   :  { %v6019_v57 = vadd.s32 %v6017_v17, %v6011_v7  ;;  %vm6020_vm5 = vc.u32 %v6018_v36, %v6014_v62  ;;  %v5993_v46 = vshrl.u32 %v13780_v59, 16  ;;  %v6088_v21 = vand.u32 2147483647, %v15057_v45  ;;  %v15061_v17 = vld [vmem:[#allocation22_spill] sm:$0xff] }
 0x5c8   :  { %v6021_v47 = vsel %vm6020_vm5, 1, %v14643_v51  ;;  %v13837_v19 = vsel %vm6278_vm2, %v13690_v44, 920167782  ;;  %v15058_v20 = vand.u32 2147483647, %v15031_v2  ;;  %v5903_v59 = vsel %vm5780_vm3, %v5902_v24, %v13755_v53  ;;  %6776 = vmatmul.f32.gmra.mxu2 %v1202_v30  ;;  %7082 = vst [vmem:[#allocation10 + $0xe0] sm:$0xff] %v1202_v30 }
 0x5c9   :  { %v5895_v56 = vor.u32 4788187, %v5894_v63  ;;  %v6475_v22 = vadd.f32 %v13681_v5, %v6474_v1  ;;  %v13851_v29 = vadd.s32 %v6002_v60, %v5993_v46  ;;  %v6013_v15 = vshrl.u32 %v6009_v40, 16  ;;  %v15062_v63 = vld [vmem:[#allocation62_spill] sm:$0xff] }
 0x5ca   :  { %vm13841_vm1 = vcmp.le.f32.partialorder %v15058_v20, 0.7853982  ;;  %v6023_v54 = vadd.s32 %v6021_v47, %v6019_v57  ;;  %vm588_vm6 = vcmp.eq.s32.totalorder %v13822_v13, 1  ;;  %v5898_v27 = vcvt.s32.f32 %v5891_v16  ;;  %v809_v20 = vpop.permute.xlu2 %808 }
 0x5cb   :  { %v5896_v52 = vand.u32 2147483647, %v5895_v56  ;;  %v5972_v53 = vsel %vm5966_vm13, %v5969_v0, %v5971_v31  ;;  %7035 = vst [vmem:[#allocation8 + $0x68] sm:$0xff] %v6475_v22  ;;  %v6015_v24 = vshrl.u32 %v13803_v61, 16  ;;  %v13857_v7 = vadd.s32 %v6018_v36, %v6014_v62  ;;  %6618 = vmatmul.f32.gmra.mxu1 %v6475_v22 }
 0x5cc   :  { %v6024_v32 = vadd.s32 %v6023_v54, %v6013_v15  ;;  %v6095_v39 = vand.u32 8388607, %v6088_v21  ;;  %v5905_v60 = vsel %vm13841_vm1, 0, %v5903_v59  ;;  %v6105_v16 = vshll.u32 %v14744_v49, %v15061_v17 }
 0x5cd   :  { %v5899_v40 = vmul.f32 %v5898_v27, %v5896_v52  ;;  %v6106_v11 = vshrl.u32 %v14725_v37, %v15062_v63  ;;  %vm6028_vm13 = vc.u32 %v13851_v29, %v13857_v7  ;;  %v6108_v61 = vshll.u32 %v14725_v37, %v15061_v17  ;;  %v1066_v52 = vpop.permute.xlu0 %1065 }
 0x5ce   :  { %v6025_v0 = vadd.s32 %v6024_v32, %v6015_v24  ;;  %v6109_v62 = vshrl.u32 %v14728_v34, %v15062_v63  ;;  %v6111_v57 = vshll.u32 %v14728_v34, %v15061_v17  ;;  %v6112_v30 = vshrl.u32 %v14724_v25, %v15062_v63 }
 0x5cf   :  { %v5900_v36 = vxor.u32 2147483648, %v5899_v40  ;;  %v13873_v31 = vor.u32 %v6106_v11, %v6105_v16  ;;  %v5922_v43 = vadd.s32 3, %v5905_v60  ;;  %v6096_v46 = vor.u32 8388608, %v6095_v39 }
 0x5d0   :  { %v6029_v42 = vadd.s32 1, %v6025_v0  ;;  %v13879_v47 = vor.u32 %v6109_v62, %v6108_v61  ;;  %v6026_v59 = vmul.u32 %v13751_v38, %v5972_v53  ;;  %v13884_v1 = vor.u32 %v6112_v30, %v6111_v57 }
 0x5d1   :  { %v5901_v56 = vsel %vm5780_vm3, %v5900_v36, %v5899_v40  ;;  %vm6120_vm10 = vcmp.lt.s32.totalorder %v12731_v50, 1  ;;  %vm6122_vm4 = vcmp.lt.s32.totalorder %v12731_v50, 3  ;;  %vm845_vm14 = vcmp.eq.s32.totalorder %v809_v20, 1 }
 0x5d2   :  { %v13890_v22 = vsel %vm13841_vm1, %v15031_v2, %v5901_v56  ;;  %v6030_v15 = vsel %vm6028_vm13, %v6029_v42, %v6025_v0  ;;  %v6128_v38 = vsel %vm6120_vm10, %v13873_v31, %v13879_v47  ;;  %v6130_v12 = vsel %vm6122_vm4, %v13884_v1, %v13072_v41 }
 0x5d3   :  { %v5906_v54 = vmul.f32 %v13890_v22, %v13890_v22  ;;  %v6031_v27 = vadd.s32 %v6030_v15, %v6026_v59  ;;  %v6134_v53 = vsel %vm6122_vm4, %v12808_v18, %v13110_v9  ;;  %vm6121_vm0 = vcmp.lt.s32.totalorder %v12731_v50, 2  ;;  %v15063_v59 = vld [vmem:[#allocation34_spill] sm:$0xff] }
 0x5d4   :  { %v6132_v24 = vsel %vm6120_vm10, %v13879_v47, %v13884_v1  ;;  %v13915_v32 = vshll.u32 %v6096_v46, 8  ;;  %v13919_v41 = vsel %vm6121_vm0, %v6128_v38, %v6130_v12  ;;  %v621_v18 = vsel %vm588_vm6, %v8133_v35, 0.0 }
 0x5d5   :  { %v5907_v39 = vmul.f32 -0.001358992, %v5906_v54  ;;  %v5914_v40 = vmul.f32 -0.00019511016, %v5906_v54  ;;  %v6032_v60 = vadd.s32 536870912, %v6031_v27  ;;  %v13924_v9 = vand.u32 3, %v5922_v43 }
 0x5d6   :  { %vm1102_vm12 = vcmp.eq.s32.totalorder %v1066_v52, 1  ;;  %v6135_v17 = vsel %vm6121_vm0, %v6132_v24, %v6134_v53  ;;  %v6137_v62 = vand.u32 65535, %v13915_v32  ;;  %v6138_v36 = vshrl.u32 %v13915_v32, 16 }
 0x5d7   :  { %v5908_v16 = vadd.f32 0.041655596, %v5907_v39  ;;  %v5915_v11 = vadd.f32 0.008332121, %v5914_v40  ;;  %v13928_v0 = vshrl.u32 %v6032_v60, 30  ;;  %v6139_v61 = vand.u32 65535, %v6135_v17 }
 0x5d8   :  { %v6140_v57 = vshrl.u32 %v6135_v17, 16  ;;  %v6162_v30 = vshrl.u32 %v13919_v41, 16  ;;  %v13938_v13 = vsel %vm6278_vm2, %v6274_v28, 1326507024  ;;  %v878_v56 = vsel %vm845_vm14, %v8876_v23, 0.0 }
 0x5d9   :  { %v5909_v43 = vmul.f32 %v5908_v16, %v5906_v54  ;;  %v5916_v42 = vmul.f32 %v5915_v11, %v5906_v54  ;;  %v6034_v46 = vshll.u32 %v13928_v0, 30  ;;  %v653_v15 = vadd.f32 %v621_v18, %v15063_v59 }
 0x5da   :  { %v6142_v38 = vmul.u32 %v6140_v57, %v6137_v62  ;;  %v13944_v12 = vmul.u32 %v6139_v61, %v6138_v36  ;;  %v1135_v33 = vsel %vm1102_vm12, %v8889_v4, 0.0  ;;  %vm5925_vm15 = vcmp.eq.s32.totalorder %v13924_v9, 0 }
 0x5db   :  { %v5910_v53 = vadd.f32 -0.4999988, %v5909_v43  ;;  %v5917_v24 = vadd.f32 -0.16666654, %v5916_v42  ;;  %v13948_v26 = vsub.s32 %v6031_v27, %v6034_v46  ;;  %v6141_v28 = vmul.u32 %v6139_v61, %v6137_v62 }
 0x5dc   :  { %v6145_v39 = vshll.u32 %v6142_v38, 16  ;;  %v6161_v40 = vand.u32 65535, %v13919_v41  ;;  %v13952_v20 = vmul.u32 %v6162_v30, %v6137_v62  ;;  %vm5924_vm3 = vcmp.lt.s32.totalorder %v13924_v9, 2 }
 0x5dd   :  { %v5911_v60 = vmul.f32 %v5910_v53, %v5906_v54  ;;  %v5918_v18 = vmul.f32 %v5917_v24, %v5906_v54  ;;  %vm6036_vm7 = vcmp.lt.s32.totalorder %v13948_v26, 0  ;;  %v6037_v17 = vsub.s32 0, %v13948_v26  ;;  %v13961_v54 = vpop.permute.xlu2 %811 }
 0x5de   :  { %vm5921_vm9 = vweird.f32 %v15031_v2  ;;  %v6144_v52 = vmul.u32 %v6140_v57, %v6138_v36  ;;  %v6147_v27 = vshll.u32 %v13944_v12, 16  ;;  %vm6149_vm8 = vc.u32 %v6141_v28, %v6145_v39 }
 0x5df   :  { %v6151_v16 = vadd.s32 %v6145_v39, %v6141_v28  ;;  %v5912_v11 = vadd.f32 1.0, %v5911_v60  ;;  %v5919_v61 = vadd.f32 1.0, %v5918_v18  ;;  %v6038_v41 = vsel %vm6036_vm7, %v6037_v17, %v13948_v26 }
 0x5e0   :  { %v6150_v43 = vsel %vm6149_vm8, 1, %v14643_v51  ;;  %v910_v42 = vadd.f32 %v878_v56, %v653_v15  ;;  %vm5935_vm5 = vcmp.lt.s32.totalorder %v15048_v48, 0  ;;  %v6039_v46 = vclz %v6038_v41 }
 0x5e1   :  { %v6152_v59 = vadd.s32 %v6150_v43, %v6144_v52  ;;  %vm6153_vm1 = vc.u32 %v6151_v16, %v6147_v27  ;;  %v5920_v57 = vmul.f32 %v5919_v61, %v13890_v22  ;;  %vm5928_vm6 = vcmp.eq.s32.totalorder %v13924_v9, 2 }
 0x5e2   :  { %v5929_v53 = vxor.u32 2147483648, %v5912_v11  ;;  %v6154_v24 = vsel %vm6153_vm1, 1, %v14643_v51  ;;  %v1167_v28 = vadd.f32 %v1135_v33, %v910_v42  ;;  %v6027_v39 = vadd.s32 %v13857_v7, %v13851_v29 }
 0x5e3   :  { %v7229_v60 = vadd.s32 4294967294, %v6039_v46  ;;  %v13969_v18 = vmul.u32 %v6161_v40, %v6138_v36  ;;  %vm846_vm13 = vcmp.eq.s32.totalorder %v13961_v54, 1  ;;  %v5926_v56 = vxor.u32 2147483648, %v5920_v57 }
 0x5e4   :  { %v6156_v15 = vadd.s32 %v6154_v24, %v6152_v59  ;;  %v6163_v17 = vmul.u32 %v6161_v40, %v6137_v62  ;;  %v6167_v52 = vshll.u32 %v13952_v20, 16  ;;  %vm13975_vm14 = vcmp.le.f32.partialorder %v5933_v58, 0.7853982 }
 0x5e5   :  { %vm7230_vm12 = vcmp.lt.s32.totalorder %v7229_v60, 0  ;;  %v6057_v33 = vsub.s32 4, %v13928_v0  ;;  %v6146_v29 = vshrl.u32 %v6142_v38, 16  ;;  %v6166_v7 = vmul.u32 %v6162_v30, %v6138_v36 }
 0x5e6   :  { %v5927_v27 = vsel %vm5925_vm15, %v5912_v11, %v5926_v56  ;;  %v5930_v16 = vsel %vm5928_vm6, %v5929_v53, %v5920_v57  ;;  %v6042_v62 = vsel %vm7230_vm12, 0, %v7229_v60  ;;  %vm6171_vm7 = vc.u32 %v6163_v17, %v6167_v52  ;;  %v6870_v56 = vld [vmem:[%s14381_s11 + $0x68] sm:$0xff] }
 0x5e7   :  { %v5931_v40 = vsel %vm5924_vm3, %v5927_v27, %v5930_v16  ;;  %v6043_v58 = vsub.s32 32, %v6042_v62  ;;  %v6047_v61 = vsub.s32 4294967266, %v6042_v62  ;;  %v6169_v41 = vshll.u32 %v13969_v18, 16  ;;  %6879 = vmatpush.msra.mxu3 %v6870_v56 }
 0x5e8   :  { %v5932_v43 = vsel %vm5921_vm9, nan, %v5931_v40  ;;  %v6157_v38 = vadd.s32 %v6156_v15, %v6146_v29  ;;  %v6172_v36 = vsel %vm6171_vm7, 1, %v14643_v51  ;;  %v6173_v30 = vadd.s32 %v6167_v52, %v6163_v17  ;;  %v15066_v17 = vld [vmem:[#allocation98_spill] sm:$0xff]  ;;  %v6477_v29 = vpop.f32.mrf.mxu0 }
 0x5e9   :  { %6518 = vmatmul.f32.gmra.mxu0 %v5932_v43  ;;  %v6044_v11 = vshll.u32 %v13948_v26, %v6042_v62  ;;  %v6045_v42 = vshrl.u32 %v6027_v39, %v6043_v58  ;;  %v6048_v46 = vadd.s32 127, %v6047_v61  ;;  %v6174_v59 = vadd.s32 %v6172_v36, %v6166_v7  ;;  %v815_v39 = vpop.permute.xlu2 %814  ;;  %v6868_v62 = vld [vmem:[%s14381_s11 + $0x58] sm:$0xff] }
 0x5ea   :  { %v6058_v9 = vsel %vm5935_vm5, %v6057_v33, %v13928_v0  ;;  %v6104_v57 = vshrl.u32 %v14744_v49, %v15062_v63  ;;  %v6125_v2 = vsel %vm6123_vm11, %v13884_v1, 2102212464  ;;  %vm6175_vm15 = vc.u32 %v6173_v30, %v6169_v41  ;;  %v6869_v63 = vld [vmem:[%s14381_s11 + $0x60] sm:$0xff]  ;;  %v555_v33 = vpop.permute.xlu1 %554 }
 0x5eb   :  { %v6046_v53 = vor.u32 %v6045_v42, %v6044_v11  ;;  %v6049_v24 = vshll.u32 %v6048_v46, 23  ;;  %v6148_v60 = vshrl.u32 %v13944_v12, 16  ;;  %v6176_v26 = vsel %vm6175_vm15, 1, %v14643_v51  ;;  %6880 = vmatpush.msra.mxu3 %v6869_v63 }
 0x5ec   :  { %v1203_v0 = vadd.f32 %v13529_v8, %v1167_v28  ;;  %v6168_v1 = vshrl.u32 %v13952_v20, 16  ;;  %v6178_v15 = vadd.s32 %v6176_v26, %v6174_v59  ;;  %v6243_v52 = vand.u32 2147483647, %v15066_v17  ;;  %v14018_v8 = vpop.f32.mrf.mxu2 }
 0x5ed   :  { %v6050_v12 = vor.u32 4788187, %v6049_v24  ;;  %v6124_v7 = vsel %vm6120_vm10, %v6104_v57, %v13873_v31  ;;  %v6126_v27 = vsel %vm6122_vm4, %v13879_v47, %v6125_v2  ;;  %v14016_v16 = vadd.s32 %v6157_v38, %v6148_v60  ;;  %v6867_v38 = vld [vmem:[%s14381_s11 + $0x50] sm:$0xff]  ;;  %6881 = vmatpush.msra.mxu3 %v6868_v62 }
 0x5ee   :  { %v6060_v20 = vsel %vm13975_vm14, 0, %v6058_v9  ;;  %6779 = vmatmul.f32.gmra.mxu2 %v1203_v0  ;;  %7083 = vst [vmem:[#allocation10 + $0xe8] sm:$0xff] %v1203_v0  ;;  %v6478_v28 = vadd.f32 %v13681_v5, %v6477_v29  ;;  %v6170_v31 = vshrl.u32 %v13969_v18, 16  ;;  %v6179_v40 = vadd.s32 %v6178_v15, %v6168_v1 }
 0x5ef   :  { %v14030_v47 = vsel %vm846_vm13, %v8876_v23, 0.0  ;;  %v6051_v58 = vand.u32 2147483647, %v6050_v12  ;;  %v6053_v61 = vcvt.s32.f32 %v6046_v53  ;;  %v14032_v43 = vadd.s32 %v6173_v30, %v6169_v41  ;;  %6882 = vmatpush.msra.mxu3 %v6867_v38  ;;  %v1069_v12 = vpop.permute.xlu0 %1068 }
 0x5f0   :  { %vm847_vm11 = vcmp.eq.s32.totalorder %v815_v39, 1  ;;  %7036 = vst [vmem:[#allocation8 + $0x70] sm:$0xff] %v6478_v28  ;;  %v6127_v18 = vsel %vm6121_vm0, %v6124_v7, %v6126_v27  ;;  %v6180_v36 = vadd.s32 %v6179_v40, %v6170_v31  ;;  %6621 = vmatmul.f32.gmra.mxu1 %v6478_v28  ;;  %v6250_v54 = vand.u32 8388607, %v6243_v52  ;;  %v15067_v39 = vld [vmem:[#allocation38_spill] sm:$0xff] }
 0x5f1   :  { %vm589_vm10 = vcmp.eq.s32.totalorder %v555_v33, 1  ;;  %v6054_v11 = vmul.f32 %v6053_v61, %v6051_v58  ;;  %v6077_v42 = vadd.s32 3, %v6060_v20  ;;  %vm6183_vm4 = vc.u32 %v14016_v16, %v14032_v43 }
 0x5f2   :  { %v6184_v41 = vadd.s32 1, %v6180_v36  ;;  %v6261_v30 = vshrl.u32 %v14725_v37, %v13354_v55  ;;  %v6263_v50 = vshll.u32 %v14725_v37, %v13129_v3  ;;  %v6264_v46 = vshrl.u32 %v14728_v34, %v13354_v55  ;;  %v558_v1 = vpop.permute.xlu1 %557 }
 0x5f3   :  { %v6055_v59 = vxor.u32 2147483648, %v6054_v11  ;;  %v6181_v9 = vmul.u32 %v13915_v32, %v6127_v18  ;;  %v6266_v57 = vshll.u32 %v14728_v34, %v13129_v3  ;;  %v6267_v2 = vshrl.u32 %v14724_v25, %v13354_v55 }
 0x5f4   :  { %v6185_v53 = vsel %vm6183_vm4, %v6184_v41, %v6180_v36  ;;  %v6251_v24 = vor.u32 8388608, %v6250_v54  ;;  %v6260_v60 = vshll.u32 %v14744_v49, %v13129_v3  ;;  %v14056_v26 = vor.u32 %v6264_v46, %v6263_v50 }
 0x5f5   :  { %v622_v37 = vsel %vm589_vm10, %v8133_v35, 0.0  ;;  %v6056_v56 = vsel %vm5935_vm5, %v6055_v59, %v6054_v11  ;;  %v6186_v32 = vadd.s32 %v6185_v53, %v6181_v9  ;;  %v14062_v63 = vor.u32 %v6267_v2, %v6266_v57 }
 0x5f6   :  { %v14066_v34 = vsel %vm847_vm11, %v8876_v23, 0.0  ;;  %v14071_v25 = vsel %vm13975_vm14, %v15048_v48, %v6056_v56  ;;  %v14073_v3 = vor.u32 %v6261_v30, %v6260_v60  ;;  %vm6277_vm0 = vcmp.lt.s32.totalorder %v13351_v6, 3 }
 0x5f7   :  { %v6061_v0 = vmul.f32 %v14071_v25, %v14071_v25  ;;  %v6187_v15 = vadd.s32 536870912, %v6186_v32  ;;  %vm6275_vm3 = vcmp.lt.s32.totalorder %v13351_v6, 1  ;;  %v6289_v23 = vsel %vm6277_vm0, %v13690_v44, %v13938_v13 }
 0x5f8   :  { %v654_v22 = vadd.f32 %v622_v37, %v15067_v39  ;;  %v14084_v33 = vand.u32 3, %v6077_v42  ;;  %v6287_v29 = vsel %vm6275_vm3, %v14056_v26, %v14062_v63  ;;  %v14090_v7 = vshll.u32 %v6251_v24, 8 }
 0x5f9   :  { %v6062_v27 = vmul.f32 -0.001358992, %v6061_v0  ;;  %v6069_v20 = vmul.f32 -0.00019511016, %v6061_v0  ;;  %v14092_v28 = vshrl.u32 %v6187_v15, 30  ;;  %vm6276_vm9 = vcmp.lt.s32.totalorder %v13351_v6, 2 }
 0x5fa   :  { %vm590_vm8 = vcmp.eq.s32.totalorder %v558_v1, 1  ;;  %v6283_v44 = vsel %vm6275_vm3, %v14073_v3, %v14056_v26  ;;  %v6285_v13 = vsel %vm6277_vm0, %v14062_v63, %v13837_v19  ;;  %v6290_v62 = vsel %vm6276_vm9, %v6287_v29, %v6289_v23  ;;  %v15068_v29 = vld [vmem:[#allocation59_spill] sm:$0xff] }
 0x5fb   :  { %v6063_v31 = vadd.f32 0.041655596, %v6062_v27  ;;  %v6070_v40 = vadd.f32 0.008332121, %v6069_v20  ;;  %vm1103_vm5 = vcmp.eq.s32.totalorder %v1069_v12, 1  ;;  %v6189_v58 = vshll.u32 %v14092_v28, 30 }
 0x5fc   :  { %v6292_v61 = vand.u32 65535, %v14090_v7  ;;  %v6293_v38 = vshrl.u32 %v14090_v7, 16  ;;  %v6294_v18 = vand.u32 65535, %v6290_v62  ;;  %v6295_v36 = vshrl.u32 %v6290_v62, 16 }
 0x5fd   :  { %v6064_v54 = vmul.f32 %v6063_v31, %v6061_v0  ;;  %v6071_v11 = vmul.f32 %v6070_v40, %v6061_v0  ;;  %v14108_v42 = vsub.s32 %v6186_v32, %v6189_v58  ;;  %v6286_v19 = vsel %vm6276_vm9, %v6283_v44, %v6285_v13 }
 0x5fe   :  { %v623_v41 = vsel %vm590_vm8, %v8133_v35, 0.0  ;;  %v911_v30 = vadd.f32 %v14030_v47, %v654_v22  ;;  %v14115_v50 = vmul.u32 %v6295_v36, %v6292_v61  ;;  %v14117_v46 = vmul.u32 %v6294_v18, %v6293_v38 }
 0x5ff   :  { %v6065_v59 = vadd.f32 -0.4999988, %v6064_v54  ;;  %v6072_v9 = vadd.f32 -0.16666654, %v6071_v11  ;;  %vm6191_vm1 = vcmp.lt.s32.totalorder %v14108_v42, 0  ;;  %v6192_v57 = vsub.s32 0, %v14108_v42 }
 0x600   :  { %vm6080_vm6 = vcmp.eq.s32.totalorder %v14084_v33, 0  ;;  %vm6083_vm13 = vcmp.eq.s32.totalorder %v14084_v33, 2  ;;  %v1136_v2 = vsel %vm1103_vm5, %v8889_v4, 0.0  ;;  %v6296_v35 = vmul.u32 %v6294_v18, %v6292_v61 }
 0x601   :  { %v6300_v47 = vshll.u32 %v14115_v50, 16  ;;  %v6317_v53 = vshrl.u32 %v6286_v19, 16  ;;  %v6066_v24 = vmul.f32 %v6065_v59, %v6061_v0  ;;  %v6073_v60 = vmul.f32 %v6072_v9, %v6061_v0 }
 0x602   :  { %vm6079_vm14 = vcmp.lt.s32.totalorder %v14084_v33, 2  ;;  %v6193_v37 = vsel %vm6191_vm1, %v6192_v57, %v14108_v42  ;;  %v6316_v56 = vand.u32 65535, %v6286_v19  ;;  %vm6076_vm12 = vweird.f32 %v15048_v48  ;;  %v6866_v48 = vld [vmem:[%s14381_s11 + $0x48] sm:$0xff] }
 0x603   :  { %v6194_v32 = vclz %v6193_v37  ;;  %v6299_v1 = vmul.u32 %v6295_v36, %v6293_v38  ;;  %v6302_v15 = vshll.u32 %v14117_v46, 16  ;;  %vm6304_vm7 = vc.u32 %v6296_v35, %v6300_v47  ;;  %6883 = vmatpush.msra.mxu3 %v6866_v48 }
 0x604   :  { %v6067_v23 = vadd.f32 1.0, %v6066_v24  ;;  %v6074_v39 = vadd.f32 1.0, %v6073_v60  ;;  %v6305_v22 = vsel %vm6304_vm7, 1, %v14643_v51  ;;  %v6306_v12 = vadd.s32 %v6300_v47, %v6296_v35  ;;  %v14154_v24 = vpop.f32.mrf.mxu2 }
 0x605   :  { %v655_v27 = vadd.f32 %v623_v41, %v15068_v29  ;;  %v6182_v0 = vadd.s32 %v14032_v43, %v14016_v16  ;;  %v7232_v20 = vadd.s32 4294967294, %v6194_v32  ;;  %v14134_v44 = vmul.u32 %v6317_v53, %v6292_v61  ;;  %v6864_v29 = vld [vmem:[%s14381_s11 + $0x38] sm:$0xff] }
 0x606   :  { %v6075_v13 = vmul.f32 %v6074_v39, %v14071_v25  ;;  %v6084_v62 = vxor.u32 2147483648, %v6067_v23  ;;  %v6307_v31 = vadd.s32 %v6305_v22, %v6299_v1  ;;  %vm6308_vm15 = vc.u32 %v6306_v12, %v6302_v15  ;;  %v6480_v1 = vpop.f32.mrf.mxu0 }
 0x607   :  { %v1168_v40 = vadd.f32 %v1136_v2, %v911_v30  ;;  %vm7233_vm11 = vcmp.lt.s32.totalorder %v7232_v20, 0  ;;  %v6259_v58 = vshrl.u32 %v14744_v49, %v13354_v55  ;;  %v6309_v18 = vsel %vm6308_vm15, 1, %v14643_v51 }
 0x608   :  { %v6081_v36 = vxor.u32 2147483648, %v6075_v13  ;;  %v6197_v54 = vsel %vm7233_vm11, 0, %v7232_v20  ;;  %v6318_v11 = vmul.u32 %v6316_v56, %v6292_v61  ;;  %v14140_v19 = vmul.u32 %v6316_v56, %v6293_v38  ;;  %v7299_v56 = vld [vmem:[#allocation5] ss:$0 sm:$0xff] }
 0x609   :  { %v6198_v16 = vsub.s32 32, %v6197_v54  ;;  %v6202_v43 = vsub.s32 4294967266, %v6197_v54  ;;  %v6301_v41 = vshrl.u32 %v14115_v50, 16  ;;  %v6322_v25 = vshll.u32 %v14134_v44, 16 }
 0x60a   :  { %v6082_v30 = vsel %vm6080_vm6, %v6067_v23, %v6081_v36  ;;  %v6085_v59 = vsel %vm6083_vm13, %v6084_v62, %v6075_v13  ;;  %v6311_v49 = vadd.s32 %v6309_v18, %v6307_v31  ;;  %v6321_v55 = vmul.u32 %v6317_v53, %v6293_v38  ;;  %v1072_v53 = vpop.permute.xlu0 %1071 }
 0x60b   :  { %v6086_v9 = vsel %vm6079_vm14, %v6082_v30, %v6085_v59  ;;  %v6199_v61 = vshll.u32 %v14108_v42, %v6197_v54  ;;  %v6200_v57 = vshrl.u32 %v6182_v0, %v6198_v16  ;;  %v6203_v2 = vadd.s32 127, %v6202_v43  ;;  %v6865_v42 = vld [vmem:[%s14381_s11 + $0x40] sm:$0xff] }
 0x60c   :  { %v6087_v50 = vsel %vm6076_vm12, nan, %v6086_v9  ;;  %v6324_v35 = vshll.u32 %v14140_v19, 16  ;;  %vm6326_vm10 = vc.u32 %v6318_v11, %v6322_v25  ;;  %v6328_v47 = vadd.s32 %v6322_v25, %v6318_v11  ;;  %6884 = vmatpush.msra.mxu3 %v6865_v42  ;;  %v14197_v43 = vpop.f32.mrf.mxu2 }
 0x60d   :  { %6521 = vmatmul.f32.gmra.mxu0 %v6087_v50  ;;  %v6201_v60 = vor.u32 %v6200_v57, %v6199_v61  ;;  %v6204_v37 = vshll.u32 %v6203_v2, 23  ;;  %v6280_v33 = vsel %vm6278_vm2, %v14062_v63, 2102212464  ;;  %v6327_v38 = vsel %vm6326_vm10, 1, %v14643_v51 }
 0x60e   :  { %v1204_v32 = vadd.f32 %v7299_v56, %v1168_v40  ;;  %v6312_v15 = vadd.s32 %v6311_v49, %v6301_v41  ;;  %v6329_v23 = vadd.s32 %v6327_v38, %v6321_v55  ;;  %vm6330_vm4 = vc.u32 %v6328_v47, %v6324_v35  ;;  %6885 = vmatpush.msra.mxu3 %v6864_v29 }
 0x60f   :  { %v6205_v39 = vor.u32 4788187, %v6204_v37  ;;  %v912_v63 = vadd.f32 %v14066_v34, %v655_v27  ;;  %vm1104_vm2 = vcmp.eq.s32.totalorder %v1072_v53, 1  ;;  %v6481_v22 = vadd.f32 %v13681_v5, %v6480_v1 }
 0x610   :  { %v1137_v12 = vsel %vm1104_vm2, %v8889_v4, 0.0  ;;  %6782 = vmatmul.f32.gmra.mxu2 %v1204_v32  ;;  %7084 = vst [vmem:[#allocation10 + $0xf0] sm:$0xff] %v1204_v32  ;;  %v6303_v0 = vshrl.u32 %v14117_v46, 16  ;;  %v6323_v20 = vshrl.u32 %v14134_v44, 16  ;;  %v6331_v13 = vsel %vm6330_vm4, 1, %v14643_v51  ;;  %v6863_v4 = vld [vmem:[%s14381_s11 + $0x30] sm:$0xff] }
 0x611   :  { %v6206_v62 = vand.u32 2147483647, %v6205_v39  ;;  %v6208_v31 = vcvt.s32.f32 %v6201_v60  ;;  %v1169_v34 = vadd.f32 %v1137_v12, %v912_v63  ;;  %7037 = vst [vmem:[#allocation8 + $0x78] sm:$0xff] %v6481_v22  ;;  %v6333_v5 = vadd.s32 %v6331_v13, %v6329_v23  ;;  %6624 = vmatmul.f32.gmra.mxu1 %v6481_v22  ;;  %6886 = vmatpush.msra.mxu3 %v6863_v4 }
 0x612   :  { %v6279_v27 = vsel %vm6275_vm3, %v6259_v58, %v14073_v3  ;;  %v6281_v46 = vsel %vm6277_vm0, %v14056_v26, %v6280_v33  ;;  %v14184_v51 = vadd.s32 %v6312_v15, %v6303_v0  ;;  %v6325_v18 = vshrl.u32 %v14140_v19, 16 }
 0x613   :  { %v6209_v44 = vmul.f32 %v6208_v31, %v6206_v62  ;;  %v1205_v40 = vadd.f32 %v7299_v56, %v1169_v34  ;;  %v6334_v36 = vadd.s32 %v6333_v5, %v6323_v20  ;;  %v6332_v54 = vadd.s32 %v6328_v47, %v6324_v35 }
 0x614   :  { %v6282_v16 = vsel %vm6276_vm9, %v6279_v27, %v6281_v46  ;;  %vm6090_vm3 = vcmp.lt.s32.totalorder %v15057_v45, 0  ;;  %vm14193_vm8 = vcmp.le.f32.partialorder %v6088_v21, 0.7853982  ;;  %v6212_v41 = vsub.s32 4, %v14092_v28 }
 0x615   :  { %v6210_v11 = vxor.u32 2147483648, %v6209_v44  ;;  %7085 = vst [vmem:[#allocation10 + $0xf8] sm:$0xff] %v1205_v40  ;;  %v6335_v3 = vadd.s32 %v6334_v36, %v6325_v18  ;;  %vm6338_vm0 = vc.u32 %v14184_v51, %v6332_v54  ;;  %v6336_v25 = vmul.u32 %v14090_v7, %v6282_v16  ;;  %v6862_v18 = vld [vmem:[%s14381_s11 + $0x28] sm:$0xff]  ;;  %v6483_v36 = vpop.f32.mrf.mxu0 }
 0x616   :  { %v6213_v9 = vsel %vm6090_vm3, %v6212_v41, %v14092_v28  ;;  %vm6231_vm14 = vweird.f32 %v15057_v45  ;;  %v6337_v31 = vadd.s32 %v6332_v54, %v14184_v51  ;;  %6887 = vmatpush.msra.mxu3 %v6862_v18  ;;  %v14221_v51 = vld [vmem:[%s14377_s7] ss:$0 sm:$0xff]  ;;  %vm14242_vm12 = vcmp.le.f32.partialorder %v6243_v52, 0.7853982 }
 0x617   :  { %v6211_v58 = vsel %vm6090_vm3, %v6210_v11, %v6209_v44  ;;  %v6339_v19 = vadd.s32 1, %v6335_v3  ;;  %v6215_v35 = vsel %vm14193_vm8, 0, %v6213_v9  ;;  %v6580_v11 = vpop.f32.mrf.mxu1  ;;  %v6484_v54 = vadd.f32 %v14221_v51, %v6483_v36  ;;  %v6857_v9 = vld [vmem:[%s14381_s11] sm:$0xff] }
 0x618   :  { %v6214_v6 = vsel %vm14193_vm8, %v15057_v45, %v6211_v58  ;;  %6785 = vmatmul.f32.gmra.mxu2 %v1205_v40  ;;  %v6232_v38 = vadd.s32 3, %v6215_v35  ;;  %v6861_v45 = vld [vmem:[%s14381_s11 + $0x20] sm:$0xff]  ;;  %v6860_v58 = vld [vmem:[%s14381_s11 + $0x18] sm:$0xff]  ;;  %vm6245_vm7 = vcmp.lt.s32.totalorder %v15066_v17, 0  ;;  %vm6386_vm4 = vweird.f32 %v15066_v17 }
 0x619   :  { %v6216_v30 = vmul.f32 %v6214_v6, %v6214_v6  ;;  %v6340_v59 = vsel %vm6338_vm0, %v6339_v19, %v6335_v3  ;;  %v15071_v3 = vld [vmem:[#allocation91_spill] sm:$0xff]  ;;  %v14231_v19 = vld [vmem:[%s14380_s10] ss:$0 sm:$0xff]  ;;  %6888 = vmatpush.msra.mxu3 %v6861_v45  ;;  %7038 = vst [vmem:[#allocation8 + $0x80] sm:$0xff] %v6484_v54  ;;  %6627 = vmatmul.f32.gmra.mxu1 %v6484_v54  ;;  %v6717_v54 = vpop.f32.mrf.mxu2 }
 0x61a   :  { %v6341_v49 = vadd.s32 %v6340_v59, %v6336_v25  ;;  %v6233_v1 = vand.u32 3, %v6232_v38  ;;  %v6694_v26 = vadd.f32 %v15071_v3, %v6580_v11  ;;  %v6859_v25 = vld [vmem:[%s14381_s11 + $0x10] sm:$0xff] }
 0x61b   :  { %v6217_v21 = vmul.f32 -0.001358992, %v6216_v30  ;;  %v6224_v55 = vmul.f32 -0.00019511016, %v6216_v30  ;;  %6889 = vmatpush.msra.mxu3 %v6860_v58 }
 0x61c   :  { %v6342_v61 = vadd.s32 536870912, %v6341_v49  ;;  %vm6235_vm5 = vcmp.eq.s32.totalorder %v6233_v1, 0  ;;  %vm6238_vm1 = vcmp.eq.s32.totalorder %v6233_v1, 2  ;;  %vm6234_vm6 = vcmp.lt.s32.totalorder %v6233_v1, 2 }
 0x61d   :  { %v6218_v57 = vadd.f32 0.041655596, %v6217_v21  ;;  %v6225_v2 = vadd.f32 0.008332121, %v6224_v55  ;;  %6890 = vmatpush.msra.mxu3 %v6859_v25 }
 0x61e   :  { %v14205_v50 = vshrl.u32 %v6342_v61, 30 }
 0x61f   :  { %v6219_v47 = vmul.f32 %v6218_v57, %v6216_v30  ;;  %v6226_v60 = vmul.f32 %v6225_v2, %v6216_v30  ;;  %v6486_v57 = vpop.f32.mrf.mxu0  ;;  %v6583_v2 = vpop.f32.mrf.mxu1 }
 0x620   :  { %v6344_v7 = vshll.u32 %v14205_v50, 30  ;;  %v6487_v52 = vadd.f32 %v14221_v51, %v6486_v57 }
 0x621   :  { %v6220_v37 = vadd.f32 -0.4999988, %v6219_v47  ;;  %v6227_v33 = vadd.f32 -0.16666654, %v6226_v60  ;;  %v6367_v47 = vsub.s32 4, %v14205_v50  ;;  %v15074_v60 = vld [vmem:[#allocation90_spill] sm:$0xff] }
 0x622   :  { %v6345_v48 = vsub.s32 %v6341_v49, %v6344_v7  ;;  %v6858_v49 = vld [vmem:[%s14381_s11 + $0x8] sm:$0xff]  ;;  %v6697_v7 = vadd.f32 %v15074_v60, %v6583_v2  ;;  %7039 = vst [vmem:[#allocation8 + $0x88] sm:$0xff] %v6487_v52  ;;  %6630 = vmatmul.f32.gmra.mxu1 %v6487_v52 }
 0x623   :  { %v6221_v42 = vmul.f32 %v6220_v37, %v6216_v30  ;;  %v6228_v53 = vmul.f32 %v6227_v33, %v6216_v30  ;;  %v6793_v30 = vadd.f32 %v14231_v19, %v6694_v26  ;;  %6891 = vmatpush.msra.mxu3 %v6858_v49 }
 0x624   :  { %vm6346_vm9 = vcmp.lt.s32.totalorder %v6345_v48, 0  ;;  %v6347_v28 = vsub.s32 0, %v6345_v48  ;;  %v6794_v38 = vadd.f32 %v14231_v19, %v6697_v7 }
 0x625   :  { %v6222_v56 = vadd.f32 1.0, %v6221_v42  ;;  %v6229_v32 = vadd.f32 1.0, %v6228_v53  ;;  %v6825_v61 = vmax.f32 %v6793_v30, 0.0  ;;  %6892 = vmatpush.msra.mxu3 %v6857_v9 }
 0x626   :  { %v6348_v15 = vsel %vm6346_vm9, %v6347_v28, %v6345_v48  ;;  %v6826_v1 = vmax.f32 %v6794_v38, 0.0 }
 0x627   :  { %v6230_v23 = vmul.f32 %v6229_v32, %v6214_v6  ;;  %v6239_v39 = vxor.u32 2147483648, %v6222_v56  ;;  %v6349_v63 = vclz %v6348_v15  ;;  %6893 = vmatmul.f32.vlgmr.msra.gmra.mxu3 %v6825_v61  ;;  %v6489_v15 = vpop.f32.mrf.mxu0 }
 0x629   :  { %v6236_v22 = vxor.u32 2147483648, %v6230_v23  ;;  %v7235_v12 = vadd.s32 4294967294, %v6349_v63  ;;  %v6240_v0 = vsel %vm6238_vm1, %v6239_v39, %v6230_v23  ;;  %v6586_v23 = vpop.f32.mrf.mxu1 }
 0x62b   :  { %v6237_v29 = vsel %vm6235_vm5, %v6222_v56, %v6236_v22  ;;  %vm7236_vm13 = vcmp.lt.s32.totalorder %v7235_v12, 0  ;;  %v6490_v22 = vadd.f32 %v14221_v51, %v6489_v15 }
 0x62c   :  { %v6241_v20 = vsel %vm6234_vm6, %v6237_v29, %v6240_v0  ;;  %v6352_v13 = vsel %vm7236_vm13, 0, %v7235_v12  ;;  %v15075_v12 = vld [vmem:[#allocation17_spill] sm:$0xff] }
 0x62d   :  { %v6242_v62 = vsel %vm6231_vm14, nan, %v6241_v20  ;;  %v6353_v34 = vsub.s32 32, %v6352_v13  ;;  %v6357_v5 = vsub.s32 4294967266, %v6352_v13  ;;  %v6354_v4 = vshll.u32 %v6345_v48, %v6352_v13  ;;  %7040 = vst [vmem:[#allocation8 + $0x90] sm:$0xff] %v6490_v22  ;;  %6633 = vmatmul.f32.gmra.mxu1 %v6490_v22 }
 0x62e   :  { %6524 = vmatmul.f32.gmra.mxu0 %v6242_v62  ;;  %v6368_v48 = vsel %vm6245_vm7, %v6367_v47, %v14205_v50  ;;  %v6700_v29 = vadd.f32 %v15075_v12, %v6586_v23 }
 0x62f   :  { %v6355_v27 = vshrl.u32 %v6337_v31, %v6353_v34  ;;  %v6358_v46 = vadd.s32 127, %v6357_v5  ;;  %v6370_v32 = vsel %vm14242_vm12, 0, %v6368_v48  ;;  %6896 = vmatmul.f32.gmra.mxu3 %v6826_v1 }
 0x630   :  { %v6387_v50 = vadd.s32 3, %v6370_v32  ;;  %v6795_v13 = vadd.f32 %v14231_v19, %v6700_v29 }
 0x631   :  { %v6356_v44 = vor.u32 %v6355_v27, %v6354_v4  ;;  %v6359_v40 = vshll.u32 %v6358_v46, 23  ;;  %v6492_v46 = vpop.f32.mrf.mxu0 }
 0x632   :  { %v6388_v4 = vand.u32 3, %v6387_v50  ;;  %v6827_v27 = vmax.f32 %v6795_v13, 0.0  ;;  %v6493_v45 = vadd.f32 %v14221_v51, %v6492_v46 }
 0x633   :  { %v6360_v16 = vor.u32 4788187, %v6359_v40  ;;  %v6363_v6 = vcvt.s32.f32 %v6356_v44  ;;  %v6589_v44 = vpop.f32.mrf.mxu1 }
 0x634   :  { %v6703_v36 = vadd.f32 %v13674_v14, %v6589_v44  ;;  %7041 = vst [vmem:[#allocation8 + $0x98] sm:$0xff] %v6493_v45  ;;  %vm6390_vm15 = vcmp.eq.s32.totalorder %v6388_v4, 0  ;;  %vm6393_vm11 = vcmp.eq.s32.totalorder %v6388_v4, 2  ;;  %vm6389_vm10 = vcmp.lt.s32.totalorder %v6388_v4, 2 }
 0x635   :  { %v6361_v41 = vand.u32 2147483647, %v6360_v16  ;;  %6636 = vmatmul.f32.gmra.mxu1 %v6493_v45 }
 0x636   :  { %v6796_v16 = vadd.f32 %v14231_v19, %v6703_v36 }
 0x637   :  { %v6364_v59 = vmul.f32 %v6363_v6, %v6361_v41  ;;  %6899 = vmatmul.f32.gmra.mxu3 %v6827_v27 }
 0x638   :  { %v6828_v6 = vmax.f32 %v6796_v16, 0.0 }
 0x639   :  { %v6365_v21 = vxor.u32 2147483648, %v6364_v59  ;;  %v6495_v25 = vpop.f32.mrf.mxu0 }
 0x63a   :  { %v6496_v30 = vadd.f32 %v14221_v51, %v6495_v25 }
 0x63b   :  { %v6366_v35 = vsel %vm6245_vm7, %v6365_v21, %v6364_v59  ;;  %v6592_v14 = vpop.f32.mrf.mxu1  ;;  %v6720_v21 = vpop.f32.mrf.mxu2 }
 0x63c   :  { %v6369_v37 = vsel %vm14242_vm12, %v15066_v17, %v6366_v35  ;;  %v6706_v59 = vadd.f32 %v13848_v10, %v6592_v14  ;;  %7042 = vst [vmem:[#allocation8 + $0xa0] sm:$0xff] %v6496_v30 }
 0x63d   :  { %v6371_v33 = vmul.f32 %v6369_v37, %v6369_v37  ;;  %6639 = vmatmul.f32.gmra.mxu1 %v6496_v30 }
 0x63e   :  { %v6797_v49 = vadd.f32 %v14231_v19, %v6706_v59 }
 0x63f   :  { %v6372_v42 = vmul.f32 -0.001358992, %v6371_v33  ;;  %v6379_v53 = vmul.f32 -0.00019511016, %v6371_v33  ;;  %6902 = vmatmul.f32.gmra.mxu3 %v6828_v6 }
 0x640   :  { %v6829_v55 = vmax.f32 %v6797_v49, 0.0 }
 0x641   :  { %v6373_v28 = vadd.f32 0.041655596, %v6372_v42  ;;  %v6380_v56 = vadd.f32 0.008332121, %v6379_v53  ;;  %v6498_v9 = vpop.f32.mrf.mxu0 }
 0x642   :  { %v6499_v17 = vadd.f32 %v14221_v51, %v6498_v9 }
 0x643   :  { %v6374_v39 = vmul.f32 %v6373_v28, %v6371_v33  ;;  %v6381_v63 = vmul.f32 %v6380_v56, %v6371_v33  ;;  %v6595_v61 = vpop.f32.mrf.mxu1  ;;  %v6723_v52 = vpop.f32.mrf.mxu2 }
 0x644   :  { %v6709_v57 = vadd.f32 %v14018_v8, %v6595_v61  ;;  %7043 = vst [vmem:[#allocation8 + $0xa8] sm:$0xff] %v6499_v17 }
 0x645   :  { %v6375_v0 = vadd.f32 -0.4999988, %v6374_v39  ;;  %v6382_v20 = vadd.f32 -0.16666654, %v6381_v63  ;;  %6642 = vmatmul.f32.gmra.mxu1 %v6499_v17 }
 0x646   :  { %v6798_v2 = vadd.f32 %v14231_v19, %v6709_v57 }
 0x647   :  { %v6376_v62 = vmul.f32 %v6375_v0, %v6371_v33  ;;  %v6383_v31 = vmul.f32 %v6382_v20, %v6371_v33  ;;  %6905 = vmatmul.f32.gmra.mxu3 %v6829_v55 }
 0x648   :  { %v6830_v35 = vmax.f32 %v6798_v2, 0.0 }
 0x649   :  { %v6377_v34 = vadd.f32 1.0, %v6376_v62  ;;  %v6384_v5 = vadd.f32 1.0, %v6383_v31  ;;  %v6501_v10 = vpop.f32.mrf.mxu0 }
 0x64a   :  { %v6502_v60 = vadd.f32 %v14221_v51, %v6501_v10 }
 0x64b   :  { %v6385_v40 = vmul.f32 %v6384_v5, %v6369_v37  ;;  %v6394_v18 = vxor.u32 2147483648, %v6377_v34  ;;  %v6598_v47 = vpop.f32.mrf.mxu1  ;;  %v6726_v53 = vpop.f32.mrf.mxu2 }
 0x64c   :  { %v6712_v7 = vadd.f32 %v14154_v24, %v6598_v47  ;;  %7044 = vst [vmem:[#allocation8 + $0xb0] sm:$0xff] %v6502_v60 }
 0x64d   :  { %v6391_v11 = vxor.u32 2147483648, %v6385_v40  ;;  %v6395_v26 = vsel %vm6393_vm11, %v6394_v18, %v6385_v40  ;;  %6645 = vmatmul.f32.gmra.mxu1 %v6502_v60 }
 0x64e   :  { %v6799_v37 = vadd.f32 %v14231_v19, %v6712_v7 }
 0x64f   :  { %v6392_v3 = vsel %vm6390_vm15, %v6377_v34, %v6391_v11  ;;  %6908 = vmatmul.f32.gmra.mxu3 %v6830_v35 }
 0x650   :  { %v6396_v58 = vsel %vm6389_vm10, %v6392_v3, %v6395_v26  ;;  %v6831_v33 = vmax.f32 %v6799_v37, 0.0 }
 0x651   :  { %v6397_v41 = vsel %vm6386_vm4, nan, %v6396_v58  ;;  %v6504_v8 = vpop.f32.mrf.mxu0 }
 0x652   :  { %6527 = vmatmul.f32.gmra.mxu0 %v6397_v41  ;;  %v6505_v48 = vadd.f32 %v14221_v51, %v6504_v8 }
 0x653   :  { %v6601_v38 = vpop.f32.mrf.mxu1  ;;  %v6729_v39 = vpop.f32.mrf.mxu2 }
 0x654   :  { %v6715_v42 = vadd.f32 %v14197_v43, %v6601_v38  ;;  %7045 = vst [vmem:[#allocation8 + $0xb8] sm:$0xff] %v6505_v48 }
 0x655   :  { %6648 = vmatmul.f32.gmra.mxu1 %v6505_v48  ;;  %v14302_v48 = vld [vmem:[%s14382_s12] ss:$0 sm:$0xff] }
 0x656   :  { %v6800_v28 = vadd.f32 %v14231_v19, %v6715_v42 }
 0x657   :  { %6911 = vmatmul.f32.gmra.mxu3 %v6831_v33 }
 0x658   :  { %v6832_v56 = vmax.f32 %v6800_v28, 0.0 }
 0x659   :  { %v6507_v24 = vpop.f32.mrf.mxu0 }
 0x65a   :  { %v6508_v1 = vadd.f32 %v14221_v51, %v6507_v24 }
 0x65b   :  { %v6604_v32 = vpop.f32.mrf.mxu1  ;;  %v6732_v20 = vpop.f32.mrf.mxu2 }
 0x65c   :  { %v6718_v15 = vadd.f32 %v6717_v54, %v6604_v32  ;;  %7046 = vst [vmem:[#allocation8 + $0xc0] sm:$0xff] %v6508_v1 }
 0x65d   :  { %6651 = vmatmul.f32.gmra.mxu1 %v6508_v1 }
 0x65e   :  { %v6801_v23 = vadd.f32 %v14231_v19, %v6718_v15 }
 0x65f   :  { %6914 = vmatmul.f32.gmra.mxu3 %v6832_v56 }
 0x660   :  { %v6833_v63 = vmax.f32 %v6801_v23, 0.0 }
 0x661   :  { %v6510_v43 = vpop.f32.mrf.mxu0 }
 0x662   :  { %v6511_v12 = vadd.f32 %v14221_v51, %v6510_v43 }
 0x663   :  { %v6607_v22 = vpop.f32.mrf.mxu1  ;;  %v6735_v44 = vpop.f32.mrf.mxu2 }
 0x664   :  { %v6721_v29 = vadd.f32 %v6720_v21, %v6607_v22  ;;  %7047 = vst [vmem:[#allocation8 + $0xc8] sm:$0xff] %v6511_v12 }
 0x665   :  { %6654 = vmatmul.f32.gmra.mxu1 %v6511_v12 }
 0x666   :  { %v6802_v0 = vadd.f32 %v14231_v19, %v6721_v29 }
 0x667   :  { %6917 = vmatmul.f32.gmra.mxu3 %v6833_v63 }
 0x668   :  { %v6834_v50 = vmax.f32 %v6802_v0, 0.0 }
 0x669   :  { %v6513_v13 = vpop.f32.mrf.mxu0 }
 0x66a   :  { %v6514_v31 = vadd.f32 %v14221_v51, %v6513_v13 }
 0x66b   :  { %v6610_v62 = vpop.f32.mrf.mxu1  ;;  %v6738_v26 = vpop.f32.mrf.mxu2 }
 0x66c   :  { %v6724_v34 = vadd.f32 %v6723_v52, %v6610_v62  ;;  %7048 = vst [vmem:[#allocation8 + $0xd0] sm:$0xff] %v6514_v31 }
 0x66d   :  { %6657 = vmatmul.f32.gmra.mxu1 %v6514_v31 }
 0x66e   :  { %v6803_v5 = vadd.f32 %v14231_v19, %v6724_v34 }
 0x66f   :  { %6920 = vmatmul.f32.gmra.mxu3 %v6834_v50 }
 0x670   :  { %v6835_v4 = vmax.f32 %v6803_v5, 0.0 }
 0x671   :  { %v6516_v27 = vpop.f32.mrf.mxu0 }
 0x672   :  { %v6517_v40 = vadd.f32 %v14221_v51, %v6516_v27 }
 0x673   :  { %v6613_v46 = vpop.f32.mrf.mxu1  ;;  %v6741_v49 = vpop.f32.mrf.mxu2 }
 0x674   :  { %v6727_v18 = vadd.f32 %v6726_v53, %v6613_v46  ;;  %7049 = vst [vmem:[#allocation8 + $0xd8] sm:$0xff] %v6517_v40 }
 0x675   :  { %6660 = vmatmul.f32.gmra.mxu1 %v6517_v40 }
 0x676   :  { %v6804_v45 = vadd.f32 %v14231_v19, %v6727_v18 }
 0x677   :  { %6923 = vmatmul.f32.gmra.mxu3 %v6835_v4 }
 0x678   :  { %v6836_v36 = vmax.f32 %v6804_v45, 0.0 }
 0x679   :  { %v6519_v11 = vpop.f32.mrf.mxu0 }
 0x67a   :  { %v6520_v54 = vadd.f32 %v14221_v51, %v6519_v11 }
 0x67b   :  { %v6616_v16 = vpop.f32.mrf.mxu1  ;;  %v6744_v17 = vpop.f32.mrf.mxu2 }
 0x67c   :  { %v6730_v3 = vadd.f32 %v6729_v39, %v6616_v16  ;;  %7050 = vst [vmem:[#allocation8 + $0xe0] sm:$0xff] %v6520_v54 }
 0x67d   :  { %6663 = vmatmul.f32.gmra.mxu1 %v6520_v54 }
 0x67e   :  { %v6805_v58 = vadd.f32 %v14231_v19, %v6730_v3 }
 0x67f   :  { %6926 = vmatmul.f32.gmra.mxu3 %v6836_v36 }
 0x680   :  { %v6837_v41 = vmax.f32 %v6805_v58, 0.0 }
 0x683   :  { %v6619_v25 = vpop.f32.mrf.mxu1  ;;  %v6747_v47 = vpop.f32.mrf.mxu2 }
 0x684   :  { %v6733_v30 = vadd.f32 %v6732_v20, %v6619_v25 }
 0x686   :  { %v6806_v59 = vadd.f32 %v14231_v19, %v6733_v30 }
 0x687   :  { %6929 = vmatmul.f32.gmra.mxu3 %v6837_v41 }
 0x688   :  { %v6838_v21 = vmax.f32 %v6806_v59, 0.0 }
 0x68a   :  { %v6522_v6 = vpop.f32.mrf.mxu0 }
 0x68b   :  { %v6523_v14 = vadd.f32 %v14221_v51, %v6522_v6  ;;  %v6622_v55 = vpop.f32.mrf.mxu1  ;;  %v6750_v8 = vpop.f32.mrf.mxu2 }
 0x68c   :  { %v6736_v9 = vadd.f32 %v6735_v44, %v6622_v55 }
 0x68d   :  { %7051 = vst [vmem:[#allocation8 + $0xe8] sm:$0xff] %v6523_v14  ;;  %6666 = vmatmul.f32.gmra.mxu1 %v6523_v14 }
 0x68e   :  { %v6807_v61 = vadd.f32 %v14231_v19, %v6736_v9 }
 0x68f   :  { %6932 = vmatmul.f32.gmra.mxu3 %v6838_v21 }
 0x690   :  { %v6839_v57 = vmax.f32 %v6807_v61, 0.0 }
 0x693   :  { %v6625_v10 = vpop.f32.mrf.mxu1  ;;  %v6753_v1 = vpop.f32.mrf.mxu2 }
 0x694   :  { %v6739_v52 = vadd.f32 %v6738_v26, %v6625_v10 }
 0x696   :  { %v6808_v60 = vadd.f32 %v14231_v19, %v6739_v52 }
 0x697   :  { %6935 = vmatmul.f32.gmra.mxu3 %v6839_v57 }
 0x698   :  { %v6840_v7 = vmax.f32 %v6808_v60, 0.0 }
 0x69b   :  { %v6628_v37 = vpop.f32.mrf.mxu1  ;;  %v6756_v20 = vpop.f32.mrf.mxu2 }
 0x69c   :  { %v6742_v33 = vadd.f32 %v6741_v49, %v6628_v37 }
 0x69e   :  { %v6809_v38 = vadd.f32 %v14231_v19, %v6742_v33 }
 0x69f   :  { %6938 = vmatmul.f32.gmra.mxu3 %v6840_v7 }
 0x6a0   :  { %v6841_v42 = vmax.f32 %v6809_v38, 0.0 }
 0x6a3   :  { %v6631_v28 = vpop.f32.mrf.mxu1  ;;  %v6759_v44 = vpop.f32.mrf.mxu2 }
 0x6a4   :  { %v6745_v24 = vadd.f32 %v6744_v17, %v6631_v28 }
 0x6a6   :  { %v6810_v32 = vadd.f32 %v14231_v19, %v6745_v24 }
 0x6a7   :  { %6941 = vmatmul.f32.gmra.mxu3 %v6841_v42 }
 0x6a8   :  { %v6842_v15 = vmax.f32 %v6810_v32, 0.0 }
 0x6aa   :  { %v6894_v53 = vpop.f32.mrf.mxu3 }
 0x6ab   :  { %v6525_v2 = vpop.f32.mrf.mxu0  ;;  %v6895_v56 = vadd.f32 %v14302_v48, %v6894_v53  ;;  %v6634_v39 = vpop.f32.mrf.mxu1 }
 0x6ac   :  { %v6526_v35 = vadd.f32 %v14221_v51, %v6525_v2  ;;  %v6748_v43 = vadd.f32 %v6747_v47, %v6634_v39  ;;  %v6762_v54 = vpop.f32.mrf.mxu2 }
 0x6ad   :  { %6990 = vst [vmem:[#allocation7] sm:$0xff] %v6895_v56 }
 0x6ae   :  { %7052 = vst [vmem:[#allocation8 + $0xf0] sm:$0xff] %v6526_v35  ;;  %6669 = vmatmul.f32.gmra.mxu1 %v6526_v35  ;;  %v6811_v22 = vadd.f32 %v14231_v19, %v6748_v43 }
 0x6af   :  { %6944 = vmatmul.f32.gmra.mxu3 %v6842_v15 }
 0x6b0   :  { %v6843_v29 = vmax.f32 %v6811_v22, 0.0 }
 0x6b2   :  { %v6897_v23 = vpop.f32.mrf.mxu3 }
 0x6b3   :  { %v6898_v63 = vadd.f32 %v14302_v48, %v6897_v23  ;;  %v6637_v13 = vpop.f32.mrf.mxu1 }
 0x6b4   :  { %v6751_v31 = vadd.f32 %v6750_v8, %v6637_v13  ;;  %v6765_v30 = vpop.f32.mrf.mxu2 }
 0x6b5   :  { %6991 = vst [vmem:[#allocation7 + $0x8] sm:$0xff] %v6898_v63 }
 0x6b6   :  { %v6812_v34 = vadd.f32 %v14231_v19, %v6751_v31 }
 0x6b7   :  { %6947 = vmatmul.f32.gmra.mxu3 %v6843_v29 }
 0x6b8   :  { %v6844_v5 = vmax.f32 %v6812_v34, 0.0 }
 0x6ba   :  { %v6900_v50 = vpop.f32.mrf.mxu3 }
 0x6bb   :  { %v6901_v62 = vadd.f32 %v14302_v48, %v6900_v50  ;;  %v6640_v27 = vpop.f32.mrf.mxu1 }
 0x6bc   :  { %v6768_v57 = vpop.f32.mrf.mxu2 }
 0x6bd   :  { %6992 = vst [vmem:[#allocation7 + $0x10] sm:$0xff] %v6901_v62 }
 0x6bf   :  { %6950 = vmatmul.f32.gmra.mxu3 %v6844_v5 }
 0x6c2   :  { %v6903_v4 = vpop.f32.mrf.mxu3 }
 0x6c3   :  { %v6904_v46 = vadd.f32 %v14302_v48, %v6903_v4  ;;  %v6643_v36 = vpop.f32.mrf.mxu1 }
 0x6c4   :  { %v6757_v16 = vadd.f32 %v6756_v20, %v6643_v36  ;;  %v6771_v8 = vpop.f32.mrf.mxu2 }
 0x6c5   :  { %6993 = vst [vmem:[#allocation7 + $0x18] sm:$0xff] %v6904_v46 }
 0x6c6   :  { %v6814_v3 = vadd.f32 %v14231_v19, %v6757_v16 }
 0x6c8   :  { %v6846_v26 = vmax.f32 %v6814_v3, 0.0 }
 0x6ca   :  { %v6906_v45 = vpop.f32.mrf.mxu3 }
 0x6cb   :  { %v6907_v11 = vadd.f32 %v14302_v48, %v6906_v45  ;;  %v6646_v41 = vpop.f32.mrf.mxu1 }
 0x6cc   :  { %v6760_v25 = vadd.f32 %v6759_v44, %v6646_v41 }
 0x6cd   :  { %6994 = vst [vmem:[#allocation7 + $0x20] sm:$0xff] %v6907_v11 }
 0x6ce   :  { %v6815_v14 = vadd.f32 %v14231_v19, %v6760_v25 }
 0x6cf   :  { %v6528_v12 = vpop.f32.mrf.mxu0 }
 0x6d0   :  { %v6529_v0 = vadd.f32 %v14221_v51, %v6528_v12  ;;  %v6754_v51 = vadd.f32 %v6753_v1, %v6640_v27  ;;  %v6847_v59 = vmax.f32 %v6815_v14, 0.0  ;;  %v6774_v1 = vpop.f32.mrf.mxu2 }
 0x6d2   :  { %7053 = vst [vmem:[#allocation8 + $0xf8] sm:$0xff] %v6529_v0  ;;  %6672 = vmatmul.f32.gmra.mxu1 %v6529_v0  ;;  %v6813_v40 = vadd.f32 %v14231_v19, %v6754_v51  ;;  %v6909_v58 = vpop.f32.mrf.mxu3 }
 0x6d3   :  { %v6910_v6 = vadd.f32 %v14302_v48, %v6909_v58  ;;  %v6649_v21 = vpop.f32.mrf.mxu1  ;;  %7111 = dma.vmem_to_hbm [thread:$0]  %s7104_s19, 4096, %s7106_s9, [#allocation9], %s7439_s20, %s7439_s20, %s7440_s21  }
 0x6d4   :  { %v6845_v18 = vmax.f32 %v6813_v40, 0.0  ;;  %v6763_v9 = vadd.f32 %v6762_v54, %v6649_v21  ;;  %7124 = dma.vmem_to_hbm [thread:$0]  %s7117_s23, 4096, %s7119_s22, [#allocation9], %s7439_s20, %s7439_s20, %s7440_s21  }
 0x6d5   :  { %6995 = vst [vmem:[#allocation7 + $0x28] sm:$0xff] %v6910_v6 }
 0x6d6   :  { %6953 = vmatmul.f32.gmra.mxu3 %v6845_v18  ;;  %v6816_v61 = vadd.f32 %v14231_v19, %v6763_v9 }
 0x6d8   :  { %v6848_v17 = vmax.f32 %v6816_v61, 0.0  ;;  %v6777_v29 = vpop.f32.mrf.mxu2 }
 0x6da   :  { %v6912_v49 = vpop.f32.mrf.mxu3 }
 0x6db   :  { %v6913_v55 = vadd.f32 %v14302_v48, %v6912_v49  ;;  %v6652_v35 = vpop.f32.mrf.mxu1 }
 0x6dc   :  { %v6766_v47 = vadd.f32 %v6765_v30, %v6652_v35 }
 0x6dd   :  { %6996 = vst [vmem:[#allocation7 + $0x30] sm:$0xff] %v6913_v55 }
 0x6de   :  { %6956 = vmatmul.f32.gmra.mxu3 %v6846_v26  ;;  %v6817_v52 = vadd.f32 %v14231_v19, %v6766_v47 }
 0x6e0   :  { %v6849_v60 = vmax.f32 %v6817_v52, 0.0  ;;  %v6780_v5 = vpop.f32.mrf.mxu2 }
 0x6e2   :  { %v6915_v2 = vpop.f32.mrf.mxu3 }
 0x6e3   :  { %v6916_v10 = vadd.f32 %v14302_v48, %v6915_v2  ;;  %v6655_v37 = vpop.f32.mrf.mxu1 }
 0x6e4   :  { %v6769_v38 = vadd.f32 %v6768_v57, %v6655_v37 }
 0x6e5   :  { %6997 = vst [vmem:[#allocation7 + $0x38] sm:$0xff] %v6916_v10 }
 0x6e6   :  { %6959 = vmatmul.f32.gmra.mxu3 %v6847_v59  ;;  %v6818_v42 = vadd.f32 %v14231_v19, %v6769_v38 }
 0x6e8   :  { %v6850_v53 = vmax.f32 %v6818_v42, 0.0  ;;  %v6783_v36 = vpop.f32.mrf.mxu2 }
 0x6ea   :  { %v6918_v7 = vpop.f32.mrf.mxu3 }
 0x6eb   :  { %v6919_v33 = vadd.f32 %v14302_v48, %v6918_v7  ;;  %v6658_v56 = vpop.f32.mrf.mxu1 }
 0x6ec   :  { %v6772_v32 = vadd.f32 %v6771_v8, %v6658_v56 }
 0x6ed   :  { %6998 = vst [vmem:[#allocation7 + $0x40] sm:$0xff] %v6919_v33 }
 0x6ee   :  { %6962 = vmatmul.f32.gmra.mxu3 %v6848_v17  ;;  %v6819_v15 = vadd.f32 %v14231_v19, %v6772_v32 }
 0x6f0   :  { %v6851_v23 = vmax.f32 %v6819_v15, 0.0  ;;  %v6786_v49 = vpop.f32.mrf.mxu2 }
 0x6f2   :  { %v6921_v28 = vpop.f32.mrf.mxu3 }
 0x6f3   :  { %v6922_v24 = vadd.f32 %v14302_v48, %v6921_v28  ;;  %v6661_v63 = vpop.f32.mrf.mxu1 }
 0x6f4   :  { %v6775_v22 = vadd.f32 %v6774_v1, %v6661_v63 }
 0x6f5   :  { %6999 = vst [vmem:[#allocation7 + $0x48] sm:$0xff] %v6922_v24 }
 0x6f6   :  { %6965 = vmatmul.f32.gmra.mxu3 %v6849_v60  ;;  %v6820_v12 = vadd.f32 %v14231_v19, %v6775_v22 }
 0x6f8   :  { %v6852_v0 = vmax.f32 %v6820_v12, 0.0 }
 0x6fa   :  { %v6924_v39 = vpop.f32.mrf.mxu3 }
 0x6fb   :  { %v6925_v43 = vadd.f32 %v14302_v48, %v6924_v39  ;;  %v6664_v50 = vpop.f32.mrf.mxu1 }
 0x6fc   :  { %v6778_v62 = vadd.f32 %v6777_v29, %v6664_v50 }
 0x6fd   :  { %7000 = vst [vmem:[#allocation7 + $0x50] sm:$0xff] %v6925_v43 }
 0x6fe   :  { %6968 = vmatmul.f32.gmra.mxu3 %v6850_v53  ;;  %v6821_v31 = vadd.f32 %v14231_v19, %v6778_v62 }
 0x700   :  { %v6853_v34 = vmax.f32 %v6821_v31, 0.0 }
 0x702   :  { %v6927_v20 = vpop.f32.mrf.mxu3 }
 0x703   :  { %v6928_v13 = vadd.f32 %v14302_v48, %v6927_v20 }
 0x705   :  { %7001 = vst [vmem:[#allocation7 + $0x58] sm:$0xff] %v6928_v13 }
 0x706   :  { %6971 = vmatmul.f32.gmra.mxu3 %v6851_v23 }
 0x70a   :  { %v6930_v4 = vpop.f32.mrf.mxu3  ;;  %v6667_v27 = vpop.f32.mrf.mxu1 }
 0x70b   :  { %v6931_v46 = vadd.f32 %v14302_v48, %v6930_v4  ;;  %v6781_v44 = vadd.f32 %v6780_v5, %v6667_v27 }
 0x70d   :  { %7002 = vst [vmem:[#allocation7 + $0x60] sm:$0xff] %v6931_v46  ;;  %v6822_v51 = vadd.f32 %v14231_v19, %v6781_v44 }
 0x70e   :  { %6974 = vmatmul.f32.gmra.mxu3 %v6852_v0 }
 0x70f   :  { %v6854_v40 = vmax.f32 %v6822_v51, 0.0 }
 0x712   :  { %v6933_v18 = vpop.f32.mrf.mxu3 }
 0x713   :  { %v6934_v45 = vadd.f32 %v14302_v48, %v6933_v18 }
 0x715   :  { %7003 = vst [vmem:[#allocation7 + $0x68] sm:$0xff] %v6934_v45 }
 0x716   :  { %6977 = vmatmul.f32.gmra.mxu3 %v6853_v34 }
 0x71a   :  { %v6936_v26 = vpop.f32.mrf.mxu3 }
 0x71b   :  { %v6937_v58 = vadd.f32 %v14302_v48, %v6936_v26 }
 0x71d   :  { %7004 = vst [vmem:[#allocation7 + $0x70] sm:$0xff] %v6937_v58 }
 0x71e   :  { %6980 = vmatmul.f32.gmra.mxu3 %v6854_v40 }
 0x722   :  { %v6939_v41 = vpop.f32.mrf.mxu3 }
 0x723   :  { %v6940_v6 = vadd.f32 %v14302_v48, %v6939_v41 }
 0x725   :  { %7005 = vst [vmem:[#allocation7 + $0x78] sm:$0xff] %v6940_v6 }
 0x72a   :  { %v6942_v25 = vpop.f32.mrf.mxu3 }
 0x72b   :  { %v6670_v11 = vpop.f32.mrf.mxu1  ;;  %v6943_v14 = vadd.f32 %v14302_v48, %v6942_v25 }
 0x72c   :  { %v6784_v16 = vadd.f32 %v6783_v36, %v6670_v11 }
 0x72d   :  { %7006 = vst [vmem:[#allocation7 + $0x80] sm:$0xff] %v6943_v14 }
 0x72e   :  { %v6823_v54 = vadd.f32 %v14231_v19, %v6784_v16 }
 0x730   :  { %v6855_v3 = vmax.f32 %v6823_v54, 0.0 }
 0x732   :  { %6983 = vmatmul.f32.gmra.mxu3 %v6855_v3  ;;  %v6945_v30 = vpop.f32.mrf.mxu3 }
 0x733   :  { %v6946_v59 = vadd.f32 %v14302_v48, %v6945_v30 }
 0x735   :  { %7007 = vst [vmem:[#allocation7 + $0x88] sm:$0xff] %v6946_v59 }
 0x73a   :  { %v6948_v17 = vpop.f32.mrf.mxu3 }
 0x73b   :  { %v6949_v57 = vadd.f32 %v14302_v48, %v6948_v17 }
 0x73d   :  { %7008 = vst [vmem:[#allocation7 + $0x90] sm:$0xff] %v6949_v57 }
 0x742   :  { %v6951_v2 = vpop.f32.mrf.mxu3 }
 0x743   :  { %v6952_v35 = vadd.f32 %v14302_v48, %v6951_v2 }
 0x745   :  { %7009 = vst [vmem:[#allocation7 + $0x98] sm:$0xff] %v6952_v35 }
 0x74f   :  { %v6673_v21 = vpop.f32.mrf.mxu1 }
 0x750   :  { %v6787_v55 = vadd.f32 %v6786_v49, %v6673_v21 }
 0x752   :  { %v6824_v9 = vadd.f32 %v14231_v19, %v6787_v55 }
 0x754   :  { %v6856_v61 = vmax.f32 %v6824_v9, 0.0 }
 0x756   :  { %6986 = vmatmul.f32.gmra.mxu3 %v6856_v61 }
 0x759   :  { %v6954_v19 = vpop.f32.mrf.mxu3 }
 0x75a   :  { %v6955_v10 = vadd.f32 %v14302_v48, %v6954_v19 }
 0x75c   :  { %7010 = vst [vmem:[#allocation7 + $0xa0] sm:$0xff] %v6955_v10 }
 0x761   :  { %v6957_v47 = vpop.f32.mrf.mxu3 }
 0x762   :  { %v6958_v52 = vadd.f32 %v14302_v48, %v6957_v47 }
 0x764   :  { %7011 = vst [vmem:[#allocation7 + $0xa8] sm:$0xff] %v6958_v52 }
 0x769   :  { %v6960_v60 = vpop.f32.mrf.mxu3 }
 0x76a   :  { %v6961_v7 = vadd.f32 %v14302_v48, %v6960_v60 }
 0x76c   :  { %7012 = vst [vmem:[#allocation7 + $0xb0] sm:$0xff] %v6961_v7 }
 0x771   :  { %v6963_v37 = vpop.f32.mrf.mxu3 }
 0x772   :  { %v6964_v33 = vadd.f32 %v14302_v48, %v6963_v37 }
 0x774   :  { %7013 = vst [vmem:[#allocation7 + $0xb8] sm:$0xff] %v6964_v33 }
 0x779   :  { %v6966_v8 = vpop.f32.mrf.mxu3 }
 0x77a   :  { %v6967_v38 = vadd.f32 %v14302_v48, %v6966_v8 }
 0x77c   :  { %7014 = vst [vmem:[#allocation7 + $0xc0] sm:$0xff] %v6967_v38 }
 0x781   :  { %v6969_v42 = vpop.f32.mrf.mxu3 }
 0x782   :  { %v6970_v53 = vadd.f32 %v14302_v48, %v6969_v42 }
 0x784   :  { %7015 = vst [vmem:[#allocation7 + $0xc8] sm:$0xff] %v6970_v53 }
 0x789   :  { %v6972_v28 = vpop.f32.mrf.mxu3 }
 0x78a   :  { %v6973_v56 = vadd.f32 %v14302_v48, %v6972_v28 }
 0x78c   :  { %7016 = vst [vmem:[#allocation7 + $0xd0] sm:$0xff] %v6973_v56 }
 0x791   :  { %v6975_v24 = vpop.f32.mrf.mxu3 }
 0x792   :  { %v6976_v32 = vadd.f32 %v14302_v48, %v6975_v24 }
 0x794   :  { %7017 = vst [vmem:[#allocation7 + $0xd8] sm:$0xff] %v6976_v32 }
 0x799   :  { %v6978_v1 = vpop.f32.mrf.mxu3 }
 0x79a   :  { %v6979_v15 = vadd.f32 %v14302_v48, %v6978_v1 }
 0x79c   :  { %7018 = vst [vmem:[#allocation7 + $0xe0] sm:$0xff] %v6979_v15 }
 0x7a1   :  { %v6981_v23 = vpop.f32.mrf.mxu3 }
 0x7a2   :  { %v6982_v39 = vadd.f32 %v14302_v48, %v6981_v23 }
 0x7a4   :  { %7019 = vst [vmem:[#allocation7 + $0xe8] sm:$0xff] %v6982_v39 }
 0x7b5   :  { %v6984_v63 = vpop.f32.mrf.mxu3 }
 0x7b6   :  { %v6985_v43 = vadd.f32 %v14302_v48, %v6984_v63 }
 0x7b8   :  { %7020 = vst [vmem:[#allocation7 + $0xf0] sm:$0xff] %v6985_v43 }
 0x7d9   :  { %v6987_v22 = vpop.f32.mrf.mxu3 }
 0x7da   :  { %v6988_v12 = vadd.f32 %v14302_v48, %v6987_v22 }
 0x7dc   :  { %7021 = vst [vmem:[#allocation7 + $0xf8] sm:$0xff] %v6988_v12 }
 0x7dd   :  { %7098 = dma.vmem_to_hbm [thread:$0]  %s7091_s15, 4096, %s7093_s26, [#allocation4], %s7439_s20, %s7439_s20, %s7440_s21  }
 0x7de   :  { %7425 = dma.done.wait [#allocation4], 4096  }
 0x7df   :  { %7426 = vsyncadd [#allocation4], 4294963200 }
 0x7e0   :  { %7427 = dma.done.wait [#allocation9], 8192  }
 0x7e1   :  { %7428 = vsyncadd [#allocation9], 4294959104 }
 0x7e2   :  { %7137 = vsyncpa [#allocation3], 1 }
 0x7e3   :  { %7138 = vsyncpa [#allocation6], 1 }
 0x7e4   :  { %7139 = vsyncpa [#allocation4], 1 }
 0x7e5   :  { %7140 = vsyncpa [#allocation9], 1 }

</bundles_post_ra>
